<compile_context>
chip_gen: v5e
topology: v5e:2x2
jax: 0.10.0
libtpu: 0.0.40
codegen_flags: <defaults>
</compile_context>

<pallas_src>
import functools

import jax
import jax.numpy as jnp
from jax.experimental import pallas as pl
from jax.experimental.pallas import tpu as pltpu


def _round_up(x, m):
    return ((x + m - 1) // m) * m


# ----------------------------------------------------------------------------
# Pallas kernel 1: fused im2col-matmul + bias + 2x2 max-pool + ReLU
# ----------------------------------------------------------------------------
def _conv_bias_pool_relu_kernel(a_ref, w_ref, b_ref, o_ref, *, n_phase):
    """a_ref: (n_phase, Pblk, K) bf16 — one im2col slab per pool-window phase.
    w_ref: (K, O) bf16, b_ref: (1, O) f32, o_ref: (Pblk, O) bf16 (pooled).

    max-pool == elementwise max over the 4 phase matmuls; bias is shared so it
    is added after the max, and relu(max(y)) == max(relu(y)) (monotone)."""
    w = w_ref[...]
    m = None
    for j in range(n_phase):                              # statically unrolled
        y = jnp.dot(a_ref[j], w, preferred_element_type=jnp.float32)
        m = y if m is None else jnp.maximum(m, y)
    o_ref[...] = jnp.maximum(m + b_ref[...], 0.0).astype(o_ref.dtype)


def conv2d_relu_pool(x, w_oihw, b, *, k, s, p, p_block=None):
    """max_pool2d(relu(conv2d(x)), 2) fused in one Pallas kernel.

    x: (B, H, W, Cin) NHWC bf16; w_oihw: (O, Cin, k, k) PyTorch layout; b: (O,).
    Returns (B, Hpo, Wpo, O) bf16 with Hpo = ((H + 2p - k)//s + 1) // 2
    (PyTorch floor-pool semantics)."""
    B, H, W, C = x.shape
    O = w_oihw.shape[0]
    Hc = (H + 2 * p - k) // s + 1
    Wc = (W + 2 * p - k) // s + 1
    Hpo, Wpo = Hc // 2, Wc // 2
    P = Hpo * Wpo
    K = k * k * C

    if p_block is None or p_block >= P:
        p_block = P                      # single band: block == full dim is OK
    nb = pl.cdiv(P, p_block)             # ragged last band handled by Pallas

    xp = jnp.pad(x, ((0, 0), (p, p), (p, p), (0, 0)))

    # im2col pre-grouped by pool-window phase (pr, pc); column order of each
    # slab is (kh, kw, cin) to match the weight transpose below:
    #   a4[b, 2*pr+pc, q*Wpo+t, (kh*k+kw)*C+c]
    #     = xp[b, (2q+pr)*s + kh, (2t+pc)*s + kw, c]
    phases = []
    for pr in range(2):
        for pc in range(2):
            taps = []
            for kh in range(k):
                for kw in range(k):
                    r0 = pr * s + kh
                    c0 = pc * s + kw
                    taps.append(jax.lax.slice(
                        xp,
                        (0, r0, c0, 0),
                        (B, r0 + 2 * s * (Hpo - 1) + 1,
                         c0 + 2 * s * (Wpo - 1) + 1, C),
                        (1, 2 * s, 2 * s, 1)))
            phases.append(jnp.concatenate(taps, axis=-1).reshape(B, P, K))
    a4 = jnp.stack(phases, axis=1)                         # (B, 4, P, K) bf16

    wm = (jnp.transpose(w_oihw, (2, 3, 1, 0))
          .reshape(K, O).astype(jnp.bfloat16))             # (K, O)
    bv = b.reshape(1, O).astype(jnp.float32)               # (1, O)

    y = pl.pallas_call(
        functools.partial(_conv_bias_pool_relu_kernel, n_phase=4),
        out_shape=jax.ShapeDtypeStruct((B, P, O), jnp.bfloat16),
        grid=(B, nb),
        in_specs=[
            pl.BlockSpec((None, 4, p_block, K), lambda i, j: (i, 0, j, 0)),
            pl.BlockSpec((K, O), lambda i, j: (0, 0)),
            pl.BlockSpec((1, O), lambda i, j: (0, 0)),
        ],
        out_specs=pl.BlockSpec((None, p_block, O), lambda i, j: (i, j, 0)),
        compiler_params=pltpu.CompilerParams(
            dimension_semantics=("parallel", "parallel")),
    )(a4, wm, bv)
    return y.reshape(B, Hpo, Wpo, O)


# ----------------------------------------------------------------------------
# Pallas kernel 2: fused fc1 -> relu -> fc2 -> relu -> fc3 (single launch)
# ----------------------------------------------------------------------------
def _fc_stack_kernel(x_ref, w1_ref, b1_ref, w2_ref, b2_ref, w3_ref, b3_ref,
                     o_ref):
    h = jnp.dot(x_ref[...], w1_ref[...],
                preferred_element_type=jnp.float32) + b1_ref[...]
    h = jnp.maximum(h, 0.0).astype(jnp.bfloat16)
    h = jnp.dot(h, w2_ref[...],
                preferred_element_type=jnp.float32) + b2_ref[...]
    h = jnp.maximum(h, 0.0).astype(jnp.bfloat16)
    o_ref[...] = (jnp.dot(h, w3_ref[...],
                          preferred_element_type=jnp.float32) + b3_ref[...])


def fc_stack(x, w1, b1, w2, b2, w3, b3, *, n_out):
    """Three Linear layers in one pallas_call; intermediates stay in VMEM.
    Weights arrive pre-padded: output widths are x128-lane multiples, padded
    K rows are zero, so padded columns are exactly 0 and only the final
    logits are sliced."""
    B = x.shape[0]
    N = w3.shape[1]
    out = pl.pallas_call(
        _fc_stack_kernel,
        out_shape=jax.ShapeDtypeStruct((B, N), jnp.float32),
        grid=(1,),
        in_specs=[
            pl.BlockSpec(x.shape, lambda i: (0, 0)),
            pl.BlockSpec(w1.shape, lambda i: (0, 0)),
            pl.BlockSpec(b1.shape, lambda i: (0, 0)),
            pl.BlockSpec(w2.shape, lambda i: (0, 0)),
            pl.BlockSpec(b2.shape, lambda i: (0, 0)),
            pl.BlockSpec(w3.shape, lambda i: (0, 0)),
            pl.BlockSpec(b3.shape, lambda i: (0, 0)),
        ],
        out_specs=pl.BlockSpec((B, N), lambda i: (0, 0)),
        compiler_params=pltpu.CompilerParams(
            dimension_semantics=("arbitrary",)),
    )(x, w1, b1, w2, b2, w3, b3)
    return out[:, :n_out]


def _pad_fc(w_t, b, k_pad, n_pad):
    """Zero-pad a transposed (K, N) Linear weight to (k_pad, n_pad) and its
    bias to (1, n_pad). Weight -> bf16, bias stays f32."""
    kk, nn = w_t.shape
    w_t = jnp.pad(w_t, ((0, k_pad - kk), (0, n_pad - nn)))
    b = jnp.pad(b, (0, n_pad - nn))
    return w_t.astype(jnp.bfloat16), b.reshape(1, n_pad).astype(jnp.float32)


# ----------------------------------------------------------------------------
# Model
# ----------------------------------------------------------------------------
def init_params(key):
    def uniform(key, shape, fan_in):
        bound = 1.0 / jnp.sqrt(jnp.float32(fan_in))
        return jax.random.uniform(key, shape, jnp.float32, -bound, bound)

    ks = jax.random.split(key, 12)
    p = {}
    p["w1"] = uniform(ks[0], (16, 3, 5, 5), 3 * 5 * 5)
    p["b1"] = uniform(ks[1], (16,), 3 * 5 * 5)
    p["w2"] = uniform(ks[2], (32, 16, 5, 5), 16 * 5 * 5)
    p["b2"] = uniform(ks[3], (32,), 16 * 5 * 5)
    p["w3"] = uniform(ks[4], (64, 32, 3, 3), 32 * 3 * 3)
    p["b3"] = uniform(ks[5], (64,), 32 * 3 * 3)
    p["fc1_w"] = uniform(ks[6], (500, 64 * 6 * 6), 64 * 6 * 6)
    p["fc1_b"] = uniform(ks[7], (500,), 64 * 6 * 6)
    p["fc2_w"] = uniform(ks[8], (50, 500), 500)
    p["fc2_b"] = uniform(ks[9], (50,), 500)
    p["fc3_w"] = uniform(ks[10], (2, 50), 50)
    p["fc3_b"] = uniform(ks[11], (2,), 50)
    return p


@jax.jit
def cat_dog_convnet_forward(x_nchw, params):
    # Incoming layout matches PyTorch (NCHW); convert to NHWC, bf16
    # activations (MXU-native). All matmul accumulation stays f32.
    x = jnp.transpose(x_nchw, (0, 2, 3, 1)).astype(jnp.bfloat16)

    # conv -> relu -> 2x2 pool, each fused into one Pallas kernel.
    x = conv2d_relu_pool(x, params["w1"], params["b1"], k=5, s=2, p=1,
                         p_block=1024)                      # (B, 55, 55, 16)
    x = conv2d_relu_pool(x, params["w2"], params["b2"], k=5, s=2, p=1)
    #                                                        (B, 13, 13, 32)
    x = conv2d_relu_pool(x, params["w3"], params["b3"], k=3, s=1, p=1)
    #                                                        (B,  6,  6, 64)

    # PyTorch flattens NCHW: (B, C, H, W) -> (B, C*H*W)
    B = x.shape[0]
    x = jnp.transpose(x, (0, 3, 1, 2)).reshape(B, -1)       # (B, 2304) bf16

    kin = x.shape[1]
    w1, b1 = _pad_fc(params["fc1_w"].T, params["fc1_b"],
                     kin, _round_up(500, 128))              # (2304, 512)
    w2, b2 = _pad_fc(params["fc2_w"].T, params["fc2_b"],
                     _round_up(500, 128), _round_up(50, 128))  # (512, 128)
    w3, b3 = _pad_fc(params["fc3_w"].T, params["fc3_b"],
                     _round_up(50, 128), _round_up(2, 128))    # (128, 128)
    return fc_stack(x, w1, b1, w2, b2, w3, b3, n_out=2)     # (B, 2) f32


if __name__ == "__main__":
    key = jax.random.PRNGKey(0)
    k_x, k_p = jax.random.split(key)
    # Smallest canonical input consistent with fc1 = 64*6*6 is 3x224x224;
    # batch kept small (2).
    x = jax.random.normal(k_x, (2, 3, 224, 224), dtype=jnp.float32)
    params = init_params(k_p)

    out = cat_dog_convnet_forward(x, params)
    out = jax.block_until_ready(out)
    assert out.shape == (2, 2) and out.dtype == jnp.float32
    print("KERNEL_OK")
</pallas_src>

<mosaic_0001>
module attributes {stable_mosaic.version = 11 : i64} {
  func.func @_conv_bias_pool_relu_kernel(%arg0: i32, %arg1: i32, %arg2: memref<1x4x1024x75xbf16, #tpu.memory_space<vmem>>, %arg3: memref<75x16xbf16, #tpu.memory_space<vmem>>, %arg4: memref<1x16xf32, #tpu.memory_space<vmem>>, %arg5: memref<1x1024x16xbf16, #tpu.memory_space<vmem>>) attributes {dimension_semantics = [#tpu.dimension_semantics<parallel>, #tpu.dimension_semantics<parallel>], iteration_bounds = array<i64: 2, 3>, scalar_prefetch = 0 : i64, scratch_operands = 0 : i64, tpu.core_type = #tpu.core_type<tc>, window_params = [{transform_indices = @transform_0, window_bounds = array<i64: 1, 4, 1024, 75>}, {pipeline_mode = #tpu.pipeline_mode<synchronous>, transform_indices = @transform_1, window_bounds = array<i64: 75, 16>}, {pipeline_mode = #tpu.pipeline_mode<synchronous>, transform_indices = @transform_2, window_bounds = array<i64: 1, 16>}, {transform_indices = @transform_3, window_bounds = array<i64: 1, 1024, 16>}]} {
    %c0 = arith.constant 0 : index
    %c0_0 = arith.constant 0 : index
    %0 = vector.load %arg3[%c0, %c0_0] : memref<75x16xbf16, #tpu.memory_space<vmem>>, vector<75x16xbf16>
    %c0_1 = arith.constant 0 : index
    %c0_2 = arith.constant 0 : index
    %c0_3 = arith.constant 0 : index
    %c0_4 = arith.constant 0 : index
    %1 = vector.load %arg2[%c0_1, %c0_2, %c0_3, %c0_4] : memref<1x4x1024x75xbf16, #tpu.memory_space<vmem>>, vector<1x1x1024x75xbf16>
    %2 = vector.shape_cast %1 : vector<1x1x1024x75xbf16> to vector<1024x75xbf16>
    %cst = arith.constant dense<0.000000e+00> : vector<1024x16xf32>
    %3 = tpu.matmul %2, %0, %cst {dimension_numbers = #tpu.dot_dimension_numbers<[1], [0], [0], [1], [0, 0, 1, 1], [], []>} : vector<1024x75xbf16>, vector<75x16xbf16>, vector<1024x16xf32> -> vector<1024x16xf32>
    %c0_5 = arith.constant 0 : index
    %c1 = arith.constant 1 : index
    %c0_6 = arith.constant 0 : index
    %c0_7 = arith.constant 0 : index
    %4 = vector.load %arg2[%c0_5, %c1, %c0_6, %c0_7] : memref<1x4x1024x75xbf16, #tpu.memory_space<vmem>>, vector<1x1x1024x75xbf16>
    %5 = vector.shape_cast %4 : vector<1x1x1024x75xbf16> to vector<1024x75xbf16>
    %cst_8 = arith.constant dense<0.000000e+00> : vector<1024x16xf32>
    %6 = tpu.matmul %5, %0, %cst_8 {dimension_numbers = #tpu.dot_dimension_numbers<[1], [0], [0], [1], [0, 0, 1, 1], [], []>} : vector<1024x75xbf16>, vector<75x16xbf16>, vector<1024x16xf32> -> vector<1024x16xf32>
    %7 = arith.maximumf %3, %6 : vector<1024x16xf32>
    %c0_9 = arith.constant 0 : index
    %c2 = arith.constant 2 : index
    %c0_10 = arith.constant 0 : index
    %c0_11 = arith.constant 0 : index
    %8 = vector.load %arg2[%c0_9, %c2, %c0_10, %c0_11] : memref<1x4x1024x75xbf16, #tpu.memory_space<vmem>>, vector<1x1x1024x75xbf16>
    %9 = vector.shape_cast %8 : vector<1x1x1024x75xbf16> to vector<1024x75xbf16>
    %cst_12 = arith.constant dense<0.000000e+00> : vector<1024x16xf32>
    %10 = tpu.matmul %9, %0, %cst_12 {dimension_numbers = #tpu.dot_dimension_numbers<[1], [0], [0], [1], [0, 0, 1, 1], [], []>} : vector<1024x75xbf16>, vector<75x16xbf16>, vector<1024x16xf32> -> vector<1024x16xf32>
    %11 = arith.maximumf %7, %10 : vector<1024x16xf32>
    %c0_13 = arith.constant 0 : index
    %c3 = arith.constant 3 : index
    %c0_14 = arith.constant 0 : index
    %c0_15 = arith.constant 0 : index
    %12 = vector.load %arg2[%c0_13, %c3, %c0_14, %c0_15] : memref<1x4x1024x75xbf16, #tpu.memory_space<vmem>>, vector<1x1x1024x75xbf16>
    %13 = vector.shape_cast %12 : vector<1x1x1024x75xbf16> to vector<1024x75xbf16>
    %cst_16 = arith.constant dense<0.000000e+00> : vector<1024x16xf32>
    %14 = tpu.matmul %13, %0, %cst_16 {dimension_numbers = #tpu.dot_dimension_numbers<[1], [0], [0], [1], [0, 0, 1, 1], [], []>} : vector<1024x75xbf16>, vector<75x16xbf16>, vector<1024x16xf32> -> vector<1024x16xf32>
    %15 = arith.maximumf %11, %14 : vector<1024x16xf32>
    %c0_17 = arith.constant 0 : index
    %c0_18 = arith.constant 0 : index
    %16 = vector.load %arg4[%c0_17, %c0_18] : memref<1x16xf32, #tpu.memory_space<vmem>>, vector<1x16xf32>
    %17 = vector.broadcast %16 : vector<1x16xf32> to vector<1024x16xf32>
    %18 = arith.addf %15, %17 : vector<1024x16xf32>
    %cst_19 = arith.constant 0.000000e+00 : f32
    %19 = vector.broadcast %cst_19 : f32 to vector<1024x16xf32>
    %20 = arith.maximumf %18, %19 : vector<1024x16xf32>
    %21 = arith.truncf %20 : vector<1024x16xf32> to vector<1024x16xbf16>
    %c0_20 = arith.constant 0 : index
    %c0_21 = arith.constant 0 : index
    %c0_22 = arith.constant 0 : index
    %22 = vector.load %arg5[%c0_20, %c0_21, %c0_22] : memref<1x1024x16xbf16, #tpu.memory_space<vmem>>, vector<1x1024x16xbf16>
    %23 = vector.shape_cast %22 : vector<1x1024x16xbf16> to vector<1024x16xbf16>
    %24 = vector.shape_cast %21 : vector<1024x16xbf16> to vector<1x1024x16xbf16>
    tpu.vector_store %arg5[%c0_20, %c0_21, %c0_22], %24 {strides = array<i32>} : memref<1x1024x16xbf16, #tpu.memory_space<vmem>>, vector<1x1024x16xbf16>,
    return
  }
  func.func @transform_0(%arg0: i32, %arg1: i32) -> (i32, i32, i32, i32) {
    %c0_i32 = arith.constant 0 : i32
    %c0_i32_0 = arith.constant 0 : i32
    %c0_i32_1 = arith.constant 0 : i32
    return %arg0, %c0_i32, %arg1, %c0_i32_0 : i32, i32, i32, i32
  }
  func.func @transform_1(%arg0: i32, %arg1: i32) -> (i32, i32) {
    %c0_i32 = arith.constant 0 : i32
    %c0_i32_0 = arith.constant 0 : i32
    %c0_i32_1 = arith.constant 0 : i32
    return %c0_i32, %c0_i32_0 : i32, i32
  }
  func.func @transform_2(%arg0: i32, %arg1: i32) -> (i32, i32) {
    %c0_i32 = arith.constant 0 : i32
    %c0_i32_0 = arith.constant 0 : i32
    %c0_i32_1 = arith.constant 0 : i32
    return %c0_i32, %c0_i32_0 : i32, i32
  }
  func.func @transform_3(%arg0: i32, %arg1: i32) -> (i32, i32, i32) {
    %c0_i32 = arith.constant 0 : i32
    %c0_i32_0 = arith.constant 0 : i32
    return %arg0, %arg1, %c0_i32 : i32, i32, i32
  }
}

module attributes {stable_mosaic.version = 11 : i64} {
  func.func @_conv_bias_pool_relu_kernel(%arg0: i32, %arg1: i32, %arg2: memref<1x4x169x400xbf16, #tpu.memory_space<vmem>>, %arg3: memref<400x32xbf16, #tpu.memory_space<vmem>>, %arg4: memref<1x32xf32, #tpu.memory_space<vmem>>, %arg5: memref<1x169x32xbf16, #tpu.memory_space<vmem>>) attributes {dimension_semantics = [#tpu.dimension_semantics<parallel>, #tpu.dimension_semantics<parallel>], iteration_bounds = array<i64: 2, 1>, scalar_prefetch = 0 : i64, scratch_operands = 0 : i64, tpu.core_type = #tpu.core_type<tc>, window_params = [{transform_indices = @transform_0, window_bounds = array<i64: 1, 4, 169, 400>}, {pipeline_mode = #tpu.pipeline_mode<synchronous>, transform_indices = @transform_1, window_bounds = array<i64: 400, 32>}, {pipeline_mode = #tpu.pipeline_mode<synchronous>, transform_indices = @transform_2, window_bounds = array<i64: 1, 32>}, {transform_indices = @transform_3, window_bounds = array<i64: 1, 169, 32>}]} {
    %c0 = arith.constant 0 : index
    %c0_0 = arith.constant 0 : index
    %0 = vector.load %arg3[%c0, %c0_0] : memref<400x32xbf16, #tpu.memory_space<vmem>>, vector<400x32xbf16>
    %c0_1 = arith.constant 0 : index
    %c0_2 = arith.constant 0 : index
    %c0_3 = arith.constant 0 : index
    %c0_4 = arith.constant 0 : index
    %1 = vector.load %arg2[%c0_1, %c0_2, %c0_3, %c0_4] : memref<1x4x169x400xbf16, #tpu.memory_space<vmem>>, vector<1x1x169x400xbf16>
    %2 = vector.shape_cast %1 : vector<1x1x169x400xbf16> to vector<169x400xbf16>
    %cst = arith.constant dense<0.000000e+00> : vector<169x32xf32>
    %3 = tpu.matmul %2, %0, %cst {dimension_numbers = #tpu.dot_dimension_numbers<[1], [0], [0], [1], [0, 0, 1, 1], [], []>} : vector<169x400xbf16>, vector<400x32xbf16>, vector<169x32xf32> -> vector<169x32xf32>
    %c0_5 = arith.constant 0 : index
    %c1 = arith.constant 1 : index
    %c0_6 = arith.constant 0 : index
    %c0_7 = arith.constant 0 : index
    %4 = vector.load %arg2[%c0_5, %c1, %c0_6, %c0_7] : memref<1x4x169x400xbf16, #tpu.memory_space<vmem>>, vector<1x1x169x400xbf16>
    %5 = vector.shape_cast %4 : vector<1x1x169x400xbf16> to vector<169x400xbf16>
    %cst_8 = arith.constant dense<0.000000e+00> : vector<169x32xf32>
    %6 = tpu.matmul %5, %0, %cst_8 {dimension_numbers = #tpu.dot_dimension_numbers<[1], [0], [0], [1], [0, 0, 1, 1], [], []>} : vector<169x400xbf16>, vector<400x32xbf16>, vector<169x32xf32> -> vector<169x32xf32>
    %7 = arith.maximumf %3, %6 : vector<169x32xf32>
    %c0_9 = arith.constant 0 : index
    %c2 = arith.constant 2 : index
    %c0_10 = arith.constant 0 : index
    %c0_11 = arith.constant 0 : index
    %8 = vector.load %arg2[%c0_9, %c2, %c0_10, %c0_11] : memref<1x4x169x400xbf16, #tpu.memory_space<vmem>>, vector<1x1x169x400xbf16>
    %9 = vector.shape_cast %8 : vector<1x1x169x400xbf16> to vector<169x400xbf16>
    %cst_12 = arith.constant dense<0.000000e+00> : vector<169x32xf32>
    %10 = tpu.matmul %9, %0, %cst_12 {dimension_numbers = #tpu.dot_dimension_numbers<[1], [0], [0], [1], [0, 0, 1, 1], [], []>} : vector<169x400xbf16>, vector<400x32xbf16>, vector<169x32xf32> -> vector<169x32xf32>
    %11 = arith.maximumf %7, %10 : vector<169x32xf32>
    %c0_13 = arith.constant 0 : index
    %c3 = arith.constant 3 : index
    %c0_14 = arith.constant 0 : index
    %c0_15 = arith.constant 0 : index
    %12 = vector.load %arg2[%c0_13, %c3, %c0_14, %c0_15] : memref<1x4x169x400xbf16, #tpu.memory_space<vmem>>, vector<1x1x169x400xbf16>
    %13 = vector.shape_cast %12 : vector<1x1x169x400xbf16> to vector<169x400xbf16>
    %cst_16 = arith.constant dense<0.000000e+00> : vector<169x32xf32>
    %14 = tpu.matmul %13, %0, %cst_16 {dimension_numbers = #tpu.dot_dimension_numbers<[1], [0], [0], [1], [0, 0, 1, 1], [], []>} : vector<169x400xbf16>, vector<400x32xbf16>, vector<169x32xf32> -> vector<169x32xf32>
    %15 = arith.maximumf %11, %14 : vector<169x32xf32>
    %c0_17 = arith.constant 0 : index
    %c0_18 = arith.constant 0 : index
    %16 = vector.load %arg4[%c0_17, %c0_18] : memref<1x32xf32, #tpu.memory_space<vmem>>, vector<1x32xf32>
    %17 = vector.broadcast %16 : vector<1x32xf32> to vector<169x32xf32>
    %18 = arith.addf %15, %17 : vector<169x32xf32>
    %cst_19 = arith.constant 0.000000e+00 : f32
    %19 = vector.broadcast %cst_19 : f32 to vector<169x32xf32>
    %20 = arith.maximumf %18, %19 : vector<169x32xf32>
    %21 = arith.truncf %20 : vector<169x32xf32> to vector<169x32xbf16>
    %c0_20 = arith.constant 0 : index
    %c0_21 = arith.constant 0 : index
    %c0_22 = arith.constant 0 : index
    %22 = vector.load %arg5[%c0_20, %c0_21, %c0_22] : memref<1x169x32xbf16, #tpu.memory_space<vmem>>, vector<1x169x32xbf16>
    %23 = vector.shape_cast %22 : vector<1x169x32xbf16> to vector<169x32xbf16>
    %24 = vector.shape_cast %21 : vector<169x32xbf16> to vector<1x169x32xbf16>
    tpu.vector_store %arg5[%c0_20, %c0_21, %c0_22], %24 {strides = array<i32>} : memref<1x169x32xbf16, #tpu.memory_space<vmem>>, vector<1x169x32xbf16>,
    return
  }
  func.func @transform_0(%arg0: i32, %arg1: i32) -> (i32, i32, i32, i32) {
    %c0_i32 = arith.constant 0 : i32
    %c0_i32_0 = arith.constant 0 : i32
    %c0_i32_1 = arith.constant 0 : i32
    return %arg0, %c0_i32, %arg1, %c0_i32_0 : i32, i32, i32, i32
  }
  func.func @transform_1(%arg0: i32, %arg1: i32) -> (i32, i32) {
    %c0_i32 = arith.constant 0 : i32
    %c0_i32_0 = arith.constant 0 : i32
    %c0_i32_1 = arith.constant 0 : i32
    return %c0_i32, %c0_i32_0 : i32, i32
  }
  func.func @transform_2(%arg0: i32, %arg1: i32) -> (i32, i32) {
    %c0_i32 = arith.constant 0 : i32
    %c0_i32_0 = arith.constant 0 : i32
    %c0_i32_1 = arith.constant 0 : i32
    return %c0_i32, %c0_i32_0 : i32, i32
  }
  func.func @transform_3(%arg0: i32, %arg1: i32) -> (i32, i32, i32) {
    %c0_i32 = arith.constant 0 : i32
    %c0_i32_0 = arith.constant 0 : i32
    return %arg0, %arg1, %c0_i32 : i32, i32, i32
  }
}

module attributes {stable_mosaic.version = 11 : i64} {
  func.func @_conv_bias_pool_relu_kernel(%arg0: i32, %arg1: i32, %arg2: memref<1x4x36x288xbf16, #tpu.memory_space<vmem>>, %arg3: memref<288x64xbf16, #tpu.memory_space<vmem>>, %arg4: memref<1x64xf32, #tpu.memory_space<vmem>>, %arg5: memref<1x36x64xbf16, #tpu.memory_space<vmem>>) attributes {dimension_semantics = [#tpu.dimension_semantics<parallel>, #tpu.dimension_semantics<parallel>], iteration_bounds = array<i64: 2, 1>, scalar_prefetch = 0 : i64, scratch_operands = 0 : i64, tpu.core_type = #tpu.core_type<tc>, window_params = [{transform_indices = @transform_0, window_bounds = array<i64: 1, 4, 36, 288>}, {pipeline_mode = #tpu.pipeline_mode<synchronous>, transform_indices = @transform_1, window_bounds = array<i64: 288, 64>}, {pipeline_mode = #tpu.pipeline_mode<synchronous>, transform_indices = @transform_2, window_bounds = array<i64: 1, 64>}, {transform_indices = @transform_3, window_bounds = array<i64: 1, 36, 64>}]} {
    %c0 = arith.constant 0 : index
    %c0_0 = arith.constant 0 : index
    %0 = vector.load %arg3[%c0, %c0_0] : memref<288x64xbf16, #tpu.memory_space<vmem>>, vector<288x64xbf16>
    %c0_1 = arith.constant 0 : index
    %c0_2 = arith.constant 0 : index
    %c0_3 = arith.constant 0 : index
    %c0_4 = arith.constant 0 : index
    %1 = vector.load %arg2[%c0_1, %c0_2, %c0_3, %c0_4] : memref<1x4x36x288xbf16, #tpu.memory_space<vmem>>, vector<1x1x36x288xbf16>
    %2 = vector.shape_cast %1 : vector<1x1x36x288xbf16> to vector<36x288xbf16>
    %cst = arith.constant dense<0.000000e+00> : vector<36x64xf32>
    %3 = tpu.matmul %2, %0, %cst {dimension_numbers = #tpu.dot_dimension_numbers<[1], [0], [0], [1], [0, 0, 1, 1], [], []>} : vector<36x288xbf16>, vector<288x64xbf16>, vector<36x64xf32> -> vector<36x64xf32>
    %c0_5 = arith.constant 0 : index
    %c1 = arith.constant 1 : index
    %c0_6 = arith.constant 0 : index
    %c0_7 = arith.constant 0 : index
    %4 = vector.load %arg2[%c0_5, %c1, %c0_6, %c0_7] : memref<1x4x36x288xbf16, #tpu.memory_space<vmem>>, vector<1x1x36x288xbf16>
    %5 = vector.shape_cast %4 : vector<1x1x36x288xbf16> to vector<36x288xbf16>
    %cst_8 = arith.constant dense<0.000000e+00> : vector<36x64xf32>
    %6 = tpu.matmul %5, %0, %cst_8 {dimension_numbers = #tpu.dot_dimension_numbers<[1], [0], [0], [1], [0, 0, 1, 1], [], []>} : vector<36x288xbf16>, vector<288x64xbf16>, vector<36x64xf32> -> vector<36x64xf32>
    %7 = arith.maximumf %3, %6 : vector<36x64xf32>
    %c0_9 = arith.constant 0 : index
    %c2 = arith.constant 2 : index
    %c0_10 = arith.constant 0 : index
    %c0_11 = arith.constant 0 : index
    %8 = vector.load %arg2[%c0_9, %c2, %c0_10, %c0_11] : memref<1x4x36x288xbf16, #tpu.memory_space<vmem>>, vector<1x1x36x288xbf16>
    %9 = vector.shape_cast %8 : vector<1x1x36x288xbf16> to vector<36x288xbf16>
    %cst_12 = arith.constant dense<0.000000e+00> : vector<36x64xf32>
    %10 = tpu.matmul %9, %0, %cst_12 {dimension_numbers = #tpu.dot_dimension_numbers<[1], [0], [0], [1], [0, 0, 1, 1], [], []>} : vector<36x288xbf16>, vector<288x64xbf16>, vector<36x64xf32> -> vector<36x64xf32>
    %11 = arith.maximumf %7, %10 : vector<36x64xf32>
    %c0_13 = arith.constant 0 : index
    %c3 = arith.constant 3 : index
    %c0_14 = arith.constant 0 : index
    %c0_15 = arith.constant 0 : index
    %12 = vector.load %arg2[%c0_13, %c3, %c0_14, %c0_15] : memref<1x4x36x288xbf16, #tpu.memory_space<vmem>>, vector<1x1x36x288xbf16>
    %13 = vector.shape_cast %12 : vector<1x1x36x288xbf16> to vector<36x288xbf16>
    %cst_16 = arith.constant dense<0.000000e+00> : vector<36x64xf32>
    %14 = tpu.matmul %13, %0, %cst_16 {dimension_numbers = #tpu.dot_dimension_numbers<[1], [0], [0], [1], [0, 0, 1, 1], [], []>} : vector<36x288xbf16>, vector<288x64xbf16>, vector<36x64xf32> -> vector<36x64xf32>
    %15 = arith.maximumf %11, %14 : vector<36x64xf32>
    %c0_17 = arith.constant 0 : index
    %c0_18 = arith.constant 0 : index
    %16 = vector.load %arg4[%c0_17, %c0_18] : memref<1x64xf32, #tpu.memory_space<vmem>>, vector<1x64xf32>
    %17 = vector.broadcast %16 : vector<1x64xf32> to vector<36x64xf32>
    %18 = arith.addf %15, %17 : vector<36x64xf32>
    %cst_19 = arith.constant 0.000000e+00 : f32
    %19 = vector.broadcast %cst_19 : f32 to vector<36x64xf32>
    %20 = arith.maximumf %18, %19 : vector<36x64xf32>
    %21 = arith.truncf %20 : vector<36x64xf32> to vector<36x64xbf16>
    %c0_20 = arith.constant 0 : index
    %c0_21 = arith.constant 0 : index
    %c0_22 = arith.constant 0 : index
    %22 = vector.load %arg5[%c0_20, %c0_21, %c0_22] : memref<1x36x64xbf16, #tpu.memory_space<vmem>>, vector<1x36x64xbf16>
    %23 = vector.shape_cast %22 : vector<1x36x64xbf16> to vector<36x64xbf16>
    %24 = vector.shape_cast %21 : vector<36x64xbf16> to vector<1x36x64xbf16>
    tpu.vector_store %arg5[%c0_20, %c0_21, %c0_22], %24 {strides = array<i32>} : memref<1x36x64xbf16, #tpu.memory_space<vmem>>, vector<1x36x64xbf16>,
    return
  }
  func.func @transform_0(%arg0: i32, %arg1: i32) -> (i32, i32, i32, i32) {
    %c0_i32 = arith.constant 0 : i32
    %c0_i32_0 = arith.constant 0 : i32
    %c0_i32_1 = arith.constant 0 : i32
    return %arg0, %c0_i32, %arg1, %c0_i32_0 : i32, i32, i32, i32
  }
  func.func @transform_1(%arg0: i32, %arg1: i32) -> (i32, i32) {
    %c0_i32 = arith.constant 0 : i32
    %c0_i32_0 = arith.constant 0 : i32
    %c0_i32_1 = arith.constant 0 : i32
    return %c0_i32, %c0_i32_0 : i32, i32
  }
  func.func @transform_2(%arg0: i32, %arg1: i32) -> (i32, i32) {
    %c0_i32 = arith.constant 0 : i32
    %c0_i32_0 = arith.constant 0 : i32
    %c0_i32_1 = arith.constant 0 : i32
    return %c0_i32, %c0_i32_0 : i32, i32
  }
  func.func @transform_3(%arg0: i32, %arg1: i32) -> (i32, i32, i32) {
    %c0_i32 = arith.constant 0 : i32
    %c0_i32_0 = arith.constant 0 : i32
    return %arg0, %arg1, %c0_i32 : i32, i32, i32
  }
}

module attributes {stable_mosaic.version = 11 : i64} {
  func.func @_fc_stack_kernel(%arg0: i32, %arg1: memref<2x2304xbf16, #tpu.memory_space<vmem>>, %arg2: memref<2304x512xbf16, #tpu.memory_space<vmem>>, %arg3: memref<1x512xf32, #tpu.memory_space<vmem>>, %arg4: memref<512x128xbf16, #tpu.memory_space<vmem>>, %arg5: memref<1x128xf32, #tpu.memory_space<vmem>>, %arg6: memref<128x128xbf16, #tpu.memory_space<vmem>>, %arg7: memref<1x128xf32, #tpu.memory_space<vmem>>, %arg8: memref<2x128xf32, #tpu.memory_space<vmem>>) attributes {dimension_semantics = [#tpu.dimension_semantics<arbitrary>], iteration_bounds = array<i64: 1>, scalar_prefetch = 0 : i64, scratch_operands = 0 : i64, tpu.core_type = #tpu.core_type<tc>, window_params = [{pipeline_mode = #tpu.pipeline_mode<synchronous>, transform_indices = @transform_0, window_bounds = array<i64: 2, 2304>}, {pipeline_mode = #tpu.pipeline_mode<synchronous>, transform_indices = @transform_1, window_bounds = array<i64: 2304, 512>}, {pipeline_mode = #tpu.pipeline_mode<synchronous>, transform_indices = @transform_2, window_bounds = array<i64: 1, 512>}, {pipeline_mode = #tpu.pipeline_mode<synchronous>, transform_indices = @transform_3, window_bounds = array<i64: 512, 128>}, {pipeline_mode = #tpu.pipeline_mode<synchronous>, transform_indices = @transform_4, window_bounds = array<i64: 1, 128>}, {pipeline_mode = #tpu.pipeline_mode<synchronous>, transform_indices = @transform_5, window_bounds = array<i64: 128, 128>}, {pipeline_mode = #tpu.pipeline_mode<synchronous>, transform_indices = @transform_6, window_bounds = array<i64: 1, 128>}, {pipeline_mode = #tpu.pipeline_mode<synchronous>, transform_indices = @transform_7, window_bounds = array<i64: 2, 128>}]} {
    %c0 = arith.constant 0 : index
    %c0_0 = arith.constant 0 : index
    %0 = vector.load %arg1[%c0, %c0_0] : memref<2x2304xbf16, #tpu.memory_space<vmem>>, vector<2x2304xbf16>
    %c0_1 = arith.constant 0 : index
    %c0_2 = arith.constant 0 : index
    %1 = vector.load %arg2[%c0_1, %c0_2] : memref<2304x512xbf16, #tpu.memory_space<vmem>>, vector<2304x512xbf16>
    %cst = arith.constant dense<0.000000e+00> : vector<2x512xf32>
    %2 = tpu.matmul %0, %1, %cst {dimension_numbers = #tpu.dot_dimension_numbers<[1], [0], [0], [1], [0, 0, 1, 1], [], []>} : vector<2x2304xbf16>, vector<2304x512xbf16>, vector<2x512xf32> -> vector<2x512xf32>
    %c0_3 = arith.constant 0 : index
    %c0_4 = arith.constant 0 : index
    %3 = vector.load %arg3[%c0_3, %c0_4] : memref<1x512xf32, #tpu.memory_space<vmem>>, vector<1x512xf32>
    %4 = vector.broadcast %3 : vector<1x512xf32> to vector<2x512xf32>
    %5 = arith.addf %2, %4 : vector<2x512xf32>
    %cst_5 = arith.constant 0.000000e+00 : f32
    %6 = vector.broadcast %cst_5 : f32 to vector<2x512xf32>
    %7 = arith.maximumf %5, %6 : vector<2x512xf32>
    %8 = arith.truncf %7 : vector<2x512xf32> to vector<2x512xbf16>
    %c0_6 = arith.constant 0 : index
    %c0_7 = arith.constant 0 : index
    %9 = vector.load %arg4[%c0_6, %c0_7] : memref<512x128xbf16, #tpu.memory_space<vmem>>, vector<512x128xbf16>
    %cst_8 = arith.constant dense<0.000000e+00> : vector<2x128xf32>
    %10 = tpu.matmul %8, %9, %cst_8 {dimension_numbers = #tpu.dot_dimension_numbers<[1], [0], [0], [1], [0, 0, 1, 1], [], []>} : vector<2x512xbf16>, vector<512x128xbf16>, vector<2x128xf32> -> vector<2x128xf32>
    %c0_9 = arith.constant 0 : index
    %c0_10 = arith.constant 0 : index
    %11 = vector.load %arg5[%c0_9, %c0_10] : memref<1x128xf32, #tpu.memory_space<vmem>>, vector<1x128xf32>
    %12 = vector.broadcast %11 : vector<1x128xf32> to vector<2x128xf32>
    %13 = arith.addf %10, %12 : vector<2x128xf32>
    %cst_11 = arith.constant 0.000000e+00 : f32
    %14 = vector.broadcast %cst_11 : f32 to vector<2x128xf32>
    %15 = arith.maximumf %13, %14 : vector<2x128xf32>
    %16 = arith.truncf %15 : vector<2x128xf32> to vector<2x128xbf16>
    %c0_12 = arith.constant 0 : index
    %c0_13 = arith.constant 0 : index
    %17 = vector.load %arg6[%c0_12, %c0_13] : memref<128x128xbf16, #tpu.memory_space<vmem>>, vector<128x128xbf16>
    %cst_14 = arith.constant dense<0.000000e+00> : vector<2x128xf32>
    %18 = tpu.matmul %16, %17, %cst_14 {dimension_numbers = #tpu.dot_dimension_numbers<[1], [0], [0], [1], [0, 0, 1, 1], [], []>} : vector<2x128xbf16>, vector<128x128xbf16>, vector<2x128xf32> -> vector<2x128xf32>
    %c0_15 = arith.constant 0 : index
    %c0_16 = arith.constant 0 : index
    %19 = vector.load %arg7[%c0_15, %c0_16] : memref<1x128xf32, #tpu.memory_space<vmem>>, vector<1x128xf32>
    %20 = vector.broadcast %19 : vector<1x128xf32> to vector<2x128xf32>
    %21 = arith.addf %18, %20 : vector<2x128xf32>
    %c0_17 = arith.constant 0 : index
    %c0_18 = arith.constant 0 : index
    %22 = vector.load %arg8[%c0_17, %c0_18] : memref<2x128xf32, #tpu.memory_space<vmem>>, vector<2x128xf32>
    tpu.vector_store %arg8[%c0_17, %c0_18], %21 {strides = array<i32>} : memref<2x128xf32, #tpu.memory_space<vmem>>, vector<2x128xf32>,
    return
  }
  func.func @transform_0(%arg0: i32) -> (i32, i32) {
    %c0_i32 = arith.constant 0 : i32
    %c0_i32_0 = arith.constant 0 : i32
    %c0_i32_1 = arith.constant 0 : i32
    return %c0_i32, %c0_i32_0 : i32, i32
  }
  func.func @transform_1(%arg0: i32) -> (i32, i32) {
    %c0_i32 = arith.constant 0 : i32
    %c0_i32_0 = arith.constant 0 : i32
    %c0_i32_1 = arith.constant 0 : i32
    return %c0_i32, %c0_i32_0 : i32, i32
  }
  func.func @transform_2(%arg0: i32) -> (i32, i32) {
    %c0_i32 = arith.constant 0 : i32
    %c0_i32_0 = arith.constant 0 : i32
    %c0_i32_1 = arith.constant 0 : i32
    return %c0_i32, %c0_i32_0 : i32, i32
  }
  func.func @transform_3(%arg0: i32) -> (i32, i32) {
    %c0_i32 = arith.constant 0 : i32
    %c0_i32_0 = arith.constant 0 : i32
    %c0_i32_1 = arith.constant 0 : i32
    return %c0_i32, %c0_i32_0 : i32, i32
  }
  func.func @transform_4(%arg0: i32) -> (i32, i32) {
    %c0_i32 = arith.constant 0 : i32
    %c0_i32_0 = arith.constant 0 : i32
    %c0_i32_1 = arith.constant 0 : i32
    return %c0_i32, %c0_i32_0 : i32, i32
  }
  func.func @transform_5(%arg0: i32) -> (i32, i32) {
    %c0_i32 = arith.constant 0 : i32
    %c0_i32_0 = arith.constant 0 : i32
    %c0_i32_1 = arith.constant 0 : i32
    return %c0_i32, %c0_i32_0 : i32, i32
  }
  func.func @transform_6(%arg0: i32) -> (i32, i32) {
    %c0_i32 = arith.constant 0 : i32
    %c0_i32_0 = arith.constant 0 : i32
    %c0_i32_1 = arith.constant 0 : i32
    return %c0_i32, %c0_i32_0 : i32, i32
  }
  func.func @transform_7(%arg0: i32) -> (i32, i32) {
    %c0_i32 = arith.constant 0 : i32
    %c0_i32_0 = arith.constant 0 : i32
    %c0_i32_1 = arith.constant 0 : i32
    return %c0_i32, %c0_i32_0 : i32, i32
  }
}

</mosaic_0001>

<bundles_post_ra>
// kernel: cat_dog_convnet_forward.4
= control target key start
LH: loop header
LB: loop body
LE: loop exit
PB: predicated region body
PF: predicated region fallthrough
CT: control target
= control target key end

     0   :  { %s8117_s12 = smov 0   ;;  %s8119_s13 = smov 0   ;;  %s9424_s0 = inlined_call_operand.vmem [shape: bf16[2,4,3025,75], index: 0, kind: input, shape index: {}]   ;;  %s9425_s1 = inlined_call_operand.vmem [shape: bf16[75,16], index: 1, kind: input, shape index: {}]   ;;  %s9426_s2 = inlined_call_operand.vmem [shape: f32[1,16], index: 2, kind: input, shape index: {}]   ;;  %s9427_s3 = inlined_call_operand.vmem [shape: bf16[2,3025,16], index: 3, kind: output, shape index: {}]  }
   0x1   :  { %s8121_s14 = smov 0   ;;  %s8123_s15 = smov 0  }
   0x2   :  { %s8125_s16 = smov 0   ;;  %s8127_s17 = smov 0  }
   0x3   :  { %s8129_s18 = smov 0  }
   0x4 LB: > { %s22_s19 = sadd.s32 1, %s8022_s16  ;;  %s25_s20 = sadd.s32 1, %s8026_s17  ;;  %s8030_s18 = sphi %s8129_s18, %s13_s18   ;;  %s8026_s17 = sphi %s8127_s17, %s9446_s17   ;;  %s8022_s16 = sphi %s8125_s16, %s9445_s16   ;;  %s8018_s15 = sphi %s8123_s15, %s9444_s15   ;;  %s8014_s14 = sphi %s8121_s14, %s9443_s14   ;;  %s8010_s13 = sphi %s8119_s13, %s9442_s13   ;;  %s8006_s12 = sphi %s8117_s12, %s9441_s12  }
   0x5   : > { %p23_p0 = scmp.ge.s32.totalorder %s22_s19, 3  ;;  %s5732_s21 = sadd.s32 4294967295, %s8030_s18  }
   0x6   : > { %p41_p1 = scmp.ne.s32.totalorder %s8010_s13, %s8006_s12  ;;  %p42_p2 = scmp.eq.s32.totalorder %s8030_s18, 0 }
   0x7   : > { %s9448_s19 = smov (%p23_p0, %s22_s19), 0  ;;  %s9450_s20 = smov (!%p23_p0, %s25_s20), %s8026_s17 }
   0x8   : > { %p27_p3 = scmp.ge.s32.totalorder %s9450_s20, 2  ;;  %p115_p4 = scmp.eq.s32.totalorder %s5732_s21, 5 }
   0x9   : > { %s30_s22 = ssub.s32 %s8022_s16, %s9448_s19  ;;  %p43_p5 = por %p42_p2, %p41_p1 }
   0xa   : > { %s9452_s20 = smov (%p27_p3, %s9450_s20), 0  ;;  %p8165_p6 = por %p115_p4, %p41_p1 }
   0xb   : > { %s29_s24 = ssub.s32 %s8026_s17, %s9452_s20  ;;  %s34_s26 = sadd.s32 1, %s8010_s13 }
   0xc   : > { %s31_s25 = sor.u32 %s30_s22, %s29_s24  ;;  %p5735_p8 = scmp.ge.s32.totalorder %s8030_s18, 6 }
   0xd   : > { %p32_p7 = scmp.eq.s32.totalorder %s31_s25, 0 }
   0xe   : > { %143 = sbr.rel (%p5735_p8) target bundleno = 80 (0x50), region = 24 }
   0xf   : > { %s8173_s27 = scalar_select %p32_p7, %s8010_s13, %s34_s26  }
  0x13   : > { %146 = sbr.rel (!%p43_p5) target bundleno = 80 (0x50), region = 28  ;;  %s148_s28 = sand.u32 (%p43_p5), 1, %s8010_s13  }
  0x14   : > { %s5737_s29 = sshll.u32 (%p43_p5), %s8022_s16, 7  ;;  %s5736_s30 = sshll.u32 (%p43_p5), %s148_s28, 11 }
  0x15   : > { %s152_s4 = ssub.s32 (%p43_p5), 379, %s5737_s29  ;;  %s7720_s5 = smul.u32 (%p43_p5), 1516, %s8026_s17 }
  0x16   : > { %p153_p9 = scmp.lt.s32.totalorder (%p43_p5), %s152_s4, 128  ;;  %s8187_s21 = scalar_lea.vmem (%p43_p5), [#allocation2], %s5736_s30  }
  0x17   : > { %s158_s6 = sadd.s32 (%p43_p5), %s7720_s5, %s5737_s29 }
  0x18   : > { %s9454_s4 = smov (!%p153_p9, %s152_s4), 128  ;;  %s5740_s8 = sshll.u32 %s158_s6, 2 }
  0x19   : > { %s5738_s7 = sshll.u32 %s9454_s4, 4  ;;  %s8185_s11 = scalar_lea.vmem %s9424_s0, %s5740_s8  }
  0x1a   : > { %p5741_p10 = scmp.eq.s32.totalorder %s5738_s7, 0 }
  0x1b   : > { %s8190_s22 = sshrl.u32 (!%p5741_p10), %s9454_s4, 3  ;;  %s9429_s24 = smov (!%p5741_p10), %s8187_s21 }
  0x1c   : > { %163 = sbr.rel (%p5741_p10) target bundleno = 80 (0x50), region = 32  ;;  %s9430_s25 = smov (!%p5741_p10), %s8185_s11 }
  0x1d   : > { %s8198_s26 = smov (!%p5741_p10), 0   ;;  %s8200_s28 = smov (!%p5741_p10), 0  }
  0x21 LB: >> { %v180_v0 = vld [vmem:[%s8038_s25] sm:$0xf]  ;;  %v182_v1 = vld [vmem:[%s8038_s25 + $0x4] sm:$0xf]  ;;  %v184_v2 = vld [vmem:[%s8038_s25 + $0x8] sm:$0xf]  ;;  %s8046_s28 = sphi %s8200_s28, %s174_s28   ;;  %s8042_s26 = sphi %s8198_s26, %s9433_s26   ;;  %s8038_s25 = sphi %s9430_s25, %s9432_s25   ;;  %s8034_s24 = sphi %s9429_s24, %s9431_s24  }
  0x22   : >> { %181 = vst [vmem:[%s8034_s24] sm:$0xf] %v180_v0  ;;  %v186_v3 = vld [vmem:[%s8038_s25 + $0xc] sm:$0xf]  ;;  %v188_v4 = vld [vmem:[%s8038_s25 + $0x10] sm:$0xf]  ;;  %s244_s29 = sadd.s32 1, %s8042_s26 }
  0x23   : >> { %183 = vst [vmem:[%s8034_s24 + $0x4] sm:$0xf] %v182_v1  ;;  %v190_v5 = vld [vmem:[%s8038_s25 + $0x14] sm:$0xf]  ;;  %v192_v6 = vld [vmem:[%s8038_s25 + $0x18] sm:$0xf]  ;;  %p245_p11 = scmp.ge.s32.totalorder %s244_s29, %s8190_s22 }
  0x24   : >> { %185 = vst [vmem:[%s8034_s24 + $0x8] sm:$0xf] %v184_v2  ;;  %v194_v7 = vld [vmem:[%s8038_s25 + $0x1c] sm:$0xf]  ;;  %v196_v8 = vld [vmem:[%s8038_s25 + $0x5ec] sm:$0xf] }
  0x25   : >> { %187 = vst [vmem:[%s8034_s24 + $0xc] sm:$0xf] %v186_v3  ;;  %v198_v9 = vld [vmem:[%s8038_s25 + $0x5f0] sm:$0xf]  ;;  %v200_v10 = vld [vmem:[%s8038_s25 + $0x5f4] sm:$0xf] }
  0x26   : >> { %189 = vst [vmem:[%s8034_s24 + $0x10] sm:$0xf] %v188_v4  ;;  %v202_v11 = vld [vmem:[%s8038_s25 + $0x5f8] sm:$0xf]  ;;  %v204_v12 = vld [vmem:[%s8038_s25 + $0x5fc] sm:$0xf] }
  0x27   : >> { %191 = vst [vmem:[%s8034_s24 + $0x14] sm:$0xf] %v190_v5  ;;  %v206_v13 = vld [vmem:[%s8038_s25 + $0x600] sm:$0xf]  ;;  %v208_v14 = vld [vmem:[%s8038_s25 + $0x604] sm:$0xf] }
  0x28   : >> { %193 = vst [vmem:[%s8034_s24 + $0x18] sm:$0xf] %v192_v6  ;;  %v210_v15 = vld [vmem:[%s8038_s25 + $0x608] sm:$0xf]  ;;  %v212_v16 = vld [vmem:[%s8038_s25 + $0xbd8] sm:$0xf] }
  0x29   : >> { %195 = vst [vmem:[%s8034_s24 + $0x1c] sm:$0xf] %v194_v7  ;;  %v214_v17 = vld [vmem:[%s8038_s25 + $0xbdc] sm:$0xf]  ;;  %s9456_s29 = smov (%p245_p11, %s244_s29), 0  ;;  %s174_s28 = sadd.s32 1, %s8046_s28  }
  0x2a   : >> { %197 = vst [vmem:[%s8034_s24 + $0x200] sm:$0xf] %v196_v8  ;;  %v216_v18 = vld [vmem:[%s8038_s25 + $0xbe0] sm:$0xf]  ;;  %v218_v19 = vld [vmem:[%s8038_s25 + $0xbe4] sm:$0xf]  ;;  %p173_p12 = scmp.ge.s32.totalorder %s174_s28, %s8190_s22  ;;  %s9433_s26 = smov %s9456_s29 }
  0x2b   : >> { %199 = vst [vmem:[%s8034_s24 + $0x204] sm:$0xf] %v198_v9  ;;  %s5743_s30 = sshll.u32 %s9456_s29, 5  ;;  %v220_v20 = vld [vmem:[%s8038_s25 + $0xbe8] sm:$0xf]  ;;  %s8300_s7 = sand.u32 (%p173_p12), 7, %s9454_s4  }
  0x2c   : >> { %201 = vst [vmem:[%s8034_s24 + $0x208] sm:$0xf] %v200_v10  ;;  %s8259_s5 = scalar_lea.vmem %s8185_s11, %s5743_s30   ;;  %s250_s6 = scalar_lea.vmem %s8187_s21, %s5743_s30 [#allocation2]   ;;  %v222_v21 = vld [vmem:[%s8038_s25 + $0xbec] sm:$0xf]  ;;  %v224_v22 = vld [vmem:[%s8038_s25 + $0xbf0] sm:$0xf] }
  0x2d   : >> { %203 = vst [vmem:[%s8034_s24 + $0x20c] sm:$0xf] %v202_v11  ;;  %v226_v23 = vld [vmem:[%s8038_s25 + $0xbf4] sm:$0xf]  ;;  %v228_v24 = vld [vmem:[%s8038_s25 + $0x11c4] sm:$0xf] }
  0x2e   : >> { %205 = vst [vmem:[%s8034_s24 + $0x210] sm:$0xf] %v204_v12  ;;  %v230_v25 = vld [vmem:[%s8038_s25 + $0x11c8] sm:$0xf]  ;;  %v232_v26 = vld [vmem:[%s8038_s25 + $0x11cc] sm:$0xf] }
  0x2f   : >> { %207 = vst [vmem:[%s8034_s24 + $0x214] sm:$0xf] %v206_v13  ;;  %v234_v27 = vld [vmem:[%s8038_s25 + $0x11d0] sm:$0xf]  ;;  %v236_v28 = vld [vmem:[%s8038_s25 + $0x11d4] sm:$0xf] }
  0x30   : >> { %209 = vst [vmem:[%s8034_s24 + $0x218] sm:$0xf] %v208_v14  ;;  %v238_v29 = vld [vmem:[%s8038_s25 + $0x11d8] sm:$0xf]  ;;  %v240_v30 = vld [vmem:[%s8038_s25 + $0x11dc] sm:$0xf] }
  0x31   : >> { %211 = vst [vmem:[%s8034_s24 + $0x21c] sm:$0xf] %v210_v15  ;;  %v242_v31 = vld [vmem:[%s8038_s25 + $0x11e0] sm:$0xf]  ;;  %s9432_s25 = smov %s8259_s5  ;;  %s7455_s8 = sshll.u32 (%p173_p12), %s8190_s22, 5 }
  0x32   : >> { %213 = vst [vmem:[%s8034_s24 + $0x400] sm:$0xf] %v212_v16  ;;  %s8304_s9 = scalar_lea.vmem (%p173_p12), %s8185_s11, %s7455_s8   ;;  %s8307_s10 = scalar_lea.vmem (%p173_p12), %s8187_s21, %s7455_s8 [#allocation2]  }
  0x33   : >> { %215 = vst [vmem:[%s8034_s24 + $0x404] sm:$0xf] %v214_v17  ;;  %p5748_p13 = scmp.le.s32.totalorder (%p173_p12), %s8300_s7, 0 }
  0x34   : >> { %217 = vst [vmem:[%s8034_s24 + $0x408] sm:$0xf] %v216_v18 }
  0x35   : >> { %219 = vst [vmem:[%s8034_s24 + $0x40c] sm:$0xf] %v218_v19 }
  0x36   : >> { %221 = vst [vmem:[%s8034_s24 + $0x410] sm:$0xf] %v220_v20 }
  0x37   : >> { %223 = vst [vmem:[%s8034_s24 + $0x414] sm:$0xf] %v222_v21 }
  0x38   : >> { %225 = vst [vmem:[%s8034_s24 + $0x418] sm:$0xf] %v224_v22 }
  0x39   : >> { %227 = vst [vmem:[%s8034_s24 + $0x41c] sm:$0xf] %v226_v23 }
  0x3a   : >> { %229 = vst [vmem:[%s8034_s24 + $0x600] sm:$0xf] %v228_v24 }
  0x3b   : >> { %231 = vst [vmem:[%s8034_s24 + $0x604] sm:$0xf] %v230_v25 }
  0x3c   : >> { %233 = vst [vmem:[%s8034_s24 + $0x608] sm:$0xf] %v232_v26 }
  0x3d   : >> { %235 = vst [vmem:[%s8034_s24 + $0x60c] sm:$0xf] %v234_v27  ;;  %176 = sbr.rel (!%p173_p12) target bundleno = 33 (0x21), region = 202 }
  0x3e   : >> { %237 = vst [vmem:[%s8034_s24 + $0x610] sm:$0xf] %v236_v28 }
  0x3f   : >> { %239 = vst [vmem:[%s8034_s24 + $0x614] sm:$0xf] %v238_v29 }
  0x40   : >> { %241 = vst [vmem:[%s8034_s24 + $0x618] sm:$0xf] %v240_v30 }
  0x41   : >> { %243 = vst [vmem:[%s8034_s24 + $0x61c] sm:$0xf] %v242_v31  ;;  %s9431_s24 = smov %s250_s6 }
  0x42   : > { %5663 = sbr.rel (%p5748_p13) target bundleno = 80 (0x50), region = 207  ;;  %s9434_s29 = smov (!%p5748_p13), %s8307_s10 }
  0x43   : > { %s9435_s28 = smov (!%p5748_p13), %s8304_s9  ;;  %s8056_s24 = smov (!%p5748_p13), 0  }
  0x44   : > { %s8060_s25 = smov (!%p5748_p13), 0  }
  0x47 LB: >> { %v267_v32 = vld [vmem:[%s8054_s28] sm:$0xf]  ;;  %v269_v33 = vld [vmem:[%s8054_s28 + $0x5ec] sm:$0xf]  ;;  %v271_v34 = vld [vmem:[%s8054_s28 + $0xbd8] sm:$0xf]  ;;  %s8062_s25 = sphi %s8060_s25, %s261_s25   ;;  %s8058_s24 = sphi %s8056_s24, %s8057_s24   ;;  %s8054_s28 = sphi %s9435_s28, %s280_s28   ;;  %s8050_s29 = sphi %s9434_s29, %s281_s29  }
  0x48   : >> { %268 = vst [vmem:[%s8050_s29] sm:$0xf] %v267_v32  ;;  %v273_v35 = vld [vmem:[%s8054_s28 + $0x11c4] sm:$0xf]  ;;  %s275_s4 = sadd.s32 1, %s8058_s24  ;;  %s261_s25 = sadd.s32 1, %s8062_s25  }
  0x49   : >> { %270 = vst [vmem:[%s8050_s29 + $0x200] sm:$0xf] %v269_v33  ;;  %p276_p0 = scmp.ge.s32.totalorder %s275_s4, %s8300_s7  ;;  %p260_p1 = scmp.ge.s32.totalorder %s261_s25, %s8300_s7 }
  0x4a   : >> { %272 = vst [vmem:[%s8050_s29 + $0x400] sm:$0xf] %v271_v34 }
  0x4b   : >> { %274 = vst [vmem:[%s8050_s29 + $0x600] sm:$0xf] %v273_v35  ;;  %s9458_s4 = smov (%p276_p0, %s275_s4), 0  ;;  %263 = sbr.rel (!%p260_p1) target bundleno = 71 (0x47), region = 213 }
  0x4c   : >> { %s5749_s11 = sshll.u32 %s9458_s4, 2  ;;  %s8057_s24 = smov %s9458_s4  }
  0x4d   : >> { %s280_s28 = scalar_lea.vmem %s8304_s9, %s5749_s11   ;;  %s281_s29 = scalar_lea.vmem %s8307_s10, %s5749_s11 [#allocation2]  }
  0x50 PF: > { %p5751_p2 = scmp.ge.s32.totalorder %s8030_s18, 1  ;;  %p440_p3 = scmp.lt.s32.totalorder %s8030_s18, 7 }
  0x52   : > { %p441_p4 = pnand %p5751_p2, %p440_p3 }
  0x53   : > { %s447_s9 = sand.u32 (!%p441_p4), 1, %s8006_s12  }
  0x54   : > { %444 = sbr.rel (%p441_p4) target bundleno = 1338 (0x53a), region = 90  ;;  %s5752_s28 = sshll.u32 (!%p441_p4), %s447_s9, 11 }
  0x55   : > { %s8349_s4 = scalar_lea.vmem (!%p441_p4), [#allocation2], %s5752_s28  ;;  %s5753_s22 = sshll.u32 (!%p441_p4), %s447_s9, 9 }
  0x56   : > { %s8435_s26 = scalar_lea.vmem (!%p441_p4), [#allocation3], %s5753_s22  }
  0x59   : > { %v6028_v36 = vld [vmem:[%s9425_s1 + $0x20] sm:$0xf]  ;;  %v7461_v37 = vld [vmem:[%s9425_s1 + $0x20] sm:$0x30]  ;;  %vm1160_vm0 = vcmask 1044480   ;;  %vm1161_vm1 = vcmask 1045504  }
  0x5a   : > { %v6029_v38 = vor.u32 %v7461_v37, %v6028_v36  ;;  %v8096_v39 = vmov 65535   ;;  %v7460_v43 = vld [vmem:[%s9425_s1 + $0x18] sm:$0xff]  ;;  %v7459_v44 = vld [vmem:[%s9425_s1 + $0x10] sm:$0xff]  ;;  %v7458_v45 = vld [vmem:[%s9425_s1 + $0x8] sm:$0xff]  ;;  %vm967_vm2 = vcmask 613376   ;;  %vm5178_vm3 = vcmask 125952  }
  0x5b   : > { %v1162_v40 = vsel %vm1160_vm0, 4294967295, %v8096_v39  ;;  %v7457_v46 = vld [vmem:[%s9425_s1] sm:$0xff]  ;;  %v7463_v51 = vld [vmem:[%s8349_s4 + $0x8] sm:$0xff]  ;;  %v7464_v55 = vld [vmem:[%s8349_s4 + $0x10] sm:$0xff]  ;;  %s7439_s9 = sshll.u32 (%p8165_p6), %s8014_s14, 7  ;;  %s7721_s10 = smul.u32 (%p8165_p6), 379, %s8018_s15 }
  0x5c   : > { %v1163_v41 = vsel %vm1161_vm1, %v1162_v40, 0  ;;  %v7462_v47 = vld [vmem:[%s8349_s4] sm:$0xff]  ;;  %v7527_v52 = vld [vmem:[%s8349_s4 + $0x208] sm:$0xff]  ;;  %v7528_v56 = vld [vmem:[%s8349_s4 + $0x210] sm:$0xff]  ;;  %s5315_s29 = ssub.s32 (%p8165_p6), 379, %s7439_s9 }
  0x5d   : > { %v1165_v42 = vand.u32 %v6029_v38, %v1163_v41  ;;  %v7526_v48 = vld [vmem:[%s8349_s4 + $0x200] sm:$0xff]  ;;  %v7591_v53 = vld [vmem:[%s8349_s4 + $0x408] sm:$0xff]  ;;  %v7592_v57 = vld [vmem:[%s8349_s4 + $0x410] sm:$0xff]  ;;  %p5316_p5 = scmp.lt.s32.totalorder (%p8165_p6), %s5315_s29, 128  ;;  %s5321_s28 = sadd.s32 (%p8165_p6), %s7721_s10, %s7439_s9 }
  0x5e   : > { %v7590_v49 = vld [vmem:[%s8349_s4 + $0x400] sm:$0xff]  ;;  %v7655_v54 = vld [vmem:[%s8349_s4 + $0x608] sm:$0xff]  ;;  %v7656_v58 = vld [vmem:[%s8349_s4 + $0x610] sm:$0xff]  ;;  %s7442_s24 = sshll.u32 (%p8165_p6), %s5321_s28, 2 }
  0x5f   : > { %1170 = vmatpush.bf16.msra.mxu0 %v1165_v42  ;;  %2140 = vmatpush.bf16.msra.mxu1 %v1165_v42  ;;  %v7654_v50 = vld [vmem:[%s8349_s4 + $0x600] sm:$0xff]  ;;  %v7465_v59 = vld [vmem:[%s8349_s4 + $0x18] sm:$0xff]  ;;  %v7467_v3 = vld [vmem:[%s8349_s4 + $0x28] sm:$0xff]  ;;  %s9280_s11 = scalar_lea.vmem (%p8165_p6), %s9427_s3, %s7442_s24  }
  0x60   : > { %3238 = vmatpush.bf16.msra.mxu2 %v1165_v42  ;;  %4336 = vmatpush.bf16.msra.mxu3 %v1165_v42  ;;  %v7529_v60 = vld [vmem:[%s8349_s4 + $0x218] sm:$0xff]  ;;  %v7466_v63 = vld [vmem:[%s8349_s4 + $0x20] sm:$0xff]  ;;  %v7531_v4 = vld [vmem:[%s8349_s4 + $0x228] sm:$0xff] }
  0x61   : > { %v7593_v61 = vld [vmem:[%s8349_s4 + $0x418] sm:$0xff]  ;;  %v7530_v0 = vld [vmem:[%s8349_s4 + $0x220] sm:$0xff]  ;;  %v7595_v5 = vld [vmem:[%s8349_s4 + $0x428] sm:$0xff] }
  0x62   : > { %v7657_v62 = vld [vmem:[%s8349_s4 + $0x618] sm:$0xff]  ;;  %v7594_v1 = vld [vmem:[%s8349_s4 + $0x420] sm:$0xff]  ;;  %v7659_v6 = vld [vmem:[%s8349_s4 + $0x628] sm:$0xff] }
  0x63   : > { %1171 = vmatpush.bf16.msra.mxu0 %v7460_v43  ;;  %2141 = vmatpush.bf16.msra.mxu1 %v7460_v43  ;;  %v7658_v2 = vld [vmem:[%s8349_s4 + $0x620] sm:$0xff]  ;;  %v7468_v7 = vld [vmem:[%s8349_s4 + $0x30] sm:$0xff]  ;;  %v7469_v11 = vld [vmem:[%s8349_s4 + $0x38] sm:$0xff] }
  0x64   : > { %3239 = vmatpush.bf16.msra.mxu2 %v7460_v43  ;;  %4337 = vmatpush.bf16.msra.mxu3 %v7460_v43  ;;  %v7532_v8 = vld [vmem:[%s8349_s4 + $0x230] sm:$0xff]  ;;  %v7533_v12 = vld [vmem:[%s8349_s4 + $0x238] sm:$0xff]  ;;  %v7470_v15 = vld [vmem:[%s8349_s4 + $0x40] sm:$0xff] }
  0x65   : > { %v7596_v9 = vld [vmem:[%s8349_s4 + $0x430] sm:$0xff]  ;;  %v7597_v13 = vld [vmem:[%s8349_s4 + $0x438] sm:$0xff]  ;;  %v7534_v16 = vld [vmem:[%s8349_s4 + $0x240] sm:$0xff] }
  0x66   : > { %v7660_v10 = vld [vmem:[%s8349_s4 + $0x630] sm:$0xff]  ;;  %v7661_v14 = vld [vmem:[%s8349_s4 + $0x638] sm:$0xff]  ;;  %v7598_v19 = vld [vmem:[%s8349_s4 + $0x440] sm:$0xff] }
  0x67   : > { %1172 = vmatpush.bf16.msra.mxu0 %v7459_v44  ;;  %2142 = vmatpush.bf16.msra.mxu1 %v7459_v44  ;;  %v7662_v20 = vld [vmem:[%s8349_s4 + $0x640] sm:$0xff]  ;;  %v7471_v34 = vld [vmem:[%s8349_s4 + $0x48] sm:$0xff] }
  0x68   : > { %3240 = vmatpush.bf16.msra.mxu2 %v7459_v44  ;;  %4338 = vmatpush.bf16.msra.mxu3 %v7459_v44  ;;  %v8426_v25 = vld [vmem:[%s9426_s2] ss:$0 sm:$0xff]  ;;  %v7535_v35 = vld [vmem:[%s8349_s4 + $0x248] sm:$0xff] }
  0x69   : > { %v7599_v40 = vld [vmem:[%s8349_s4 + $0x448] sm:$0xff] }
  0x6a   : > { %v7663_v41 = vld [vmem:[%s8349_s4 + $0x648] sm:$0xff] }
  0x6b   : > { %1173 = vmatpush.bf16.msra.mxu0 %v7458_v45  ;;  %2143 = vmatpush.bf16.msra.mxu1 %v7458_v45 }
  0x6c   : > { %3241 = vmatpush.bf16.msra.mxu2 %v7458_v45  ;;  %4339 = vmatpush.bf16.msra.mxu3 %v7458_v45 }
  0x6f   : > { %1174 = vmatpush.bf16.msra.mxu0 %v7457_v46  ;;  %2144 = vmatpush.bf16.msra.mxu1 %v7457_v46 }
  0x70   : > { %3242 = vmatpush.bf16.msra.mxu2 %v7457_v46  ;;  %4340 = vmatpush.bf16.msra.mxu3 %v7457_v46 }
  0x72   : > { %6030 = vmatmul.msk.bf16.vlgmr.msra.gmra.mxu0 %vm967_vm2, %v7462_v47  ;;  %6478 = vmatmul.msk.bf16.vlgmr.msra.gmra.mxu1 %vm967_vm2, %v7526_v48 }
  0x73   : > { %6926 = vmatmul.msk.bf16.vlgmr.msra.gmra.mxu2 %vm967_vm2, %v7590_v49  ;;  %7374 = vmatmul.msk.bf16.vlgmr.msra.gmra.mxu3 %vm967_vm2, %v7654_v50 }
  0x82   : > { %6031 = vmatmul.msk.bf16.gmra.mxu0 %vm967_vm2, %v7463_v51  ;;  %6479 = vmatmul.msk.bf16.gmra.mxu1 %vm967_vm2, %v7527_v52 }
  0x83   : > { %6927 = vmatmul.msk.bf16.gmra.mxu2 %vm967_vm2, %v7591_v53  ;;  %7375 = vmatmul.msk.bf16.gmra.mxu3 %vm967_vm2, %v7655_v54 }
  0x92   : > { %6032 = vmatmul.msk.bf16.gmra.mxu0 %vm967_vm2, %v7464_v55  ;;  %6480 = vmatmul.msk.bf16.gmra.mxu1 %vm967_vm2, %v7528_v56 }
  0x93   : > { %6928 = vmatmul.msk.bf16.gmra.mxu2 %vm967_vm2, %v7592_v57  ;;  %7376 = vmatmul.msk.bf16.gmra.mxu3 %vm967_vm2, %v7656_v58  ;;  %v7472_v58 = vld [vmem:[%s8349_s4 + $0x50] sm:$0xff] }
  0xa2   : > { %6033 = vmatmul.msk.bf16.gmra.mxu0 %vm967_vm2, %v7465_v59  ;;  %6481 = vmatmul.msk.bf16.gmra.mxu1 %vm967_vm2, %v7529_v60  ;;  %v7536_v59 = vld [vmem:[%s8349_s4 + $0x250] sm:$0xff] }
  0xa3   : > { %6929 = vmatmul.msk.bf16.gmra.mxu2 %vm967_vm2, %v7593_v61  ;;  %7377 = vmatmul.msk.bf16.gmra.mxu3 %vm967_vm2, %v7657_v62 }
  0xb2   : > { %6034 = vmatmul.msk.bf16.gmra.mxu0 %vm967_vm2, %v7466_v63  ;;  %6482 = vmatmul.msk.bf16.gmra.mxu1 %vm967_vm2, %v7530_v0  ;;  %v7600_v0 = vld [vmem:[%s8349_s4 + $0x450] sm:$0xff] }
  0xb3   : > { %6930 = vmatmul.msk.bf16.gmra.mxu2 %vm967_vm2, %v7594_v1  ;;  %7378 = vmatmul.msk.bf16.gmra.mxu3 %vm967_vm2, %v7658_v2  ;;  %v7664_v1 = vld [vmem:[%s8349_s4 + $0x650] sm:$0xff] }
  0xc2   : > { %6035 = vmatmul.msk.bf16.gmra.mxu0 %vm967_vm2, %v7467_v3  ;;  %6483 = vmatmul.msk.bf16.gmra.mxu1 %vm967_vm2, %v7531_v4 }
  0xc3   : > { %6931 = vmatmul.msk.bf16.gmra.mxu2 %vm967_vm2, %v7595_v5  ;;  %7379 = vmatmul.msk.bf16.gmra.mxu3 %vm967_vm2, %v7659_v6 }
  0xd2   : > { %6036 = vmatmul.msk.bf16.gmra.mxu0 %vm967_vm2, %v7468_v7  ;;  %6484 = vmatmul.msk.bf16.gmra.mxu1 %vm967_vm2, %v7532_v8 }
  0xd3   : > { %6932 = vmatmul.msk.bf16.gmra.mxu2 %vm967_vm2, %v7596_v9  ;;  %7380 = vmatmul.msk.bf16.gmra.mxu3 %vm967_vm2, %v7660_v10 }
  0xe2   : > { %6037 = vmatmul.msk.bf16.gmra.mxu0 %vm967_vm2, %v7469_v11  ;;  %6485 = vmatmul.msk.bf16.gmra.mxu1 %vm967_vm2, %v7533_v12 }
  0xe3   : > { %6933 = vmatmul.msk.bf16.gmra.mxu2 %vm967_vm2, %v7597_v13  ;;  %7381 = vmatmul.msk.bf16.gmra.mxu3 %vm967_vm2, %v7661_v14 }
  0xef   : > { %v1176_v17 = vpop.f32.mrf.mxu0  ;;  %v2146_v18 = vpop.f32.mrf.mxu1 }
  0xf0   : > { %v2466_v21 = vmax.f32 %v1176_v17, %v2146_v18  ;;  %v7473_v18 = vld [vmem:[%s8349_s4 + $0x58] sm:$0xff] }
  0xf2   : > { %6038 = vmatmul.msk.bf16.gmra.mxu0 %vm967_vm2, %v7470_v15  ;;  %6486 = vmatmul.msk.bf16.gmra.mxu1 %vm967_vm2, %v7534_v16 }
  0xf3   : > { %6934 = vmatmul.msk.bf16.gmra.mxu2 %vm967_vm2, %v7598_v19  ;;  %7382 = vmatmul.msk.bf16.gmra.mxu3 %vm967_vm2, %v7662_v20  ;;  %v7537_v19 = vld [vmem:[%s8349_s4 + $0x258] sm:$0xff] }
  0xf6   : > { %v3244_v22 = vpop.f32.mrf.mxu2  ;;  %v4342_v23 = vpop.f32.mrf.mxu3 }
  0xf7   : > { %v3564_v24 = vmax.f32 %v2466_v21, %v3244_v22  ;;  %v1178_v26 = vpop.f32.mrf.mxu0  ;;  %v2148_v27 = vpop.f32.mrf.mxu1 }
  0xf8   : > { %v2467_v31 = vmax.f32 %v1178_v26, %v2148_v27  ;;  %v7665_v26 = vld [vmem:[%s8349_s4 + $0x658] sm:$0xff] }
  0xf9   : > { %v4662_v28 = vmax.f32 %v3564_v24, %v4342_v23  ;;  %v7601_v24 = vld [vmem:[%s8349_s4 + $0x458] sm:$0xff] }
  0xfb   : > { %v4794_v29 = vadd.f32 %v8426_v25, %v4662_v28 }
  0xfd   : > { %v4922_v30 = vmax.f32 %v4794_v29, 0.0 }
  0xfe   : > { %v3246_v32 = vpop.f32.mrf.mxu2  ;;  %v4344_v33 = vpop.f32.mrf.mxu3 }
  0xff   : > { %v5050_v36 = vpack.c.bf16 %v4922_v30, %v4922_v30  ;;  %v3565_v37 = vmax.f32 %v2467_v31, %v3246_v32  ;;  %v1181_v38 = vpop.f32.mrf.mxu0  ;;  %v2151_v39 = vpop.f32.mrf.mxu1 }
 0x100   : > { %v2468_v44 = vmax.f32 %v1181_v38, %v2151_v39 }
 0x101   : > { %5179 = vst.msk [vmem:[%s8435_s26] sm:$0xf] %vm5178_vm3, %v5050_v36  ;;  %v4663_v42 = vmax.f32 %v3565_v37, %v4344_v33 }
 0x102   : > { %6039 = vmatmul.msk.bf16.gmra.mxu0 %vm967_vm2, %v7471_v34  ;;  %6487 = vmatmul.msk.bf16.gmra.mxu1 %vm967_vm2, %v7535_v35 }
 0x103   : > { %v4795_v43 = vadd.f32 %v8426_v25, %v4663_v42  ;;  %6935 = vmatmul.msk.bf16.gmra.mxu2 %vm967_vm2, %v7599_v40  ;;  %7383 = vmatmul.msk.bf16.gmra.mxu3 %vm967_vm2, %v7663_v41 }
 0x105   : > { %v4923_v45 = vmax.f32 %v4795_v43, 0.0  ;;  %v7474_v43 = vld [vmem:[%s8349_s4 + $0x60] sm:$0xff] }
 0x106   : > { %v3249_v46 = vpop.f32.mrf.mxu2  ;;  %v4347_v47 = vpop.f32.mrf.mxu3 }
 0x107   : > { %v5051_v48 = vpack.c.bf16 %v4923_v45, %v4923_v45  ;;  %v3566_v49 = vmax.f32 %v2468_v44, %v3249_v46  ;;  %v1183_v50 = vpop.f32.mrf.mxu0  ;;  %v2153_v51 = vpop.f32.mrf.mxu1  ;;  %v7538_v44 = vld [vmem:[%s8349_s4 + $0x260] sm:$0xff] }
 0x108   : > { %v2469_v55 = vmax.f32 %v1183_v50, %v2153_v51  ;;  %v7666_v50 = vld [vmem:[%s8349_s4 + $0x660] sm:$0xff] }
 0x109   : > { %5180 = vst.msk [vmem:[%s8435_s26 + $0x4] sm:$0xf] %vm5178_vm3, %v5051_v48  ;;  %v4664_v52 = vmax.f32 %v3566_v49, %v4347_v47  ;;  %v7602_v49 = vld [vmem:[%s8349_s4 + $0x460] sm:$0xff] }
 0x10b   : > { %v4796_v53 = vadd.f32 %v8426_v25, %v4664_v52 }
 0x10d   : > { %v4924_v54 = vmax.f32 %v4796_v53, 0.0 }
 0x10e   : > { %v3251_v56 = vpop.f32.mrf.mxu2  ;;  %v4349_v57 = vpop.f32.mrf.mxu3 }
 0x10f   : > { %v5052_v60 = vpack.c.bf16 %v4924_v54, %v4924_v54  ;;  %v3567_v61 = vmax.f32 %v2469_v55, %v3251_v56  ;;  %v1186_v62 = vpop.f32.mrf.mxu0  ;;  %v2156_v63 = vpop.f32.mrf.mxu1 }
 0x110   : > { %v2470_v4 = vmax.f32 %v1186_v62, %v2156_v63 }
 0x111   : > { %5181 = vst.msk [vmem:[%s8435_s26 + $0x8] sm:$0xf] %vm5178_vm3, %v5052_v60  ;;  %v4665_v2 = vmax.f32 %v3567_v61, %v4349_v57 }
 0x112   : > { %6040 = vmatmul.msk.bf16.gmra.mxu0 %vm967_vm2, %v7472_v58  ;;  %6488 = vmatmul.msk.bf16.gmra.mxu1 %vm967_vm2, %v7536_v59 }
 0x113   : > { %v4797_v3 = vadd.f32 %v8426_v25, %v4665_v2  ;;  %6936 = vmatmul.msk.bf16.gmra.mxu2 %vm967_vm2, %v7600_v0  ;;  %7384 = vmatmul.msk.bf16.gmra.mxu3 %vm967_vm2, %v7664_v1 }
 0x115   : > { %v4925_v5 = vmax.f32 %v4797_v3, 0.0  ;;  %v7475_v3 = vld [vmem:[%s8349_s4 + $0x68] sm:$0xff] }
 0x116   : > { %v3254_v6 = vpop.f32.mrf.mxu2  ;;  %v4352_v7 = vpop.f32.mrf.mxu3 }
 0x117   : > { %v5053_v8 = vpack.c.bf16 %v4925_v5, %v4925_v5  ;;  %v3568_v9 = vmax.f32 %v2470_v4, %v3254_v6  ;;  %v1188_v10 = vpop.f32.mrf.mxu0  ;;  %v2158_v11 = vpop.f32.mrf.mxu1  ;;  %v7539_v4 = vld [vmem:[%s8349_s4 + $0x268] sm:$0xff] }
 0x118   : > { %v2471_v15 = vmax.f32 %v1188_v10, %v2158_v11  ;;  %v7667_v10 = vld [vmem:[%s8349_s4 + $0x668] sm:$0xff] }
 0x119   : > { %5182 = vst.msk [vmem:[%s8435_s26 + $0xc] sm:$0xf] %vm5178_vm3, %v5053_v8  ;;  %v4666_v12 = vmax.f32 %v3568_v9, %v4352_v7  ;;  %v7603_v9 = vld [vmem:[%s8349_s4 + $0x468] sm:$0xff] }
 0x11b   : > { %v4798_v13 = vadd.f32 %v8426_v25, %v4666_v12 }
 0x11d   : > { %v4926_v14 = vmax.f32 %v4798_v13, 0.0 }
 0x11e   : > { %v3256_v16 = vpop.f32.mrf.mxu2  ;;  %v4354_v17 = vpop.f32.mrf.mxu3 }
 0x11f   : > { %v5054_v20 = vpack.c.bf16 %v4926_v14, %v4926_v14  ;;  %v3569_v21 = vmax.f32 %v2471_v15, %v3256_v16  ;;  %v1191_v22 = vpop.f32.mrf.mxu0  ;;  %v2161_v23 = vpop.f32.mrf.mxu1 }
 0x120   : > { %v2472_v29 = vmax.f32 %v1191_v22, %v2161_v23 }
 0x121   : > { %5183 = vst.msk [vmem:[%s8435_s26 + $0x10] sm:$0xf] %vm5178_vm3, %v5054_v20  ;;  %v4667_v27 = vmax.f32 %v3569_v21, %v4354_v17 }
 0x122   : > { %6041 = vmatmul.msk.bf16.gmra.mxu0 %vm967_vm2, %v7473_v18  ;;  %6489 = vmatmul.msk.bf16.gmra.mxu1 %vm967_vm2, %v7537_v19 }
 0x123   : > { %v4799_v28 = vadd.f32 %v8426_v25, %v4667_v27  ;;  %6937 = vmatmul.msk.bf16.gmra.mxu2 %vm967_vm2, %v7601_v24  ;;  %7385 = vmatmul.msk.bf16.gmra.mxu3 %vm967_vm2, %v7665_v26 }
 0x125   : > { %v4927_v30 = vmax.f32 %v4799_v28, 0.0  ;;  %v7476_v28 = vld [vmem:[%s8349_s4 + $0x70] sm:$0xff] }
 0x126   : > { %v3259_v31 = vpop.f32.mrf.mxu2  ;;  %v4357_v32 = vpop.f32.mrf.mxu3 }
 0x127   : > { %v5055_v33 = vpack.c.bf16 %v4927_v30, %v4927_v30  ;;  %v3570_v34 = vmax.f32 %v2472_v29, %v3259_v31  ;;  %v1193_v35 = vpop.f32.mrf.mxu0  ;;  %v2163_v36 = vpop.f32.mrf.mxu1  ;;  %v7540_v29 = vld [vmem:[%s8349_s4 + $0x270] sm:$0xff] }
 0x128   : > { %v2473_v40 = vmax.f32 %v1193_v35, %v2163_v36  ;;  %v7668_v35 = vld [vmem:[%s8349_s4 + $0x670] sm:$0xff] }
 0x129   : > { %5184 = vst.msk [vmem:[%s8435_s26 + $0x14] sm:$0xf] %vm5178_vm3, %v5055_v33  ;;  %v4668_v37 = vmax.f32 %v3570_v34, %v4357_v32  ;;  %v7604_v34 = vld [vmem:[%s8349_s4 + $0x470] sm:$0xff] }
 0x12b   : > { %v4800_v38 = vadd.f32 %v8426_v25, %v4668_v37 }
 0x12d   : > { %v4928_v39 = vmax.f32 %v4800_v38, 0.0 }
 0x12e   : > { %v3261_v41 = vpop.f32.mrf.mxu2  ;;  %v4359_v42 = vpop.f32.mrf.mxu3 }
 0x12f   : > { %v5056_v45 = vpack.c.bf16 %v4928_v39, %v4928_v39  ;;  %v3571_v46 = vmax.f32 %v2473_v40, %v3261_v41  ;;  %v1196_v47 = vpop.f32.mrf.mxu0  ;;  %v2166_v48 = vpop.f32.mrf.mxu1 }
 0x130   : > { %v2474_v53 = vmax.f32 %v1196_v47, %v2166_v48 }
 0x131   : > { %5185 = vst.msk [vmem:[%s8435_s26 + $0x18] sm:$0xf] %vm5178_vm3, %v5056_v45  ;;  %v4669_v51 = vmax.f32 %v3571_v46, %v4359_v42 }
 0x132   : > { %6042 = vmatmul.msk.bf16.gmra.mxu0 %vm967_vm2, %v7474_v43  ;;  %6490 = vmatmul.msk.bf16.gmra.mxu1 %vm967_vm2, %v7538_v44 }
 0x133   : > { %v4801_v52 = vadd.f32 %v8426_v25, %v4669_v51  ;;  %6938 = vmatmul.msk.bf16.gmra.mxu2 %vm967_vm2, %v7602_v49  ;;  %7386 = vmatmul.msk.bf16.gmra.mxu3 %vm967_vm2, %v7666_v50 }
 0x135   : > { %v4929_v54 = vmax.f32 %v4801_v52, 0.0  ;;  %v7477_v52 = vld [vmem:[%s8349_s4 + $0x78] sm:$0xff] }
 0x136   : > { %v3264_v55 = vpop.f32.mrf.mxu2  ;;  %v4362_v56 = vpop.f32.mrf.mxu3 }
 0x137   : > { %v5057_v57 = vpack.c.bf16 %v4929_v54, %v4929_v54  ;;  %v3572_v58 = vmax.f32 %v2474_v53, %v3264_v55  ;;  %v1198_v59 = vpop.f32.mrf.mxu0  ;;  %v2168_v60 = vpop.f32.mrf.mxu1  ;;  %v7541_v53 = vld [vmem:[%s8349_s4 + $0x278] sm:$0xff] }
 0x138   : > { %v2475_v0 = vmax.f32 %v1198_v59, %v2168_v60  ;;  %v7669_v59 = vld [vmem:[%s8349_s4 + $0x678] sm:$0xff] }
 0x139   : > { %5186 = vst.msk [vmem:[%s8435_s26 + $0x1c] sm:$0xf] %vm5178_vm3, %v5057_v57  ;;  %v4670_v61 = vmax.f32 %v3572_v58, %v4362_v56  ;;  %v7605_v58 = vld [vmem:[%s8349_s4 + $0x478] sm:$0xff] }
 0x13b   : > { %v4802_v62 = vadd.f32 %v8426_v25, %v4670_v61 }
 0x13d   : > { %v4930_v63 = vmax.f32 %v4802_v62, 0.0 }
 0x13e   : > { %v3266_v1 = vpop.f32.mrf.mxu2  ;;  %v4364_v2 = vpop.f32.mrf.mxu3 }
 0x13f   : > { %v5058_v5 = vpack.c.bf16 %v4930_v63, %v4930_v63  ;;  %v3573_v6 = vmax.f32 %v2475_v0, %v3266_v1  ;;  %v1201_v7 = vpop.f32.mrf.mxu0  ;;  %v2171_v8 = vpop.f32.mrf.mxu1 }
 0x140   : > { %v2476_v13 = vmax.f32 %v1201_v7, %v2171_v8 }
 0x141   : > { %5187 = vst.msk [vmem:[%s8435_s26 + $0x20] sm:$0xf] %vm5178_vm3, %v5058_v5  ;;  %v4671_v11 = vmax.f32 %v3573_v6, %v4364_v2 }
 0x142   : > { %6043 = vmatmul.msk.bf16.gmra.mxu0 %vm967_vm2, %v7475_v3  ;;  %6491 = vmatmul.msk.bf16.gmra.mxu1 %vm967_vm2, %v7539_v4 }
 0x143   : > { %v4803_v12 = vadd.f32 %v8426_v25, %v4671_v11  ;;  %6939 = vmatmul.msk.bf16.gmra.mxu2 %vm967_vm2, %v7603_v9  ;;  %7387 = vmatmul.msk.bf16.gmra.mxu3 %vm967_vm2, %v7667_v10 }
 0x145   : > { %v4931_v14 = vmax.f32 %v4803_v12, 0.0  ;;  %v7478_v12 = vld [vmem:[%s8349_s4 + $0x80] sm:$0xff] }
 0x146   : > { %v3269_v15 = vpop.f32.mrf.mxu2  ;;  %v4367_v16 = vpop.f32.mrf.mxu3 }
 0x147   : > { %v5059_v17 = vpack.c.bf16 %v4931_v14, %v4931_v14  ;;  %v3574_v18 = vmax.f32 %v2476_v13, %v3269_v15  ;;  %v1203_v19 = vpop.f32.mrf.mxu0  ;;  %v2173_v20 = vpop.f32.mrf.mxu1  ;;  %v7542_v13 = vld [vmem:[%s8349_s4 + $0x280] sm:$0xff] }
 0x148   : > { %v2477_v24 = vmax.f32 %v1203_v19, %v2173_v20  ;;  %v7670_v19 = vld [vmem:[%s8349_s4 + $0x680] sm:$0xff] }
 0x149   : > { %5188 = vst.msk [vmem:[%s8435_s26 + $0x24] sm:$0xf] %vm5178_vm3, %v5059_v17  ;;  %v4672_v21 = vmax.f32 %v3574_v18, %v4367_v16  ;;  %v7606_v18 = vld [vmem:[%s8349_s4 + $0x480] sm:$0xff] }
 0x14b   : > { %v4804_v22 = vadd.f32 %v8426_v25, %v4672_v21 }
 0x14d   : > { %v4932_v23 = vmax.f32 %v4804_v22, 0.0 }
 0x14e   : > { %v3271_v26 = vpop.f32.mrf.mxu2  ;;  %v4369_v27 = vpop.f32.mrf.mxu3 }
 0x14f   : > { %v5060_v30 = vpack.c.bf16 %v4932_v23, %v4932_v23  ;;  %v3575_v31 = vmax.f32 %v2477_v24, %v3271_v26  ;;  %v1206_v32 = vpop.f32.mrf.mxu0  ;;  %v2176_v33 = vpop.f32.mrf.mxu1 }
 0x150   : > { %v2478_v38 = vmax.f32 %v1206_v32, %v2176_v33 }
 0x151   : > { %5189 = vst.msk [vmem:[%s8435_s26 + $0x28] sm:$0xf] %vm5178_vm3, %v5060_v30  ;;  %v4673_v36 = vmax.f32 %v3575_v31, %v4369_v27 }
 0x152   : > { %6044 = vmatmul.msk.bf16.gmra.mxu0 %vm967_vm2, %v7476_v28  ;;  %6492 = vmatmul.msk.bf16.gmra.mxu1 %vm967_vm2, %v7540_v29 }
 0x153   : > { %v4805_v37 = vadd.f32 %v8426_v25, %v4673_v36  ;;  %6940 = vmatmul.msk.bf16.gmra.mxu2 %vm967_vm2, %v7604_v34  ;;  %7388 = vmatmul.msk.bf16.gmra.mxu3 %vm967_vm2, %v7668_v35 }
 0x155   : > { %v4933_v39 = vmax.f32 %v4805_v37, 0.0  ;;  %v7479_v37 = vld [vmem:[%s8349_s4 + $0x88] sm:$0xff] }
 0x156   : > { %v3274_v40 = vpop.f32.mrf.mxu2  ;;  %v4372_v41 = vpop.f32.mrf.mxu3 }
 0x157   : > { %v5061_v42 = vpack.c.bf16 %v4933_v39, %v4933_v39  ;;  %v3576_v43 = vmax.f32 %v2478_v38, %v3274_v40  ;;  %v1208_v44 = vpop.f32.mrf.mxu0  ;;  %v2178_v45 = vpop.f32.mrf.mxu1  ;;  %v7543_v38 = vld [vmem:[%s8349_s4 + $0x288] sm:$0xff] }
 0x158   : > { %v2479_v49 = vmax.f32 %v1208_v44, %v2178_v45  ;;  %v7671_v44 = vld [vmem:[%s8349_s4 + $0x688] sm:$0xff] }
 0x159   : > { %5190 = vst.msk [vmem:[%s8435_s26 + $0x2c] sm:$0xf] %vm5178_vm3, %v5061_v42  ;;  %v4674_v46 = vmax.f32 %v3576_v43, %v4372_v41  ;;  %v7607_v43 = vld [vmem:[%s8349_s4 + $0x488] sm:$0xff] }
 0x15b   : > { %v4806_v47 = vadd.f32 %v8426_v25, %v4674_v46 }
 0x15d   : > { %v4934_v48 = vmax.f32 %v4806_v47, 0.0 }
 0x15e   : > { %v3276_v50 = vpop.f32.mrf.mxu2  ;;  %v4374_v51 = vpop.f32.mrf.mxu3 }
 0x15f   : > { %v5062_v54 = vpack.c.bf16 %v4934_v48, %v4934_v48  ;;  %v3577_v55 = vmax.f32 %v2479_v49, %v3276_v50  ;;  %v1211_v56 = vpop.f32.mrf.mxu0  ;;  %v2181_v57 = vpop.f32.mrf.mxu1 }
 0x160   : > { %v2480_v62 = vmax.f32 %v1211_v56, %v2181_v57 }
 0x161   : > { %5191 = vst.msk [vmem:[%s8435_s26 + $0x30] sm:$0xf] %vm5178_vm3, %v5062_v54  ;;  %v4675_v60 = vmax.f32 %v3577_v55, %v4374_v51 }
 0x162   : > { %6045 = vmatmul.msk.bf16.gmra.mxu0 %vm967_vm2, %v7477_v52  ;;  %6493 = vmatmul.msk.bf16.gmra.mxu1 %vm967_vm2, %v7541_v53 }
 0x163   : > { %v4807_v61 = vadd.f32 %v8426_v25, %v4675_v60  ;;  %6941 = vmatmul.msk.bf16.gmra.mxu2 %vm967_vm2, %v7605_v58  ;;  %7389 = vmatmul.msk.bf16.gmra.mxu3 %vm967_vm2, %v7669_v59 }
 0x165   : > { %v4935_v63 = vmax.f32 %v4807_v61, 0.0  ;;  %v7480_v61 = vld [vmem:[%s8349_s4 + $0x90] sm:$0xff] }
 0x166   : > { %v3279_v0 = vpop.f32.mrf.mxu2  ;;  %v4377_v1 = vpop.f32.mrf.mxu3 }
 0x167   : > { %v5063_v2 = vpack.c.bf16 %v4935_v63, %v4935_v63  ;;  %v3578_v3 = vmax.f32 %v2480_v62, %v3279_v0  ;;  %v1213_v4 = vpop.f32.mrf.mxu0  ;;  %v2183_v5 = vpop.f32.mrf.mxu1  ;;  %v7544_v62 = vld [vmem:[%s8349_s4 + $0x290] sm:$0xff] }
 0x168   : > { %v2481_v9 = vmax.f32 %v1213_v4, %v2183_v5  ;;  %v7672_v4 = vld [vmem:[%s8349_s4 + $0x690] sm:$0xff] }
 0x169   : > { %5192 = vst.msk [vmem:[%s8435_s26 + $0x34] sm:$0xf] %vm5178_vm3, %v5063_v2  ;;  %v4676_v6 = vmax.f32 %v3578_v3, %v4377_v1  ;;  %v7608_v3 = vld [vmem:[%s8349_s4 + $0x490] sm:$0xff] }
 0x16b   : > { %v4808_v7 = vadd.f32 %v8426_v25, %v4676_v6 }
 0x16d   : > { %v4936_v8 = vmax.f32 %v4808_v7, 0.0 }
 0x16e   : > { %v3281_v10 = vpop.f32.mrf.mxu2  ;;  %v4379_v11 = vpop.f32.mrf.mxu3 }
 0x16f   : > { %v5064_v14 = vpack.c.bf16 %v4936_v8, %v4936_v8  ;;  %v3579_v15 = vmax.f32 %v2481_v9, %v3281_v10  ;;  %v1216_v16 = vpop.f32.mrf.mxu0  ;;  %v2186_v17 = vpop.f32.mrf.mxu1 }
 0x170   : > { %v2482_v22 = vmax.f32 %v1216_v16, %v2186_v17 }
 0x171   : > { %5193 = vst.msk [vmem:[%s8435_s26 + $0x38] sm:$0xf] %vm5178_vm3, %v5064_v14  ;;  %v4677_v20 = vmax.f32 %v3579_v15, %v4379_v11 }
 0x172   : > { %6046 = vmatmul.msk.bf16.gmra.mxu0 %vm967_vm2, %v7478_v12  ;;  %6494 = vmatmul.msk.bf16.gmra.mxu1 %vm967_vm2, %v7542_v13 }
 0x173   : > { %v4809_v21 = vadd.f32 %v8426_v25, %v4677_v20  ;;  %6942 = vmatmul.msk.bf16.gmra.mxu2 %vm967_vm2, %v7606_v18  ;;  %7390 = vmatmul.msk.bf16.gmra.mxu3 %vm967_vm2, %v7670_v19 }
 0x175   : > { %v4937_v23 = vmax.f32 %v4809_v21, 0.0  ;;  %v7481_v21 = vld [vmem:[%s8349_s4 + $0x98] sm:$0xff] }
 0x176   : > { %v3284_v24 = vpop.f32.mrf.mxu2  ;;  %v4382_v26 = vpop.f32.mrf.mxu3 }
 0x177   : > { %v5065_v27 = vpack.c.bf16 %v4937_v23, %v4937_v23  ;;  %v3580_v28 = vmax.f32 %v2482_v22, %v3284_v24  ;;  %v1218_v29 = vpop.f32.mrf.mxu0  ;;  %v2188_v30 = vpop.f32.mrf.mxu1  ;;  %v7545_v22 = vld [vmem:[%s8349_s4 + $0x298] sm:$0xff] }
 0x178   : > { %v2483_v34 = vmax.f32 %v1218_v29, %v2188_v30  ;;  %v7673_v29 = vld [vmem:[%s8349_s4 + $0x698] sm:$0xff] }
 0x179   : > { %5194 = vst.msk [vmem:[%s8435_s26 + $0x3c] sm:$0xf] %vm5178_vm3, %v5065_v27  ;;  %v4678_v31 = vmax.f32 %v3580_v28, %v4382_v26  ;;  %v7609_v28 = vld [vmem:[%s8349_s4 + $0x498] sm:$0xff] }
 0x17b   : > { %v4810_v32 = vadd.f32 %v8426_v25, %v4678_v31 }
 0x17d   : > { %v4938_v33 = vmax.f32 %v4810_v32, 0.0 }
 0x17e   : > { %v3286_v35 = vpop.f32.mrf.mxu2  ;;  %v4384_v36 = vpop.f32.mrf.mxu3 }
 0x17f   : > { %v5066_v39 = vpack.c.bf16 %v4938_v33, %v4938_v33  ;;  %v3581_v40 = vmax.f32 %v2483_v34, %v3286_v35  ;;  %v1221_v41 = vpop.f32.mrf.mxu0  ;;  %v2191_v42 = vpop.f32.mrf.mxu1 }
 0x180   : > { %v2484_v47 = vmax.f32 %v1221_v41, %v2191_v42 }
 0x181   : > { %5195 = vst.msk [vmem:[%s8435_s26 + $0x40] sm:$0xf] %vm5178_vm3, %v5066_v39  ;;  %v4679_v45 = vmax.f32 %v3581_v40, %v4384_v36 }
 0x182   : > { %6047 = vmatmul.msk.bf16.gmra.mxu0 %vm967_vm2, %v7479_v37  ;;  %6495 = vmatmul.msk.bf16.gmra.mxu1 %vm967_vm2, %v7543_v38 }
 0x183   : > { %v4811_v46 = vadd.f32 %v8426_v25, %v4679_v45  ;;  %6943 = vmatmul.msk.bf16.gmra.mxu2 %vm967_vm2, %v7607_v43  ;;  %7391 = vmatmul.msk.bf16.gmra.mxu3 %vm967_vm2, %v7671_v44 }
 0x185   : > { %v4939_v48 = vmax.f32 %v4811_v46, 0.0  ;;  %v7482_v46 = vld [vmem:[%s8349_s4 + $0xa0] sm:$0xff] }
 0x186   : > { %v3289_v49 = vpop.f32.mrf.mxu2  ;;  %v4387_v50 = vpop.f32.mrf.mxu3 }
 0x187   : > { %v5067_v51 = vpack.c.bf16 %v4939_v48, %v4939_v48  ;;  %v3582_v52 = vmax.f32 %v2484_v47, %v3289_v49  ;;  %v1223_v53 = vpop.f32.mrf.mxu0  ;;  %v2193_v54 = vpop.f32.mrf.mxu1  ;;  %v7546_v47 = vld [vmem:[%s8349_s4 + $0x2a0] sm:$0xff] }
 0x188   : > { %v2485_v58 = vmax.f32 %v1223_v53, %v2193_v54  ;;  %v7674_v53 = vld [vmem:[%s8349_s4 + $0x6a0] sm:$0xff] }
 0x189   : > { %5196 = vst.msk [vmem:[%s8435_s26 + $0x44] sm:$0xf] %vm5178_vm3, %v5067_v51  ;;  %v4680_v55 = vmax.f32 %v3582_v52, %v4387_v50  ;;  %v7610_v52 = vld [vmem:[%s8349_s4 + $0x4a0] sm:$0xff] }
 0x18b   : > { %v4812_v56 = vadd.f32 %v8426_v25, %v4680_v55 }
 0x18d   : > { %v4940_v57 = vmax.f32 %v4812_v56, 0.0 }
 0x18e   : > { %v3291_v59 = vpop.f32.mrf.mxu2  ;;  %v4389_v60 = vpop.f32.mrf.mxu3 }
 0x18f   : > { %v5068_v63 = vpack.c.bf16 %v4940_v57, %v4940_v57  ;;  %v3583_v0 = vmax.f32 %v2485_v58, %v3291_v59  ;;  %v1226_v1 = vpop.f32.mrf.mxu0  ;;  %v2196_v2 = vpop.f32.mrf.mxu1 }
 0x190   : > { %v2486_v7 = vmax.f32 %v1226_v1, %v2196_v2 }
 0x191   : > { %5197 = vst.msk [vmem:[%s8435_s26 + $0x48] sm:$0xf] %vm5178_vm3, %v5068_v63  ;;  %v4681_v5 = vmax.f32 %v3583_v0, %v4389_v60 }
 0x192   : > { %6048 = vmatmul.msk.bf16.gmra.mxu0 %vm967_vm2, %v7480_v61  ;;  %6496 = vmatmul.msk.bf16.gmra.mxu1 %vm967_vm2, %v7544_v62 }
 0x193   : > { %v4813_v6 = vadd.f32 %v8426_v25, %v4681_v5  ;;  %6944 = vmatmul.msk.bf16.gmra.mxu2 %vm967_vm2, %v7608_v3  ;;  %7392 = vmatmul.msk.bf16.gmra.mxu3 %vm967_vm2, %v7672_v4 }
 0x195   : > { %v4941_v8 = vmax.f32 %v4813_v6, 0.0  ;;  %v7483_v6 = vld [vmem:[%s8349_s4 + $0xa8] sm:$0xff] }
 0x196   : > { %v3294_v9 = vpop.f32.mrf.mxu2  ;;  %v4392_v10 = vpop.f32.mrf.mxu3 }
 0x197   : > { %v5069_v11 = vpack.c.bf16 %v4941_v8, %v4941_v8  ;;  %v3584_v12 = vmax.f32 %v2486_v7, %v3294_v9  ;;  %v1228_v13 = vpop.f32.mrf.mxu0  ;;  %v2198_v14 = vpop.f32.mrf.mxu1  ;;  %v7547_v7 = vld [vmem:[%s8349_s4 + $0x2a8] sm:$0xff] }
 0x198   : > { %v2487_v18 = vmax.f32 %v1228_v13, %v2198_v14  ;;  %v7675_v13 = vld [vmem:[%s8349_s4 + $0x6a8] sm:$0xff] }
 0x199   : > { %5198 = vst.msk [vmem:[%s8435_s26 + $0x4c] sm:$0xf] %vm5178_vm3, %v5069_v11  ;;  %v4682_v15 = vmax.f32 %v3584_v12, %v4392_v10  ;;  %v7611_v12 = vld [vmem:[%s8349_s4 + $0x4a8] sm:$0xff] }
 0x19b   : > { %v4814_v16 = vadd.f32 %v8426_v25, %v4682_v15 }
 0x19d   : > { %v4942_v17 = vmax.f32 %v4814_v16, 0.0 }
 0x19e   : > { %v3296_v19 = vpop.f32.mrf.mxu2  ;;  %v4394_v20 = vpop.f32.mrf.mxu3 }
 0x19f   : > { %v5070_v23 = vpack.c.bf16 %v4942_v17, %v4942_v17  ;;  %v3585_v24 = vmax.f32 %v2487_v18, %v3296_v19  ;;  %v1231_v26 = vpop.f32.mrf.mxu0  ;;  %v2201_v27 = vpop.f32.mrf.mxu1 }
 0x1a0   : > { %v2488_v32 = vmax.f32 %v1231_v26, %v2201_v27 }
 0x1a1   : > { %5199 = vst.msk [vmem:[%s8435_s26 + $0x50] sm:$0xf] %vm5178_vm3, %v5070_v23  ;;  %v4683_v30 = vmax.f32 %v3585_v24, %v4394_v20 }
 0x1a2   : > { %6049 = vmatmul.msk.bf16.gmra.mxu0 %vm967_vm2, %v7481_v21  ;;  %6497 = vmatmul.msk.bf16.gmra.mxu1 %vm967_vm2, %v7545_v22 }
 0x1a3   : > { %v4815_v31 = vadd.f32 %v8426_v25, %v4683_v30  ;;  %6945 = vmatmul.msk.bf16.gmra.mxu2 %vm967_vm2, %v7609_v28  ;;  %7393 = vmatmul.msk.bf16.gmra.mxu3 %vm967_vm2, %v7673_v29 }
 0x1a5   : > { %v4943_v33 = vmax.f32 %v4815_v31, 0.0  ;;  %v7484_v31 = vld [vmem:[%s8349_s4 + $0xb0] sm:$0xff] }
 0x1a6   : > { %v3299_v34 = vpop.f32.mrf.mxu2  ;;  %v4397_v35 = vpop.f32.mrf.mxu3 }
 0x1a7   : > { %v5071_v36 = vpack.c.bf16 %v4943_v33, %v4943_v33  ;;  %v3586_v37 = vmax.f32 %v2488_v32, %v3299_v34  ;;  %v1233_v38 = vpop.f32.mrf.mxu0  ;;  %v2203_v39 = vpop.f32.mrf.mxu1  ;;  %v7548_v32 = vld [vmem:[%s8349_s4 + $0x2b0] sm:$0xff] }
 0x1a8   : > { %v2489_v43 = vmax.f32 %v1233_v38, %v2203_v39  ;;  %v7676_v38 = vld [vmem:[%s8349_s4 + $0x6b0] sm:$0xff] }
 0x1a9   : > { %5200 = vst.msk [vmem:[%s8435_s26 + $0x54] sm:$0xf] %vm5178_vm3, %v5071_v36  ;;  %v4684_v40 = vmax.f32 %v3586_v37, %v4397_v35  ;;  %v7612_v37 = vld [vmem:[%s8349_s4 + $0x4b0] sm:$0xff] }
 0x1ab   : > { %v4816_v41 = vadd.f32 %v8426_v25, %v4684_v40 }
 0x1ad   : > { %v4944_v42 = vmax.f32 %v4816_v41, 0.0 }
 0x1ae   : > { %v3301_v44 = vpop.f32.mrf.mxu2  ;;  %v4399_v45 = vpop.f32.mrf.mxu3 }
 0x1af   : > { %v5072_v48 = vpack.c.bf16 %v4944_v42, %v4944_v42  ;;  %v3587_v49 = vmax.f32 %v2489_v43, %v3301_v44  ;;  %v1236_v50 = vpop.f32.mrf.mxu0  ;;  %v2206_v51 = vpop.f32.mrf.mxu1 }
 0x1b0   : > { %v2490_v56 = vmax.f32 %v1236_v50, %v2206_v51 }
 0x1b1   : > { %5201 = vst.msk [vmem:[%s8435_s26 + $0x58] sm:$0xf] %vm5178_vm3, %v5072_v48  ;;  %v4685_v54 = vmax.f32 %v3587_v49, %v4399_v45 }
 0x1b2   : > { %6050 = vmatmul.msk.bf16.gmra.mxu0 %vm967_vm2, %v7482_v46  ;;  %6498 = vmatmul.msk.bf16.gmra.mxu1 %vm967_vm2, %v7546_v47 }
 0x1b3   : > { %v4817_v55 = vadd.f32 %v8426_v25, %v4685_v54  ;;  %6946 = vmatmul.msk.bf16.gmra.mxu2 %vm967_vm2, %v7610_v52  ;;  %7394 = vmatmul.msk.bf16.gmra.mxu3 %vm967_vm2, %v7674_v53 }
 0x1b5   : > { %v4945_v57 = vmax.f32 %v4817_v55, 0.0  ;;  %v7485_v55 = vld [vmem:[%s8349_s4 + $0xb8] sm:$0xff] }
 0x1b6   : > { %v3304_v58 = vpop.f32.mrf.mxu2  ;;  %v4402_v59 = vpop.f32.mrf.mxu3 }
 0x1b7   : > { %v5073_v60 = vpack.c.bf16 %v4945_v57, %v4945_v57  ;;  %v3588_v61 = vmax.f32 %v2490_v56, %v3304_v58  ;;  %v1238_v62 = vpop.f32.mrf.mxu0  ;;  %v2208_v63 = vpop.f32.mrf.mxu1  ;;  %v7549_v56 = vld [vmem:[%s8349_s4 + $0x2b8] sm:$0xff] }
 0x1b8   : > { %v2491_v3 = vmax.f32 %v1238_v62, %v2208_v63  ;;  %v7677_v62 = vld [vmem:[%s8349_s4 + $0x6b8] sm:$0xff] }
 0x1b9   : > { %5202 = vst.msk [vmem:[%s8435_s26 + $0x5c] sm:$0xf] %vm5178_vm3, %v5073_v60  ;;  %v4686_v0 = vmax.f32 %v3588_v61, %v4402_v59  ;;  %v7613_v61 = vld [vmem:[%s8349_s4 + $0x4b8] sm:$0xff] }
 0x1bb   : > { %v4818_v1 = vadd.f32 %v8426_v25, %v4686_v0 }
 0x1bd   : > { %v4946_v2 = vmax.f32 %v4818_v1, 0.0 }
 0x1be   : > { %v3306_v4 = vpop.f32.mrf.mxu2  ;;  %v4404_v5 = vpop.f32.mrf.mxu3 }
 0x1bf   : > { %v5074_v8 = vpack.c.bf16 %v4946_v2, %v4946_v2  ;;  %v3589_v9 = vmax.f32 %v2491_v3, %v3306_v4  ;;  %v1241_v10 = vpop.f32.mrf.mxu0  ;;  %v2211_v11 = vpop.f32.mrf.mxu1 }
 0x1c0   : > { %v2492_v16 = vmax.f32 %v1241_v10, %v2211_v11 }
 0x1c1   : > { %5203 = vst.msk [vmem:[%s8435_s26 + $0x60] sm:$0xf] %vm5178_vm3, %v5074_v8  ;;  %v4687_v14 = vmax.f32 %v3589_v9, %v4404_v5 }
 0x1c2   : > { %6051 = vmatmul.msk.bf16.gmra.mxu0 %vm967_vm2, %v7483_v6  ;;  %6499 = vmatmul.msk.bf16.gmra.mxu1 %vm967_vm2, %v7547_v7 }
 0x1c3   : > { %v4819_v15 = vadd.f32 %v8426_v25, %v4687_v14  ;;  %6947 = vmatmul.msk.bf16.gmra.mxu2 %vm967_vm2, %v7611_v12  ;;  %7395 = vmatmul.msk.bf16.gmra.mxu3 %vm967_vm2, %v7675_v13 }
 0x1c5   : > { %v4947_v17 = vmax.f32 %v4819_v15, 0.0  ;;  %v7486_v15 = vld [vmem:[%s8349_s4 + $0xc0] sm:$0xff] }
 0x1c6   : > { %v3309_v18 = vpop.f32.mrf.mxu2  ;;  %v4407_v19 = vpop.f32.mrf.mxu3 }
 0x1c7   : > { %v5075_v20 = vpack.c.bf16 %v4947_v17, %v4947_v17  ;;  %v3590_v21 = vmax.f32 %v2492_v16, %v3309_v18  ;;  %v1243_v22 = vpop.f32.mrf.mxu0  ;;  %v2213_v23 = vpop.f32.mrf.mxu1  ;;  %v7550_v16 = vld [vmem:[%s8349_s4 + $0x2c0] sm:$0xff] }
 0x1c8   : > { %v2493_v28 = vmax.f32 %v1243_v22, %v2213_v23  ;;  %v7678_v22 = vld [vmem:[%s8349_s4 + $0x6c0] sm:$0xff] }
 0x1c9   : > { %5204 = vst.msk [vmem:[%s8435_s26 + $0x64] sm:$0xf] %vm5178_vm3, %v5075_v20  ;;  %v4688_v24 = vmax.f32 %v3590_v21, %v4407_v19  ;;  %v7614_v21 = vld [vmem:[%s8349_s4 + $0x4c0] sm:$0xff] }
 0x1cb   : > { %v4820_v26 = vadd.f32 %v8426_v25, %v4688_v24 }
 0x1cd   : > { %v4948_v27 = vmax.f32 %v4820_v26, 0.0 }
 0x1ce   : > { %v3311_v29 = vpop.f32.mrf.mxu2  ;;  %v4409_v30 = vpop.f32.mrf.mxu3 }
 0x1cf   : > { %v5076_v33 = vpack.c.bf16 %v4948_v27, %v4948_v27  ;;  %v3591_v34 = vmax.f32 %v2493_v28, %v3311_v29  ;;  %v1246_v35 = vpop.f32.mrf.mxu0  ;;  %v2216_v36 = vpop.f32.mrf.mxu1 }
 0x1d0   : > { %v2494_v41 = vmax.f32 %v1246_v35, %v2216_v36 }
 0x1d1   : > { %5205 = vst.msk [vmem:[%s8435_s26 + $0x68] sm:$0xf] %vm5178_vm3, %v5076_v33  ;;  %v4689_v39 = vmax.f32 %v3591_v34, %v4409_v30 }
 0x1d2   : > { %6052 = vmatmul.msk.bf16.gmra.mxu0 %vm967_vm2, %v7484_v31  ;;  %6500 = vmatmul.msk.bf16.gmra.mxu1 %vm967_vm2, %v7548_v32 }
 0x1d3   : > { %v4821_v40 = vadd.f32 %v8426_v25, %v4689_v39  ;;  %6948 = vmatmul.msk.bf16.gmra.mxu2 %vm967_vm2, %v7612_v37  ;;  %7396 = vmatmul.msk.bf16.gmra.mxu3 %vm967_vm2, %v7676_v38 }
 0x1d5   : > { %v4949_v42 = vmax.f32 %v4821_v40, 0.0  ;;  %v7487_v40 = vld [vmem:[%s8349_s4 + $0xc8] sm:$0xff] }
 0x1d6   : > { %v3314_v43 = vpop.f32.mrf.mxu2  ;;  %v4412_v44 = vpop.f32.mrf.mxu3 }
 0x1d7   : > { %v5077_v45 = vpack.c.bf16 %v4949_v42, %v4949_v42  ;;  %v3592_v46 = vmax.f32 %v2494_v41, %v3314_v43  ;;  %v1248_v47 = vpop.f32.mrf.mxu0  ;;  %v2218_v48 = vpop.f32.mrf.mxu1  ;;  %v7551_v41 = vld [vmem:[%s8349_s4 + $0x2c8] sm:$0xff] }
 0x1d8   : > { %v2495_v52 = vmax.f32 %v1248_v47, %v2218_v48  ;;  %v7679_v47 = vld [vmem:[%s8349_s4 + $0x6c8] sm:$0xff] }
 0x1d9   : > { %5206 = vst.msk [vmem:[%s8435_s26 + $0x6c] sm:$0xf] %vm5178_vm3, %v5077_v45  ;;  %v4690_v49 = vmax.f32 %v3592_v46, %v4412_v44  ;;  %v7615_v46 = vld [vmem:[%s8349_s4 + $0x4c8] sm:$0xff] }
 0x1db   : > { %v4822_v50 = vadd.f32 %v8426_v25, %v4690_v49 }
 0x1dd   : > { %v4950_v51 = vmax.f32 %v4822_v50, 0.0 }
 0x1de   : > { %v3316_v53 = vpop.f32.mrf.mxu2  ;;  %v4414_v54 = vpop.f32.mrf.mxu3 }
 0x1df   : > { %v5078_v57 = vpack.c.bf16 %v4950_v51, %v4950_v51  ;;  %v3593_v58 = vmax.f32 %v2495_v52, %v3316_v53  ;;  %v1251_v59 = vpop.f32.mrf.mxu0  ;;  %v2221_v60 = vpop.f32.mrf.mxu1 }
 0x1e0   : > { %v2496_v1 = vmax.f32 %v1251_v59, %v2221_v60 }
 0x1e1   : > { %5207 = vst.msk [vmem:[%s8435_s26 + $0x70] sm:$0xf] %vm5178_vm3, %v5078_v57  ;;  %v4691_v63 = vmax.f32 %v3593_v58, %v4414_v54  ;;  %v8673_v58 = vld [vmem:[%s9426_s2] ss:$0 sm:$0xff] }
 0x1e2   : > { %6053 = vmatmul.msk.bf16.gmra.mxu0 %vm967_vm2, %v7485_v55  ;;  %6501 = vmatmul.msk.bf16.gmra.mxu1 %vm967_vm2, %v7549_v56 }
 0x1e3   : > { %v4823_v0 = vadd.f32 %v8426_v25, %v4691_v63  ;;  %6949 = vmatmul.msk.bf16.gmra.mxu2 %vm967_vm2, %v7613_v61  ;;  %7397 = vmatmul.msk.bf16.gmra.mxu3 %vm967_vm2, %v7677_v62 }
 0x1e5   : > { %v4951_v2 = vmax.f32 %v4823_v0, 0.0  ;;  %v7488_v0 = vld [vmem:[%s8349_s4 + $0xd0] sm:$0xff] }
 0x1e6   : > { %v3319_v3 = vpop.f32.mrf.mxu2  ;;  %v4417_v4 = vpop.f32.mrf.mxu3 }
 0x1e7   : > { %v5079_v5 = vpack.c.bf16 %v4951_v2, %v4951_v2  ;;  %v3594_v6 = vmax.f32 %v2496_v1, %v3319_v3  ;;  %v1253_v7 = vpop.f32.mrf.mxu0  ;;  %v2223_v8 = vpop.f32.mrf.mxu1  ;;  %v7552_v1 = vld [vmem:[%s8349_s4 + $0x2d0] sm:$0xff] }
 0x1e8   : > { %v2497_v12 = vmax.f32 %v1253_v7, %v2223_v8  ;;  %v7680_v7 = vld [vmem:[%s8349_s4 + $0x6d0] sm:$0xff] }
 0x1e9   : > { %5208 = vst.msk [vmem:[%s8435_s26 + $0x74] sm:$0xf] %vm5178_vm3, %v5079_v5  ;;  %v4692_v9 = vmax.f32 %v3594_v6, %v4417_v4  ;;  %v7616_v6 = vld [vmem:[%s8349_s4 + $0x4d0] sm:$0xff] }
 0x1eb   : > { %v4824_v10 = vadd.f32 %v8426_v25, %v4692_v9 }
 0x1ed   : > { %v4952_v11 = vmax.f32 %v4824_v10, 0.0 }
 0x1ee   : > { %v3321_v13 = vpop.f32.mrf.mxu2  ;;  %v4419_v14 = vpop.f32.mrf.mxu3 }
 0x1ef   : > { %v5080_v17 = vpack.c.bf16 %v4952_v11, %v4952_v11  ;;  %v3595_v18 = vmax.f32 %v2497_v12, %v3321_v13  ;;  %v1256_v19 = vpop.f32.mrf.mxu0  ;;  %v2226_v20 = vpop.f32.mrf.mxu1 }
 0x1f0   : > { %v2498_v26 = vmax.f32 %v1256_v19, %v2226_v20 }
 0x1f1   : > { %5209 = vst.msk [vmem:[%s8435_s26 + $0x78] sm:$0xf] %vm5178_vm3, %v5080_v17  ;;  %v4693_v23 = vmax.f32 %v3595_v18, %v4419_v14 }
 0x1f2   : > { %6054 = vmatmul.msk.bf16.gmra.mxu0 %vm967_vm2, %v7486_v15  ;;  %6502 = vmatmul.msk.bf16.gmra.mxu1 %vm967_vm2, %v7550_v16 }
 0x1f3   : > { %v4825_v24 = vadd.f32 %v8426_v25, %v4693_v23  ;;  %6950 = vmatmul.msk.bf16.gmra.mxu2 %vm967_vm2, %v7614_v21  ;;  %7398 = vmatmul.msk.bf16.gmra.mxu3 %vm967_vm2, %v7678_v22 }
 0x1f5   : > { %v4953_v27 = vmax.f32 %v4825_v24, 0.0  ;;  %v7489_v24 = vld [vmem:[%s8349_s4 + $0xd8] sm:$0xff] }
 0x1f6   : > { %v3324_v28 = vpop.f32.mrf.mxu2  ;;  %v4422_v29 = vpop.f32.mrf.mxu3 }
 0x1f7   : > { %v5081_v30 = vpack.c.bf16 %v4953_v27, %v4953_v27  ;;  %v3596_v31 = vmax.f32 %v2498_v26, %v3324_v28  ;;  %v1258_v32 = vpop.f32.mrf.mxu0  ;;  %v2228_v33 = vpop.f32.mrf.mxu1  ;;  %v7553_v26 = vld [vmem:[%s8349_s4 + $0x2d8] sm:$0xff] }
 0x1f8   : > { %v2499_v37 = vmax.f32 %v1258_v32, %v2228_v33  ;;  %v7681_v32 = vld [vmem:[%s8349_s4 + $0x6d8] sm:$0xff] }
 0x1f9   : > { %5210 = vst.msk [vmem:[%s8435_s26 + $0x7c] sm:$0xf] %vm5178_vm3, %v5081_v30  ;;  %v4694_v34 = vmax.f32 %v3596_v31, %v4422_v29  ;;  %v7617_v31 = vld [vmem:[%s8349_s4 + $0x4d8] sm:$0xff] }
 0x1fb   : > { %v4826_v35 = vadd.f32 %v8426_v25, %v4694_v34 }
 0x1fd   : > { %v4954_v36 = vmax.f32 %v4826_v35, 0.0 }
 0x1fe   : > { %v3326_v38 = vpop.f32.mrf.mxu2  ;;  %v4424_v39 = vpop.f32.mrf.mxu3 }
 0x1ff   : > { %v5082_v42 = vpack.c.bf16 %v4954_v36, %v4954_v36  ;;  %v3597_v43 = vmax.f32 %v2499_v37, %v3326_v38  ;;  %v1261_v44 = vpop.f32.mrf.mxu0  ;;  %v2231_v45 = vpop.f32.mrf.mxu1 }
 0x200   : > { %v2500_v50 = vmax.f32 %v1261_v44, %v2231_v45 }
 0x201   : > { %5211 = vst.msk [vmem:[%s8435_s26 + $0x80] sm:$0xf] %vm5178_vm3, %v5082_v42  ;;  %v4695_v48 = vmax.f32 %v3597_v43, %v4424_v39 }
 0x202   : > { %6055 = vmatmul.msk.bf16.gmra.mxu0 %vm967_vm2, %v7487_v40  ;;  %6503 = vmatmul.msk.bf16.gmra.mxu1 %vm967_vm2, %v7551_v41 }
 0x203   : > { %v4827_v49 = vadd.f32 %v8426_v25, %v4695_v48  ;;  %6951 = vmatmul.msk.bf16.gmra.mxu2 %vm967_vm2, %v7615_v46  ;;  %7399 = vmatmul.msk.bf16.gmra.mxu3 %vm967_vm2, %v7679_v47 }
 0x205   : > { %v4955_v51 = vmax.f32 %v4827_v49, 0.0  ;;  %v7490_v49 = vld [vmem:[%s8349_s4 + $0xe0] sm:$0xff] }
 0x206   : > { %v3329_v52 = vpop.f32.mrf.mxu2  ;;  %v4427_v53 = vpop.f32.mrf.mxu3 }
 0x207   : > { %v5083_v54 = vpack.c.bf16 %v4955_v51, %v4955_v51  ;;  %v3598_v55 = vmax.f32 %v2500_v50, %v3329_v52  ;;  %v1263_v56 = vpop.f32.mrf.mxu0  ;;  %v2233_v57 = vpop.f32.mrf.mxu1  ;;  %v7554_v50 = vld [vmem:[%s8349_s4 + $0x2e0] sm:$0xff] }
 0x208   : > { %v2501_v61 = vmax.f32 %v1263_v56, %v2233_v57  ;;  %v7682_v56 = vld [vmem:[%s8349_s4 + $0x6e0] sm:$0xff] }
 0x209   : > { %5212 = vst.msk [vmem:[%s8435_s26 + $0x84] sm:$0xf] %vm5178_vm3, %v5083_v54  ;;  %v4696_v25 = vmax.f32 %v3598_v55, %v4427_v53  ;;  %v7618_v55 = vld [vmem:[%s8349_s4 + $0x4e0] sm:$0xff] }
 0x20b   : > { %v4828_v59 = vadd.f32 %v8673_v58, %v4696_v25 }
 0x20d   : > { %v4956_v60 = vmax.f32 %v4828_v59, 0.0 }
 0x20e   : > { %v3331_v62 = vpop.f32.mrf.mxu2  ;;  %v4429_v63 = vpop.f32.mrf.mxu3 }
 0x20f   : > { %v5084_v2 = vpack.c.bf16 %v4956_v60, %v4956_v60  ;;  %v3599_v3 = vmax.f32 %v2501_v61, %v3331_v62  ;;  %v1266_v4 = vpop.f32.mrf.mxu0  ;;  %v2236_v5 = vpop.f32.mrf.mxu1 }
 0x210   : > { %v2502_v10 = vmax.f32 %v1266_v4, %v2236_v5 }
 0x211   : > { %5213 = vst.msk [vmem:[%s8435_s26 + $0x88] sm:$0xf] %vm5178_vm3, %v5084_v2  ;;  %v4697_v8 = vmax.f32 %v3599_v3, %v4429_v63 }
 0x212   : > { %6056 = vmatmul.msk.bf16.gmra.mxu0 %vm967_vm2, %v7488_v0  ;;  %6504 = vmatmul.msk.bf16.gmra.mxu1 %vm967_vm2, %v7552_v1 }
 0x213   : > { %v4829_v9 = vadd.f32 %v8673_v58, %v4697_v8  ;;  %6952 = vmatmul.msk.bf16.gmra.mxu2 %vm967_vm2, %v7616_v6  ;;  %7400 = vmatmul.msk.bf16.gmra.mxu3 %vm967_vm2, %v7680_v7 }
 0x215   : > { %v4957_v11 = vmax.f32 %v4829_v9, 0.0  ;;  %v7491_v9 = vld [vmem:[%s8349_s4 + $0xe8] sm:$0xff] }
 0x216   : > { %v3334_v12 = vpop.f32.mrf.mxu2  ;;  %v4432_v13 = vpop.f32.mrf.mxu3 }
 0x217   : > { %v5085_v14 = vpack.c.bf16 %v4957_v11, %v4957_v11  ;;  %v3600_v15 = vmax.f32 %v2502_v10, %v3334_v12  ;;  %v1268_v16 = vpop.f32.mrf.mxu0  ;;  %v2238_v17 = vpop.f32.mrf.mxu1  ;;  %v7555_v10 = vld [vmem:[%s8349_s4 + $0x2e8] sm:$0xff] }
 0x218   : > { %v2503_v21 = vmax.f32 %v1268_v16, %v2238_v17  ;;  %v7683_v16 = vld [vmem:[%s8349_s4 + $0x6e8] sm:$0xff] }
 0x219   : > { %5214 = vst.msk [vmem:[%s8435_s26 + $0x8c] sm:$0xf] %vm5178_vm3, %v5085_v14  ;;  %v4698_v18 = vmax.f32 %v3600_v15, %v4432_v13  ;;  %v7619_v15 = vld [vmem:[%s8349_s4 + $0x4e8] sm:$0xff] }
 0x21b   : > { %v4830_v19 = vadd.f32 %v8673_v58, %v4698_v18 }
 0x21d   : > { %v4958_v20 = vmax.f32 %v4830_v19, 0.0 }
 0x21e   : > { %v3336_v22 = vpop.f32.mrf.mxu2  ;;  %v4434_v23 = vpop.f32.mrf.mxu3 }
 0x21f   : > { %v5086_v27 = vpack.c.bf16 %v4958_v20, %v4958_v20  ;;  %v3601_v28 = vmax.f32 %v2503_v21, %v3336_v22  ;;  %v1271_v29 = vpop.f32.mrf.mxu0  ;;  %v2241_v30 = vpop.f32.mrf.mxu1 }
 0x220   : > { %v2504_v35 = vmax.f32 %v1271_v29, %v2241_v30 }
 0x221   : > { %5215 = vst.msk [vmem:[%s8435_s26 + $0x90] sm:$0xf] %vm5178_vm3, %v5086_v27  ;;  %v4699_v33 = vmax.f32 %v3601_v28, %v4434_v23 }
 0x222   : > { %6057 = vmatmul.msk.bf16.gmra.mxu0 %vm967_vm2, %v7489_v24  ;;  %6505 = vmatmul.msk.bf16.gmra.mxu1 %vm967_vm2, %v7553_v26 }
 0x223   : > { %v4831_v34 = vadd.f32 %v8673_v58, %v4699_v33  ;;  %6953 = vmatmul.msk.bf16.gmra.mxu2 %vm967_vm2, %v7617_v31  ;;  %7401 = vmatmul.msk.bf16.gmra.mxu3 %vm967_vm2, %v7681_v32 }
 0x225   : > { %v4959_v36 = vmax.f32 %v4831_v34, 0.0  ;;  %v7492_v34 = vld [vmem:[%s8349_s4 + $0xf0] sm:$0xff] }
 0x226   : > { %v3339_v37 = vpop.f32.mrf.mxu2  ;;  %v4437_v38 = vpop.f32.mrf.mxu3 }
 0x227   : > { %v5087_v39 = vpack.c.bf16 %v4959_v36, %v4959_v36  ;;  %v3602_v40 = vmax.f32 %v2504_v35, %v3339_v37  ;;  %v1273_v41 = vpop.f32.mrf.mxu0  ;;  %v2243_v42 = vpop.f32.mrf.mxu1  ;;  %v7556_v35 = vld [vmem:[%s8349_s4 + $0x2f0] sm:$0xff] }
 0x228   : > { %v2505_v46 = vmax.f32 %v1273_v41, %v2243_v42  ;;  %v7684_v41 = vld [vmem:[%s8349_s4 + $0x6f0] sm:$0xff] }
 0x229   : > { %5216 = vst.msk [vmem:[%s8435_s26 + $0x94] sm:$0xf] %vm5178_vm3, %v5087_v39  ;;  %v4700_v43 = vmax.f32 %v3602_v40, %v4437_v38  ;;  %v7620_v40 = vld [vmem:[%s8349_s4 + $0x4f0] sm:$0xff] }
 0x22b   : > { %v4832_v44 = vadd.f32 %v8673_v58, %v4700_v43 }
 0x22d   : > { %v4960_v45 = vmax.f32 %v4832_v44, 0.0 }
 0x22e   : > { %v3341_v47 = vpop.f32.mrf.mxu2  ;;  %v4439_v48 = vpop.f32.mrf.mxu3 }
 0x22f   : > { %v5088_v51 = vpack.c.bf16 %v4960_v45, %v4960_v45  ;;  %v3603_v52 = vmax.f32 %v2505_v46, %v3341_v47  ;;  %v1276_v53 = vpop.f32.mrf.mxu0  ;;  %v2246_v54 = vpop.f32.mrf.mxu1 }
 0x230   : > { %v2506_v59 = vmax.f32 %v1276_v53, %v2246_v54 }
 0x231   : > { %5217 = vst.msk [vmem:[%s8435_s26 + $0x98] sm:$0xf] %vm5178_vm3, %v5088_v51  ;;  %v4701_v57 = vmax.f32 %v3603_v52, %v4439_v48 }
 0x232   : > { %6058 = vmatmul.msk.bf16.gmra.mxu0 %vm967_vm2, %v7490_v49  ;;  %6506 = vmatmul.msk.bf16.gmra.mxu1 %vm967_vm2, %v7554_v50 }
 0x233   : > { %v4833_v25 = vadd.f32 %v8673_v58, %v4701_v57  ;;  %6954 = vmatmul.msk.bf16.gmra.mxu2 %vm967_vm2, %v7618_v55  ;;  %7402 = vmatmul.msk.bf16.gmra.mxu3 %vm967_vm2, %v7682_v56 }
 0x235   : > { %v4961_v60 = vmax.f32 %v4833_v25, 0.0  ;;  %v7493_v25 = vld [vmem:[%s8349_s4 + $0xf8] sm:$0xff] }
 0x236   : > { %v3344_v61 = vpop.f32.mrf.mxu2  ;;  %v4442_v62 = vpop.f32.mrf.mxu3 }
 0x237   : > { %v5089_v63 = vpack.c.bf16 %v4961_v60, %v4961_v60  ;;  %v3604_v0 = vmax.f32 %v2506_v59, %v3344_v61  ;;  %v1278_v1 = vpop.f32.mrf.mxu0  ;;  %v2248_v2 = vpop.f32.mrf.mxu1  ;;  %v7557_v59 = vld [vmem:[%s8349_s4 + $0x2f8] sm:$0xff] }
 0x238   : > { %v2507_v6 = vmax.f32 %v1278_v1, %v2248_v2  ;;  %v7685_v1 = vld [vmem:[%s8349_s4 + $0x6f8] sm:$0xff] }
 0x239   : > { %5218 = vst.msk [vmem:[%s8435_s26 + $0x9c] sm:$0xf] %vm5178_vm3, %v5089_v63  ;;  %v4702_v3 = vmax.f32 %v3604_v0, %v4442_v62  ;;  %v7621_v0 = vld [vmem:[%s8349_s4 + $0x4f8] sm:$0xff] }
 0x23b   : > { %v4834_v4 = vadd.f32 %v8673_v58, %v4702_v3 }
 0x23d   : > { %v4962_v5 = vmax.f32 %v4834_v4, 0.0 }
 0x23e   : > { %v3346_v7 = vpop.f32.mrf.mxu2  ;;  %v4444_v8 = vpop.f32.mrf.mxu3 }
 0x23f   : > { %v5090_v11 = vpack.c.bf16 %v4962_v5, %v4962_v5  ;;  %v3605_v12 = vmax.f32 %v2507_v6, %v3346_v7  ;;  %v1281_v13 = vpop.f32.mrf.mxu0  ;;  %v2251_v14 = vpop.f32.mrf.mxu1 }
 0x240   : > { %v2508_v19 = vmax.f32 %v1281_v13, %v2251_v14 }
 0x241   : > { %5219 = vst.msk [vmem:[%s8435_s26 + $0xa0] sm:$0xf] %vm5178_vm3, %v5090_v11  ;;  %v4703_v17 = vmax.f32 %v3605_v12, %v4444_v8 }
 0x242   : > { %6059 = vmatmul.msk.bf16.gmra.mxu0 %vm967_vm2, %v7491_v9  ;;  %6507 = vmatmul.msk.bf16.gmra.mxu1 %vm967_vm2, %v7555_v10 }
 0x243   : > { %v4835_v18 = vadd.f32 %v8673_v58, %v4703_v17  ;;  %6955 = vmatmul.msk.bf16.gmra.mxu2 %vm967_vm2, %v7619_v15  ;;  %7403 = vmatmul.msk.bf16.gmra.mxu3 %vm967_vm2, %v7683_v16 }
 0x245   : > { %v4963_v20 = vmax.f32 %v4835_v18, 0.0  ;;  %v7494_v18 = vld [vmem:[%s8349_s4 + $0x100] sm:$0xff] }
 0x246   : > { %v3349_v21 = vpop.f32.mrf.mxu2  ;;  %v4447_v22 = vpop.f32.mrf.mxu3 }
 0x247   : > { %v5091_v23 = vpack.c.bf16 %v4963_v20, %v4963_v20  ;;  %v3606_v24 = vmax.f32 %v2508_v19, %v3349_v21  ;;  %v1283_v26 = vpop.f32.mrf.mxu0  ;;  %v2253_v27 = vpop.f32.mrf.mxu1  ;;  %v7558_v19 = vld [vmem:[%s8349_s4 + $0x300] sm:$0xff] }
 0x248   : > { %v2509_v31 = vmax.f32 %v1283_v26, %v2253_v27  ;;  %v7686_v26 = vld [vmem:[%s8349_s4 + $0x700] sm:$0xff] }
 0x249   : > { %5220 = vst.msk [vmem:[%s8435_s26 + $0xa4] sm:$0xf] %vm5178_vm3, %v5091_v23  ;;  %v4704_v28 = vmax.f32 %v3606_v24, %v4447_v22  ;;  %v7622_v24 = vld [vmem:[%s8349_s4 + $0x500] sm:$0xff] }
 0x24b   : > { %v4836_v29 = vadd.f32 %v8673_v58, %v4704_v28 }
 0x24d   : > { %v4964_v30 = vmax.f32 %v4836_v29, 0.0 }
 0x24e   : > { %v3351_v32 = vpop.f32.mrf.mxu2  ;;  %v4449_v33 = vpop.f32.mrf.mxu3 }
 0x24f   : > { %v5092_v36 = vpack.c.bf16 %v4964_v30, %v4964_v30  ;;  %v3607_v37 = vmax.f32 %v2509_v31, %v3351_v32  ;;  %v1286_v38 = vpop.f32.mrf.mxu0  ;;  %v2256_v39 = vpop.f32.mrf.mxu1 }
 0x250   : > { %v2510_v44 = vmax.f32 %v1286_v38, %v2256_v39 }
 0x251   : > { %5221 = vst.msk [vmem:[%s8435_s26 + $0xa8] sm:$0xf] %vm5178_vm3, %v5092_v36  ;;  %v4705_v42 = vmax.f32 %v3607_v37, %v4449_v33 }
 0x252   : > { %6060 = vmatmul.msk.bf16.gmra.mxu0 %vm967_vm2, %v7492_v34  ;;  %6508 = vmatmul.msk.bf16.gmra.mxu1 %vm967_vm2, %v7556_v35 }
 0x253   : > { %v4837_v43 = vadd.f32 %v8673_v58, %v4705_v42  ;;  %6956 = vmatmul.msk.bf16.gmra.mxu2 %vm967_vm2, %v7620_v40  ;;  %7404 = vmatmul.msk.bf16.gmra.mxu3 %vm967_vm2, %v7684_v41 }
 0x255   : > { %v4965_v45 = vmax.f32 %v4837_v43, 0.0  ;;  %v7495_v43 = vld [vmem:[%s8349_s4 + $0x108] sm:$0xff] }
 0x256   : > { %v3354_v46 = vpop.f32.mrf.mxu2  ;;  %v4452_v47 = vpop.f32.mrf.mxu3 }
 0x257   : > { %v5093_v48 = vpack.c.bf16 %v4965_v45, %v4965_v45  ;;  %v3608_v49 = vmax.f32 %v2510_v44, %v3354_v46  ;;  %v1288_v50 = vpop.f32.mrf.mxu0  ;;  %v2258_v51 = vpop.f32.mrf.mxu1  ;;  %v7559_v44 = vld [vmem:[%s8349_s4 + $0x308] sm:$0xff] }
 0x258   : > { %v2511_v55 = vmax.f32 %v1288_v50, %v2258_v51  ;;  %v7687_v50 = vld [vmem:[%s8349_s4 + $0x708] sm:$0xff] }
 0x259   : > { %5222 = vst.msk [vmem:[%s8435_s26 + $0xac] sm:$0xf] %vm5178_vm3, %v5093_v48  ;;  %v4706_v52 = vmax.f32 %v3608_v49, %v4452_v47  ;;  %v7623_v49 = vld [vmem:[%s8349_s4 + $0x508] sm:$0xff] }
 0x25b   : > { %v4838_v53 = vadd.f32 %v8673_v58, %v4706_v52 }
 0x25d   : > { %v4966_v54 = vmax.f32 %v4838_v53, 0.0 }
 0x25e   : > { %v3356_v56 = vpop.f32.mrf.mxu2  ;;  %v4454_v57 = vpop.f32.mrf.mxu3 }
 0x25f   : > { %v5094_v60 = vpack.c.bf16 %v4966_v54, %v4966_v54  ;;  %v3609_v61 = vmax.f32 %v2511_v55, %v3356_v56  ;;  %v1291_v62 = vpop.f32.mrf.mxu0  ;;  %v2261_v63 = vpop.f32.mrf.mxu1 }
 0x260   : > { %v2512_v4 = vmax.f32 %v1291_v62, %v2261_v63 }
 0x261   : > { %5223 = vst.msk [vmem:[%s8435_s26 + $0xb0] sm:$0xf] %vm5178_vm3, %v5094_v60  ;;  %v4707_v2 = vmax.f32 %v3609_v61, %v4454_v57 }
 0x262   : > { %6061 = vmatmul.msk.bf16.gmra.mxu0 %vm967_vm2, %v7493_v25  ;;  %6509 = vmatmul.msk.bf16.gmra.mxu1 %vm967_vm2, %v7557_v59 }
 0x263   : > { %v4839_v3 = vadd.f32 %v8673_v58, %v4707_v2  ;;  %6957 = vmatmul.msk.bf16.gmra.mxu2 %vm967_vm2, %v7621_v0  ;;  %7405 = vmatmul.msk.bf16.gmra.mxu3 %vm967_vm2, %v7685_v1 }
 0x265   : > { %v4967_v5 = vmax.f32 %v4839_v3, 0.0  ;;  %v7496_v3 = vld [vmem:[%s8349_s4 + $0x110] sm:$0xff] }
 0x266   : > { %v3359_v6 = vpop.f32.mrf.mxu2  ;;  %v4457_v7 = vpop.f32.mrf.mxu3 }
 0x267   : > { %v5095_v8 = vpack.c.bf16 %v4967_v5, %v4967_v5  ;;  %v3610_v9 = vmax.f32 %v2512_v4, %v3359_v6  ;;  %v1293_v10 = vpop.f32.mrf.mxu0  ;;  %v2263_v11 = vpop.f32.mrf.mxu1  ;;  %v7560_v4 = vld [vmem:[%s8349_s4 + $0x310] sm:$0xff] }
 0x268   : > { %v2513_v15 = vmax.f32 %v1293_v10, %v2263_v11  ;;  %v7688_v10 = vld [vmem:[%s8349_s4 + $0x710] sm:$0xff] }
 0x269   : > { %5224 = vst.msk [vmem:[%s8435_s26 + $0xb4] sm:$0xf] %vm5178_vm3, %v5095_v8  ;;  %v4708_v12 = vmax.f32 %v3610_v9, %v4457_v7  ;;  %v7624_v9 = vld [vmem:[%s8349_s4 + $0x510] sm:$0xff] }
 0x26b   : > { %v4840_v13 = vadd.f32 %v8673_v58, %v4708_v12 }
 0x26d   : > { %v4968_v14 = vmax.f32 %v4840_v13, 0.0 }
 0x26e   : > { %v3361_v16 = vpop.f32.mrf.mxu2  ;;  %v4459_v17 = vpop.f32.mrf.mxu3 }
 0x26f   : > { %v5096_v20 = vpack.c.bf16 %v4968_v14, %v4968_v14  ;;  %v3611_v21 = vmax.f32 %v2513_v15, %v3361_v16  ;;  %v1296_v22 = vpop.f32.mrf.mxu0  ;;  %v2266_v23 = vpop.f32.mrf.mxu1 }
 0x270   : > { %v2514_v29 = vmax.f32 %v1296_v22, %v2266_v23 }
 0x271   : > { %5225 = vst.msk [vmem:[%s8435_s26 + $0xb8] sm:$0xf] %vm5178_vm3, %v5096_v20  ;;  %v4709_v27 = vmax.f32 %v3611_v21, %v4459_v17 }
 0x272   : > { %6062 = vmatmul.msk.bf16.gmra.mxu0 %vm967_vm2, %v7494_v18  ;;  %6510 = vmatmul.msk.bf16.gmra.mxu1 %vm967_vm2, %v7558_v19 }
 0x273   : > { %v4841_v28 = vadd.f32 %v8673_v58, %v4709_v27  ;;  %6958 = vmatmul.msk.bf16.gmra.mxu2 %vm967_vm2, %v7622_v24  ;;  %7406 = vmatmul.msk.bf16.gmra.mxu3 %vm967_vm2, %v7686_v26 }
 0x275   : > { %v4969_v30 = vmax.f32 %v4841_v28, 0.0  ;;  %v7497_v28 = vld [vmem:[%s8349_s4 + $0x118] sm:$0xff] }
 0x276   : > { %v3364_v31 = vpop.f32.mrf.mxu2  ;;  %v4462_v32 = vpop.f32.mrf.mxu3 }
 0x277   : > { %v5097_v33 = vpack.c.bf16 %v4969_v30, %v4969_v30  ;;  %v3612_v34 = vmax.f32 %v2514_v29, %v3364_v31  ;;  %v1298_v35 = vpop.f32.mrf.mxu0  ;;  %v2268_v36 = vpop.f32.mrf.mxu1  ;;  %v7561_v29 = vld [vmem:[%s8349_s4 + $0x318] sm:$0xff] }
 0x278   : > { %v2515_v40 = vmax.f32 %v1298_v35, %v2268_v36  ;;  %v7689_v35 = vld [vmem:[%s8349_s4 + $0x718] sm:$0xff] }
 0x279   : > { %5226 = vst.msk [vmem:[%s8435_s26 + $0xbc] sm:$0xf] %vm5178_vm3, %v5097_v33  ;;  %v4710_v37 = vmax.f32 %v3612_v34, %v4462_v32  ;;  %v7625_v34 = vld [vmem:[%s8349_s4 + $0x518] sm:$0xff] }
 0x27b   : > { %v4842_v38 = vadd.f32 %v8673_v58, %v4710_v37 }
 0x27d   : > { %v4970_v39 = vmax.f32 %v4842_v38, 0.0 }
 0x27e   : > { %v3366_v41 = vpop.f32.mrf.mxu2  ;;  %v4464_v42 = vpop.f32.mrf.mxu3 }
 0x27f   : > { %v5098_v45 = vpack.c.bf16 %v4970_v39, %v4970_v39  ;;  %v3613_v46 = vmax.f32 %v2515_v40, %v3366_v41  ;;  %v1301_v47 = vpop.f32.mrf.mxu0  ;;  %v2271_v48 = vpop.f32.mrf.mxu1 }
 0x280   : > { %v2516_v53 = vmax.f32 %v1301_v47, %v2271_v48 }
 0x281   : > { %5227 = vst.msk [vmem:[%s8435_s26 + $0xc0] sm:$0xf] %vm5178_vm3, %v5098_v45  ;;  %v4711_v51 = vmax.f32 %v3613_v46, %v4464_v42 }
 0x282   : > { %6063 = vmatmul.msk.bf16.gmra.mxu0 %vm967_vm2, %v7495_v43  ;;  %6511 = vmatmul.msk.bf16.gmra.mxu1 %vm967_vm2, %v7559_v44 }
 0x283   : > { %v4843_v52 = vadd.f32 %v8673_v58, %v4711_v51  ;;  %6959 = vmatmul.msk.bf16.gmra.mxu2 %vm967_vm2, %v7623_v49  ;;  %7407 = vmatmul.msk.bf16.gmra.mxu3 %vm967_vm2, %v7687_v50 }
 0x285   : > { %v4971_v54 = vmax.f32 %v4843_v52, 0.0  ;;  %v7498_v52 = vld [vmem:[%s8349_s4 + $0x120] sm:$0xff] }
 0x286   : > { %v3369_v55 = vpop.f32.mrf.mxu2  ;;  %v4467_v56 = vpop.f32.mrf.mxu3 }
 0x287   : > { %v5099_v57 = vpack.c.bf16 %v4971_v54, %v4971_v54  ;;  %v3614_v25 = vmax.f32 %v2516_v53, %v3369_v55  ;;  %v1303_v59 = vpop.f32.mrf.mxu0  ;;  %v2273_v60 = vpop.f32.mrf.mxu1  ;;  %v7562_v53 = vld [vmem:[%s8349_s4 + $0x320] sm:$0xff] }
 0x288   : > { %v2517_v0 = vmax.f32 %v1303_v59, %v2273_v60  ;;  %v7690_v59 = vld [vmem:[%s8349_s4 + $0x720] sm:$0xff] }
 0x289   : > { %5228 = vst.msk [vmem:[%s8435_s26 + $0xc4] sm:$0xf] %vm5178_vm3, %v5099_v57  ;;  %v4712_v61 = vmax.f32 %v3614_v25, %v4467_v56  ;;  %v7626_v25 = vld [vmem:[%s8349_s4 + $0x520] sm:$0xff] }
 0x28b   : > { %v4844_v62 = vadd.f32 %v8673_v58, %v4712_v61 }
 0x28d   : > { %v4972_v63 = vmax.f32 %v4844_v62, 0.0 }
 0x28e   : > { %v3371_v1 = vpop.f32.mrf.mxu2  ;;  %v4469_v2 = vpop.f32.mrf.mxu3 }
 0x28f   : > { %v5100_v5 = vpack.c.bf16 %v4972_v63, %v4972_v63  ;;  %v3615_v6 = vmax.f32 %v2517_v0, %v3371_v1  ;;  %v1306_v7 = vpop.f32.mrf.mxu0  ;;  %v2276_v8 = vpop.f32.mrf.mxu1 }
 0x290   : > { %v2518_v13 = vmax.f32 %v1306_v7, %v2276_v8 }
 0x291   : > { %5229 = vst.msk [vmem:[%s8435_s26 + $0xc8] sm:$0xf] %vm5178_vm3, %v5100_v5  ;;  %v4713_v11 = vmax.f32 %v3615_v6, %v4469_v2 }
 0x292   : > { %6064 = vmatmul.msk.bf16.gmra.mxu0 %vm967_vm2, %v7496_v3  ;;  %6512 = vmatmul.msk.bf16.gmra.mxu1 %vm967_vm2, %v7560_v4 }
 0x293   : > { %v4845_v12 = vadd.f32 %v8673_v58, %v4713_v11  ;;  %6960 = vmatmul.msk.bf16.gmra.mxu2 %vm967_vm2, %v7624_v9  ;;  %7408 = vmatmul.msk.bf16.gmra.mxu3 %vm967_vm2, %v7688_v10 }
 0x295   : > { %v4973_v14 = vmax.f32 %v4845_v12, 0.0  ;;  %v7499_v12 = vld [vmem:[%s8349_s4 + $0x128] sm:$0xff] }
 0x296   : > { %v3374_v15 = vpop.f32.mrf.mxu2  ;;  %v4472_v16 = vpop.f32.mrf.mxu3 }
 0x297   : > { %v5101_v17 = vpack.c.bf16 %v4973_v14, %v4973_v14  ;;  %v3616_v18 = vmax.f32 %v2518_v13, %v3374_v15  ;;  %v1308_v19 = vpop.f32.mrf.mxu0  ;;  %v2278_v20 = vpop.f32.mrf.mxu1  ;;  %v7563_v13 = vld [vmem:[%s8349_s4 + $0x328] sm:$0xff] }
 0x298   : > { %v2519_v24 = vmax.f32 %v1308_v19, %v2278_v20  ;;  %v7691_v19 = vld [vmem:[%s8349_s4 + $0x728] sm:$0xff] }
 0x299   : > { %5230 = vst.msk [vmem:[%s8435_s26 + $0xcc] sm:$0xf] %vm5178_vm3, %v5101_v17  ;;  %v4714_v21 = vmax.f32 %v3616_v18, %v4472_v16  ;;  %v7627_v18 = vld [vmem:[%s8349_s4 + $0x528] sm:$0xff] }
 0x29b   : > { %v4846_v22 = vadd.f32 %v8673_v58, %v4714_v21 }
 0x29d   : > { %v4974_v23 = vmax.f32 %v4846_v22, 0.0 }
 0x29e   : > { %v3376_v26 = vpop.f32.mrf.mxu2  ;;  %v4474_v27 = vpop.f32.mrf.mxu3 }
 0x29f   : > { %v5102_v30 = vpack.c.bf16 %v4974_v23, %v4974_v23  ;;  %v3617_v31 = vmax.f32 %v2519_v24, %v3376_v26  ;;  %v1311_v32 = vpop.f32.mrf.mxu0  ;;  %v2281_v33 = vpop.f32.mrf.mxu1 }
 0x2a0   : > { %v2520_v38 = vmax.f32 %v1311_v32, %v2281_v33 }
 0x2a1   : > { %5231 = vst.msk [vmem:[%s8435_s26 + $0xd0] sm:$0xf] %vm5178_vm3, %v5102_v30  ;;  %v4715_v36 = vmax.f32 %v3617_v31, %v4474_v27 }
 0x2a2   : > { %6065 = vmatmul.msk.bf16.gmra.mxu0 %vm967_vm2, %v7497_v28  ;;  %6513 = vmatmul.msk.bf16.gmra.mxu1 %vm967_vm2, %v7561_v29 }
 0x2a3   : > { %v4847_v37 = vadd.f32 %v8673_v58, %v4715_v36  ;;  %6961 = vmatmul.msk.bf16.gmra.mxu2 %vm967_vm2, %v7625_v34  ;;  %7409 = vmatmul.msk.bf16.gmra.mxu3 %vm967_vm2, %v7689_v35 }
 0x2a5   : > { %v4975_v39 = vmax.f32 %v4847_v37, 0.0  ;;  %v7500_v37 = vld [vmem:[%s8349_s4 + $0x130] sm:$0xff] }
 0x2a6   : > { %v3379_v40 = vpop.f32.mrf.mxu2  ;;  %v4477_v41 = vpop.f32.mrf.mxu3 }
 0x2a7   : > { %v5103_v42 = vpack.c.bf16 %v4975_v39, %v4975_v39  ;;  %v3618_v43 = vmax.f32 %v2520_v38, %v3379_v40  ;;  %v1313_v44 = vpop.f32.mrf.mxu0  ;;  %v2283_v45 = vpop.f32.mrf.mxu1  ;;  %v7564_v38 = vld [vmem:[%s8349_s4 + $0x330] sm:$0xff] }
 0x2a8   : > { %v2521_v49 = vmax.f32 %v1313_v44, %v2283_v45  ;;  %v7692_v44 = vld [vmem:[%s8349_s4 + $0x730] sm:$0xff] }
 0x2a9   : > { %5232 = vst.msk [vmem:[%s8435_s26 + $0xd4] sm:$0xf] %vm5178_vm3, %v5103_v42  ;;  %v4716_v46 = vmax.f32 %v3618_v43, %v4477_v41  ;;  %v7628_v43 = vld [vmem:[%s8349_s4 + $0x530] sm:$0xff] }
 0x2ab   : > { %v4848_v47 = vadd.f32 %v8673_v58, %v4716_v46 }
 0x2ad   : > { %v4976_v48 = vmax.f32 %v4848_v47, 0.0 }
 0x2ae   : > { %v3381_v50 = vpop.f32.mrf.mxu2  ;;  %v4479_v51 = vpop.f32.mrf.mxu3 }
 0x2af   : > { %v5104_v54 = vpack.c.bf16 %v4976_v48, %v4976_v48  ;;  %v3619_v55 = vmax.f32 %v2521_v49, %v3381_v50  ;;  %v1316_v56 = vpop.f32.mrf.mxu0  ;;  %v2286_v57 = vpop.f32.mrf.mxu1 }
 0x2b0   : > { %v2522_v62 = vmax.f32 %v1316_v56, %v2286_v57 }
 0x2b1   : > { %5233 = vst.msk [vmem:[%s8435_s26 + $0xd8] sm:$0xf] %vm5178_vm3, %v5104_v54  ;;  %v4717_v60 = vmax.f32 %v3619_v55, %v4479_v51 }
 0x2b2   : > { %6066 = vmatmul.msk.bf16.gmra.mxu0 %vm967_vm2, %v7498_v52  ;;  %6514 = vmatmul.msk.bf16.gmra.mxu1 %vm967_vm2, %v7562_v53 }
 0x2b3   : > { %v4849_v61 = vadd.f32 %v8673_v58, %v4717_v60  ;;  %6962 = vmatmul.msk.bf16.gmra.mxu2 %vm967_vm2, %v7626_v25  ;;  %7410 = vmatmul.msk.bf16.gmra.mxu3 %vm967_vm2, %v7690_v59 }
 0x2b5   : > { %v4977_v63 = vmax.f32 %v4849_v61, 0.0  ;;  %v7501_v61 = vld [vmem:[%s8349_s4 + $0x138] sm:$0xff] }
 0x2b6   : > { %v3384_v0 = vpop.f32.mrf.mxu2  ;;  %v4482_v1 = vpop.f32.mrf.mxu3 }
 0x2b7   : > { %v5105_v2 = vpack.c.bf16 %v4977_v63, %v4977_v63  ;;  %v3620_v3 = vmax.f32 %v2522_v62, %v3384_v0  ;;  %v1318_v4 = vpop.f32.mrf.mxu0  ;;  %v2288_v5 = vpop.f32.mrf.mxu1  ;;  %v7565_v62 = vld [vmem:[%s8349_s4 + $0x338] sm:$0xff] }
 0x2b8   : > { %v2523_v9 = vmax.f32 %v1318_v4, %v2288_v5  ;;  %v7693_v4 = vld [vmem:[%s8349_s4 + $0x738] sm:$0xff] }
 0x2b9   : > { %5234 = vst.msk [vmem:[%s8435_s26 + $0xdc] sm:$0xf] %vm5178_vm3, %v5105_v2  ;;  %v4718_v6 = vmax.f32 %v3620_v3, %v4482_v1  ;;  %v7629_v3 = vld [vmem:[%s8349_s4 + $0x538] sm:$0xff] }
 0x2bb   : > { %v4850_v7 = vadd.f32 %v8673_v58, %v4718_v6 }
 0x2bd   : > { %v4978_v8 = vmax.f32 %v4850_v7, 0.0 }
 0x2be   : > { %v3386_v10 = vpop.f32.mrf.mxu2  ;;  %v4484_v11 = vpop.f32.mrf.mxu3 }
 0x2bf   : > { %v5106_v14 = vpack.c.bf16 %v4978_v8, %v4978_v8  ;;  %v3621_v15 = vmax.f32 %v2523_v9, %v3386_v10  ;;  %v1321_v16 = vpop.f32.mrf.mxu0  ;;  %v2291_v17 = vpop.f32.mrf.mxu1 }
 0x2c0   : > { %v2524_v22 = vmax.f32 %v1321_v16, %v2291_v17 }
 0x2c1   : > { %5235 = vst.msk [vmem:[%s8435_s26 + $0xe0] sm:$0xf] %vm5178_vm3, %v5106_v14  ;;  %v4719_v20 = vmax.f32 %v3621_v15, %v4484_v11 }
 0x2c2   : > { %6067 = vmatmul.msk.bf16.gmra.mxu0 %vm967_vm2, %v7499_v12  ;;  %6515 = vmatmul.msk.bf16.gmra.mxu1 %vm967_vm2, %v7563_v13 }
 0x2c3   : > { %v4851_v21 = vadd.f32 %v8673_v58, %v4719_v20  ;;  %6963 = vmatmul.msk.bf16.gmra.mxu2 %vm967_vm2, %v7627_v18  ;;  %7411 = vmatmul.msk.bf16.gmra.mxu3 %vm967_vm2, %v7691_v19 }
 0x2c5   : > { %v4979_v23 = vmax.f32 %v4851_v21, 0.0  ;;  %v7502_v21 = vld [vmem:[%s8349_s4 + $0x140] sm:$0xff] }
 0x2c6   : > { %v3389_v24 = vpop.f32.mrf.mxu2  ;;  %v4487_v26 = vpop.f32.mrf.mxu3 }
 0x2c7   : > { %v5107_v27 = vpack.c.bf16 %v4979_v23, %v4979_v23  ;;  %v3622_v28 = vmax.f32 %v2524_v22, %v3389_v24  ;;  %v1323_v29 = vpop.f32.mrf.mxu0  ;;  %v2293_v30 = vpop.f32.mrf.mxu1  ;;  %v7566_v22 = vld [vmem:[%s8349_s4 + $0x340] sm:$0xff] }
 0x2c8   : > { %v2525_v34 = vmax.f32 %v1323_v29, %v2293_v30  ;;  %v7694_v29 = vld [vmem:[%s8349_s4 + $0x740] sm:$0xff] }
 0x2c9   : > { %5236 = vst.msk [vmem:[%s8435_s26 + $0xe4] sm:$0xf] %vm5178_vm3, %v5107_v27  ;;  %v4720_v31 = vmax.f32 %v3622_v28, %v4487_v26  ;;  %v7630_v28 = vld [vmem:[%s8349_s4 + $0x540] sm:$0xff] }
 0x2cb   : > { %v4852_v32 = vadd.f32 %v8673_v58, %v4720_v31 }
 0x2cd   : > { %v4980_v33 = vmax.f32 %v4852_v32, 0.0 }
 0x2ce   : > { %v3391_v35 = vpop.f32.mrf.mxu2  ;;  %v4489_v36 = vpop.f32.mrf.mxu3 }
 0x2cf   : > { %v5108_v39 = vpack.c.bf16 %v4980_v33, %v4980_v33  ;;  %v3623_v40 = vmax.f32 %v2525_v34, %v3391_v35  ;;  %v1326_v41 = vpop.f32.mrf.mxu0  ;;  %v2296_v42 = vpop.f32.mrf.mxu1 }
 0x2d0   : > { %v2526_v47 = vmax.f32 %v1326_v41, %v2296_v42 }
 0x2d1   : > { %5237 = vst.msk [vmem:[%s8435_s26 + $0xe8] sm:$0xf] %vm5178_vm3, %v5108_v39  ;;  %v4721_v45 = vmax.f32 %v3623_v40, %v4489_v36 }
 0x2d2   : > { %6068 = vmatmul.msk.bf16.gmra.mxu0 %vm967_vm2, %v7500_v37  ;;  %6516 = vmatmul.msk.bf16.gmra.mxu1 %vm967_vm2, %v7564_v38 }
 0x2d3   : > { %v4853_v46 = vadd.f32 %v8673_v58, %v4721_v45  ;;  %6964 = vmatmul.msk.bf16.gmra.mxu2 %vm967_vm2, %v7628_v43  ;;  %7412 = vmatmul.msk.bf16.gmra.mxu3 %vm967_vm2, %v7692_v44 }
 0x2d5   : > { %v4981_v48 = vmax.f32 %v4853_v46, 0.0  ;;  %v7503_v46 = vld [vmem:[%s8349_s4 + $0x148] sm:$0xff] }
 0x2d6   : > { %v3394_v49 = vpop.f32.mrf.mxu2  ;;  %v4492_v50 = vpop.f32.mrf.mxu3 }
 0x2d7   : > { %v5109_v51 = vpack.c.bf16 %v4981_v48, %v4981_v48  ;;  %v3624_v52 = vmax.f32 %v2526_v47, %v3394_v49  ;;  %v1328_v53 = vpop.f32.mrf.mxu0  ;;  %v2298_v54 = vpop.f32.mrf.mxu1  ;;  %v7567_v47 = vld [vmem:[%s8349_s4 + $0x348] sm:$0xff] }
 0x2d8   : > { %v2527_v25 = vmax.f32 %v1328_v53, %v2298_v54  ;;  %v7695_v53 = vld [vmem:[%s8349_s4 + $0x748] sm:$0xff] }
 0x2d9   : > { %5238 = vst.msk [vmem:[%s8435_s26 + $0xec] sm:$0xf] %vm5178_vm3, %v5109_v51  ;;  %v4722_v55 = vmax.f32 %v3624_v52, %v4492_v50  ;;  %v7631_v52 = vld [vmem:[%s8349_s4 + $0x548] sm:$0xff] }
 0x2db   : > { %v4854_v56 = vadd.f32 %v8673_v58, %v4722_v55 }
 0x2dd   : > { %v4982_v57 = vmax.f32 %v4854_v56, 0.0 }
 0x2de   : > { %v3396_v59 = vpop.f32.mrf.mxu2  ;;  %v4494_v60 = vpop.f32.mrf.mxu3 }
 0x2df   : > { %v5110_v63 = vpack.c.bf16 %v4982_v57, %v4982_v57  ;;  %v3625_v0 = vmax.f32 %v2527_v25, %v3396_v59  ;;  %v1331_v1 = vpop.f32.mrf.mxu0  ;;  %v2301_v2 = vpop.f32.mrf.mxu1 }
 0x2e0   : > { %v2528_v7 = vmax.f32 %v1331_v1, %v2301_v2 }
 0x2e1   : > { %5239 = vst.msk [vmem:[%s8435_s26 + $0xf0] sm:$0xf] %vm5178_vm3, %v5110_v63  ;;  %v4723_v5 = vmax.f32 %v3625_v0, %v4494_v60 }
 0x2e2   : > { %6069 = vmatmul.msk.bf16.gmra.mxu0 %vm967_vm2, %v7501_v61  ;;  %6517 = vmatmul.msk.bf16.gmra.mxu1 %vm967_vm2, %v7565_v62 }
 0x2e3   : > { %v4855_v6 = vadd.f32 %v8673_v58, %v4723_v5  ;;  %6965 = vmatmul.msk.bf16.gmra.mxu2 %vm967_vm2, %v7629_v3  ;;  %7413 = vmatmul.msk.bf16.gmra.mxu3 %vm967_vm2, %v7693_v4 }
 0x2e5   : > { %v4983_v8 = vmax.f32 %v4855_v6, 0.0  ;;  %v7504_v6 = vld [vmem:[%s8349_s4 + $0x150] sm:$0xff] }
 0x2e6   : > { %v3399_v9 = vpop.f32.mrf.mxu2  ;;  %v4497_v10 = vpop.f32.mrf.mxu3 }
 0x2e7   : > { %v5111_v11 = vpack.c.bf16 %v4983_v8, %v4983_v8  ;;  %v3626_v12 = vmax.f32 %v2528_v7, %v3399_v9  ;;  %v1333_v13 = vpop.f32.mrf.mxu0  ;;  %v2303_v14 = vpop.f32.mrf.mxu1  ;;  %v7568_v7 = vld [vmem:[%s8349_s4 + $0x350] sm:$0xff] }
 0x2e8   : > { %v2529_v18 = vmax.f32 %v1333_v13, %v2303_v14  ;;  %v7696_v13 = vld [vmem:[%s8349_s4 + $0x750] sm:$0xff] }
 0x2e9   : > { %5240 = vst.msk [vmem:[%s8435_s26 + $0xf4] sm:$0xf] %vm5178_vm3, %v5111_v11  ;;  %v4724_v15 = vmax.f32 %v3626_v12, %v4497_v10  ;;  %v7632_v12 = vld [vmem:[%s8349_s4 + $0x550] sm:$0xff] }
 0x2eb   : > { %v4856_v16 = vadd.f32 %v8673_v58, %v4724_v15 }
 0x2ed   : > { %v4984_v17 = vmax.f32 %v4856_v16, 0.0 }
 0x2ee   : > { %v3401_v19 = vpop.f32.mrf.mxu2  ;;  %v4499_v20 = vpop.f32.mrf.mxu3 }
 0x2ef   : > { %v5112_v23 = vpack.c.bf16 %v4984_v17, %v4984_v17  ;;  %v3627_v24 = vmax.f32 %v2529_v18, %v3401_v19  ;;  %v1336_v26 = vpop.f32.mrf.mxu0  ;;  %v2306_v27 = vpop.f32.mrf.mxu1 }
 0x2f0   : > { %v2530_v32 = vmax.f32 %v1336_v26, %v2306_v27 }
 0x2f1   : > { %5241 = vst.msk [vmem:[%s8435_s26 + $0xf8] sm:$0xf] %vm5178_vm3, %v5112_v23  ;;  %v4725_v30 = vmax.f32 %v3627_v24, %v4499_v20 }
 0x2f2   : > { %6070 = vmatmul.msk.bf16.gmra.mxu0 %vm967_vm2, %v7502_v21  ;;  %6518 = vmatmul.msk.bf16.gmra.mxu1 %vm967_vm2, %v7566_v22 }
 0x2f3   : > { %v4857_v31 = vadd.f32 %v8673_v58, %v4725_v30  ;;  %6966 = vmatmul.msk.bf16.gmra.mxu2 %vm967_vm2, %v7630_v28  ;;  %7414 = vmatmul.msk.bf16.gmra.mxu3 %vm967_vm2, %v7694_v29 }
 0x2f5   : > { %v4985_v33 = vmax.f32 %v4857_v31, 0.0  ;;  %v7505_v31 = vld [vmem:[%s8349_s4 + $0x158] sm:$0xff] }
 0x2f6   : > { %v3404_v34 = vpop.f32.mrf.mxu2  ;;  %v4502_v35 = vpop.f32.mrf.mxu3 }
 0x2f7   : > { %v5113_v36 = vpack.c.bf16 %v4985_v33, %v4985_v33  ;;  %v3628_v37 = vmax.f32 %v2530_v32, %v3404_v34  ;;  %v1338_v38 = vpop.f32.mrf.mxu0  ;;  %v2308_v39 = vpop.f32.mrf.mxu1  ;;  %v7569_v32 = vld [vmem:[%s8349_s4 + $0x358] sm:$0xff] }
 0x2f8   : > { %v2531_v43 = vmax.f32 %v1338_v38, %v2308_v39  ;;  %v7697_v38 = vld [vmem:[%s8349_s4 + $0x758] sm:$0xff] }
 0x2f9   : > { %5242 = vst.msk [vmem:[%s8435_s26 + $0xfc] sm:$0xf] %vm5178_vm3, %v5113_v36  ;;  %v4726_v40 = vmax.f32 %v3628_v37, %v4502_v35  ;;  %v7633_v37 = vld [vmem:[%s8349_s4 + $0x558] sm:$0xff] }
 0x2fb   : > { %v4858_v41 = vadd.f32 %v8673_v58, %v4726_v40 }
 0x2fd   : > { %v4986_v42 = vmax.f32 %v4858_v41, 0.0 }
 0x2fe   : > { %v3406_v44 = vpop.f32.mrf.mxu2  ;;  %v4504_v45 = vpop.f32.mrf.mxu3 }
 0x2ff   : > { %v5114_v48 = vpack.c.bf16 %v4986_v42, %v4986_v42  ;;  %v3629_v49 = vmax.f32 %v2531_v43, %v3406_v44  ;;  %v1341_v50 = vpop.f32.mrf.mxu0  ;;  %v2311_v51 = vpop.f32.mrf.mxu1 }
 0x300   : > { %v2532_v56 = vmax.f32 %v1341_v50, %v2311_v51 }
 0x301   : > { %5243 = vst.msk [vmem:[%s8435_s26 + $0x100] sm:$0xf] %vm5178_vm3, %v5114_v48  ;;  %v4727_v54 = vmax.f32 %v3629_v49, %v4504_v45 }
 0x302   : > { %6071 = vmatmul.msk.bf16.gmra.mxu0 %vm967_vm2, %v7503_v46  ;;  %6519 = vmatmul.msk.bf16.gmra.mxu1 %vm967_vm2, %v7567_v47 }
 0x303   : > { %v4859_v55 = vadd.f32 %v8673_v58, %v4727_v54  ;;  %6967 = vmatmul.msk.bf16.gmra.mxu2 %vm967_vm2, %v7631_v52  ;;  %7415 = vmatmul.msk.bf16.gmra.mxu3 %vm967_vm2, %v7695_v53 }
 0x305   : > { %v4987_v57 = vmax.f32 %v4859_v55, 0.0  ;;  %v7506_v55 = vld [vmem:[%s8349_s4 + $0x160] sm:$0xff] }
 0x306   : > { %v3409_v25 = vpop.f32.mrf.mxu2  ;;  %v4507_v59 = vpop.f32.mrf.mxu3 }
 0x307   : > { %v5115_v60 = vpack.c.bf16 %v4987_v57, %v4987_v57  ;;  %v3630_v61 = vmax.f32 %v2532_v56, %v3409_v25  ;;  %v1343_v62 = vpop.f32.mrf.mxu0  ;;  %v2313_v63 = vpop.f32.mrf.mxu1  ;;  %v7570_v56 = vld [vmem:[%s8349_s4 + $0x360] sm:$0xff] }
 0x308   : > { %v2533_v3 = vmax.f32 %v1343_v62, %v2313_v63  ;;  %v7698_v62 = vld [vmem:[%s8349_s4 + $0x760] sm:$0xff] }
 0x309   : > { %5244 = vst.msk [vmem:[%s8435_s26 + $0x104] sm:$0xf] %vm5178_vm3, %v5115_v60  ;;  %v4728_v0 = vmax.f32 %v3630_v61, %v4507_v59  ;;  %v7634_v61 = vld [vmem:[%s8349_s4 + $0x560] sm:$0xff] }
 0x30b   : > { %v4860_v1 = vadd.f32 %v8673_v58, %v4728_v0 }
 0x30d   : > { %v4988_v2 = vmax.f32 %v4860_v1, 0.0 }
 0x30e   : > { %v3411_v4 = vpop.f32.mrf.mxu2  ;;  %v4509_v5 = vpop.f32.mrf.mxu3 }
 0x30f   : > { %v5116_v8 = vpack.c.bf16 %v4988_v2, %v4988_v2  ;;  %v3631_v9 = vmax.f32 %v2533_v3, %v3411_v4  ;;  %v1346_v10 = vpop.f32.mrf.mxu0  ;;  %v2316_v11 = vpop.f32.mrf.mxu1 }
 0x310   : > { %v2534_v16 = vmax.f32 %v1346_v10, %v2316_v11 }
 0x311   : > { %5245 = vst.msk [vmem:[%s8435_s26 + $0x108] sm:$0xf] %vm5178_vm3, %v5116_v8  ;;  %v4729_v14 = vmax.f32 %v3631_v9, %v4509_v5 }
 0x312   : > { %6072 = vmatmul.msk.bf16.gmra.mxu0 %vm967_vm2, %v7504_v6  ;;  %6520 = vmatmul.msk.bf16.gmra.mxu1 %vm967_vm2, %v7568_v7 }
 0x313   : > { %v4861_v15 = vadd.f32 %v8673_v58, %v4729_v14  ;;  %6968 = vmatmul.msk.bf16.gmra.mxu2 %vm967_vm2, %v7632_v12  ;;  %7416 = vmatmul.msk.bf16.gmra.mxu3 %vm967_vm2, %v7696_v13 }
 0x315   : > { %v4989_v17 = vmax.f32 %v4861_v15, 0.0  ;;  %v7507_v15 = vld [vmem:[%s8349_s4 + $0x168] sm:$0xff] }
 0x316   : > { %v3414_v18 = vpop.f32.mrf.mxu2  ;;  %v4512_v19 = vpop.f32.mrf.mxu3 }
 0x317   : > { %v5117_v20 = vpack.c.bf16 %v4989_v17, %v4989_v17  ;;  %v3632_v21 = vmax.f32 %v2534_v16, %v3414_v18  ;;  %v1348_v22 = vpop.f32.mrf.mxu0  ;;  %v2318_v23 = vpop.f32.mrf.mxu1  ;;  %v7571_v16 = vld [vmem:[%s8349_s4 + $0x368] sm:$0xff] }
 0x318   : > { %v2535_v28 = vmax.f32 %v1348_v22, %v2318_v23  ;;  %v7699_v22 = vld [vmem:[%s8349_s4 + $0x768] sm:$0xff] }
 0x319   : > { %5246 = vst.msk [vmem:[%s8435_s26 + $0x10c] sm:$0xf] %vm5178_vm3, %v5117_v20  ;;  %v4730_v24 = vmax.f32 %v3632_v21, %v4512_v19  ;;  %v7635_v21 = vld [vmem:[%s8349_s4 + $0x568] sm:$0xff] }
 0x31b   : > { %v4862_v26 = vadd.f32 %v8673_v58, %v4730_v24  ;;  %v8925_v58 = vld [vmem:[%s9426_s2] ss:$0 sm:$0xff] }
 0x31d   : > { %v4990_v27 = vmax.f32 %v4862_v26, 0.0 }
 0x31e   : > { %v3416_v29 = vpop.f32.mrf.mxu2  ;;  %v4514_v30 = vpop.f32.mrf.mxu3 }
 0x31f   : > { %v5118_v33 = vpack.c.bf16 %v4990_v27, %v4990_v27  ;;  %v3633_v34 = vmax.f32 %v2535_v28, %v3416_v29  ;;  %v1351_v35 = vpop.f32.mrf.mxu0  ;;  %v2321_v36 = vpop.f32.mrf.mxu1 }
 0x320   : > { %v2536_v41 = vmax.f32 %v1351_v35, %v2321_v36 }
 0x321   : > { %5247 = vst.msk [vmem:[%s8435_s26 + $0x110] sm:$0xf] %vm5178_vm3, %v5118_v33  ;;  %v4731_v39 = vmax.f32 %v3633_v34, %v4514_v30 }
 0x322   : > { %6073 = vmatmul.msk.bf16.gmra.mxu0 %vm967_vm2, %v7505_v31  ;;  %6521 = vmatmul.msk.bf16.gmra.mxu1 %vm967_vm2, %v7569_v32 }
 0x323   : > { %v4863_v40 = vadd.f32 %v8925_v58, %v4731_v39  ;;  %6969 = vmatmul.msk.bf16.gmra.mxu2 %vm967_vm2, %v7633_v37  ;;  %7417 = vmatmul.msk.bf16.gmra.mxu3 %vm967_vm2, %v7697_v38 }
 0x325   : > { %v4991_v42 = vmax.f32 %v4863_v40, 0.0  ;;  %v7508_v40 = vld [vmem:[%s8349_s4 + $0x170] sm:$0xff] }
 0x326   : > { %v3419_v43 = vpop.f32.mrf.mxu2  ;;  %v4517_v44 = vpop.f32.mrf.mxu3 }
 0x327   : > { %v5119_v45 = vpack.c.bf16 %v4991_v42, %v4991_v42  ;;  %v3634_v46 = vmax.f32 %v2536_v41, %v3419_v43  ;;  %v1353_v47 = vpop.f32.mrf.mxu0  ;;  %v2323_v48 = vpop.f32.mrf.mxu1  ;;  %v7572_v41 = vld [vmem:[%s8349_s4 + $0x370] sm:$0xff] }
 0x328   : > { %v2537_v52 = vmax.f32 %v1353_v47, %v2323_v48  ;;  %v7700_v47 = vld [vmem:[%s8349_s4 + $0x770] sm:$0xff] }
 0x329   : > { %5248 = vst.msk [vmem:[%s8435_s26 + $0x114] sm:$0xf] %vm5178_vm3, %v5119_v45  ;;  %v4732_v49 = vmax.f32 %v3634_v46, %v4517_v44  ;;  %v7636_v46 = vld [vmem:[%s8349_s4 + $0x570] sm:$0xff] }
 0x32b   : > { %v4864_v50 = vadd.f32 %v8925_v58, %v4732_v49 }
 0x32d   : > { %v4992_v51 = vmax.f32 %v4864_v50, 0.0 }
 0x32e   : > { %v3421_v53 = vpop.f32.mrf.mxu2  ;;  %v4519_v54 = vpop.f32.mrf.mxu3 }
 0x32f   : > { %v5120_v57 = vpack.c.bf16 %v4992_v51, %v4992_v51  ;;  %v3635_v25 = vmax.f32 %v2537_v52, %v3421_v53  ;;  %v1356_v59 = vpop.f32.mrf.mxu0  ;;  %v2326_v60 = vpop.f32.mrf.mxu1 }
 0x330   : > { %v2538_v1 = vmax.f32 %v1356_v59, %v2326_v60 }
 0x331   : > { %5249 = vst.msk [vmem:[%s8435_s26 + $0x118] sm:$0xf] %vm5178_vm3, %v5120_v57  ;;  %v4733_v63 = vmax.f32 %v3635_v25, %v4519_v54 }
 0x332   : > { %6074 = vmatmul.msk.bf16.gmra.mxu0 %vm967_vm2, %v7506_v55  ;;  %6522 = vmatmul.msk.bf16.gmra.mxu1 %vm967_vm2, %v7570_v56 }
 0x333   : > { %v4865_v0 = vadd.f32 %v8925_v58, %v4733_v63  ;;  %6970 = vmatmul.msk.bf16.gmra.mxu2 %vm967_vm2, %v7634_v61  ;;  %7418 = vmatmul.msk.bf16.gmra.mxu3 %vm967_vm2, %v7698_v62 }
 0x335   : > { %v4993_v2 = vmax.f32 %v4865_v0, 0.0  ;;  %v7509_v0 = vld [vmem:[%s8349_s4 + $0x178] sm:$0xff] }
 0x336   : > { %v3424_v3 = vpop.f32.mrf.mxu2  ;;  %v4522_v4 = vpop.f32.mrf.mxu3 }
 0x337   : > { %v5121_v5 = vpack.c.bf16 %v4993_v2, %v4993_v2  ;;  %v3636_v6 = vmax.f32 %v2538_v1, %v3424_v3  ;;  %v1358_v7 = vpop.f32.mrf.mxu0  ;;  %v2328_v8 = vpop.f32.mrf.mxu1  ;;  %v7573_v1 = vld [vmem:[%s8349_s4 + $0x378] sm:$0xff] }
 0x338   : > { %v2539_v12 = vmax.f32 %v1358_v7, %v2328_v8  ;;  %v7701_v7 = vld [vmem:[%s8349_s4 + $0x778] sm:$0xff] }
 0x339   : > { %5250 = vst.msk [vmem:[%s8435_s26 + $0x11c] sm:$0xf] %vm5178_vm3, %v5121_v5  ;;  %v4734_v9 = vmax.f32 %v3636_v6, %v4522_v4  ;;  %v7637_v6 = vld [vmem:[%s8349_s4 + $0x578] sm:$0xff] }
 0x33b   : > { %v4866_v10 = vadd.f32 %v8925_v58, %v4734_v9 }
 0x33d   : > { %v4994_v11 = vmax.f32 %v4866_v10, 0.0 }
 0x33e   : > { %v3426_v13 = vpop.f32.mrf.mxu2  ;;  %v4524_v14 = vpop.f32.mrf.mxu3 }
 0x33f   : > { %v5122_v17 = vpack.c.bf16 %v4994_v11, %v4994_v11  ;;  %v3637_v18 = vmax.f32 %v2539_v12, %v3426_v13  ;;  %v1361_v19 = vpop.f32.mrf.mxu0  ;;  %v2331_v20 = vpop.f32.mrf.mxu1 }
 0x340   : > { %v2540_v26 = vmax.f32 %v1361_v19, %v2331_v20 }
 0x341   : > { %5251 = vst.msk [vmem:[%s8435_s26 + $0x120] sm:$0xf] %vm5178_vm3, %v5122_v17  ;;  %v4735_v23 = vmax.f32 %v3637_v18, %v4524_v14 }
 0x342   : > { %6075 = vmatmul.msk.bf16.gmra.mxu0 %vm967_vm2, %v7507_v15  ;;  %6523 = vmatmul.msk.bf16.gmra.mxu1 %vm967_vm2, %v7571_v16 }
 0x343   : > { %v4867_v24 = vadd.f32 %v8925_v58, %v4735_v23  ;;  %6971 = vmatmul.msk.bf16.gmra.mxu2 %vm967_vm2, %v7635_v21  ;;  %7419 = vmatmul.msk.bf16.gmra.mxu3 %vm967_vm2, %v7699_v22 }
 0x345   : > { %v4995_v27 = vmax.f32 %v4867_v24, 0.0  ;;  %v7510_v24 = vld [vmem:[%s8349_s4 + $0x180] sm:$0xff] }
 0x346   : > { %v3429_v28 = vpop.f32.mrf.mxu2  ;;  %v4527_v29 = vpop.f32.mrf.mxu3 }
 0x347   : > { %v5123_v30 = vpack.c.bf16 %v4995_v27, %v4995_v27  ;;  %v3638_v31 = vmax.f32 %v2540_v26, %v3429_v28  ;;  %v1363_v32 = vpop.f32.mrf.mxu0  ;;  %v2333_v33 = vpop.f32.mrf.mxu1  ;;  %v7574_v26 = vld [vmem:[%s8349_s4 + $0x380] sm:$0xff] }
 0x348   : > { %v2541_v37 = vmax.f32 %v1363_v32, %v2333_v33  ;;  %v7702_v32 = vld [vmem:[%s8349_s4 + $0x780] sm:$0xff] }
 0x349   : > { %5252 = vst.msk [vmem:[%s8435_s26 + $0x124] sm:$0xf] %vm5178_vm3, %v5123_v30  ;;  %v4736_v34 = vmax.f32 %v3638_v31, %v4527_v29  ;;  %v7638_v31 = vld [vmem:[%s8349_s4 + $0x580] sm:$0xff] }
 0x34b   : > { %v4868_v35 = vadd.f32 %v8925_v58, %v4736_v34 }
 0x34d   : > { %v4996_v36 = vmax.f32 %v4868_v35, 0.0 }
 0x34e   : > { %v3431_v38 = vpop.f32.mrf.mxu2  ;;  %v4529_v39 = vpop.f32.mrf.mxu3 }
 0x34f   : > { %v5124_v42 = vpack.c.bf16 %v4996_v36, %v4996_v36  ;;  %v3639_v43 = vmax.f32 %v2541_v37, %v3431_v38  ;;  %v1366_v44 = vpop.f32.mrf.mxu0  ;;  %v2336_v45 = vpop.f32.mrf.mxu1 }
 0x350   : > { %v2542_v50 = vmax.f32 %v1366_v44, %v2336_v45 }
 0x351   : > { %5253 = vst.msk [vmem:[%s8435_s26 + $0x128] sm:$0xf] %vm5178_vm3, %v5124_v42  ;;  %v4737_v48 = vmax.f32 %v3639_v43, %v4529_v39 }
 0x352   : > { %6076 = vmatmul.msk.bf16.gmra.mxu0 %vm967_vm2, %v7508_v40  ;;  %6524 = vmatmul.msk.bf16.gmra.mxu1 %vm967_vm2, %v7572_v41 }
 0x353   : > { %v4869_v49 = vadd.f32 %v8925_v58, %v4737_v48  ;;  %6972 = vmatmul.msk.bf16.gmra.mxu2 %vm967_vm2, %v7636_v46  ;;  %7420 = vmatmul.msk.bf16.gmra.mxu3 %vm967_vm2, %v7700_v47 }
 0x355   : > { %v4997_v51 = vmax.f32 %v4869_v49, 0.0  ;;  %v7511_v49 = vld [vmem:[%s8349_s4 + $0x188] sm:$0xff] }
 0x356   : > { %v3434_v52 = vpop.f32.mrf.mxu2  ;;  %v4532_v53 = vpop.f32.mrf.mxu3 }
 0x357   : > { %v5125_v54 = vpack.c.bf16 %v4997_v51, %v4997_v51  ;;  %v3640_v55 = vmax.f32 %v2542_v50, %v3434_v52  ;;  %v1368_v56 = vpop.f32.mrf.mxu0  ;;  %v2338_v57 = vpop.f32.mrf.mxu1  ;;  %v7575_v50 = vld [vmem:[%s8349_s4 + $0x388] sm:$0xff] }
 0x358   : > { %v2543_v61 = vmax.f32 %v1368_v56, %v2338_v57  ;;  %v7703_v56 = vld [vmem:[%s8349_s4 + $0x788] sm:$0xff] }
 0x359   : > { %5254 = vst.msk [vmem:[%s8435_s26 + $0x12c] sm:$0xf] %vm5178_vm3, %v5125_v54  ;;  %v4738_v25 = vmax.f32 %v3640_v55, %v4532_v53  ;;  %v7639_v55 = vld [vmem:[%s8349_s4 + $0x588] sm:$0xff] }
 0x35b   : > { %v4870_v59 = vadd.f32 %v8925_v58, %v4738_v25 }
 0x35d   : > { %v4998_v60 = vmax.f32 %v4870_v59, 0.0 }
 0x35e   : > { %v3436_v62 = vpop.f32.mrf.mxu2  ;;  %v4534_v63 = vpop.f32.mrf.mxu3 }
 0x35f   : > { %v5126_v2 = vpack.c.bf16 %v4998_v60, %v4998_v60  ;;  %v3641_v3 = vmax.f32 %v2543_v61, %v3436_v62  ;;  %v1371_v4 = vpop.f32.mrf.mxu0  ;;  %v2341_v5 = vpop.f32.mrf.mxu1 }
 0x360   : > { %v2544_v10 = vmax.f32 %v1371_v4, %v2341_v5 }
 0x361   : > { %5255 = vst.msk [vmem:[%s8435_s26 + $0x130] sm:$0xf] %vm5178_vm3, %v5126_v2  ;;  %v4739_v8 = vmax.f32 %v3641_v3, %v4534_v63 }
 0x362   : > { %6077 = vmatmul.msk.bf16.gmra.mxu0 %vm967_vm2, %v7509_v0  ;;  %6525 = vmatmul.msk.bf16.gmra.mxu1 %vm967_vm2, %v7573_v1 }
 0x363   : > { %v4871_v9 = vadd.f32 %v8925_v58, %v4739_v8  ;;  %6973 = vmatmul.msk.bf16.gmra.mxu2 %vm967_vm2, %v7637_v6  ;;  %7421 = vmatmul.msk.bf16.gmra.mxu3 %vm967_vm2, %v7701_v7 }
 0x365   : > { %v4999_v11 = vmax.f32 %v4871_v9, 0.0  ;;  %v7512_v9 = vld [vmem:[%s8349_s4 + $0x190] sm:$0xff] }
 0x366   : > { %v3439_v12 = vpop.f32.mrf.mxu2  ;;  %v4537_v13 = vpop.f32.mrf.mxu3 }
 0x367   : > { %v5127_v14 = vpack.c.bf16 %v4999_v11, %v4999_v11  ;;  %v3642_v15 = vmax.f32 %v2544_v10, %v3439_v12  ;;  %v1373_v16 = vpop.f32.mrf.mxu0  ;;  %v2343_v17 = vpop.f32.mrf.mxu1  ;;  %v7576_v10 = vld [vmem:[%s8349_s4 + $0x390] sm:$0xff] }
 0x368   : > { %v2545_v21 = vmax.f32 %v1373_v16, %v2343_v17  ;;  %v7704_v16 = vld [vmem:[%s8349_s4 + $0x790] sm:$0xff] }
 0x369   : > { %5256 = vst.msk [vmem:[%s8435_s26 + $0x134] sm:$0xf] %vm5178_vm3, %v5127_v14  ;;  %v4740_v18 = vmax.f32 %v3642_v15, %v4537_v13  ;;  %v7640_v15 = vld [vmem:[%s8349_s4 + $0x590] sm:$0xff] }
 0x36b   : > { %v4872_v19 = vadd.f32 %v8925_v58, %v4740_v18 }
 0x36d   : > { %v5000_v20 = vmax.f32 %v4872_v19, 0.0 }
 0x36e   : > { %v3441_v22 = vpop.f32.mrf.mxu2  ;;  %v4539_v23 = vpop.f32.mrf.mxu3 }
 0x36f   : > { %v5128_v27 = vpack.c.bf16 %v5000_v20, %v5000_v20  ;;  %v3643_v28 = vmax.f32 %v2545_v21, %v3441_v22  ;;  %v1376_v29 = vpop.f32.mrf.mxu0  ;;  %v2346_v30 = vpop.f32.mrf.mxu1 }
 0x370   : > { %v2546_v35 = vmax.f32 %v1376_v29, %v2346_v30 }
 0x371   : > { %5257 = vst.msk [vmem:[%s8435_s26 + $0x138] sm:$0xf] %vm5178_vm3, %v5128_v27  ;;  %v4741_v33 = vmax.f32 %v3643_v28, %v4539_v23 }
 0x372   : > { %6078 = vmatmul.msk.bf16.gmra.mxu0 %vm967_vm2, %v7510_v24  ;;  %6526 = vmatmul.msk.bf16.gmra.mxu1 %vm967_vm2, %v7574_v26 }
 0x373   : > { %v4873_v34 = vadd.f32 %v8925_v58, %v4741_v33  ;;  %6974 = vmatmul.msk.bf16.gmra.mxu2 %vm967_vm2, %v7638_v31  ;;  %7422 = vmatmul.msk.bf16.gmra.mxu3 %vm967_vm2, %v7702_v32 }
 0x375   : > { %v5001_v36 = vmax.f32 %v4873_v34, 0.0  ;;  %v7513_v34 = vld [vmem:[%s8349_s4 + $0x198] sm:$0xff] }
 0x376   : > { %v3444_v37 = vpop.f32.mrf.mxu2  ;;  %v4542_v38 = vpop.f32.mrf.mxu3 }
 0x377   : > { %v5129_v39 = vpack.c.bf16 %v5001_v36, %v5001_v36  ;;  %v3644_v40 = vmax.f32 %v2546_v35, %v3444_v37  ;;  %v1378_v41 = vpop.f32.mrf.mxu0  ;;  %v2348_v42 = vpop.f32.mrf.mxu1  ;;  %v7577_v35 = vld [vmem:[%s8349_s4 + $0x398] sm:$0xff] }
 0x378   : > { %v2547_v46 = vmax.f32 %v1378_v41, %v2348_v42  ;;  %v7705_v41 = vld [vmem:[%s8349_s4 + $0x798] sm:$0xff] }
 0x379   : > { %5258 = vst.msk [vmem:[%s8435_s26 + $0x13c] sm:$0xf] %vm5178_vm3, %v5129_v39  ;;  %v4742_v43 = vmax.f32 %v3644_v40, %v4542_v38  ;;  %v7641_v40 = vld [vmem:[%s8349_s4 + $0x598] sm:$0xff] }
 0x37b   : > { %v4874_v44 = vadd.f32 %v8925_v58, %v4742_v43 }
 0x37d   : > { %v5002_v45 = vmax.f32 %v4874_v44, 0.0 }
 0x37e   : > { %v3446_v47 = vpop.f32.mrf.mxu2  ;;  %v4544_v48 = vpop.f32.mrf.mxu3 }
 0x37f   : > { %v5130_v51 = vpack.c.bf16 %v5002_v45, %v5002_v45  ;;  %v3645_v52 = vmax.f32 %v2547_v46, %v3446_v47  ;;  %v1381_v53 = vpop.f32.mrf.mxu0  ;;  %v2351_v54 = vpop.f32.mrf.mxu1 }
 0x380   : > { %v2548_v59 = vmax.f32 %v1381_v53, %v2351_v54 }
 0x381   : > { %5259 = vst.msk [vmem:[%s8435_s26 + $0x140] sm:$0xf] %vm5178_vm3, %v5130_v51  ;;  %v4743_v57 = vmax.f32 %v3645_v52, %v4544_v48 }
 0x382   : > { %6079 = vmatmul.msk.bf16.gmra.mxu0 %vm967_vm2, %v7511_v49  ;;  %6527 = vmatmul.msk.bf16.gmra.mxu1 %vm967_vm2, %v7575_v50 }
 0x383   : > { %v4875_v25 = vadd.f32 %v8925_v58, %v4743_v57  ;;  %6975 = vmatmul.msk.bf16.gmra.mxu2 %vm967_vm2, %v7639_v55  ;;  %7423 = vmatmul.msk.bf16.gmra.mxu3 %vm967_vm2, %v7703_v56 }
 0x385   : > { %v5003_v60 = vmax.f32 %v4875_v25, 0.0  ;;  %v7514_v25 = vld [vmem:[%s8349_s4 + $0x1a0] sm:$0xff] }
 0x386   : > { %v3449_v61 = vpop.f32.mrf.mxu2  ;;  %v4547_v62 = vpop.f32.mrf.mxu3 }
 0x387   : > { %v5131_v63 = vpack.c.bf16 %v5003_v60, %v5003_v60  ;;  %v3646_v0 = vmax.f32 %v2548_v59, %v3449_v61  ;;  %v1383_v1 = vpop.f32.mrf.mxu0  ;;  %v2353_v2 = vpop.f32.mrf.mxu1  ;;  %v7578_v59 = vld [vmem:[%s8349_s4 + $0x3a0] sm:$0xff] }
 0x388   : > { %v2549_v6 = vmax.f32 %v1383_v1, %v2353_v2  ;;  %v7706_v1 = vld [vmem:[%s8349_s4 + $0x7a0] sm:$0xff] }
 0x389   : > { %5260 = vst.msk [vmem:[%s8435_s26 + $0x144] sm:$0xf] %vm5178_vm3, %v5131_v63  ;;  %v4744_v3 = vmax.f32 %v3646_v0, %v4547_v62  ;;  %v7642_v0 = vld [vmem:[%s8349_s4 + $0x5a0] sm:$0xff] }
 0x38b   : > { %v4876_v4 = vadd.f32 %v8925_v58, %v4744_v3 }
 0x38d   : > { %v5004_v5 = vmax.f32 %v4876_v4, 0.0 }
 0x38e   : > { %v3451_v7 = vpop.f32.mrf.mxu2  ;;  %v4549_v8 = vpop.f32.mrf.mxu3 }
 0x38f   : > { %v5132_v11 = vpack.c.bf16 %v5004_v5, %v5004_v5  ;;  %v3647_v12 = vmax.f32 %v2549_v6, %v3451_v7  ;;  %v1386_v13 = vpop.f32.mrf.mxu0  ;;  %v2356_v14 = vpop.f32.mrf.mxu1 }
 0x390   : > { %v2550_v19 = vmax.f32 %v1386_v13, %v2356_v14 }
 0x391   : > { %5261 = vst.msk [vmem:[%s8435_s26 + $0x148] sm:$0xf] %vm5178_vm3, %v5132_v11  ;;  %v4745_v17 = vmax.f32 %v3647_v12, %v4549_v8 }
 0x392   : > { %6080 = vmatmul.msk.bf16.gmra.mxu0 %vm967_vm2, %v7512_v9  ;;  %6528 = vmatmul.msk.bf16.gmra.mxu1 %vm967_vm2, %v7576_v10 }
 0x393   : > { %v4877_v18 = vadd.f32 %v8925_v58, %v4745_v17  ;;  %6976 = vmatmul.msk.bf16.gmra.mxu2 %vm967_vm2, %v7640_v15  ;;  %7424 = vmatmul.msk.bf16.gmra.mxu3 %vm967_vm2, %v7704_v16 }
 0x395   : > { %v5005_v20 = vmax.f32 %v4877_v18, 0.0  ;;  %v7515_v18 = vld [vmem:[%s8349_s4 + $0x1a8] sm:$0xff] }
 0x396   : > { %v3454_v21 = vpop.f32.mrf.mxu2  ;;  %v4552_v22 = vpop.f32.mrf.mxu3 }
 0x397   : > { %v5133_v23 = vpack.c.bf16 %v5005_v20, %v5005_v20  ;;  %v3648_v24 = vmax.f32 %v2550_v19, %v3454_v21  ;;  %v1388_v26 = vpop.f32.mrf.mxu0  ;;  %v2358_v27 = vpop.f32.mrf.mxu1  ;;  %v7579_v19 = vld [vmem:[%s8349_s4 + $0x3a8] sm:$0xff] }
 0x398   : > { %v2551_v31 = vmax.f32 %v1388_v26, %v2358_v27  ;;  %v7707_v26 = vld [vmem:[%s8349_s4 + $0x7a8] sm:$0xff] }
 0x399   : > { %5262 = vst.msk [vmem:[%s8435_s26 + $0x14c] sm:$0xf] %vm5178_vm3, %v5133_v23  ;;  %v4746_v28 = vmax.f32 %v3648_v24, %v4552_v22  ;;  %v7643_v24 = vld [vmem:[%s8349_s4 + $0x5a8] sm:$0xff] }
 0x39b   : > { %v4878_v29 = vadd.f32 %v8925_v58, %v4746_v28 }
 0x39d   : > { %v5006_v30 = vmax.f32 %v4878_v29, 0.0 }
 0x39e   : > { %v3456_v32 = vpop.f32.mrf.mxu2  ;;  %v4554_v33 = vpop.f32.mrf.mxu3 }
 0x39f   : > { %v5134_v36 = vpack.c.bf16 %v5006_v30, %v5006_v30  ;;  %v3649_v37 = vmax.f32 %v2551_v31, %v3456_v32  ;;  %v1391_v38 = vpop.f32.mrf.mxu0  ;;  %v2361_v39 = vpop.f32.mrf.mxu1 }
 0x3a0   : > { %v2552_v44 = vmax.f32 %v1391_v38, %v2361_v39 }
 0x3a1   : > { %5263 = vst.msk [vmem:[%s8435_s26 + $0x150] sm:$0xf] %vm5178_vm3, %v5134_v36  ;;  %v4747_v42 = vmax.f32 %v3649_v37, %v4554_v33 }
 0x3a2   : > { %6081 = vmatmul.msk.bf16.gmra.mxu0 %vm967_vm2, %v7513_v34  ;;  %6529 = vmatmul.msk.bf16.gmra.mxu1 %vm967_vm2, %v7577_v35 }
 0x3a3   : > { %v4879_v43 = vadd.f32 %v8925_v58, %v4747_v42  ;;  %6977 = vmatmul.msk.bf16.gmra.mxu2 %vm967_vm2, %v7641_v40  ;;  %7425 = vmatmul.msk.bf16.gmra.mxu3 %vm967_vm2, %v7705_v41 }
 0x3a5   : > { %v5007_v45 = vmax.f32 %v4879_v43, 0.0  ;;  %v7516_v43 = vld [vmem:[%s8349_s4 + $0x1b0] sm:$0xff] }
 0x3a6   : > { %v3459_v46 = vpop.f32.mrf.mxu2  ;;  %v4557_v47 = vpop.f32.mrf.mxu3 }
 0x3a7   : > { %v5135_v48 = vpack.c.bf16 %v5007_v45, %v5007_v45  ;;  %v3650_v49 = vmax.f32 %v2552_v44, %v3459_v46  ;;  %v1393_v50 = vpop.f32.mrf.mxu0  ;;  %v2363_v51 = vpop.f32.mrf.mxu1  ;;  %v7580_v44 = vld [vmem:[%s8349_s4 + $0x3b0] sm:$0xff] }
 0x3a8   : > { %v2553_v55 = vmax.f32 %v1393_v50, %v2363_v51  ;;  %v7708_v50 = vld [vmem:[%s8349_s4 + $0x7b0] sm:$0xff] }
 0x3a9   : > { %5264 = vst.msk [vmem:[%s8435_s26 + $0x154] sm:$0xf] %vm5178_vm3, %v5135_v48  ;;  %v4748_v52 = vmax.f32 %v3650_v49, %v4557_v47  ;;  %v7644_v49 = vld [vmem:[%s8349_s4 + $0x5b0] sm:$0xff] }
 0x3ab   : > { %v4880_v53 = vadd.f32 %v8925_v58, %v4748_v52 }
 0x3ad   : > { %v5008_v54 = vmax.f32 %v4880_v53, 0.0 }
 0x3ae   : > { %v3461_v56 = vpop.f32.mrf.mxu2  ;;  %v4559_v57 = vpop.f32.mrf.mxu3 }
 0x3af   : > { %v5136_v60 = vpack.c.bf16 %v5008_v54, %v5008_v54  ;;  %v3651_v61 = vmax.f32 %v2553_v55, %v3461_v56  ;;  %v1396_v62 = vpop.f32.mrf.mxu0  ;;  %v2366_v63 = vpop.f32.mrf.mxu1 }
 0x3b0   : > { %v2554_v4 = vmax.f32 %v1396_v62, %v2366_v63 }
 0x3b1   : > { %5265 = vst.msk [vmem:[%s8435_s26 + $0x158] sm:$0xf] %vm5178_vm3, %v5136_v60  ;;  %v4749_v2 = vmax.f32 %v3651_v61, %v4559_v57 }
 0x3b2   : > { %6082 = vmatmul.msk.bf16.gmra.mxu0 %vm967_vm2, %v7514_v25  ;;  %6530 = vmatmul.msk.bf16.gmra.mxu1 %vm967_vm2, %v7578_v59 }
 0x3b3   : > { %v4881_v3 = vadd.f32 %v8925_v58, %v4749_v2  ;;  %6978 = vmatmul.msk.bf16.gmra.mxu2 %vm967_vm2, %v7642_v0  ;;  %7426 = vmatmul.msk.bf16.gmra.mxu3 %vm967_vm2, %v7706_v1 }
 0x3b5   : > { %v5009_v5 = vmax.f32 %v4881_v3, 0.0  ;;  %v7517_v3 = vld [vmem:[%s8349_s4 + $0x1b8] sm:$0xff] }
 0x3b6   : > { %v3464_v6 = vpop.f32.mrf.mxu2  ;;  %v4562_v7 = vpop.f32.mrf.mxu3 }
 0x3b7   : > { %v5137_v8 = vpack.c.bf16 %v5009_v5, %v5009_v5  ;;  %v3652_v9 = vmax.f32 %v2554_v4, %v3464_v6  ;;  %v1398_v10 = vpop.f32.mrf.mxu0  ;;  %v2368_v11 = vpop.f32.mrf.mxu1  ;;  %v7581_v4 = vld [vmem:[%s8349_s4 + $0x3b8] sm:$0xff] }
 0x3b8   : > { %v2555_v15 = vmax.f32 %v1398_v10, %v2368_v11  ;;  %v7709_v10 = vld [vmem:[%s8349_s4 + $0x7b8] sm:$0xff] }
 0x3b9   : > { %5266 = vst.msk [vmem:[%s8435_s26 + $0x15c] sm:$0xf] %vm5178_vm3, %v5137_v8  ;;  %v4750_v12 = vmax.f32 %v3652_v9, %v4562_v7  ;;  %v7645_v9 = vld [vmem:[%s8349_s4 + $0x5b8] sm:$0xff] }
 0x3bb   : > { %v4882_v13 = vadd.f32 %v8925_v58, %v4750_v12 }
 0x3bd   : > { %v5010_v14 = vmax.f32 %v4882_v13, 0.0 }
 0x3be   : > { %v3466_v16 = vpop.f32.mrf.mxu2  ;;  %v4564_v17 = vpop.f32.mrf.mxu3 }
 0x3bf   : > { %v5138_v20 = vpack.c.bf16 %v5010_v14, %v5010_v14  ;;  %v3653_v21 = vmax.f32 %v2555_v15, %v3466_v16  ;;  %v1401_v22 = vpop.f32.mrf.mxu0  ;;  %v2371_v23 = vpop.f32.mrf.mxu1 }
 0x3c0   : > { %v2556_v29 = vmax.f32 %v1401_v22, %v2371_v23 }
 0x3c1   : > { %5267 = vst.msk [vmem:[%s8435_s26 + $0x160] sm:$0xf] %vm5178_vm3, %v5138_v20  ;;  %v4751_v27 = vmax.f32 %v3653_v21, %v4564_v17 }
 0x3c2   : > { %6083 = vmatmul.msk.bf16.gmra.mxu0 %vm967_vm2, %v7515_v18  ;;  %6531 = vmatmul.msk.bf16.gmra.mxu1 %vm967_vm2, %v7579_v19 }
 0x3c3   : > { %v4883_v28 = vadd.f32 %v8925_v58, %v4751_v27  ;;  %6979 = vmatmul.msk.bf16.gmra.mxu2 %vm967_vm2, %v7643_v24  ;;  %7427 = vmatmul.msk.bf16.gmra.mxu3 %vm967_vm2, %v7707_v26 }
 0x3c5   : > { %v5011_v30 = vmax.f32 %v4883_v28, 0.0  ;;  %v7518_v28 = vld [vmem:[%s8349_s4 + $0x1c0] sm:$0xff] }
 0x3c6   : > { %v3469_v31 = vpop.f32.mrf.mxu2  ;;  %v4567_v32 = vpop.f32.mrf.mxu3 }
 0x3c7   : > { %v5139_v33 = vpack.c.bf16 %v5011_v30, %v5011_v30  ;;  %v3654_v34 = vmax.f32 %v2556_v29, %v3469_v31  ;;  %v1403_v35 = vpop.f32.mrf.mxu0  ;;  %v2373_v36 = vpop.f32.mrf.mxu1  ;;  %v7582_v29 = vld [vmem:[%s8349_s4 + $0x3c0] sm:$0xff] }
 0x3c8   : > { %v2557_v40 = vmax.f32 %v1403_v35, %v2373_v36  ;;  %v7710_v35 = vld [vmem:[%s8349_s4 + $0x7c0] sm:$0xff] }
 0x3c9   : > { %5268 = vst.msk [vmem:[%s8435_s26 + $0x164] sm:$0xf] %vm5178_vm3, %v5139_v33  ;;  %v4752_v37 = vmax.f32 %v3654_v34, %v4567_v32  ;;  %v7646_v34 = vld [vmem:[%s8349_s4 + $0x5c0] sm:$0xff] }
 0x3cb   : > { %v4884_v38 = vadd.f32 %v8925_v58, %v4752_v37 }
 0x3cd   : > { %v5012_v39 = vmax.f32 %v4884_v38, 0.0 }
 0x3ce   : > { %v3471_v41 = vpop.f32.mrf.mxu2  ;;  %v4569_v42 = vpop.f32.mrf.mxu3 }
 0x3cf   : > { %v5140_v45 = vpack.c.bf16 %v5012_v39, %v5012_v39  ;;  %v3655_v46 = vmax.f32 %v2557_v40, %v3471_v41  ;;  %v1406_v47 = vpop.f32.mrf.mxu0  ;;  %v2376_v48 = vpop.f32.mrf.mxu1 }
 0x3d0   : > { %v2558_v53 = vmax.f32 %v1406_v47, %v2376_v48 }
 0x3d1   : > { %5269 = vst.msk [vmem:[%s8435_s26 + $0x168] sm:$0xf] %vm5178_vm3, %v5140_v45  ;;  %v4753_v51 = vmax.f32 %v3655_v46, %v4569_v42 }
 0x3d2   : > { %6084 = vmatmul.msk.bf16.gmra.mxu0 %vm967_vm2, %v7516_v43  ;;  %6532 = vmatmul.msk.bf16.gmra.mxu1 %vm967_vm2, %v7580_v44 }
 0x3d3   : > { %v4885_v52 = vadd.f32 %v8925_v58, %v4753_v51  ;;  %6980 = vmatmul.msk.bf16.gmra.mxu2 %vm967_vm2, %v7644_v49  ;;  %7428 = vmatmul.msk.bf16.gmra.mxu3 %vm967_vm2, %v7708_v50 }
 0x3d5   : > { %v5013_v54 = vmax.f32 %v4885_v52, 0.0  ;;  %v7519_v52 = vld [vmem:[%s8349_s4 + $0x1c8] sm:$0xff] }
 0x3d6   : > { %v3474_v55 = vpop.f32.mrf.mxu2  ;;  %v4572_v56 = vpop.f32.mrf.mxu3 }
 0x3d7   : > { %v5141_v57 = vpack.c.bf16 %v5013_v54, %v5013_v54  ;;  %v3656_v25 = vmax.f32 %v2558_v53, %v3474_v55  ;;  %v1408_v59 = vpop.f32.mrf.mxu0  ;;  %v2378_v60 = vpop.f32.mrf.mxu1  ;;  %v7583_v53 = vld [vmem:[%s8349_s4 + $0x3c8] sm:$0xff] }
 0x3d8   : > { %v2559_v0 = vmax.f32 %v1408_v59, %v2378_v60  ;;  %v7711_v59 = vld [vmem:[%s8349_s4 + $0x7c8] sm:$0xff] }
 0x3d9   : > { %5270 = vst.msk [vmem:[%s8435_s26 + $0x16c] sm:$0xf] %vm5178_vm3, %v5141_v57  ;;  %v4754_v61 = vmax.f32 %v3656_v25, %v4572_v56  ;;  %v7647_v25 = vld [vmem:[%s8349_s4 + $0x5c8] sm:$0xff] }
 0x3db   : > { %v4886_v62 = vadd.f32 %v8925_v58, %v4754_v61 }
 0x3dd   : > { %v5014_v63 = vmax.f32 %v4886_v62, 0.0 }
 0x3de   : > { %v3476_v1 = vpop.f32.mrf.mxu2  ;;  %v4574_v2 = vpop.f32.mrf.mxu3 }
 0x3df   : > { %v5142_v5 = vpack.c.bf16 %v5014_v63, %v5014_v63  ;;  %v3657_v6 = vmax.f32 %v2559_v0, %v3476_v1  ;;  %v1411_v7 = vpop.f32.mrf.mxu0  ;;  %v2381_v8 = vpop.f32.mrf.mxu1 }
 0x3e0   : > { %v2560_v13 = vmax.f32 %v1411_v7, %v2381_v8 }
 0x3e1   : > { %5271 = vst.msk [vmem:[%s8435_s26 + $0x170] sm:$0xf] %vm5178_vm3, %v5142_v5  ;;  %v4755_v11 = vmax.f32 %v3657_v6, %v4574_v2 }
 0x3e2   : > { %6085 = vmatmul.msk.bf16.gmra.mxu0 %vm967_vm2, %v7517_v3  ;;  %6533 = vmatmul.msk.bf16.gmra.mxu1 %vm967_vm2, %v7581_v4 }
 0x3e3   : > { %v4887_v12 = vadd.f32 %v8925_v58, %v4755_v11  ;;  %6981 = vmatmul.msk.bf16.gmra.mxu2 %vm967_vm2, %v7645_v9  ;;  %7429 = vmatmul.msk.bf16.gmra.mxu3 %vm967_vm2, %v7709_v10 }
 0x3e5   : > { %v5015_v14 = vmax.f32 %v4887_v12, 0.0  ;;  %v7520_v12 = vld [vmem:[%s8349_s4 + $0x1d0] sm:$0xff] }
 0x3e6   : > { %v3479_v15 = vpop.f32.mrf.mxu2  ;;  %v4577_v16 = vpop.f32.mrf.mxu3 }
 0x3e7   : > { %v5143_v17 = vpack.c.bf16 %v5015_v14, %v5015_v14  ;;  %v3658_v18 = vmax.f32 %v2560_v13, %v3479_v15  ;;  %v1413_v19 = vpop.f32.mrf.mxu0  ;;  %v2383_v20 = vpop.f32.mrf.mxu1  ;;  %v7584_v13 = vld [vmem:[%s8349_s4 + $0x3d0] sm:$0xff] }
 0x3e8   : > { %v2561_v24 = vmax.f32 %v1413_v19, %v2383_v20  ;;  %v7712_v19 = vld [vmem:[%s8349_s4 + $0x7d0] sm:$0xff] }
 0x3e9   : > { %5272 = vst.msk [vmem:[%s8435_s26 + $0x174] sm:$0xf] %vm5178_vm3, %v5143_v17  ;;  %v4756_v21 = vmax.f32 %v3658_v18, %v4577_v16  ;;  %v7648_v18 = vld [vmem:[%s8349_s4 + $0x5d0] sm:$0xff] }
 0x3eb   : > { %v4888_v22 = vadd.f32 %v8925_v58, %v4756_v21 }
 0x3ed   : > { %v5016_v23 = vmax.f32 %v4888_v22, 0.0 }
 0x3ee   : > { %v3481_v26 = vpop.f32.mrf.mxu2  ;;  %v4579_v27 = vpop.f32.mrf.mxu3 }
 0x3ef   : > { %v5144_v30 = vpack.c.bf16 %v5016_v23, %v5016_v23  ;;  %v3659_v31 = vmax.f32 %v2561_v24, %v3481_v26  ;;  %v1416_v32 = vpop.f32.mrf.mxu0  ;;  %v2386_v33 = vpop.f32.mrf.mxu1 }
 0x3f0   : > { %v2562_v38 = vmax.f32 %v1416_v32, %v2386_v33 }
 0x3f1   : > { %5273 = vst.msk [vmem:[%s8435_s26 + $0x178] sm:$0xf] %vm5178_vm3, %v5144_v30  ;;  %v4757_v36 = vmax.f32 %v3659_v31, %v4579_v27 }
 0x3f2   : > { %6086 = vmatmul.msk.bf16.gmra.mxu0 %vm967_vm2, %v7518_v28  ;;  %6534 = vmatmul.msk.bf16.gmra.mxu1 %vm967_vm2, %v7582_v29 }
 0x3f3   : > { %v4889_v37 = vadd.f32 %v8925_v58, %v4757_v36  ;;  %6982 = vmatmul.msk.bf16.gmra.mxu2 %vm967_vm2, %v7646_v34  ;;  %7430 = vmatmul.msk.bf16.gmra.mxu3 %vm967_vm2, %v7710_v35 }
 0x3f5   : > { %v5017_v39 = vmax.f32 %v4889_v37, 0.0  ;;  %v7521_v37 = vld [vmem:[%s8349_s4 + $0x1d8] sm:$0xff] }
 0x3f6   : > { %v3484_v40 = vpop.f32.mrf.mxu2  ;;  %v4582_v41 = vpop.f32.mrf.mxu3 }
 0x3f7   : > { %v5145_v42 = vpack.c.bf16 %v5017_v39, %v5017_v39  ;;  %v3660_v43 = vmax.f32 %v2562_v38, %v3484_v40  ;;  %v1418_v44 = vpop.f32.mrf.mxu0  ;;  %v2388_v45 = vpop.f32.mrf.mxu1  ;;  %v7585_v38 = vld [vmem:[%s8349_s4 + $0x3d8] sm:$0xff] }
 0x3f8   : > { %v2563_v49 = vmax.f32 %v1418_v44, %v2388_v45  ;;  %v7713_v44 = vld [vmem:[%s8349_s4 + $0x7d8] sm:$0xff] }
 0x3f9   : > { %5274 = vst.msk [vmem:[%s8435_s26 + $0x17c] sm:$0xf] %vm5178_vm3, %v5145_v42  ;;  %v4758_v46 = vmax.f32 %v3660_v43, %v4582_v41  ;;  %v7649_v43 = vld [vmem:[%s8349_s4 + $0x5d8] sm:$0xff] }
 0x3fb   : > { %v4890_v47 = vadd.f32 %v8925_v58, %v4758_v46 }
 0x3fd   : > { %v5018_v48 = vmax.f32 %v4890_v47, 0.0 }
 0x3fe   : > { %v3486_v50 = vpop.f32.mrf.mxu2  ;;  %v4584_v51 = vpop.f32.mrf.mxu3 }
 0x3ff   : > { %v5146_v54 = vpack.c.bf16 %v5018_v48, %v5018_v48  ;;  %v3661_v55 = vmax.f32 %v2563_v49, %v3486_v50  ;;  %v1421_v56 = vpop.f32.mrf.mxu0  ;;  %v2391_v57 = vpop.f32.mrf.mxu1 }
 0x400   : > { %v2564_v62 = vmax.f32 %v1421_v56, %v2391_v57 }
 0x401   : > { %5275 = vst.msk [vmem:[%s8435_s26 + $0x180] sm:$0xf] %vm5178_vm3, %v5146_v54  ;;  %v4759_v60 = vmax.f32 %v3661_v55, %v4584_v51 }
 0x402   : > { %6087 = vmatmul.msk.bf16.gmra.mxu0 %vm967_vm2, %v7519_v52  ;;  %6535 = vmatmul.msk.bf16.gmra.mxu1 %vm967_vm2, %v7583_v53 }
 0x403   : > { %v4891_v61 = vadd.f32 %v8925_v58, %v4759_v60  ;;  %6983 = vmatmul.msk.bf16.gmra.mxu2 %vm967_vm2, %v7647_v25  ;;  %7431 = vmatmul.msk.bf16.gmra.mxu3 %vm967_vm2, %v7711_v59 }
 0x405   : > { %v5019_v63 = vmax.f32 %v4891_v61, 0.0  ;;  %v7522_v61 = vld [vmem:[%s8349_s4 + $0x1e0] sm:$0xff] }
 0x406   : > { %v3489_v0 = vpop.f32.mrf.mxu2  ;;  %v4587_v1 = vpop.f32.mrf.mxu3 }
 0x407   : > { %v5147_v2 = vpack.c.bf16 %v5019_v63, %v5019_v63  ;;  %v3662_v3 = vmax.f32 %v2564_v62, %v3489_v0  ;;  %v1423_v4 = vpop.f32.mrf.mxu0  ;;  %v2393_v5 = vpop.f32.mrf.mxu1  ;;  %v7586_v62 = vld [vmem:[%s8349_s4 + $0x3e0] sm:$0xff] }
 0x408   : > { %v2565_v9 = vmax.f32 %v1423_v4, %v2393_v5  ;;  %v7714_v4 = vld [vmem:[%s8349_s4 + $0x7e0] sm:$0xff] }
 0x409   : > { %5276 = vst.msk [vmem:[%s8435_s26 + $0x184] sm:$0xf] %vm5178_vm3, %v5147_v2  ;;  %v4760_v6 = vmax.f32 %v3662_v3, %v4587_v1  ;;  %v7650_v3 = vld [vmem:[%s8349_s4 + $0x5e0] sm:$0xff] }
 0x40b   : > { %v4892_v7 = vadd.f32 %v8925_v58, %v4760_v6 }
 0x40d   : > { %v5020_v8 = vmax.f32 %v4892_v7, 0.0 }
 0x40e   : > { %v3491_v10 = vpop.f32.mrf.mxu2  ;;  %v4589_v11 = vpop.f32.mrf.mxu3 }
 0x40f   : > { %v5148_v14 = vpack.c.bf16 %v5020_v8, %v5020_v8  ;;  %v3663_v15 = vmax.f32 %v2565_v9, %v3491_v10  ;;  %v1426_v16 = vpop.f32.mrf.mxu0  ;;  %v2396_v17 = vpop.f32.mrf.mxu1 }
 0x410   : > { %v2566_v22 = vmax.f32 %v1426_v16, %v2396_v17 }
 0x411   : > { %5277 = vst.msk [vmem:[%s8435_s26 + $0x188] sm:$0xf] %vm5178_vm3, %v5148_v14  ;;  %v4761_v20 = vmax.f32 %v3663_v15, %v4589_v11  ;;  %v9173_v15 = vld [vmem:[%s9426_s2] ss:$0 sm:$0xff] }
 0x412   : > { %6088 = vmatmul.msk.bf16.gmra.mxu0 %vm967_vm2, %v7520_v12  ;;  %6536 = vmatmul.msk.bf16.gmra.mxu1 %vm967_vm2, %v7584_v13 }
 0x413   : > { %v4893_v21 = vadd.f32 %v8925_v58, %v4761_v20  ;;  %6984 = vmatmul.msk.bf16.gmra.mxu2 %vm967_vm2, %v7648_v18  ;;  %7432 = vmatmul.msk.bf16.gmra.mxu3 %vm967_vm2, %v7712_v19 }
 0x415   : > { %v5021_v23 = vmax.f32 %v4893_v21, 0.0  ;;  %v7523_v21 = vld [vmem:[%s8349_s4 + $0x1e8] sm:$0xff] }
 0x416   : > { %v3494_v24 = vpop.f32.mrf.mxu2  ;;  %v4592_v26 = vpop.f32.mrf.mxu3 }
 0x417   : > { %v5149_v27 = vpack.c.bf16 %v5021_v23, %v5021_v23  ;;  %v3664_v28 = vmax.f32 %v2566_v22, %v3494_v24  ;;  %v1428_v29 = vpop.f32.mrf.mxu0  ;;  %v2398_v30 = vpop.f32.mrf.mxu1  ;;  %v7587_v22 = vld [vmem:[%s8349_s4 + $0x3e8] sm:$0xff] }
 0x418   : > { %v2567_v34 = vmax.f32 %v1428_v29, %v2398_v30  ;;  %v7715_v29 = vld [vmem:[%s8349_s4 + $0x7e8] sm:$0xff] }
 0x419   : > { %5278 = vst.msk [vmem:[%s8435_s26 + $0x18c] sm:$0xf] %vm5178_vm3, %v5149_v27  ;;  %v4762_v31 = vmax.f32 %v3664_v28, %v4592_v26  ;;  %v7651_v28 = vld [vmem:[%s8349_s4 + $0x5e8] sm:$0xff] }
 0x41b   : > { %v4894_v32 = vadd.f32 %v8925_v58, %v4762_v31 }
 0x41d   : > { %v5022_v33 = vmax.f32 %v4894_v32, 0.0 }
 0x41e   : > { %v3496_v35 = vpop.f32.mrf.mxu2  ;;  %v4594_v36 = vpop.f32.mrf.mxu3 }
 0x41f   : > { %v5150_v39 = vpack.c.bf16 %v5022_v33, %v5022_v33  ;;  %v3665_v40 = vmax.f32 %v2567_v34, %v3496_v35  ;;  %v1431_v41 = vpop.f32.mrf.mxu0  ;;  %v2401_v42 = vpop.f32.mrf.mxu1 }
 0x420   : > { %v2568_v47 = vmax.f32 %v1431_v41, %v2401_v42 }
 0x421   : > { %5279 = vst.msk [vmem:[%s8435_s26 + $0x190] sm:$0xf] %vm5178_vm3, %v5150_v39  ;;  %v4763_v45 = vmax.f32 %v3665_v40, %v4594_v36 }
 0x422   : > { %6089 = vmatmul.msk.bf16.gmra.mxu0 %vm967_vm2, %v7521_v37  ;;  %6537 = vmatmul.msk.bf16.gmra.mxu1 %vm967_vm2, %v7585_v38 }
 0x423   : > { %v4895_v46 = vadd.f32 %v8925_v58, %v4763_v45  ;;  %6985 = vmatmul.msk.bf16.gmra.mxu2 %vm967_vm2, %v7649_v43  ;;  %7433 = vmatmul.msk.bf16.gmra.mxu3 %vm967_vm2, %v7713_v44 }
 0x425   : > { %v5023_v48 = vmax.f32 %v4895_v46, 0.0  ;;  %v7524_v46 = vld [vmem:[%s8349_s4 + $0x1f0] sm:$0xff] }
 0x426   : > { %v3499_v49 = vpop.f32.mrf.mxu2  ;;  %v4597_v50 = vpop.f32.mrf.mxu3 }
 0x427   : > { %v5151_v51 = vpack.c.bf16 %v5023_v48, %v5023_v48  ;;  %v3666_v52 = vmax.f32 %v2568_v47, %v3499_v49  ;;  %v1433_v53 = vpop.f32.mrf.mxu0  ;;  %v2403_v54 = vpop.f32.mrf.mxu1  ;;  %v7588_v47 = vld [vmem:[%s8349_s4 + $0x3f0] sm:$0xff] }
 0x428   : > { %v2569_v25 = vmax.f32 %v1433_v53, %v2403_v54  ;;  %v7716_v53 = vld [vmem:[%s8349_s4 + $0x7f0] sm:$0xff] }
 0x429   : > { %5280 = vst.msk [vmem:[%s8435_s26 + $0x194] sm:$0xf] %vm5178_vm3, %v5151_v51  ;;  %v4764_v55 = vmax.f32 %v3666_v52, %v4597_v50  ;;  %v7652_v52 = vld [vmem:[%s8349_s4 + $0x5f0] sm:$0xff] }
 0x42b   : > { %v4896_v56 = vadd.f32 %v8925_v58, %v4764_v55 }
 0x42d   : > { %v5024_v57 = vmax.f32 %v4896_v56, 0.0 }
 0x42e   : > { %v3501_v59 = vpop.f32.mrf.mxu2  ;;  %v4599_v60 = vpop.f32.mrf.mxu3 }
 0x42f   : > { %v5152_v63 = vpack.c.bf16 %v5024_v57, %v5024_v57  ;;  %v3667_v0 = vmax.f32 %v2569_v25, %v3501_v59  ;;  %v1436_v1 = vpop.f32.mrf.mxu0  ;;  %v2406_v2 = vpop.f32.mrf.mxu1 }
 0x430   : > { %v2570_v7 = vmax.f32 %v1436_v1, %v2406_v2 }
 0x431   : > { %5281 = vst.msk [vmem:[%s8435_s26 + $0x198] sm:$0xf] %vm5178_vm3, %v5152_v63  ;;  %v4765_v5 = vmax.f32 %v3667_v0, %v4599_v60 }
 0x432   : > { %6090 = vmatmul.msk.bf16.gmra.mxu0 %vm967_vm2, %v7522_v61  ;;  %6538 = vmatmul.msk.bf16.gmra.mxu1 %vm967_vm2, %v7586_v62 }
 0x433   : > { %v4897_v6 = vadd.f32 %v8925_v58, %v4765_v5  ;;  %6986 = vmatmul.msk.bf16.gmra.mxu2 %vm967_vm2, %v7650_v3  ;;  %7434 = vmatmul.msk.bf16.gmra.mxu3 %vm967_vm2, %v7714_v4 }
 0x435   : > { %v5025_v8 = vmax.f32 %v4897_v6, 0.0  ;;  %v7525_v6 = vld [vmem:[%s8349_s4 + $0x1f8] sm:$0xff] }
 0x436   : > { %v3504_v9 = vpop.f32.mrf.mxu2  ;;  %v4602_v10 = vpop.f32.mrf.mxu3 }
 0x437   : > { %v5153_v11 = vpack.c.bf16 %v5025_v8, %v5025_v8  ;;  %v3668_v12 = vmax.f32 %v2570_v7, %v3504_v9  ;;  %v1438_v13 = vpop.f32.mrf.mxu0  ;;  %v2408_v14 = vpop.f32.mrf.mxu1  ;;  %v7589_v7 = vld [vmem:[%s8349_s4 + $0x3f8] sm:$0xff] }
 0x438   : > { %v2571_v18 = vmax.f32 %v1438_v13, %v2408_v14  ;;  %v7717_v13 = vld [vmem:[%s8349_s4 + $0x7f8] sm:$0xff] }
 0x439   : > { %5282 = vst.msk [vmem:[%s8435_s26 + $0x19c] sm:$0xf] %vm5178_vm3, %v5153_v11  ;;  %v4766_v58 = vmax.f32 %v3668_v12, %v4602_v10  ;;  %v7653_v12 = vld [vmem:[%s8349_s4 + $0x5f8] sm:$0xff] }
 0x43b   : > { %v4898_v16 = vadd.f32 %v9173_v15, %v4766_v58 }
 0x43d   : > { %v5026_v17 = vmax.f32 %v4898_v16, 0.0 }
 0x43e   : > { %v3506_v19 = vpop.f32.mrf.mxu2  ;;  %v4604_v20 = vpop.f32.mrf.mxu3 }
 0x43f   : > { %v5154_v23 = vpack.c.bf16 %v5026_v17, %v5026_v17  ;;  %v3669_v24 = vmax.f32 %v2571_v18, %v3506_v19  ;;  %v1441_v26 = vpop.f32.mrf.mxu0  ;;  %v2411_v27 = vpop.f32.mrf.mxu1 }
 0x440   : > { %v2572_v32 = vmax.f32 %v1441_v26, %v2411_v27 }
 0x441   : > { %5283 = vst.msk [vmem:[%s8435_s26 + $0x1a0] sm:$0xf] %vm5178_vm3, %v5154_v23  ;;  %v4767_v30 = vmax.f32 %v3669_v24, %v4604_v20 }
 0x442   : > { %6091 = vmatmul.msk.bf16.gmra.mxu0 %vm967_vm2, %v7523_v21  ;;  %6539 = vmatmul.msk.bf16.gmra.mxu1 %vm967_vm2, %v7587_v22 }
 0x443   : > { %v4899_v31 = vadd.f32 %v9173_v15, %v4767_v30  ;;  %6987 = vmatmul.msk.bf16.gmra.mxu2 %vm967_vm2, %v7651_v28  ;;  %7435 = vmatmul.msk.bf16.gmra.mxu3 %vm967_vm2, %v7715_v29 }
 0x445   : > { %v5027_v33 = vmax.f32 %v4899_v31, 0.0 }
 0x446   : > { %v3509_v34 = vpop.f32.mrf.mxu2  ;;  %v4607_v35 = vpop.f32.mrf.mxu3 }
 0x447   : > { %v5155_v36 = vpack.c.bf16 %v5027_v33, %v5027_v33  ;;  %v3670_v37 = vmax.f32 %v2572_v32, %v3509_v34  ;;  %v1443_v38 = vpop.f32.mrf.mxu0  ;;  %v2413_v39 = vpop.f32.mrf.mxu1 }
 0x448   : > { %v2573_v43 = vmax.f32 %v1443_v38, %v2413_v39 }
 0x449   : > { %5284 = vst.msk [vmem:[%s8435_s26 + $0x1a4] sm:$0xf] %vm5178_vm3, %v5155_v36  ;;  %v4768_v40 = vmax.f32 %v3670_v37, %v4607_v35 }
 0x44b   : > { %v4900_v41 = vadd.f32 %v9173_v15, %v4768_v40 }
 0x44d   : > { %v5028_v42 = vmax.f32 %v4900_v41, 0.0 }
 0x44e   : > { %v3511_v44 = vpop.f32.mrf.mxu2  ;;  %v4609_v45 = vpop.f32.mrf.mxu3 }
 0x44f   : > { %v5156_v48 = vpack.c.bf16 %v5028_v42, %v5028_v42  ;;  %v3671_v49 = vmax.f32 %v2573_v43, %v3511_v44  ;;  %v1446_v50 = vpop.f32.mrf.mxu0  ;;  %v2416_v51 = vpop.f32.mrf.mxu1 }
 0x450   : > { %v2574_v56 = vmax.f32 %v1446_v50, %v2416_v51 }
 0x451   : > { %5285 = vst.msk [vmem:[%s8435_s26 + $0x1a8] sm:$0xf] %vm5178_vm3, %v5156_v48  ;;  %v4769_v54 = vmax.f32 %v3671_v49, %v4609_v45 }
 0x452   : > { %6092 = vmatmul.msk.bf16.gmra.mxu0 %vm967_vm2, %v7524_v46  ;;  %6540 = vmatmul.msk.bf16.gmra.mxu1 %vm967_vm2, %v7588_v47 }
 0x453   : > { %v4901_v55 = vadd.f32 %v9173_v15, %v4769_v54  ;;  %6988 = vmatmul.msk.bf16.gmra.mxu2 %vm967_vm2, %v7652_v52  ;;  %7436 = vmatmul.msk.bf16.gmra.mxu3 %vm967_vm2, %v7716_v53 }
 0x455   : > { %v5029_v57 = vmax.f32 %v4901_v55, 0.0 }
 0x456   : > { %v3514_v25 = vpop.f32.mrf.mxu2  ;;  %v4612_v59 = vpop.f32.mrf.mxu3 }
 0x457   : > { %v5157_v60 = vpack.c.bf16 %v5029_v57, %v5029_v57  ;;  %v3672_v61 = vmax.f32 %v2574_v56, %v3514_v25  ;;  %v1448_v62 = vpop.f32.mrf.mxu0  ;;  %v2418_v63 = vpop.f32.mrf.mxu1 }
 0x458   : > { %v2575_v3 = vmax.f32 %v1448_v62, %v2418_v63 }
 0x459   : > { %5286 = vst.msk [vmem:[%s8435_s26 + $0x1ac] sm:$0xf] %vm5178_vm3, %v5157_v60  ;;  %v4770_v0 = vmax.f32 %v3672_v61, %v4612_v59 }
 0x45b   : > { %v4902_v1 = vadd.f32 %v9173_v15, %v4770_v0 }
 0x45d   : > { %v5030_v2 = vmax.f32 %v4902_v1, 0.0 }
 0x45e   : > { %v3516_v4 = vpop.f32.mrf.mxu2  ;;  %v4614_v5 = vpop.f32.mrf.mxu3 }
 0x45f   : > { %v5158_v8 = vpack.c.bf16 %v5030_v2, %v5030_v2  ;;  %v3673_v9 = vmax.f32 %v2575_v3, %v3516_v4  ;;  %v1451_v10 = vpop.f32.mrf.mxu0  ;;  %v2421_v11 = vpop.f32.mrf.mxu1 }
 0x460   : > { %v2576_v16 = vmax.f32 %v1451_v10, %v2421_v11 }
 0x461   : > { %5287 = vst.msk [vmem:[%s8435_s26 + $0x1b0] sm:$0xf] %vm5178_vm3, %v5158_v8  ;;  %v4771_v14 = vmax.f32 %v3673_v9, %v4614_v5 }
 0x462   : > { %6093 = vmatmul.msk.bf16.gmra.mxu0 %vm967_vm2, %v7525_v6  ;;  %6541 = vmatmul.msk.bf16.gmra.mxu1 %vm967_vm2, %v7589_v7 }
 0x463   : > { %v4903_v58 = vadd.f32 %v9173_v15, %v4771_v14  ;;  %6989 = vmatmul.msk.bf16.gmra.mxu2 %vm967_vm2, %v7653_v12  ;;  %7437 = vmatmul.msk.bf16.gmra.mxu3 %vm967_vm2, %v7717_v13 }
 0x465   : > { %v5031_v17 = vmax.f32 %v4903_v58, 0.0 }
 0x466   : > { %v3519_v18 = vpop.f32.mrf.mxu2  ;;  %v4617_v19 = vpop.f32.mrf.mxu3 }
 0x467   : > { %v5159_v20 = vpack.c.bf16 %v5031_v17, %v5031_v17  ;;  %v3674_v21 = vmax.f32 %v2576_v16, %v3519_v18  ;;  %v1453_v22 = vpop.f32.mrf.mxu0  ;;  %v2423_v23 = vpop.f32.mrf.mxu1 }
 0x468   : > { %v2577_v28 = vmax.f32 %v1453_v22, %v2423_v23 }
 0x469   : > { %5288 = vst.msk [vmem:[%s8435_s26 + $0x1b4] sm:$0xf] %vm5178_vm3, %v5159_v20  ;;  %v4772_v24 = vmax.f32 %v3674_v21, %v4617_v19 }
 0x46b   : > { %v4904_v26 = vadd.f32 %v9173_v15, %v4772_v24 }
 0x46d   : > { %v5032_v27 = vmax.f32 %v4904_v26, 0.0 }
 0x46e   : > { %v3521_v29 = vpop.f32.mrf.mxu2  ;;  %v4619_v30 = vpop.f32.mrf.mxu3 }
 0x46f   : > { %v5160_v31 = vpack.c.bf16 %v5032_v27, %v5032_v27  ;;  %v3675_v32 = vmax.f32 %v2577_v28, %v3521_v29  ;;  %v1456_v33 = vpop.f32.mrf.mxu0  ;;  %v2426_v34 = vpop.f32.mrf.mxu1 }
 0x470   : > { %v2578_v37 = vmax.f32 %v1456_v33, %v2426_v34 }
 0x471   : > { %5289 = vst.msk [vmem:[%s8435_s26 + $0x1b8] sm:$0xf] %vm5178_vm3, %v5160_v31  ;;  %v4773_v35 = vmax.f32 %v3675_v32, %v4619_v30 }
 0x473   : > { %v4905_v36 = vadd.f32 %v9173_v15, %v4773_v35 }
 0x475   : > { %v5033_v38 = vmax.f32 %v4905_v36, 0.0 }
 0x476   : > { %v3524_v39 = vpop.f32.mrf.mxu2  ;;  %v4622_v40 = vpop.f32.mrf.mxu3 }
 0x477   : > { %v5161_v41 = vpack.c.bf16 %v5033_v38, %v5033_v38  ;;  %v3676_v42 = vmax.f32 %v2578_v37, %v3524_v39  ;;  %v1458_v43 = vpop.f32.mrf.mxu0  ;;  %v2428_v44 = vpop.f32.mrf.mxu1 }
 0x478   : > { %v2579_v48 = vmax.f32 %v1458_v43, %v2428_v44 }
 0x479   : > { %5290 = vst.msk [vmem:[%s8435_s26 + $0x1bc] sm:$0xf] %vm5178_vm3, %v5161_v41  ;;  %v4774_v45 = vmax.f32 %v3676_v42, %v4622_v40 }
 0x47b   : > { %v4906_v46 = vadd.f32 %v9173_v15, %v4774_v45 }
 0x47d   : > { %v5034_v47 = vmax.f32 %v4906_v46, 0.0 }
 0x47e   : > { %v3526_v49 = vpop.f32.mrf.mxu2  ;;  %v4624_v50 = vpop.f32.mrf.mxu3 }
 0x47f   : > { %v5162_v51 = vpack.c.bf16 %v5034_v47, %v5034_v47  ;;  %v3677_v52 = vmax.f32 %v2579_v48, %v3526_v49  ;;  %v1461_v53 = vpop.f32.mrf.mxu0  ;;  %v2431_v54 = vpop.f32.mrf.mxu1 }
 0x480   : > { %v2580_v57 = vmax.f32 %v1461_v53, %v2431_v54 }
 0x481   : > { %5291 = vst.msk [vmem:[%s8435_s26 + $0x1c0] sm:$0xf] %vm5178_vm3, %v5162_v51  ;;  %v4775_v55 = vmax.f32 %v3677_v52, %v4624_v50 }
 0x483   : > { %v4907_v56 = vadd.f32 %v9173_v15, %v4775_v55 }
 0x485   : > { %v5035_v25 = vmax.f32 %v4907_v56, 0.0 }
 0x486   : > { %v3529_v59 = vpop.f32.mrf.mxu2  ;;  %v4627_v60 = vpop.f32.mrf.mxu3 }
 0x487   : > { %v5163_v61 = vpack.c.bf16 %v5035_v25, %v5035_v25  ;;  %v3678_v62 = vmax.f32 %v2580_v57, %v3529_v59  ;;  %v1463_v63 = vpop.f32.mrf.mxu0  ;;  %v2433_v0 = vpop.f32.mrf.mxu1 }
 0x488   : > { %v2581_v4 = vmax.f32 %v1463_v63, %v2433_v0 }
 0x489   : > { %5292 = vst.msk [vmem:[%s8435_s26 + $0x1c4] sm:$0xf] %vm5178_vm3, %v5163_v61  ;;  %v4776_v1 = vmax.f32 %v3678_v62, %v4627_v60 }
 0x48b   : > { %v4908_v2 = vadd.f32 %v9173_v15, %v4776_v1 }
 0x48d   : > { %v5036_v3 = vmax.f32 %v4908_v2, 0.0 }
 0x48e   : > { %v3531_v5 = vpop.f32.mrf.mxu2  ;;  %v4629_v6 = vpop.f32.mrf.mxu3 }
 0x48f   : > { %v5164_v7 = vpack.c.bf16 %v5036_v3, %v5036_v3  ;;  %v3679_v8 = vmax.f32 %v2581_v4, %v3531_v5  ;;  %v1466_v9 = vpop.f32.mrf.mxu0  ;;  %v2436_v10 = vpop.f32.mrf.mxu1 }
 0x490   : > { %v2582_v13 = vmax.f32 %v1466_v9, %v2436_v10 }
 0x491   : > { %5293 = vst.msk [vmem:[%s8435_s26 + $0x1c8] sm:$0xf] %vm5178_vm3, %v5164_v7  ;;  %v4777_v11 = vmax.f32 %v3679_v8, %v4629_v6 }
 0x493   : > { %v4909_v12 = vadd.f32 %v9173_v15, %v4777_v11 }
 0x495   : > { %v5037_v14 = vmax.f32 %v4909_v12, 0.0 }
 0x496   : > { %v3534_v58 = vpop.f32.mrf.mxu2  ;;  %v4632_v16 = vpop.f32.mrf.mxu3 }
 0x497   : > { %v5165_v17 = vpack.c.bf16 %v5037_v14, %v5037_v14  ;;  %v3680_v18 = vmax.f32 %v2582_v13, %v3534_v58  ;;  %v1468_v19 = vpop.f32.mrf.mxu0  ;;  %v2438_v20 = vpop.f32.mrf.mxu1 }
 0x498   : > { %v2583_v24 = vmax.f32 %v1468_v19, %v2438_v20 }
 0x499   : > { %5294 = vst.msk [vmem:[%s8435_s26 + $0x1cc] sm:$0xf] %vm5178_vm3, %v5165_v17  ;;  %v4778_v21 = vmax.f32 %v3680_v18, %v4632_v16 }
 0x49b   : > { %v4910_v22 = vadd.f32 %v9173_v15, %v4778_v21 }
 0x49d   : > { %v5038_v23 = vmax.f32 %v4910_v22, 0.0 }
 0x49e   : > { %v3536_v26 = vpop.f32.mrf.mxu2  ;;  %v4634_v27 = vpop.f32.mrf.mxu3 }
 0x49f   : > { %v5166_v28 = vpack.c.bf16 %v5038_v23, %v5038_v23  ;;  %v3681_v29 = vmax.f32 %v2583_v24, %v3536_v26  ;;  %v1471_v30 = vpop.f32.mrf.mxu0  ;;  %v2441_v31 = vpop.f32.mrf.mxu1 }
 0x4a0   : > { %v2584_v34 = vmax.f32 %v1471_v30, %v2441_v31 }
 0x4a1   : > { %5295 = vst.msk [vmem:[%s8435_s26 + $0x1d0] sm:$0xf] %vm5178_vm3, %v5166_v28  ;;  %v4779_v32 = vmax.f32 %v3681_v29, %v4634_v27 }
 0x4a3   : > { %v4911_v33 = vadd.f32 %v9173_v15, %v4779_v32 }
 0x4a5   : > { %v5039_v35 = vmax.f32 %v4911_v33, 0.0 }
 0x4a6   : > { %v3539_v36 = vpop.f32.mrf.mxu2  ;;  %v4637_v37 = vpop.f32.mrf.mxu3 }
 0x4a7   : > { %v5167_v38 = vpack.c.bf16 %v5039_v35, %v5039_v35  ;;  %v3682_v39 = vmax.f32 %v2584_v34, %v3539_v36  ;;  %v1473_v40 = vpop.f32.mrf.mxu0  ;;  %v2443_v41 = vpop.f32.mrf.mxu1 }
 0x4a8   : > { %v2585_v45 = vmax.f32 %v1473_v40, %v2443_v41 }
 0x4a9   : > { %5296 = vst.msk [vmem:[%s8435_s26 + $0x1d4] sm:$0xf] %vm5178_vm3, %v5167_v38  ;;  %v4780_v42 = vmax.f32 %v3682_v39, %v4637_v37 }
 0x4ab   : > { %v4912_v43 = vadd.f32 %v9173_v15, %v4780_v42 }
 0x4ad   : > { %v5040_v44 = vmax.f32 %v4912_v43, 0.0 }
 0x4ae   : > { %v3541_v46 = vpop.f32.mrf.mxu2  ;;  %v4639_v47 = vpop.f32.mrf.mxu3 }
 0x4af   : > { %v5168_v48 = vpack.c.bf16 %v5040_v44, %v5040_v44  ;;  %v3683_v49 = vmax.f32 %v2585_v45, %v3541_v46  ;;  %v1476_v50 = vpop.f32.mrf.mxu0  ;;  %v2446_v51 = vpop.f32.mrf.mxu1 }
 0x4b0   : > { %v2586_v54 = vmax.f32 %v1476_v50, %v2446_v51 }
 0x4b1   : > { %5297 = vst.msk [vmem:[%s8435_s26 + $0x1d8] sm:$0xf] %vm5178_vm3, %v5168_v48  ;;  %v4781_v52 = vmax.f32 %v3683_v49, %v4639_v47 }
 0x4b3   : > { %v4913_v53 = vadd.f32 %v9173_v15, %v4781_v52 }
 0x4b5   : > { %v5041_v55 = vmax.f32 %v4913_v53, 0.0 }
 0x4b6   : > { %v3544_v56 = vpop.f32.mrf.mxu2  ;;  %v4642_v57 = vpop.f32.mrf.mxu3 }
 0x4b7   : > { %v5169_v25 = vpack.c.bf16 %v5041_v55, %v5041_v55  ;;  %v3684_v59 = vmax.f32 %v2586_v54, %v3544_v56  ;;  %v1478_v60 = vpop.f32.mrf.mxu0  ;;  %v2448_v61 = vpop.f32.mrf.mxu1 }
 0x4b8   : > { %v2587_v1 = vmax.f32 %v1478_v60, %v2448_v61 }
 0x4b9   : > { %5298 = vst.msk [vmem:[%s8435_s26 + $0x1dc] sm:$0xf] %vm5178_vm3, %v5169_v25  ;;  %v4782_v62 = vmax.f32 %v3684_v59, %v4642_v57 }
 0x4bb   : > { %v4914_v63 = vadd.f32 %v9173_v15, %v4782_v62 }
 0x4bd   : > { %v5042_v0 = vmax.f32 %v4914_v63, 0.0 }
 0x4be   : > { %v3546_v2 = vpop.f32.mrf.mxu2  ;;  %v4644_v3 = vpop.f32.mrf.mxu3 }
 0x4bf   : > { %v5170_v4 = vpack.c.bf16 %v5042_v0, %v5042_v0  ;;  %v3685_v5 = vmax.f32 %v2587_v1, %v3546_v2  ;;  %v1481_v6 = vpop.f32.mrf.mxu0  ;;  %v2451_v7 = vpop.f32.mrf.mxu1 }
 0x4c0   : > { %v2588_v10 = vmax.f32 %v1481_v6, %v2451_v7 }
 0x4c1   : > { %5299 = vst.msk [vmem:[%s8435_s26 + $0x1e0] sm:$0xf] %vm5178_vm3, %v5170_v4  ;;  %v4783_v8 = vmax.f32 %v3685_v5, %v4644_v3 }
 0x4c3   : > { %v4915_v9 = vadd.f32 %v9173_v15, %v4783_v8 }
 0x4c5   : > { %v5043_v11 = vmax.f32 %v4915_v9, 0.0 }
 0x4c6   : > { %v3549_v12 = vpop.f32.mrf.mxu2  ;;  %v4647_v13 = vpop.f32.mrf.mxu3 }
 0x4c7   : > { %v5171_v14 = vpack.c.bf16 %v5043_v11, %v5043_v11  ;;  %v3686_v58 = vmax.f32 %v2588_v10, %v3549_v12  ;;  %v1483_v16 = vpop.f32.mrf.mxu0  ;;  %v2453_v17 = vpop.f32.mrf.mxu1 }
 0x4c8   : > { %v2589_v21 = vmax.f32 %v1483_v16, %v2453_v17 }
 0x4c9   : > { %5300 = vst.msk [vmem:[%s8435_s26 + $0x1e4] sm:$0xf] %vm5178_vm3, %v5171_v14  ;;  %v4784_v18 = vmax.f32 %v3686_v58, %v4647_v13 }
 0x4cb   : > { %v4916_v19 = vadd.f32 %v9173_v15, %v4784_v18 }
 0x4cd   : > { %v5044_v20 = vmax.f32 %v4916_v19, 0.0 }
 0x4ce   : > { %v3551_v22 = vpop.f32.mrf.mxu2  ;;  %v4649_v23 = vpop.f32.mrf.mxu3 }
 0x4cf   : > { %v5172_v24 = vpack.c.bf16 %v5044_v20, %v5044_v20  ;;  %v3687_v26 = vmax.f32 %v2589_v21, %v3551_v22  ;;  %v1486_v27 = vpop.f32.mrf.mxu0  ;;  %v2456_v28 = vpop.f32.mrf.mxu1 }
 0x4d0   : > { %v2590_v31 = vmax.f32 %v1486_v27, %v2456_v28 }
 0x4d1   : > { %5301 = vst.msk [vmem:[%s8435_s26 + $0x1e8] sm:$0xf] %vm5178_vm3, %v5172_v24  ;;  %v4785_v29 = vmax.f32 %v3687_v26, %v4649_v23 }
 0x4d3   : > { %v4917_v30 = vadd.f32 %v9173_v15, %v4785_v29 }
 0x4d5   : > { %v5045_v32 = vmax.f32 %v4917_v30, 0.0 }
 0x4d6   : > { %v3554_v33 = vpop.f32.mrf.mxu2  ;;  %v4652_v34 = vpop.f32.mrf.mxu3 }
 0x4d7   : > { %v5173_v35 = vpack.c.bf16 %v5045_v32, %v5045_v32  ;;  %v3688_v36 = vmax.f32 %v2590_v31, %v3554_v33  ;;  %v1488_v37 = vpop.f32.mrf.mxu0  ;;  %v2458_v38 = vpop.f32.mrf.mxu1 }
 0x4d8   : > { %v2591_v42 = vmax.f32 %v1488_v37, %v2458_v38 }
 0x4d9   : > { %5302 = vst.msk [vmem:[%s8435_s26 + $0x1ec] sm:$0xf] %vm5178_vm3, %v5173_v35  ;;  %v4786_v39 = vmax.f32 %v3688_v36, %v4652_v34 }
 0x4db   : > { %v4918_v40 = vadd.f32 %v9173_v15, %v4786_v39 }
 0x4dd   : > { %v5046_v41 = vmax.f32 %v4918_v40, 0.0 }
 0x4de   : > { %v3556_v43 = vpop.f32.mrf.mxu2  ;;  %v4654_v44 = vpop.f32.mrf.mxu3 }
 0x4df   : > { %v5174_v45 = vpack.c.bf16 %v5046_v41, %v5046_v41  ;;  %v3689_v46 = vmax.f32 %v2591_v42, %v3556_v43  ;;  %v1491_v47 = vpop.f32.mrf.mxu0  ;;  %v2461_v48 = vpop.f32.mrf.mxu1 }
 0x4e0   : > { %v2592_v51 = vmax.f32 %v1491_v47, %v2461_v48 }
 0x4e1   : > { %5303 = vst.msk [vmem:[%s8435_s26 + $0x1f0] sm:$0xf] %vm5178_vm3, %v5174_v45  ;;  %v4787_v49 = vmax.f32 %v3689_v46, %v4654_v44 }
 0x4e3   : > { %v4919_v50 = vadd.f32 %v9173_v15, %v4787_v49 }
 0x4e5   : > { %v5047_v52 = vmax.f32 %v4919_v50, 0.0 }
 0x4e6   : > { %v3559_v53 = vpop.f32.mrf.mxu2  ;;  %v4657_v54 = vpop.f32.mrf.mxu3 }
 0x4e7   : > { %v5175_v55 = vpack.c.bf16 %v5047_v52, %v5047_v52  ;;  %v3690_v56 = vmax.f32 %v2592_v51, %v3559_v53  ;;  %v1493_v25 = vpop.f32.mrf.mxu0  ;;  %v2463_v59 = vpop.f32.mrf.mxu1 }
 0x4e8   : > { %v2593_v62 = vmax.f32 %v1493_v25, %v2463_v59 }
 0x4e9   : > { %5304 = vst.msk [vmem:[%s8435_s26 + $0x1f4] sm:$0xf] %vm5178_vm3, %v5175_v55  ;;  %v4788_v57 = vmax.f32 %v3690_v56, %v4657_v54 }
 0x4eb   : > { %v4920_v60 = vadd.f32 %v9173_v15, %v4788_v57 }
 0x4ed   : > { %v5048_v61 = vmax.f32 %v4920_v60, 0.0 }
 0x4ee   : > { %v3561_v63 = vpop.f32.mrf.mxu2  ;;  %v4659_v2 = vpop.f32.mrf.mxu3 }
 0x4ef   : > { %v5176_v0 = vpack.c.bf16 %v5048_v61, %v5048_v61  ;;  %v3691_v1 = vmax.f32 %v2593_v62, %v3561_v63 }
 0x4f1   : > { %5305 = vst.msk [vmem:[%s8435_s26 + $0x1f8] sm:$0xf] %vm5178_vm3, %v5176_v0  ;;  %v4789_v3 = vmax.f32 %v3691_v1, %v4659_v2 }
 0x4f3   : > { %v4921_v4 = vadd.f32 %v9173_v15, %v4789_v3 }
 0x4f5   : > { %v5049_v5 = vmax.f32 %v4921_v4, 0.0  ;;  %5313 = sbr.rel (!%p8165_p6) target bundleno = 1338 (0x53a), region = 98 }
 0x4f7   : > { %v5177_v6 = vpack.c.bf16 %v5049_v5, %v5049_v5 }
 0x4f9   : > { %5306 = vst.msk [vmem:[%s8435_s26 + $0x1fc] sm:$0xf] %vm5178_vm3, %v5177_v6 }
 0x4fa   : > { %s9460_s29 = smov (!%p5316_p5, %s5315_s29), 128 }
 0x4fb   : > { %s7440_s21 = sshll.u32 %s9460_s29, 2 }
 0x4fc   : > { %p7443_p7 = scmp.eq.s32.totalorder %s7440_s21, 0 }
 0x4fd   : > { %s9284_s23 = sshrl.u32 (!%p7443_p7), %s9460_s29, 5 }
 0x4fe   : > { %5326 = sbr.rel (%p7443_p7) target bundleno = 1338 (0x53a), region = 102  ;;  %p7444_p6 = scmp.le.s32.totalorder (!%p7443_p7), %s9284_s23, 0 }
 0x503   : > { %5677 = sbr.rel (%p7444_p6) target bundleno = 1321 (0x529), region = 218  ;;  %s9436_s14 = smov (!%p7444_p6), %s9280_s11 }
 0x504   : > { %s9437_s15 = smov (!%p7444_p6), %s8435_s26  ;;  %s9293_s22 = smov (!%p7444_p6), 0  }
 0x505   : > { %s9295_s12 = smov (!%p7444_p6), 0  }
 0x508 LB: >> { %v5343_v15 = vld [vmem:[%s8070_s15] sm:$0xf]  ;;  %v5345_v7 = vld [vmem:[%s8070_s15 + $0x4] sm:$0xf]  ;;  %v5347_v8 = vld [vmem:[%s8070_s15 + $0x8] sm:$0xf]  ;;  %s8078_s12 = sphi %s9295_s12, %s5337_s12   ;;  %s8074_s22 = sphi %s9293_s22, %s9440_s22   ;;  %s8070_s15 = sphi %s9437_s15, %s9439_s15   ;;  %s8066_s14 = sphi %s9436_s14, %s9438_s14  }
 0x509   : >> { %5344 = vst [vmem:[%s8066_s14] sm:$0xf] %v5343_v15  ;;  %v5349_v9 = vld [vmem:[%s8070_s15 + $0xc] sm:$0xf]  ;;  %v5351_v10 = vld [vmem:[%s8070_s15 + $0x10] sm:$0xf]  ;;  %s5407_s30 = sadd.s32 1, %s8074_s22 }
 0x50a   : >> { %5346 = vst [vmem:[%s8066_s14 + $0x4] sm:$0xf] %v5345_v7  ;;  %v5353_v11 = vld [vmem:[%s8070_s15 + $0x14] sm:$0xf]  ;;  %v5355_v12 = vld [vmem:[%s8070_s15 + $0x18] sm:$0xf]  ;;  %p5408_p8 = scmp.ge.s32.totalorder %s5407_s30, %s9284_s23 }
 0x50b   : >> { %5348 = vst [vmem:[%s8066_s14 + $0x8] sm:$0xf] %v5347_v8  ;;  %v5357_v13 = vld [vmem:[%s8070_s15 + $0x1c] sm:$0xf]  ;;  %v5359_v14 = vld [vmem:[%s8070_s15 + $0x20] sm:$0xf] }
 0x50c   : >> { %5350 = vst [vmem:[%s8066_s14 + $0xc] sm:$0xf] %v5349_v9  ;;  %v5361_v58 = vld [vmem:[%s8070_s15 + $0x24] sm:$0xf]  ;;  %v5363_v16 = vld [vmem:[%s8070_s15 + $0x28] sm:$0xf] }
 0x50d   : >> { %5352 = vst [vmem:[%s8066_s14 + $0x10] sm:$0xf] %v5351_v10  ;;  %v5365_v17 = vld [vmem:[%s8070_s15 + $0x2c] sm:$0xf]  ;;  %v5367_v18 = vld [vmem:[%s8070_s15 + $0x30] sm:$0xf] }
 0x50e   : >> { %5354 = vst [vmem:[%s8066_s14 + $0x14] sm:$0xf] %v5353_v11  ;;  %v5369_v19 = vld [vmem:[%s8070_s15 + $0x34] sm:$0xf]  ;;  %v5371_v20 = vld [vmem:[%s8070_s15 + $0x38] sm:$0xf] }
 0x50f   : >> { %5356 = vst [vmem:[%s8066_s14 + $0x18] sm:$0xf] %v5355_v12  ;;  %v5373_v21 = vld [vmem:[%s8070_s15 + $0x3c] sm:$0xf]  ;;  %v5375_v22 = vld [vmem:[%s8070_s15 + $0x40] sm:$0xf] }
 0x510   : >> { %5358 = vst [vmem:[%s8066_s14 + $0x1c] sm:$0xf] %v5357_v13  ;;  %v5377_v23 = vld [vmem:[%s8070_s15 + $0x44] sm:$0xf]  ;;  %s9462_s30 = smov (%p5408_p8, %s5407_s30), 0  ;;  %s5337_s12 = sadd.s32 1, %s8078_s12  }
 0x511   : >> { %5360 = vst [vmem:[%s8066_s14 + $0x20] sm:$0xf] %v5359_v14  ;;  %v5379_v24 = vld [vmem:[%s8070_s15 + $0x48] sm:$0xf]  ;;  %v5381_v26 = vld [vmem:[%s8070_s15 + $0x4c] sm:$0xf]  ;;  %p5336_p9 = scmp.ge.s32.totalorder %s5337_s12, %s9284_s23  ;;  %s9440_s22 = smov %s9462_s30 }
 0x512   : >> { %5362 = vst [vmem:[%s8066_s14 + $0x24] sm:$0xf] %v5361_v58  ;;  %s7445_s5 = sshll.u32 %s9462_s30, 7  ;;  %v5383_v27 = vld [vmem:[%s8070_s15 + $0x50] sm:$0xf] }
 0x513   : >> { %5364 = vst [vmem:[%s8066_s14 + $0x28] sm:$0xf] %v5363_v16  ;;  %s9354_s6 = scalar_lea.vmem %s8435_s26, %s7445_s5 [#allocation3]   ;;  %s5413_s7 = scalar_lea.vmem %s9280_s11, %s7445_s5   ;;  %v5385_v28 = vld [vmem:[%s8070_s15 + $0x54] sm:$0xf]  ;;  %v5387_v29 = vld [vmem:[%s8070_s15 + $0x58] sm:$0xf] }
 0x514   : >> { %5366 = vst [vmem:[%s8066_s14 + $0x2c] sm:$0xf] %v5365_v17  ;;  %v5389_v30 = vld [vmem:[%s8070_s15 + $0x5c] sm:$0xf]  ;;  %v5391_v31 = vld [vmem:[%s8070_s15 + $0x60] sm:$0xf] }
 0x515   : >> { %5368 = vst [vmem:[%s8066_s14 + $0x30] sm:$0xf] %v5367_v18  ;;  %v5393_v32 = vld [vmem:[%s8070_s15 + $0x64] sm:$0xf]  ;;  %v5395_v33 = vld [vmem:[%s8070_s15 + $0x68] sm:$0xf] }
 0x516   : >> { %5370 = vst [vmem:[%s8066_s14 + $0x34] sm:$0xf] %v5369_v19  ;;  %v5397_v34 = vld [vmem:[%s8070_s15 + $0x6c] sm:$0xf]  ;;  %v5399_v35 = vld [vmem:[%s8070_s15 + $0x70] sm:$0xf] }
 0x517   : >> { %5372 = vst [vmem:[%s8066_s14 + $0x38] sm:$0xf] %v5371_v20  ;;  %v5401_v36 = vld [vmem:[%s8070_s15 + $0x74] sm:$0xf]  ;;  %v5403_v37 = vld [vmem:[%s8070_s15 + $0x78] sm:$0xf] }
 0x518   : >> { %5374 = vst [vmem:[%s8066_s14 + $0x3c] sm:$0xf] %v5373_v21  ;;  %v5405_v38 = vld [vmem:[%s8070_s15 + $0x7c] sm:$0xf]  ;;  %s9439_s15 = smov %s9354_s6 }
 0x519   : >> { %5376 = vst [vmem:[%s8066_s14 + $0x40] sm:$0xf] %v5375_v22 }
 0x51a   : >> { %5378 = vst [vmem:[%s8066_s14 + $0x44] sm:$0xf] %v5377_v23 }
 0x51b   : >> { %5380 = vst [vmem:[%s8066_s14 + $0x48] sm:$0xf] %v5379_v24 }
 0x51c   : >> { %5382 = vst [vmem:[%s8066_s14 + $0x4c] sm:$0xf] %v5381_v26 }
 0x51d   : >> { %5384 = vst [vmem:[%s8066_s14 + $0x50] sm:$0xf] %v5383_v27 }
 0x51e   : >> { %5386 = vst [vmem:[%s8066_s14 + $0x54] sm:$0xf] %v5385_v28 }
 0x51f   : >> { %5388 = vst [vmem:[%s8066_s14 + $0x58] sm:$0xf] %v5387_v29 }
 0x520   : >> { %5390 = vst [vmem:[%s8066_s14 + $0x5c] sm:$0xf] %v5389_v30 }
 0x521   : >> { %5392 = vst [vmem:[%s8066_s14 + $0x60] sm:$0xf] %v5391_v31 }
 0x522   : >> { %5394 = vst [vmem:[%s8066_s14 + $0x64] sm:$0xf] %v5393_v32 }
 0x523   : >> { %5396 = vst [vmem:[%s8066_s14 + $0x68] sm:$0xf] %v5395_v33 }
 0x524   : >> { %5398 = vst [vmem:[%s8066_s14 + $0x6c] sm:$0xf] %v5397_v34  ;;  %5339 = sbr.rel (!%p5336_p9) target bundleno = 1288 (0x508), region = 224 }
 0x525   : >> { %5400 = vst [vmem:[%s8066_s14 + $0x70] sm:$0xf] %v5399_v35 }
 0x526   : >> { %5402 = vst [vmem:[%s8066_s14 + $0x74] sm:$0xf] %v5401_v36 }
 0x527   : >> { %5404 = vst [vmem:[%s8066_s14 + $0x78] sm:$0xf] %v5403_v37 }
 0x528   : >> { %5406 = vst [vmem:[%s8066_s14 + $0x7c] sm:$0xf] %v5405_v38  ;;  %s9438_s14 = smov %s5413_s7 }
 0x529 PF: > { %s9395_s8 = sand.u32 31, %s9460_s29   ;;  %s7718_s9 = sshll.u32 %s9284_s23, 7 }
 0x52a   : > { %s5418_s10 = scalar_lea.vmem %s8435_s26, %s7718_s9 [#allocation3]   ;;  %s5420_s28 = scalar_lea.vmem %s9280_s11, %s7718_s9  }
 0x52b   : > { %p7450_p10 = scmp.le.s32.totalorder %s9395_s8, 0 }
 0x52c   : > { %s8080_s24 = smov (!%p7450_p10), %s5420_s28   ;;  %s8084_s25 = smov (!%p7450_p10), %s5418_s10  }
 0x52d   : > { %5691 = sbr.rel (%p7450_p10) target bundleno = 1338 (0x53a), region = 229  ;;  %s8088_s4 = smov (!%p7450_p10), 0  }
 0x52e   : > { %s8092_s21 = smov (!%p7450_p10), 0  }
 0x532 LB: >> { %v5430_v39 = vld [vmem:[%s8086_s25] sm:$0xf]  ;;  %s5432_s29 = sadd.s32 1, %s8090_s4  ;;  %s5424_s21 = sadd.s32 1, %s8094_s21   ;;  %s8094_s21 = sphi %s8092_s21, %s5424_s21   ;;  %s8090_s4 = sphi %s8088_s4, %s8089_s4   ;;  %s8086_s25 = sphi %s8084_s25, %s5437_s25   ;;  %s8082_s24 = sphi %s8080_s24, %s5438_s24  }
 0x533   : >> { %5431 = vst [vmem:[%s8082_s24] sm:$0xf] %v5430_v39  ;;  %p5433_p11 = scmp.ge.s32.totalorder %s5432_s29, %s9395_s8  ;;  %p5423_p12 = scmp.ge.s32.totalorder %s5424_s21, %s9395_s8 }
 0x535   : >> { %s9464_s29 = smov (%p5433_p11, %s5432_s29), 0  ;;  %5426 = sbr.rel (!%p5423_p12) target bundleno = 1330 (0x532), region = 235 }
 0x536   : >> { %s7451_s26 = sshll.u32 %s9464_s29, 2  ;;  %s8089_s4 = smov %s9464_s29  }
 0x537   : >> { %s5437_s25 = scalar_lea.vmem %s5418_s10, %s7451_s26 [#allocation3]   ;;  %s5438_s24 = scalar_lea.vmem %s5420_s28, %s7451_s26  }
 0x53a PF: > { %s13_s18 = sadd.s32 1, %s8030_s18   ;;  %s9441_s12 = smov %s8010_s13 }
 0x53b   : > { %p10_p13 = scmp.ge.s32.totalorder %s13_s18, 8   ;;  %s9442_s13 = smov %s8173_s27 }
 0x53c   : > { %s9443_s14 = smov %s8022_s16  ;;  %s9444_s15 = smov %s8026_s17 }
 0x53d   : > { %s9445_s16 = smov %s9448_s19  ;;  %s9446_s17 = smov %s9452_s20 }
 0x53e   :  { %12 = sbr.rel (!%p10_p13) target bundleno = 4 (0x4), region = 246 }

// kernel: cat_dog_convnet_forward.5
= control target key start
LH: loop header
LB: loop body
LE: loop exit
PB: predicated region body
PF: predicated region fallthrough
CT: control target
= control target key end

     0   :  { %s4101_s12 = smov 0   ;;  %s4103_s13 = smov 0   ;;  %s5104_s0 = inlined_call_operand.vmem [shape: bf16[2,4,169,400], index: 0, kind: input, shape index: {}]   ;;  %s5105_s1 = inlined_call_operand.vmem [shape: bf16[400,32], index: 1, kind: input, shape index: {}]   ;;  %s5106_s2 = inlined_call_operand.vmem [shape: f32[1,32], index: 2, kind: input, shape index: {}]   ;;  %s5107_s3 = inlined_call_operand.vmem [shape: bf16[2,169,32], index: 3, kind: output, shape index: {}]  }
   0x1   :  { %s4105_s14 = smov 0  }
   0x2 LB: > { %s25_s15 = sadd.s32 1, %s4075_s13  ;;  %p2844_p0 = scmp.ge.s32.totalorder %s4079_s14, 1  ;;  %s4079_s14 = sphi %s4105_s14, %s13_s14   ;;  %s4075_s13 = sphi %s4103_s13, %s5137_s13   ;;  %s4071_s12 = sphi %s4101_s12, %s5136_s12  }
   0x3   : > { %p27_p1 = scmp.ge.s32.totalorder %s25_s15, 2  ;;  %p159_p2 = scmp.lt.s32.totalorder %s4079_s14, 3 }
   0x5   : > { %s5139_s15 = smov (%p27_p1, %s25_s15), 0  ;;  %p160_p3 = pnand %p2844_p0, %p159_p2 }
   0x7   : > { %163 = sbr.rel (%p160_p3) target bundleno = 886 (0x376), region = 32 }
   0xc   : > { %v4122_v0 = vld [vmem:[%s5105_s1 + $0x38] sm:$0xff]  ;;  %p193_p4 = scmp.lt.s32.totalorder %s4071_s12, 1  ;;  %v4139_v3 = vld [vmem:[%s5105_s1 + $0x30] sm:$0xff]  ;;  %v4158_v6 = vld [vmem:[%s5105_s1 + $0xc0] sm:$0xff]  ;;  %vm667_vm0 = vcmask 130048   ;;  %vm2722_vm1 = vcmask 257024  }
   0xd   : > { %v4127_v1 = vld [vmem:[%s5105_s1 + $0x78] sm:$0xff]  ;;  %701 = vmatpush.bf16.msra.mxu0 %v4122_v0  ;;  %v4144_v4 = vld [vmem:[%s5105_s1 + $0x70] sm:$0xff]  ;;  %v4165_v7 = vld [vmem:[%s5105_s1 + $0x28] sm:$0xff]  ;;  %900 = vmatpush.bf16.msra.mxu3 %v4158_v6  ;;  %vm2744_vm2 = vcmask 253952   ;;  %vm2745_vm3 = vsmask.f32 256 }
   0xe   : > { %v4132_v2 = vld [vmem:[%s5105_s1 + $0xb8] sm:$0xff]  ;;  %765 = vmatpush.bf16.msra.mxu1 %v4127_v1  ;;  %s5141_s12 = smov (!%p193_p4, %s4071_s12), 1  ;;  %v4152_v5 = vld [vmem:[%s5105_s1 + $0xb0] sm:$0xff]  ;;  %v4170_v8 = vld [vmem:[%s5105_s1 + $0x68] sm:$0xff] }
   0xf   : > { %829 = vmatpush.bf16.msra.mxu2 %v4132_v2  ;;  %s4030_s28 = smul.u32 1408, %s5141_s12  ;;  %v4181_v9 = vld [vmem:[%s5105_s1 + $0xa8] sm:$0xff]  ;;  %v4192_v13 = vld [vmem:[%s5105_s1 + $0x20] sm:$0xff]  ;;  %v4212_v16 = vld [vmem:[%s5105_s1 + $0x18] sm:$0xff] }
  0x10   : > { %v4197_v14 = vld [vmem:[%s5105_s1 + $0x60] sm:$0xff]  ;;  %v4217_v17 = vld [vmem:[%s5105_s1 + $0x58] sm:$0xff]  ;;  %v4231_v19 = vld [vmem:[%s5105_s1 + $0x10] sm:$0xff]  ;;  %s4031_s27 = smul.u32 88, %s5141_s12 }
  0x11   : > { %702 = vmatpush.bf16.msra.mxu0 %v4139_v3  ;;  %s4175_s10 = scalar_lea.vmem %s5104_s0, %s4030_s28  ;;  %1244 = vmatpush.bf16.msrb.mxu3 %v4122_v0  ;;  %v4203_v15 = vld [vmem:[%s5105_s1 + $0xa0] sm:$0xff]  ;;  %v4223_v18 = vld [vmem:[%s5105_s1 + $0x98] sm:$0xff]  ;;  %v4236_v20 = vld [vmem:[%s5105_s1 + $0x50] sm:$0xff] }
  0x12   : > { %766 = vmatpush.bf16.msra.mxu1 %v4144_v4  ;;  %v3855_v10 = vld [vmem:[%s4175_s10 + $0xc] sm:$0xf]  ;;  %v2859_v11 = vld [vmem:[%s4175_s10 + $0x18] sm:$0xf0]  ;;  %v4242_v21 = vld [vmem:[%s5105_s1 + $0x90] sm:$0xff]  ;;  %s4999_s30 = scalar_lea.vmem %s5107_s3, %s4031_s27 }
  0x13   : > { %830 = vmatpush.bf16.msra.mxu2 %v4152_v5  ;;  %v2862_v12 = vor.u32 %v3855_v10, %v2859_v11  ;;  %v3859_v22 = vld [vmem:[%s4175_s10 + $0x2c] sm:$0xf]  ;;  %v2875_v23 = vld [vmem:[%s4175_s10 + $0x38] sm:$0xf0]  ;;  %v4269_v28 = vld [vmem:[%s5105_s1] sm:$0xff] }
  0x14   : > { %v4252_v24 = vld [vmem:[%s5105_s1 + $0x8] sm:$0xff]  ;;  %v2878_v27 = vor.u32 %v3859_v22, %v2875_v23  ;;  %v4274_v29 = vld [vmem:[%s5105_s1 + $0x40] sm:$0xff]  ;;  %v3856_v31 = vld [vmem:[%s4175_s10 + $0xc] sm:$0xf0] }
  0x15   : > { %703 = vmatpush.bf16.msra.mxu0 %v4165_v7  ;;  %3123 = vmatmul.msk.bf16.vlgmr.msra.gmra.mxu3 %vm667_vm0, %v2862_v12  ;;  %v4257_v25 = vld [vmem:[%s5105_s1 + $0x48] sm:$0xff]  ;;  %v2849_v30 = vld [vmem:[%s4175_s10] sm:$0xf]  ;;  %v3854_v32 = vld [vmem:[%s4175_s10 + $0x4] sm:$0xf] }
  0x16   : > { %767 = vmatpush.bf16.msra.mxu1 %v4170_v8  ;;  %1245 = vmatpush.bf16.msrb.mxu3 %v4139_v3  ;;  %v4263_v26 = vld [vmem:[%s5105_s1 + $0x88] sm:$0xff]  ;;  %v2851_v33 = vld [vmem:[%s4175_s10 + $0x10] sm:$0xf0]  ;;  %v4286_v34 = vld [vmem:[%s5105_s1 + $0x80] sm:$0xff]  ;;  %v2850_v37 = vor.u32 %v3856_v31, %v2849_v30 }
  0x17   : > { %831 = vmatpush.bf16.msra.mxu2 %v4181_v9  ;;  %v2857_v35 = vld [vmem:[%s4175_s10 + $0x8] sm:$0xf]  ;;  %v3857_v36 = vld [vmem:[%s4175_s10 + $0x14] sm:$0xf0]  ;;  %v2854_v38 = vor.u32 %v3854_v32, %v2851_v33  ;;  %v3863_v40 = vld [vmem:[%s4175_s10 + $0x4c] sm:$0xf] }
  0x18   : > { %v2858_v39 = vor.u32 %v3857_v36, %v2857_v35  ;;  %v2891_v41 = vld [vmem:[%s4175_s10 + $0x58] sm:$0xf0]  ;;  %v2865_v43 = vld [vmem:[%s4175_s10 + $0x20] sm:$0xf]  ;;  %v3860_v44 = vld [vmem:[%s4175_s10 + $0x2c] sm:$0xf0] }
  0x19   : > { %704 = vmatpush.bf16.msra.mxu0 %v4192_v13  ;;  %v2894_v42 = vor.u32 %v3863_v40, %v2891_v41  ;;  %v3858_v45 = vld [vmem:[%s4175_s10 + $0x24] sm:$0xf]  ;;  %v2867_v46 = vld [vmem:[%s4175_s10 + $0x30] sm:$0xf0]  ;;  %v2873_v47 = vld [vmem:[%s4175_s10 + $0x28] sm:$0xf]  ;;  %v2866_v49 = vor.u32 %v3860_v44, %v2865_v43 }
  0x1a   : > { %768 = vmatpush.bf16.msra.mxu1 %v4197_v14  ;;  %1246 = vmatpush.bf16.msrb.mxu3 %v4165_v7  ;;  %v3861_v48 = vld [vmem:[%s4175_s10 + $0x34] sm:$0xf0]  ;;  %v2870_v50 = vor.u32 %v3858_v45, %v2867_v46  ;;  %v3867_v52 = vld [vmem:[%s4175_s10 + $0x6c] sm:$0xf]  ;;  %v2907_v53 = vld [vmem:[%s4175_s10 + $0x78] sm:$0xf0] }
  0x1b   : > { %832 = vmatpush.bf16.msra.mxu2 %v4203_v15  ;;  %v2874_v51 = vor.u32 %v3861_v48, %v2873_v47  ;;  %v2910_v54 = vor.u32 %v3867_v52, %v2907_v53  ;;  %v2881_v55 = vld [vmem:[%s4175_s10 + $0x40] sm:$0xf]  ;;  %v3864_v56 = vld [vmem:[%s4175_s10 + $0x4c] sm:$0xf0]  ;;  %v3862_v57 = vld [vmem:[%s4175_s10 + $0x44] sm:$0xf] }
  0x1c   : > { %v2883_v58 = vld [vmem:[%s4175_s10 + $0x50] sm:$0xf0]  ;;  %v2889_v59 = vld [vmem:[%s4175_s10 + $0x48] sm:$0xf]  ;;  %v3865_v60 = vld [vmem:[%s4175_s10 + $0x54] sm:$0xf0]  ;;  %v2882_v61 = vor.u32 %v3864_v56, %v2881_v55 }
  0x1d   : > { %705 = vmatpush.bf16.msra.mxu0 %v4212_v16  ;;  %v2886_v62 = vor.u32 %v3862_v57, %v2883_v58  ;;  %v2890_v63 = vor.u32 %v3865_v60, %v2889_v59  ;;  %v3871_v10 = vld [vmem:[%s4175_s10 + $0x8c] sm:$0xf]  ;;  %v2923_v11 = vld [vmem:[%s4175_s10 + $0x98] sm:$0xf0]  ;;  %v2897_v22 = vld [vmem:[%s4175_s10 + $0x60] sm:$0xf] }
  0x1e   : > { %769 = vmatpush.bf16.msra.mxu1 %v4217_v17  ;;  %1247 = vmatpush.bf16.msrb.mxu3 %v4192_v13  ;;  %v2926_v12 = vor.u32 %v3871_v10, %v2923_v11  ;;  %v3868_v23 = vld [vmem:[%s4175_s10 + $0x6c] sm:$0xf0]  ;;  %v2899_v30 = vld [vmem:[%s4175_s10 + $0x70] sm:$0xf0]  ;;  %v2905_v31 = vld [vmem:[%s4175_s10 + $0x68] sm:$0xf] }
  0x1f   : > { %833 = vmatpush.bf16.msra.mxu2 %v4223_v18  ;;  %v3869_v32 = vld [vmem:[%s4175_s10 + $0x74] sm:$0xf0]  ;;  %v2898_v33 = vor.u32 %v3868_v23, %v2897_v22  ;;  %v2913_v40 = vld [vmem:[%s4175_s10 + $0x80] sm:$0xf]  ;;  %v3872_v41 = vld [vmem:[%s4175_s10 + $0x8c] sm:$0xf0] }
  0x20   : > { %v2906_v36 = vor.u32 %v3869_v32, %v2905_v31  ;;  %v2915_v43 = vld [vmem:[%s4175_s10 + $0x90] sm:$0xf0]  ;;  %v2921_v44 = vld [vmem:[%s4175_s10 + $0x88] sm:$0xf]  ;;  %v3873_v45 = vld [vmem:[%s4175_s10 + $0x94] sm:$0xf0]  ;;  %v2914_v46 = vor.u32 %v3872_v41, %v2913_v40 }
  0x21   : > { %706 = vmatpush.bf16.msra.mxu0 %v4231_v19  ;;  %v2922_v48 = vor.u32 %v3873_v45, %v2921_v44  ;;  %v2929_v52 = vld [vmem:[%s4175_s10 + $0xa0] sm:$0xf]  ;;  %v3876_v53 = vld [vmem:[%s4175_s10 + $0xac] sm:$0xf0]  ;;  %v2931_v55 = vld [vmem:[%s4175_s10 + $0xb0] sm:$0xf0] }
  0x22   : > { %770 = vmatpush.bf16.msra.mxu1 %v4236_v20  ;;  %1248 = vmatpush.bf16.msrb.mxu3 %v4212_v16  ;;  %v2937_v56 = vld [vmem:[%s4175_s10 + $0xa8] sm:$0xf]  ;;  %v3877_v57 = vld [vmem:[%s4175_s10 + $0xb4] sm:$0xf0]  ;;  %v2930_v58 = vor.u32 %v3876_v53, %v2929_v52  ;;  %v2945_v10 = vld [vmem:[%s4175_s10 + $0xc0] sm:$0xf] }
  0x23   : > { %834 = vmatpush.bf16.msra.mxu2 %v4242_v21  ;;  %v2938_v60 = vor.u32 %v3877_v57, %v2937_v56  ;;  %v3880_v11 = vld [vmem:[%s4175_s10 + $0xcc] sm:$0xf0]  ;;  %v2947_v22 = vld [vmem:[%s4175_s10 + $0xd0] sm:$0xf0]  ;;  %v2953_v23 = vld [vmem:[%s4175_s10 + $0xc8] sm:$0xf] }
  0x24   : > { %v2963_v40 = vld [vmem:[%s4175_s10 + $0xf0] sm:$0xf0]  ;;  %v2969_v41 = vld [vmem:[%s4175_s10 + $0xe8] sm:$0xf]  ;;  %v3888_v52 = vld [vmem:[%s4175_s10 + $0x10c] sm:$0xf0] }
  0x25   : > { %707 = vmatpush.bf16.msra.mxu0 %v4252_v24  ;;  %3124 = vmatmul.msk.bf16.gmra.mxu3 %vm667_vm0, %v2878_v27  ;;  %v3866_v27 = vld [vmem:[%s4175_s10 + $0x64] sm:$0xf]  ;;  %v3889_v56 = vld [vmem:[%s4175_s10 + $0x114] sm:$0xf0]  ;;  %vm2746_vm4 = vmand %vm2744_vm2, %vm2745_vm3 }
  0x26   : > { %771 = vmatpush.bf16.msra.mxu1 %v4257_v25  ;;  %1249 = vmatpush.bf16.msrb.mxu3 %v4231_v19  ;;  %v2902_v35 = vor.u32 %v3866_v27, %v2899_v30  ;;  %v3881_v27 = vld [vmem:[%s4175_s10 + $0xd4] sm:$0xf0]  ;;  %v2946_v30 = vor.u32 %v3880_v11, %v2945_v10  ;;  %v3886_v53 = vld [vmem:[%s4175_s10 + $0x104] sm:$0xf]  ;;  %v3895_v10 = vld [vmem:[%s4175_s10 + $0x14c] sm:$0xf] }
  0x27   : > { %835 = vmatpush.bf16.msra.mxu2 %v4263_v26  ;;  %v2954_v32 = vor.u32 %v3881_v27, %v2953_v23  ;;  %v3019_v11 = vld [vmem:[%s4175_s10 + $0x158] sm:$0x10] }
  0x29   : > { %708 = vmatpush.bf16.msra.mxu0 %v4269_v28 }
  0x2a   : > { %772 = vmatpush.bf16.msra.mxu1 %v4274_v29  ;;  %1250 = vmatpush.bf16.msrb.mxu3 %v4252_v24 }
  0x2b   : > { %836 = vmatpush.bf16.msra.mxu2 %v4286_v34 }
  0x2c   : > { %709 = vmatmul.bf16.vlgmr.msra.gmra.mxu0 %v2850_v37  ;;  %v3875_v37 = vld [vmem:[%s4175_s10 + $0xac] sm:$0xf] }
  0x2d   : > { %1308 = vmatpush.bf16.msrb.mxu0 %v4127_v1  ;;  %773 = vmatmul.bf16.vlgmr.msra.gmra.mxu1 %v2854_v38  ;;  %v2939_v38 = vld [vmem:[%s4175_s10 + $0xb8] sm:$0xf0] }
  0x2e   : > { %1372 = vmatpush.bf16.msrb.mxu1 %v4132_v2  ;;  %837 = vmatmul.bf16.vlgmr.msra.gmra.mxu2 %v2858_v39  ;;  %v2942_v39 = vor.u32 %v3875_v37, %v2939_v38  ;;  %v2961_v37 = vld [vmem:[%s4175_s10 + $0xe0] sm:$0xf]  ;;  %v3884_v38 = vld [vmem:[%s4175_s10 + $0xec] sm:$0xf0] }
  0x2f   : > { %1443 = vmatpush.bf16.msrb.mxu2 %v4158_v6  ;;  %1251 = vmatpush.bf16.msrb.mxu3 %v4269_v28 }
  0x31   : > { %1309 = vmatpush.bf16.msrb.mxu0 %v4144_v4 }
  0x32   : > { %1373 = vmatpush.bf16.msrb.mxu1 %v4152_v5 }
  0x33   : > { %2008 = vmatpush.bf16.msra.mxu2 %v4158_v6  ;;  %1809 = vmatpush.bf16.msra.mxu3 %v4122_v0 }
  0x35   : > { %1310 = vmatpush.bf16.msrb.mxu0 %v4170_v8  ;;  %3125 = vmatmul.msk.bf16.gmra.mxu3 %vm667_vm0, %v2894_v42  ;;  %v3870_v42 = vld [vmem:[%s4175_s10 + $0x84] sm:$0xf] }
  0x36   : > { %1374 = vmatpush.bf16.msrb.mxu1 %v4181_v9  ;;  %v2918_v47 = vor.u32 %v3870_v42, %v2915_v43  ;;  %v3885_v42 = vld [vmem:[%s4175_s10 + $0xf4] sm:$0xf0]  ;;  %v2962_v43 = vor.u32 %v3884_v38, %v2961_v37  ;;  %v3890_v37 = vld [vmem:[%s4175_s10 + $0x124] sm:$0xf]  ;;  %v2995_v38 = vld [vmem:[%s4175_s10 + $0x130] sm:$0xf0] }
  0x37   : > { %1810 = vmatpush.bf16.msra.mxu3 %v4139_v3  ;;  %v2970_v45 = vor.u32 %v3885_v42, %v2969_v41 }
  0x39   : > { %1311 = vmatpush.bf16.msrb.mxu0 %v4197_v14 }
  0x3a   : > { %1375 = vmatpush.bf16.msrb.mxu1 %v4203_v15 }
  0x3b   : > { %1811 = vmatpush.bf16.msra.mxu3 %v4165_v7 }
  0x3c   : > { %714 = vmatmul.bf16.gmra.mxu0 %v2866_v49  ;;  %v3879_v49 = vld [vmem:[%s4175_s10 + $0xcc] sm:$0xf] }
  0x3d   : > { %1312 = vmatpush.bf16.msrb.mxu0 %v4217_v17  ;;  %778 = vmatmul.bf16.gmra.mxu1 %v2870_v50  ;;  %v2955_v50 = vld [vmem:[%s4175_s10 + $0xd8] sm:$0xf0] }
  0x3e   : > { %1376 = vmatpush.bf16.msrb.mxu1 %v4223_v18  ;;  %842 = vmatmul.bf16.gmra.mxu2 %v2874_v51  ;;  %v2958_v51 = vor.u32 %v3879_v49, %v2955_v50 }
  0x3f   : > { %1812 = vmatpush.bf16.msra.mxu3 %v4192_v13 }
  0x41   : > { %1313 = vmatpush.bf16.msrb.mxu0 %v4236_v20 }
  0x42   : > { %1377 = vmatpush.bf16.msrb.mxu1 %v4242_v21 }
  0x43   : > { %1813 = vmatpush.bf16.msra.mxu3 %v4212_v16 }
  0x45   : > { %1314 = vmatpush.bf16.msrb.mxu0 %v4257_v25  ;;  %3126 = vmatmul.msk.bf16.gmra.mxu3 %vm667_vm0, %v2910_v54  ;;  %v3874_v54 = vld [vmem:[%s4175_s10 + $0xa4] sm:$0xf] }
  0x46   : > { %1378 = vmatpush.bf16.msrb.mxu1 %v4263_v26  ;;  %v2934_v59 = vor.u32 %v3874_v54, %v2931_v55  ;;  %v2979_v54 = vld [vmem:[%s4175_s10 + $0x110] sm:$0xf0]  ;;  %v2985_v55 = vld [vmem:[%s4175_s10 + $0x108] sm:$0xf] }
  0x47   : > { %1814 = vmatpush.bf16.msra.mxu3 %v4231_v19 }
  0x49   : > { %1315 = vmatpush.bf16.msrb.mxu0 %v4274_v29 }
  0x4a   : > { %1379 = vmatpush.bf16.msrb.mxu1 %v4286_v34 }
  0x4b   : > { %1815 = vmatpush.bf16.msra.mxu3 %v4252_v24 }
  0x4c   : > { %719 = vmatmul.bf16.gmra.mxu0 %v2882_v61  ;;  %v3883_v61 = vld [vmem:[%s4175_s10 + $0xec] sm:$0xf] }
  0x4d   : > { %1873 = vmatpush.bf16.msra.mxu0 %v4127_v1  ;;  %783 = vmatmul.bf16.gmra.mxu1 %v2886_v62  ;;  %v2971_v62 = vld [vmem:[%s4175_s10 + $0xf8] sm:$0xf0] }
  0x4e   : > { %1937 = vmatpush.bf16.msra.mxu1 %v4132_v2  ;;  %847 = vmatmul.bf16.gmra.mxu2 %v2890_v63  ;;  %v2974_v63 = vor.u32 %v3883_v61, %v2971_v62  ;;  %v2986_v61 = vor.u32 %v3889_v56, %v2985_v55 }
  0x4f   : > { %1816 = vmatpush.bf16.msra.mxu3 %v4269_v28 }
  0x51   : > { %1874 = vmatpush.bf16.msra.mxu0 %v4144_v4 }
  0x52   : > { %1938 = vmatpush.bf16.msra.mxu1 %v4152_v5 }
  0x55   : > { %1875 = vmatpush.bf16.msra.mxu0 %v4170_v8  ;;  %3127 = vmatmul.msk.bf16.gmra.mxu3 %vm667_vm0, %v2926_v12  ;;  %v3878_v12 = vld [vmem:[%s4175_s10 + $0xc4] sm:$0xf] }
  0x56   : > { %1939 = vmatpush.bf16.msra.mxu1 %v4181_v9  ;;  %v2950_v31 = vor.u32 %v3878_v12, %v2947_v22 }
  0x59   : > { %1876 = vmatpush.bf16.msra.mxu0 %v4197_v14 }
  0x5a   : > { %1940 = vmatpush.bf16.msra.mxu1 %v4203_v15 }
  0x5c   : > { %724 = vmatmul.bf16.gmra.mxu0 %v2898_v33  ;;  %v3887_v33 = vld [vmem:[%s4175_s10 + $0x10c] sm:$0xf] }
  0x5d   : > { %1877 = vmatpush.bf16.msra.mxu0 %v4217_v17  ;;  %788 = vmatmul.bf16.gmra.mxu1 %v2902_v35  ;;  %v2987_v35 = vld [vmem:[%s4175_s10 + $0x118] sm:$0xf0] }
  0x5e   : > { %1941 = vmatpush.bf16.msra.mxu1 %v4223_v18  ;;  %852 = vmatmul.bf16.gmra.mxu2 %v2906_v36  ;;  %v2990_v36 = vor.u32 %v3887_v33, %v2987_v35  ;;  %v2993_v35 = vld [vmem:[%s4175_s10 + $0x120] sm:$0xf] }
  0x61   : > { %1878 = vmatpush.bf16.msra.mxu0 %v4236_v20 }
  0x62   : > { %1942 = vmatpush.bf16.msra.mxu1 %v4242_v21 }
  0x65   : > { %1879 = vmatpush.bf16.msra.mxu0 %v4257_v25  ;;  %3128 = vmatmul.msk.bf16.gmra.mxu3 %vm667_vm0, %v2942_v39  ;;  %v3882_v39 = vld [vmem:[%s4175_s10 + $0xe4] sm:$0xf] }
  0x66   : > { %1943 = vmatpush.bf16.msra.mxu1 %v4263_v26  ;;  %v2966_v44 = vor.u32 %v3882_v39, %v2963_v40  ;;  %v3001_v39 = vld [vmem:[%s4175_s10 + $0x128] sm:$0xf]  ;;  %v3893_v40 = vld [vmem:[%s4175_s10 + $0x134] sm:$0xf0] }
  0x69   : > { %1880 = vmatpush.bf16.msra.mxu0 %v4274_v29 }
  0x6a   : > { %1944 = vmatpush.bf16.msra.mxu1 %v4286_v34 }
  0x6c   : > { %729 = vmatmul.bf16.gmra.mxu0 %v2914_v46 }
  0x6d   : > { %793 = vmatmul.bf16.gmra.mxu1 %v2918_v47  ;;  %v3891_v47 = vld [vmem:[%s4175_s10 + $0x12c] sm:$0xf] }
  0x6e   : > { %857 = vmatmul.bf16.gmra.mxu2 %v2922_v48  ;;  %v3003_v48 = vld [vmem:[%s4175_s10 + $0x138] sm:$0xf0] }
  0x6f   : > { %v3006_v50 = vor.u32 %v3891_v47, %v3003_v48  ;;  %v3002_v48 = vor.u32 %v3893_v40, %v3001_v39  ;;  %v3904_v40 = vld [vmem:[%s4175_s10 + $0x18c] sm:$0xf0] }
  0x75   : > { %3129 = vmatmul.msk.bf16.gmra.mxu3 %vm667_vm0, %v2958_v51  ;;  %v2977_v51 = vld [vmem:[%s4175_s10 + $0x100] sm:$0xf] }
  0x76   : > { %v2978_v57 = vor.u32 %v3888_v52, %v2977_v51  ;;  %v3180_v52 = vld [vmem:[%s4175_s10 + $0x160] sm:$0xf] }
  0x7c   : > { %734 = vmatmul.bf16.gmra.mxu0 %v2930_v58  ;;  %v2982_v58 = vor.u32 %v3886_v53, %v2979_v54  ;;  %v3900_v53 = vld [vmem:[%s4175_s10 + $0x16c] sm:$0xf0] }
  0x7d   : > { %798 = vmatmul.bf16.gmra.mxu1 %v2934_v59 }
  0x7e   : > { %862 = vmatmul.bf16.gmra.mxu2 %v2938_v60 }
  0x85   : > { %3130 = vmatmul.msk.bf16.gmra.mxu3 %vm667_vm0, %v2974_v63 }
  0x8c   : > { %739 = vmatmul.bf16.gmra.mxu0 %v2946_v30 }
  0x8d   : > { %803 = vmatmul.bf16.gmra.mxu1 %v2950_v31 }
  0x8e   : > { %867 = vmatmul.bf16.gmra.mxu2 %v2954_v32  ;;  %v3022_v32 = vor.u32 %v3895_v10, %v3019_v11  ;;  %v3894_v10 = vld [vmem:[%s4175_s10 + $0x144] sm:$0xf]  ;;  %v3011_v11 = vld [vmem:[%s4175_s10 + $0x150] sm:$0x10] }
  0x95   : > { %3131 = vmatmul.msk.bf16.gmra.mxu3 %vm667_vm0, %v2990_v36  ;;  %v3892_v36 = vld [vmem:[%s4175_s10 + $0x12c] sm:$0xf0] }
  0x96   : > { %v2994_v42 = vor.u32 %v3892_v36, %v2993_v35 }
  0x98   : > { %v902_v46 = vpop.f32.mrf.mxu3 }
  0x9c   : > { %744 = vmatmul.bf16.gmra.mxu0 %v2962_v43  ;;  %v2998_v43 = vor.u32 %v3890_v37, %v2995_v38 }
  0x9d   : > { %808 = vmatmul.bf16.gmra.mxu1 %v2966_v44 }
  0x9e   : > { %872 = vmatmul.bf16.gmra.mxu2 %v2970_v45 }
  0xa0   : > { %v904_v49 = vpop.f32.mrf.mxu3 }
  0xa5   : > { %3132 = vmatmul.msk.bf16.gmra.mxu3 %vm667_vm0, %v3006_v50 }
  0xa8   : > { %v907_v63 = vpop.f32.mrf.mxu3 }
  0xa9   : > { %v710_v59 = vpop.f32.mrf.mxu0 }
  0xaa   : > { %v774_v60 = vpop.f32.mrf.mxu1 }
  0xab   : > { %v775_v62 = vadd.f32 %v774_v60, %v710_v59  ;;  %v3181_v60 = vor.u32 %v3900_v53, %v3180_v52  ;;  %v3188_v52 = vld [vmem:[%s4175_s10 + $0x168] sm:$0xf]  ;;  %v3901_v53 = vld [vmem:[%s4175_s10 + $0x174] sm:$0xf0] }
  0xac   : > { %749 = vmatmul.bf16.gmra.mxu0 %v2978_v57 }
  0xad   : > { %813 = vmatmul.bf16.gmra.mxu1 %v2982_v58 }
  0xae   : > { %877 = vmatmul.bf16.gmra.mxu2 %v2986_v61 }
  0xb0   : > { %v909_v31 = vpop.f32.mrf.mxu3 }
  0xb1   : > { %v838_v12 = vpop.f32.mrf.mxu2  ;;  %v712_v23 = vpop.f32.mrf.mxu0 }
  0xb2   : > { %v839_v22 = vadd.f32 %v838_v12, %v775_v62  ;;  %v776_v27 = vpop.f32.mrf.mxu1  ;;  %v3896_v62 = vld [vmem:[%s4175_s10 + $0x14c] sm:$0x10]  ;;  %v3017_v12 = vld [vmem:[%s4175_s10 + $0x148] sm:$0xf] }
  0xb3   : > { %v777_v30 = vadd.f32 %v776_v27, %v712_v23 }
  0xb4   : > { %v4413_v33 = vadd.f32 %v902_v46, %v839_v22  ;;  %v3897_v22 = vld [vmem:[%s4175_s10 + $0x154] sm:$0x10] }
  0xb5   : > { %3133 = vmatmul.msk.bf16.gmra.mxu3 %vm667_vm0, %v3022_v32  ;;  %v3018_v37 = vor.u32 %v3897_v22, %v3017_v12 }
  0xb8   : > { %v912_v46 = vpop.f32.mrf.mxu3 }
  0xb9   : > { %v840_v41 = vpop.f32.mrf.mxu2  ;;  %v715_v45 = vpop.f32.mrf.mxu0 }
  0xba   : > { %v841_v44 = vadd.f32 %v840_v41, %v777_v30  ;;  %v779_v47 = vpop.f32.mrf.mxu1  ;;  %v3014_v30 = vor.u32 %v3894_v10, %v3011_v11  ;;  %v3908_v11 = vld [vmem:[%s4175_s10 + $0x1ac] sm:$0xf0] }
  0xbb   : > { %v780_v50 = vadd.f32 %v779_v47, %v715_v45 }
  0xbc   : > { %v4422_v51 = vadd.f32 %v904_v49, %v841_v44  ;;  %754 = vmatmul.bf16.gmra.mxu0 %v2994_v42  ;;  %v3009_v49 = vld [vmem:[%s4175_s10 + $0x140] sm:$0xf] }
  0xbd   : > { %818 = vmatmul.bf16.gmra.mxu1 %v2998_v43  ;;  %v3010_v27 = vor.u32 %v3896_v62, %v3009_v49 }
  0xbe   : > { %882 = vmatmul.bf16.gmra.mxu2 %v3002_v48  ;;  %v3898_v48 = vld [vmem:[%s4175_s10 + $0x164] sm:$0xf] }
  0xc0   : > { %v914_v59 = vpop.f32.mrf.mxu3 }
  0xc1   : > { %v843_v54 = vpop.f32.mrf.mxu2  ;;  %v717_v56 = vpop.f32.mrf.mxu0 }
  0xc2   : > { %v844_v55 = vadd.f32 %v843_v54, %v780_v50  ;;  %v781_v57 = vpop.f32.mrf.mxu1  ;;  %v3182_v50 = vld [vmem:[%s4175_s10 + $0x170] sm:$0xf0]  ;;  %v3899_v54 = vld [vmem:[%s4175_s10 + $0x16c] sm:$0xf] }
  0xc3   : > { %v782_v58 = vadd.f32 %v781_v57, %v717_v56  ;;  %v3185_v56 = vor.u32 %v3898_v48, %v3182_v50  ;;  %v3189_v57 = vor.u32 %v3901_v53, %v3188_v52  ;;  %v3906_v48 = vld [vmem:[%s4175_s10 + $0x1a4] sm:$0xf]  ;;  %v3220_v50 = vld [vmem:[%s4175_s10 + $0x1a8] sm:$0xf]  ;;  %v3909_v52 = vld [vmem:[%s4175_s10 + $0x1b4] sm:$0xf0] }
  0xc4   : > { %v4426_v61 = vadd.f32 %v907_v63, %v844_v55  ;;  %v3190_v55 = vld [vmem:[%s4175_s10 + $0x178] sm:$0xf0]  ;;  %v3907_v53 = vld [vmem:[%s4175_s10 + $0x1ac] sm:$0xf] }
  0xc5   : > { %1252 = vmatmul.bf16.vlgmr.msrb.gmra.mxu3 %v3181_v60  ;;  %v3193_v49 = vor.u32 %v3899_v54, %v3190_v55  ;;  %v3222_v54 = vld [vmem:[%s4175_s10 + $0x1b8] sm:$0xf0] }
  0xc6   : > { %2374 = vmatpush.bf16.msrb.mxu3 %v4122_v0  ;;  %v3196_v0 = vld [vmem:[%s4175_s10 + $0x180] sm:$0xf] }
  0xc8   : > { %v917_v38 = vpop.f32.mrf.mxu3 }
  0xc9   : > { %v845_v23 = vpop.f32.mrf.mxu2  ;;  %v720_v35 = vpop.f32.mrf.mxu0 }
  0xca   : > { %v846_v32 = vadd.f32 %v845_v23, %v782_v58  ;;  %v784_v36 = vpop.f32.mrf.mxu1  ;;  %2375 = vmatpush.bf16.msrb.mxu3 %v4139_v3  ;;  %v3197_v3 = vor.u32 %v3904_v40, %v3196_v0 }
  0xcb   : > { %v785_v63 = vadd.f32 %v784_v36, %v720_v35  ;;  %v3903_v35 = vld [vmem:[%s4175_s10 + $0x18c] sm:$0xf]  ;;  %v3206_v36 = vld [vmem:[%s4175_s10 + $0x198] sm:$0xf0] }
  0xcc   : > { %v4435_v39 = vadd.f32 %v909_v31, %v846_v32  ;;  %759 = vmatmul.bf16.gmra.mxu0 %v3010_v27  ;;  %v3902_v27 = vld [vmem:[%s4175_s10 + $0x184] sm:$0xf]  ;;  %v3905_v32 = vld [vmem:[%s4175_s10 + $0x194] sm:$0xf0] }
  0xcd   : > { %823 = vmatmul.bf16.gmra.mxu1 %v3014_v30  ;;  %v3204_v30 = vld [vmem:[%s4175_s10 + $0x188] sm:$0xf] }
  0xce   : > { %887 = vmatmul.bf16.gmra.mxu2 %v3018_v37  ;;  %2376 = vmatpush.bf16.msrb.mxu3 %v4165_v7 }
  0xd0   : > { %v4441_v45 = vpop.f32.mrf.mxu3 }
  0xd1   : > { %v848_v41 = vpop.f32.mrf.mxu2  ;;  %v722_v43 = vpop.f32.mrf.mxu0 }
  0xd2   : > { %v849_v42 = vadd.f32 %v848_v41, %v785_v63  ;;  %v786_v31 = vpop.f32.mrf.mxu1  ;;  %2377 = vmatpush.bf16.msrb.mxu3 %v4192_v13  ;;  %v3205_v63 = vor.u32 %v3905_v32, %v3204_v30 }
  0xd3   : > { %v787_v44 = vadd.f32 %v786_v31, %v722_v43 }
  0xd4   : > { %v4443_v47 = vadd.f32 %v912_v46, %v849_v42 }
  0xd5   : > { %1257 = vmatmul.bf16.gmra.mxu3 %v3197_v3 }
  0xd6   : > { %2378 = vmatpush.bf16.msrb.mxu3 %v4212_v16  ;;  %v3212_v16 = vld [vmem:[%s4175_s10 + $0x1a0] sm:$0xf] }
  0xd7   : > { %v3213_v23 = vor.u32 %v3908_v11, %v3212_v16 }
  0xd8   : > { %v922_v13 = vpop.f32.mrf.mxu3 }
  0xd9   : > { %v850_v7 = vpop.f32.mrf.mxu2  ;;  %v725_v60 = vpop.f32.mrf.mxu0 }
  0xda   : > { %v851_v58 = vadd.f32 %v850_v7, %v787_v44  ;;  %v789_v46 = vpop.f32.mrf.mxu1  ;;  %2379 = vmatpush.bf16.msrb.mxu3 %v4231_v19  ;;  %v3221_v7 = vor.u32 %v3909_v52, %v3220_v50  ;;  %v3254_v50 = vld [vmem:[%s4175_s10 + $0x1f8] sm:$0xf0] }
  0xdb   : > { %v790_v62 = vadd.f32 %v789_v46, %v725_v60 }
  0xdc   : > { %v4453_v10 = vadd.f32 %v914_v59, %v851_v58  ;;  %1316 = vmatmul.bf16.vlgmr.msrb.gmra.mxu0 %v3185_v56  ;;  %v3225_v58 = vor.u32 %v3907_v53, %v3222_v54 }
  0xdd   : > { %1380 = vmatmul.bf16.vlgmr.msrb.gmra.mxu1 %v3189_v57  ;;  %2438 = vmatpush.bf16.msrb.mxu0 %v4127_v1 }
  0xde   : > { %3354 = vmatmul.msk.bf16.vlgmr.msrb.gmra.mxu2 %vm667_vm0, %v3193_v49  ;;  %2502 = vmatpush.bf16.msrb.mxu1 %v4132_v2  ;;  %v3916_v49 = vld [vmem:[%s4175_s10 + $0x1ec] sm:$0xf0] }
  0xdf   : > { %2573 = vmatpush.bf16.msrb.mxu2 %v4158_v6  ;;  %2380 = vmatpush.bf16.msrb.mxu3 %v4252_v24  ;;  %v3198_v24 = vld [vmem:[%s4175_s10 + $0x190] sm:$0xf0] }
  0xe0   : > { %v4464_v6 = vpop.f32.mrf.mxu3  ;;  %v3201_v37 = vor.u32 %v3902_v27, %v3198_v24  ;;  %v3238_v27 = vld [vmem:[%s4175_s10 + $0x1d8] sm:$0xf0] }
  0xe1   : > { %v853_v59 = vpop.f32.mrf.mxu2  ;;  %v727_v12 = vpop.f32.mrf.mxu0  ;;  %2439 = vmatpush.bf16.msrb.mxu0 %v4144_v4 }
  0xe2   : > { %v854_v19 = vadd.f32 %v853_v59, %v790_v62  ;;  %v791_v22 = vpop.f32.mrf.mxu1  ;;  %2503 = vmatpush.bf16.msrb.mxu1 %v4152_v5 }
  0xe3   : > { %v792_v1 = vadd.f32 %v791_v22, %v727_v12  ;;  %2381 = vmatpush.bf16.msrb.mxu3 %v4269_v28  ;;  %v3209_v28 = vor.u32 %v3903_v35, %v3206_v36  ;;  %v3910_v12 = vld [vmem:[%s4175_s10 + $0x1c4] sm:$0xf]  ;;  %v3230_v22 = vld [vmem:[%s4175_s10 + $0x1d0] sm:$0xf0] }
  0xe4   : > { %v4467_v2 = vadd.f32 %v917_v38, %v854_v19  ;;  %v3233_v30 = vor.u32 %v3910_v12, %v3230_v22  ;;  %v3262_v12 = vld [vmem:[%s4175_s10 + $0x210] sm:$0xf0]  ;;  %v3268_v22 = vld [vmem:[%s4175_s10 + $0x208] sm:$0xf] }
  0xe5   : > { %2440 = vmatpush.bf16.msrb.mxu0 %v4170_v8  ;;  %1262 = vmatmul.bf16.gmra.mxu3 %v3213_v23  ;;  %v3911_v23 = vld [vmem:[%s4175_s10 + $0x1cc] sm:$0xf] }
  0xe6   : > { %2504 = vmatpush.bf16.msrb.mxu1 %v4181_v9  ;;  %v3228_v9 = vld [vmem:[%s4175_s10 + $0x1c0] sm:$0xf] }
  0xe8   : > { %v927_v41 = vpop.f32.mrf.mxu3 }
  0xe9   : > { %v855_v4 = vpop.f32.mrf.mxu2  ;;  %v730_v38 = vpop.f32.mrf.mxu0  ;;  %2441 = vmatpush.bf16.msrb.mxu0 %v4197_v14  ;;  %v3912_v14 = vld [vmem:[%s4175_s10 + $0x1cc] sm:$0xf0] }
  0xea   : > { %v856_v5 = vadd.f32 %v855_v4, %v792_v1  ;;  %v794_v0 = vpop.f32.mrf.mxu1  ;;  %2505 = vmatpush.bf16.msrb.mxu1 %v4203_v15  ;;  %v3229_v3 = vor.u32 %v3912_v14, %v3228_v9  ;;  %v3236_v1 = vld [vmem:[%s4175_s10 + $0x1c8] sm:$0xf] }
  0xeb   : > { %v795_v40 = vadd.f32 %v794_v0, %v730_v38  ;;  %v3260_v0 = vld [vmem:[%s4175_s10 + $0x200] sm:$0xf] }
  0xec   : > { %v4481_v8 = vadd.f32 %v4441_v45, %v856_v5  ;;  %1321 = vmatmul.bf16.gmra.mxu0 %v3201_v37  ;;  %v3241_v37 = vor.u32 %v3911_v23, %v3238_v27  ;;  %v3270_v23 = vld [vmem:[%s4175_s10 + $0x218] sm:$0xf0] }
  0xed   : > { %1385 = vmatmul.bf16.gmra.mxu1 %v3205_v63  ;;  %2442 = vmatpush.bf16.msrb.mxu0 %v4217_v17 }
  0xee   : > { %3355 = vmatmul.msk.bf16.gmra.mxu2 %vm667_vm0, %v3209_v28  ;;  %2506 = vmatpush.bf16.msrb.mxu1 %v4223_v18  ;;  %v3214_v18 = vld [vmem:[%s4175_s10 + $0x1b0] sm:$0xf0]  ;;  %v3920_v28 = vld [vmem:[%s4175_s10 + $0x20c] sm:$0xf0] }
  0xef   : > { %v3217_v55 = vor.u32 %v3906_v48, %v3214_v18  ;;  %v3917_v48 = vld [vmem:[%s4175_s10 + $0x1f4] sm:$0xf0]  ;;  %v3915_v18 = vld [vmem:[%s4175_s10 + $0x1ec] sm:$0xf] }
  0xf0   : > { %v929_v45 = vpop.f32.mrf.mxu3 }
  0xf1   : > { %v858_v42 = vpop.f32.mrf.mxu2  ;;  %v732_v43 = vpop.f32.mrf.mxu0  ;;  %2443 = vmatpush.bf16.msrb.mxu0 %v4236_v20 }
  0xf2   : > { %v859_v15 = vadd.f32 %v858_v42, %v795_v40  ;;  %v796_v31 = vpop.f32.mrf.mxu1  ;;  %2507 = vmatpush.bf16.msrb.mxu1 %v4242_v21 }
  0xf3   : > { %v797_v44 = vadd.f32 %v796_v31, %v732_v43  ;;  %v3261_v43 = vor.u32 %v3920_v28, %v3260_v0  ;;  %v3292_v0 = vld [vmem:[%s4175_s10 + $0x240] sm:$0xf]  ;;  %v3928_v28 = vld [vmem:[%s4175_s10 + $0x24c] sm:$0xf0] }
  0xf4   : > { %v4490_v17 = vadd.f32 %v922_v13, %v859_v15 }
  0xf5   : > { %2444 = vmatpush.bf16.msrb.mxu0 %v4257_v25  ;;  %1267 = vmatmul.bf16.gmra.mxu3 %v3229_v3  ;;  %v3252_v3 = vld [vmem:[%s4175_s10 + $0x1e8] sm:$0xf] }
  0xf6   : > { %2508 = vmatpush.bf16.msrb.mxu1 %v4263_v26  ;;  %v3244_v26 = vld [vmem:[%s4175_s10 + $0x1e0] sm:$0xf]  ;;  %v3253_v54 = vor.u32 %v3917_v48, %v3252_v3  ;;  %v3278_v3 = vld [vmem:[%s4175_s10 + $0x230] sm:$0xf0]  ;;  %v3284_v48 = vld [vmem:[%s4175_s10 + $0x228] sm:$0xf] }
  0xf7   : > { %v3245_v59 = vor.u32 %v3916_v49, %v3244_v26 }
  0xf8   : > { %v932_v46 = vpop.f32.mrf.mxu3 }
  0xf9   : > { %v860_v20 = vpop.f32.mrf.mxu2  ;;  %v735_v21 = vpop.f32.mrf.mxu0  ;;  %2445 = vmatpush.bf16.msrb.mxu0 %v4274_v29 }
  0xfa   : > { %v861_v56 = vadd.f32 %v860_v20, %v797_v44  ;;  %v799_v57 = vpop.f32.mrf.mxu1  ;;  %2509 = vmatpush.bf16.msrb.mxu1 %v4286_v34  ;;  %v3914_v44 = vld [vmem:[%s4175_s10 + $0x1e4] sm:$0xf] }
  0xfb   : > { %v800_v60 = vadd.f32 %v799_v57, %v735_v21 }
  0xfc   : > { %v4503_v25 = vadd.f32 %v4464_v6, %v861_v56  ;;  %1326 = vmatmul.bf16.gmra.mxu0 %v3217_v55  ;;  %v3913_v6 = vld [vmem:[%s4175_s10 + $0x1d4] sm:$0xf0]  ;;  %v3257_v56 = vor.u32 %v3915_v18, %v3254_v50  ;;  %v3923_v50 = vld [vmem:[%s4175_s10 + $0x22c] sm:$0xf] }
  0xfd   : > { %1390 = vmatmul.bf16.gmra.mxu1 %v3221_v7  ;;  %v3237_v32 = vor.u32 %v3913_v6, %v3236_v1  ;;  %v3921_v1 = vld [vmem:[%s4175_s10 + $0x214] sm:$0xf0]  ;;  %v3919_v6 = vld [vmem:[%s4175_s10 + $0x20c] sm:$0xf] }
  0xfe   : > { %3356 = vmatmul.msk.bf16.gmra.mxu2 %vm667_vm0, %v3225_v58  ;;  %v3925_v18 = vld [vmem:[%s4175_s10 + $0x234] sm:$0xf0] }
 0x100   : > { %v934_v34 = vpop.f32.mrf.mxu3 }
 0x101   : > { %v863_v29 = vpop.f32.mrf.mxu2  ;;  %v737_v13 = vpop.f32.mrf.mxu0 }
 0x102   : > { %v864_v62 = vadd.f32 %v863_v29, %v800_v60  ;;  %v801_v16 = vpop.f32.mrf.mxu1  ;;  %v3276_v60 = vld [vmem:[%s4175_s10 + $0x220] sm:$0xf] }
 0x103   : > { %v802_v11 = vadd.f32 %v801_v16, %v737_v13 }
 0x104   : > { %v4508_v19 = vadd.f32 %v927_v41, %v864_v62 }
 0x105   : > { %1272 = vmatmul.bf16.gmra.mxu3 %v3245_v59 }
 0x108   : > { %v937_v5 = vpop.f32.mrf.mxu3 }
 0x109   : > { %v865_v24 = vpop.f32.mrf.mxu2  ;;  %v740_v36 = vpop.f32.mrf.mxu0 }
 0x10a   : > { %v866_v35 = vadd.f32 %v865_v24, %v802_v11  ;;  %v804_v4 = vpop.f32.mrf.mxu1 }
 0x10b   : > { %v805_v63 = vadd.f32 %v804_v4, %v740_v36  ;;  %v3273_v4 = vor.u32 %v3919_v6, %v3270_v23  ;;  %v3294_v6 = vld [vmem:[%s4175_s10 + $0x250] sm:$0xf0]  ;;  %v3300_v23 = vld [vmem:[%s4175_s10 + $0x248] sm:$0xf] }
 0x10c   : > { %v4516_v38 = vadd.f32 %v929_v45, %v866_v35  ;;  %1331 = vmatmul.bf16.gmra.mxu0 %v3233_v30  ;;  %v3246_v45 = vld [vmem:[%s4175_s10 + $0x1f0] sm:$0xf0]  ;;  %v3269_v30 = vor.u32 %v3921_v1, %v3268_v22 }
 0x10d   : > { %1395 = vmatmul.bf16.gmra.mxu1 %v3237_v32  ;;  %v3249_v53 = vor.u32 %v3914_v44, %v3246_v45  ;;  %v3293_v44 = vor.u32 %v3928_v28, %v3292_v0 }
 0x10e   : > { %3357 = vmatmul.msk.bf16.gmra.mxu2 %vm667_vm0, %v3241_v37 }
 0x110   : > { %v939_v15 = vpop.f32.mrf.mxu3 }
 0x111   : > { %v868_v40 = vpop.f32.mrf.mxu2  ;;  %v742_v9 = vpop.f32.mrf.mxu0 }
 0x112   : > { %v869_v41 = vadd.f32 %v868_v40, %v805_v63  ;;  %v806_v14 = vpop.f32.mrf.mxu1 }
 0x113   : > { %v807_v42 = vadd.f32 %v806_v14, %v742_v9 }
 0x114   : > { %v4521_v31 = vadd.f32 %v932_v46, %v869_v41  ;;  %v3924_v46 = vld [vmem:[%s4175_s10 + $0x22c] sm:$0xf0] }
 0x115   : > { %1277 = vmatmul.bf16.gmra.mxu3 %v3261_v43  ;;  %v3277_v11 = vor.u32 %v3924_v46, %v3276_v60 }
 0x118   : > { %v942_v57 = vpop.f32.mrf.mxu3 }
 0x119   : > { %v870_v52 = vpop.f32.mrf.mxu2  ;;  %v745_v55 = vpop.f32.mrf.mxu0 }
 0x11a   : > { %v871_v20 = vadd.f32 %v870_v52, %v807_v42  ;;  %v809_v7 = vpop.f32.mrf.mxu1  ;;  %v3286_v52 = vld [vmem:[%s4175_s10 + $0x238] sm:$0xf0] }
 0x11b   : > { %v810_v21 = vadd.f32 %v809_v7, %v745_v55 }
 0x11c   : > { %v4529_v58 = vadd.f32 %v934_v34, %v871_v20  ;;  %1336 = vmatmul.bf16.gmra.mxu0 %v3249_v53  ;;  %v3918_v34 = vld [vmem:[%s4175_s10 + $0x204] sm:$0xf]  ;;  %v3285_v20 = vor.u32 %v3925_v18, %v3284_v48 }
 0x11d   : > { %1400 = vmatmul.bf16.gmra.mxu1 %v3253_v54  ;;  %v3265_v24 = vor.u32 %v3918_v34, %v3262_v12 }
 0x11e   : > { %3358 = vmatmul.msk.bf16.gmra.mxu2 %vm667_vm0, %v3257_v56 }
 0x120   : > { %v944_v16 = vpop.f32.mrf.mxu3 }
 0x121   : > { %v873_v26 = vpop.f32.mrf.mxu2  ;;  %v747_v29 = vpop.f32.mrf.mxu0 }
 0x122   : > { %v874_v49 = vadd.f32 %v873_v26, %v810_v21  ;;  %v811_v62 = vpop.f32.mrf.mxu1  ;;  %v3289_v21 = vor.u32 %v3923_v50, %v3286_v52  ;;  %v3308_v26 = vld [vmem:[%s4175_s10 + $0x260] sm:$0xf] }
 0x123   : > { %v812_v13 = vadd.f32 %v811_v62, %v747_v29 }
 0x124   : > { %v4534_v59 = vadd.f32 %v937_v5, %v874_v49  ;;  %v3932_v49 = vld [vmem:[%s4175_s10 + $0x26c] sm:$0xf0] }
 0x125   : > { %1282 = vmatmul.bf16.gmra.mxu3 %v3277_v11  ;;  %v3309_v22 = vor.u32 %v3932_v49, %v3308_v26 }
 0x128   : > { %v947_v63 = vpop.f32.mrf.mxu3 }
 0x129   : > { %v875_v27 = vpop.f32.mrf.mxu2  ;;  %v750_v35 = vpop.f32.mrf.mxu0 }
 0x12a   : > { %v876_v32 = vadd.f32 %v875_v27, %v812_v13  ;;  %v814_v36 = vpop.f32.mrf.mxu1  ;;  %v3929_v27 = vld [vmem:[%s4175_s10 + $0x254] sm:$0xf0] }
 0x12b   : > { %v815_v37 = vadd.f32 %v814_v36, %v750_v35  ;;  %v3301_v36 = vor.u32 %v3929_v27, %v3300_v23 }
 0x12c   : > { %v4542_v5 = vadd.f32 %v939_v15, %v876_v32  ;;  %1341 = vmatmul.bf16.gmra.mxu0 %v3265_v24  ;;  %v3922_v15 = vld [vmem:[%s4175_s10 + $0x224] sm:$0xf]  ;;  %v3927_v24 = vld [vmem:[%s4175_s10 + $0x24c] sm:$0xf] }
 0x12d   : > { %1405 = vmatmul.bf16.gmra.mxu1 %v3269_v30  ;;  %v3281_v54 = vor.u32 %v3922_v15, %v3278_v3  ;;  %v3302_v30 = vld [vmem:[%s4175_s10 + $0x258] sm:$0xf0] }
 0x12e   : > { %3359 = vmatmul.msk.bf16.gmra.mxu2 %vm667_vm0, %v3273_v4  ;;  %v3305_v28 = vor.u32 %v3927_v24, %v3302_v30 }
 0x130   : > { %v949_v43 = vpop.f32.mrf.mxu3 }
 0x131   : > { %v878_v40 = vpop.f32.mrf.mxu2  ;;  %v752_v9 = vpop.f32.mrf.mxu0 }
 0x132   : > { %v879_v41 = vadd.f32 %v878_v40, %v815_v37  ;;  %v816_v14 = vpop.f32.mrf.mxu1 }
 0x133   : > { %v817_v42 = vadd.f32 %v816_v14, %v752_v9  ;;  %v3324_v9 = vld [vmem:[%s4175_s10 + $0x280] sm:$0xf]  ;;  %v3936_v14 = vld [vmem:[%s4175_s10 + $0x28c] sm:$0xf0] }
 0x134   : > { %v4547_v45 = vadd.f32 %v942_v57, %v879_v41  ;;  %v3325_v50 = vor.u32 %v3936_v14, %v3324_v9 }
 0x135   : > { %1287 = vmatmul.bf16.gmra.mxu3 %v3293_v44 }
 0x138   : > { %v952_v57 = vpop.f32.mrf.mxu3 }
 0x139   : > { %v880_v53 = vpop.f32.mrf.mxu2  ;;  %v755_v7 = vpop.f32.mrf.mxu0 }
 0x13a   : > { %v881_v55 = vadd.f32 %v880_v53, %v817_v42  ;;  %v819_v56 = vpop.f32.mrf.mxu1  ;;  %v3310_v53 = vld [vmem:[%s4175_s10 + $0x270] sm:$0xf0] }
 0x13b   : > { %v820_v60 = vadd.f32 %v819_v56, %v755_v7  ;;  %v3318_v7 = vld [vmem:[%s4175_s10 + $0x278] sm:$0xf0] }
 0x13c   : > { %v4555_v46 = vadd.f32 %v944_v16, %v881_v55  ;;  %1346 = vmatmul.bf16.gmra.mxu0 %v3281_v54  ;;  %v3926_v16 = vld [vmem:[%s4175_s10 + $0x244] sm:$0xf]  ;;  %v3316_v54 = vld [vmem:[%s4175_s10 + $0x268] sm:$0xf]  ;;  %v3931_v55 = vld [vmem:[%s4175_s10 + $0x26c] sm:$0xf] }
 0x13d   : > { %1410 = vmatmul.bf16.gmra.mxu1 %v3285_v20  ;;  %v3297_v35 = vor.u32 %v3926_v16, %v3294_v6  ;;  %v3933_v20 = vld [vmem:[%s4175_s10 + $0x274] sm:$0xf0]  ;;  %v3940_v16 = vld [vmem:[%s4175_s10 + $0x2ac] sm:$0x10] }
 0x13e   : > { %3360 = vmatmul.msk.bf16.gmra.mxu2 %vm667_vm0, %v3289_v21 }
 0x140   : > { %v954_v12 = vpop.f32.mrf.mxu3 }
 0x141   : > { %v883_v29 = vpop.f32.mrf.mxu2  ;;  %v757_v13 = vpop.f32.mrf.mxu0 }
 0x142   : > { %v884_v62 = vadd.f32 %v883_v29, %v820_v60  ;;  %v821_v11 = vpop.f32.mrf.mxu1  ;;  %v3317_v60 = vor.u32 %v3933_v20, %v3316_v54  ;;  %v3411_v54 = vld [vmem:[%s4175_s10 + $0x2c0] sm:$0xf]  ;;  %v3944_v20 = vld [vmem:[%s4175_s10 + $0x2cc] sm:$0xf0] }
 0x143   : > { %v822_v34 = vadd.f32 %v821_v11, %v757_v13 }
 0x144   : > { %v4560_v1 = vadd.f32 %v947_v63, %v884_v62  ;;  %v3321_v62 = vor.u32 %v3931_v55, %v3318_v7 }
 0x145   : > { %1292 = vmatmul.bf16.gmra.mxu3 %v3309_v22  ;;  %v3340_v22 = vld [vmem:[%s4175_s10 + $0x2a0] sm:$0xf] }
 0x148   : > { %v1253_v63 = vpop.f32.mrf.mxu3 }
 0x149   : > { %v885_v32 = vpop.f32.mrf.mxu2  ;;  %v760_v37 = vpop.f32.mrf.mxu0 }
 0x14a   : > { %v886_v4 = vadd.f32 %v885_v32, %v822_v34  ;;  %v824_v0 = vpop.f32.mrf.mxu1  ;;  %v3341_v32 = vor.u32 %v3940_v16, %v3340_v22  ;;  %v3941_v22 = vld [vmem:[%s4175_s10 + $0x2b4] sm:$0x10]  ;;  %v3939_v16 = vld [vmem:[%s4175_s10 + $0x2ac] sm:$0xf] }
 0x14b   : > { %v825_v40 = vadd.f32 %v824_v0, %v760_v37  ;;  %v3326_v37 = vld [vmem:[%s4175_s10 + $0x290] sm:$0xf0]  ;;  %v3332_v0 = vld [vmem:[%s4175_s10 + $0x288] sm:$0xf] }
 0x14c   : > { %v4568_v41 = vadd.f32 %v949_v43, %v886_v4  ;;  %1351 = vmatmul.bf16.gmra.mxu0 %v3297_v35  ;;  %v3930_v43 = vld [vmem:[%s4175_s10 + $0x264] sm:$0xf] }
 0x14d   : > { %1415 = vmatmul.bf16.gmra.mxu1 %v3301_v36  ;;  %v3313_v21 = vor.u32 %v3930_v43, %v3310_v53  ;;  %v3934_v4 = vld [vmem:[%s4175_s10 + $0x284] sm:$0xf] }
 0x14e   : > { %3361 = vmatmul.msk.bf16.gmra.mxu2 %vm667_vm0, %v3305_v28  ;;  %v3937_v28 = vld [vmem:[%s4175_s10 + $0x294] sm:$0xf0]  ;;  %v3329_v14 = vor.u32 %v3934_v4, %v3326_v37 }
 0x150   : > { %v1255_v18 = vpop.f32.mrf.mxu3 }
 0x151   : > { %v888_v42 = vpop.f32.mrf.mxu2  ;;  %v762_v15 = vpop.f32.mrf.mxu0 }
 0x152   : > { %v889_v44 = vadd.f32 %v888_v42, %v825_v40  ;;  %v826_v3 = vpop.f32.mrf.mxu1  ;;  %v3935_v40 = vld [vmem:[%s4175_s10 + $0x28c] sm:$0xf]  ;;  %v3333_v42 = vor.u32 %v3937_v28, %v3332_v0 }
 0x153   : > { %v827_v48 = vadd.f32 %v826_v3, %v762_v15 }
 0x154   : > { %v4573_v52 = vadd.f32 %v952_v57, %v889_v44 }
 0x155   : > { %1297 = vmatmul.bf16.gmra.mxu3 %v3325_v50 }
 0x158   : > { %v1258_v11 = vpop.f32.mrf.mxu3 }
 0x159   : > { %v890_v56 = vpop.f32.mrf.mxu2  ;;  %v1317_v49 = vpop.f32.mrf.mxu0 }
 0x15a   : > { %v891_v26 = vadd.f32 %v890_v56, %v827_v48  ;;  %v1381_v29 = vpop.f32.mrf.mxu1  ;;  %v1318_v13 = vadd.f32 %v1317_v49, %v1253_v63  ;;  %v3334_v63 = vld [vmem:[%s4175_s10 + $0x298] sm:$0xf0]  ;;  %v3412_v49 = vor.u32 %v3944_v20, %v3411_v54  ;;  %v3942_v20 = vld [vmem:[%s4175_s10 + $0x2c4] sm:$0xf] }
 0x15b   : > { %v3337_v48 = vor.u32 %v3935_v40, %v3334_v63  ;;  %v3427_v63 = vld [vmem:[%s4175_s10 + $0x2e0] sm:$0xf] }
 0x15c   : > { %v4581_v57 = vadd.f32 %v954_v12, %v891_v26  ;;  %v1382_v34 = vadd.f32 %v1381_v29, %v1318_v13  ;;  %1356 = vmatmul.bf16.gmra.mxu0 %v3313_v21  ;;  %v3938_v13 = vld [vmem:[%s4175_s10 + $0x2a4] sm:$0xf] }
 0x15d   : > { %1420 = vmatmul.bf16.gmra.mxu1 %v3317_v60 }
 0x15e   : > { %5110 = vst [vmem:[#allocation2_spill] sm:$0xff] %v4581_v57  ;;  %3362 = vmatmul.msk.bf16.gmra.mxu2 %vm667_vm0, %v3321_v62 }
 0x160   : > { %v1260_v30 = vpop.f32.mrf.mxu3 }
 0x161   : > { %v1445_v6 = vpop.f32.mrf.mxu2  ;;  %v1319_v27 = vpop.f32.mrf.mxu0 }
 0x162   : > { %v4586_v23 = vadd.f32 %v1445_v6, %v1382_v34  ;;  %v1383_v24 = vpop.f32.mrf.mxu1  ;;  %v1320_v12 = vadd.f32 %v1319_v27, %v1255_v18  ;;  %v3348_v34 = vld [vmem:[%s4175_s10 + $0x2a8] sm:$0xf]  ;;  %v3350_v6 = vld [vmem:[%s4175_s10 + $0x2b8] sm:$0x10] }
 0x163   : > { %v3353_v4 = vor.u32 %v3939_v16, %v3350_v6 }
 0x164   : > { %v1384_v36 = vadd.f32 %v1383_v24, %v1320_v12  ;;  %v3349_v12 = vor.u32 %v3941_v22, %v3348_v34 }
 0x165   : > { %1302 = vmatmul.bf16.gmra.mxu3 %v3341_v32 }
 0x168   : > { %v1263_v50 = vpop.f32.mrf.mxu3 }
 0x169   : > { %v1447_v9 = vpop.f32.mrf.mxu2  ;;  %v1322_v15 = vpop.f32.mrf.mxu0 }
 0x16a   : > { %v4596_v44 = vadd.f32 %v1447_v9, %v1384_v36  ;;  %v1386_v3 = vpop.f32.mrf.mxu1  ;;  %v1323_v18 = vadd.f32 %v1322_v15, %v1258_v11  ;;  %v3342_v11 = vld [vmem:[%s4175_s10 + $0x2b0] sm:$0x10]  ;;  %v3948_v9 = vld [vmem:[%s4175_s10 + $0x2ec] sm:$0xf0] }
 0x16b   : > { %v3345_v24 = vor.u32 %v3938_v13, %v3342_v11 }
 0x16c   : > { %v1387_v53 = vadd.f32 %v1386_v3, %v1323_v18  ;;  %1361 = vmatmul.bf16.gmra.mxu0 %v3329_v14 }
 0x16d   : > { %1425 = vmatmul.bf16.gmra.mxu1 %v3333_v42 }
 0x16e   : > { %3363 = vmatmul.msk.bf16.gmra.mxu2 %vm667_vm0, %v3337_v48 }
 0x170   : > { %v1265_v26 = vpop.f32.mrf.mxu3 }
 0x171   : > { %v1450_v55 = vpop.f32.mrf.mxu2  ;;  %v1324_v56 = vpop.f32.mrf.mxu0 }
 0x172   : > { %v4603_v7 = vadd.f32 %v1450_v55, %v1387_v53  ;;  %v1388_v21 = vpop.f32.mrf.mxu1  ;;  %v1325_v60 = vadd.f32 %v1324_v56, %v1260_v30  ;;  %v3413_v55 = vld [vmem:[%s4175_s10 + $0x2d0] sm:$0xf0]  ;;  %v3419_v56 = vld [vmem:[%s4175_s10 + $0x2c8] sm:$0xf] }
 0x173   : > { %v3416_v13 = vor.u32 %v3942_v20, %v3413_v55  ;;  %v3949_v20 = vld [vmem:[%s4175_s10 + $0x2f4] sm:$0xf0]  ;;  %v3947_v55 = vld [vmem:[%s4175_s10 + $0x2ec] sm:$0xf] }
 0x174   : > { %v1389_v62 = vadd.f32 %v1388_v21, %v1325_v60  ;;  %v3945_v21 = vld [vmem:[%s4175_s10 + $0x2d4] sm:$0xf0]  ;;  %v3943_v60 = vld [vmem:[%s4175_s10 + $0x2cc] sm:$0xf] }
 0x175   : > { %1817 = vmatmul.bf16.vlgmr.msra.gmra.mxu3 %v3412_v49  ;;  %v3421_v49 = vld [vmem:[%s4175_s10 + $0x2d8] sm:$0xf0]  ;;  %v3420_v11 = vor.u32 %v3945_v21, %v3419_v56 }
 0x176   : > { %v3424_v16 = vor.u32 %v3943_v60, %v3421_v49  ;;  %v3437_v56 = vld [vmem:[%s4175_s10 + $0x2f8] sm:$0xf0] }
 0x178   : > { %v1268_v0 = vpop.f32.mrf.mxu3 }
 0x179   : > { %v1452_v27 = vpop.f32.mrf.mxu2  ;;  %v1327_v30 = vpop.f32.mrf.mxu0 }
 0x17a   : > { %v4613_v32 = vadd.f32 %v1452_v27, %v1389_v62  ;;  %v1391_v36 = vpop.f32.mrf.mxu1  ;;  %v1328_v37 = vadd.f32 %v1327_v30, %v1263_v50  ;;  %v3428_v50 = vor.u32 %v3948_v9, %v3427_v63  ;;  %v3443_v30 = vld [vmem:[%s4175_s10 + $0x300] sm:$0xf] }
 0x17c   : > { %v1392_v40 = vadd.f32 %v1391_v36, %v1328_v37  ;;  %1366 = vmatmul.bf16.gmra.mxu0 %v3345_v24  ;;  %v3952_v36 = vld [vmem:[%s4175_s10 + $0x30c] sm:$0xf0] }
 0x17d   : > { %1430 = vmatmul.bf16.gmra.mxu1 %v3349_v12 }
 0x17e   : > { %3364 = vmatmul.msk.bf16.gmra.mxu2 %vm667_vm0, %v3353_v4 }
 0x180   : > { %v1270_v18 = vpop.f32.mrf.mxu3 }
 0x181   : > { %v1455_v14 = vpop.f32.mrf.mxu2  ;;  %v1329_v15 = vpop.f32.mrf.mxu0 }
 0x182   : > { %v4620_v42 = vadd.f32 %v1455_v14, %v1392_v40  ;;  %v1393_v3 = vpop.f32.mrf.mxu1  ;;  %v1330_v48 = vadd.f32 %v1329_v15, %v1265_v26  ;;  %v3444_v14 = vor.u32 %v3952_v36, %v3443_v30  ;;  %v3956_v30 = vld [vmem:[%s4175_s10 + $0x32c] sm:$0xf0] }
 0x184   : > { %v1394_v54 = vadd.f32 %v1393_v3, %v1330_v48  ;;  %v3946_v48 = vld [vmem:[%s4175_s10 + $0x2e4] sm:$0xf] }
 0x185   : > { %1822 = vmatmul.bf16.gmra.mxu3 %v3428_v50  ;;  %v3429_v50 = vld [vmem:[%s4175_s10 + $0x2f0] sm:$0xf0] }
 0x186   : > { %v3432_v60 = vor.u32 %v3946_v48, %v3429_v50  ;;  %v3950_v50 = vld [vmem:[%s4175_s10 + $0x304] sm:$0xf] }
 0x188   : > { %v1273_v27 = vpop.f32.mrf.mxu3 }
 0x189   : > { %v1457_v62 = vpop.f32.mrf.mxu2  ;;  %v1332_v26 = vpop.f32.mrf.mxu0 }
 0x18a   : > { %v4630_v34 = vadd.f32 %v1457_v62, %v1394_v54  ;;  %v1396_v22 = vpop.f32.mrf.mxu1  ;;  %v1333_v6 = vadd.f32 %v1332_v26, %v1268_v0  ;;  %v3435_v54 = vld [vmem:[%s4175_s10 + $0x2e8] sm:$0xf] }
 0x18b   : > { %v3436_v49 = vor.u32 %v3949_v20, %v3435_v54  ;;  %v3445_v54 = vld [vmem:[%s4175_s10 + $0x310] sm:$0xf0]  ;;  %v3451_v20 = vld [vmem:[%s4175_s10 + $0x308] sm:$0xf] }
 0x18c   : > { %v1397_v12 = vadd.f32 %v1396_v22, %v1333_v6  ;;  %1881 = vmatmul.bf16.vlgmr.msra.gmra.mxu0 %v3416_v13 }
 0x18d   : > { %1945 = vmatmul.bf16.vlgmr.msra.gmra.mxu1 %v3420_v11  ;;  %v3440_v11 = vor.u32 %v3947_v55, %v3437_v56  ;;  %v3953_v55 = vld [vmem:[%s4175_s10 + $0x314] sm:$0xf0]  ;;  %v3951_v56 = vld [vmem:[%s4175_s10 + $0x30c] sm:$0xf] }
 0x18e   : > { %3585 = vmatmul.msk.bf16.vlgmr.msra.gmra.mxu2 %vm667_vm0, %v3424_v16 }
 0x190   : > { %v1275_v9 = vpop.f32.mrf.mxu3 }
 0x191   : > { %v1460_v4 = vpop.f32.mrf.mxu2  ;;  %v1334_v0 = vpop.f32.mrf.mxu0 }
 0x192   : > { %v4637_v37 = vadd.f32 %v1460_v4, %v1397_v12  ;;  %v1398_v40 = vpop.f32.mrf.mxu1  ;;  %v1335_v63 = vadd.f32 %v1334_v0, %v1270_v18  ;;  %v3459_v12 = vld [vmem:[%s4175_s10 + $0x320] sm:$0xf] }
 0x194   : > { %v1399_v3 = vadd.f32 %v1398_v40, %v1335_v63 }
 0x195   : > { %1827 = vmatmul.bf16.gmra.mxu3 %v3444_v14  ;;  %v3460_v14 = vor.u32 %v3956_v30, %v3459_v12 }
 0x198   : > { %v1278_v22 = vpop.f32.mrf.mxu3 }
 0x199   : > { %v1462_v21 = vpop.f32.mrf.mxu2  ;;  %v1337_v18 = vpop.f32.mrf.mxu0 }
 0x19a   : > { %v4647_v62 = vadd.f32 %v1462_v21, %v1399_v3  ;;  %v1401_v13 = vpop.f32.mrf.mxu1  ;;  %v1338_v26 = vadd.f32 %v1337_v18, %v1273_v27  ;;  %v3453_v21 = vld [vmem:[%s4175_s10 + $0x318] sm:$0xf0]  ;;  %v3452_v18 = vor.u32 %v3953_v55, %v3451_v20 }
 0x19c   : > { %v1402_v6 = vadd.f32 %v1401_v13, %v1338_v26  ;;  %1886 = vmatmul.bf16.gmra.mxu0 %v3432_v60  ;;  %v3456_v26 = vor.u32 %v3951_v56, %v3453_v21  ;;  %v3954_v21 = vld [vmem:[%s4175_s10 + $0x324] sm:$0xf] }
 0x19d   : > { %1950 = vmatmul.bf16.gmra.mxu1 %v3436_v49  ;;  %v3448_v49 = vor.u32 %v3950_v50, %v3445_v54 }
 0x19e   : > { %3586 = vmatmul.msk.bf16.gmra.mxu2 %vm667_vm0, %v3440_v11 }
 0x1a0   : > { %v1280_v63 = vpop.f32.mrf.mxu3 }
 0x1a1   : > { %v1465_v36 = vpop.f32.mrf.mxu2  ;;  %v1339_v27 = vpop.f32.mrf.mxu0 }
 0x1a2   : > { %v4654_v4 = vadd.f32 %v1465_v36, %v1402_v6  ;;  %v1403_v0 = vpop.f32.mrf.mxu1  ;;  %v1340_v40 = vadd.f32 %v1339_v27, %v1275_v9  ;;  %v3475_v27 = vld [vmem:[%s4175_s10 + $0x340] sm:$0xf] }
 0x1a4   : > { %v1404_v48 = vadd.f32 %v1403_v0, %v1340_v40  ;;  %v3960_v0 = vld [vmem:[%s4175_s10 + $0x34c] sm:$0xf0] }
 0x1a5   : > { %1832 = vmatmul.bf16.gmra.mxu3 %v3460_v14  ;;  %v3476_v20 = vor.u32 %v3960_v0, %v3475_v27 }
 0x1a8   : > { %v1283_v12 = vpop.f32.mrf.mxu3 }
 0x1a9   : > { %v1467_v60 = vpop.f32.mrf.mxu2  ;;  %v1342_v9 = vpop.f32.mrf.mxu0 }
 0x1aa   : > { %v4664_v13 = vadd.f32 %v1467_v60, %v1404_v48  ;;  %v1406_v11 = vpop.f32.mrf.mxu1  ;;  %v1343_v6 = vadd.f32 %v1342_v9, %v1278_v22  ;;  %v3461_v60 = vld [vmem:[%s4175_s10 + $0x330] sm:$0xf0]  ;;  %v3955_v9 = vld [vmem:[%s4175_s10 + $0x32c] sm:$0xf] }
 0x1ac   : > { %v1407_v36 = vadd.f32 %v1406_v11, %v1343_v6  ;;  %1891 = vmatmul.bf16.gmra.mxu0 %v3448_v49  ;;  %v3467_v49 = vld [vmem:[%s4175_s10 + $0x328] sm:$0xf]  ;;  %v3469_v11 = vld [vmem:[%s4175_s10 + $0x338] sm:$0xf0]  ;;  %v3464_v6 = vor.u32 %v3954_v21, %v3461_v60 }
 0x1ad   : > { %1955 = vmatmul.bf16.gmra.mxu1 %v3452_v18  ;;  %v3957_v18 = vld [vmem:[%s4175_s10 + $0x334] sm:$0xf0]  ;;  %v3472_v0 = vor.u32 %v3955_v9, %v3469_v11 }
 0x1ae   : > { %3587 = vmatmul.msk.bf16.gmra.mxu2 %vm667_vm0, %v3456_v26 }
 0x1b0   : > { %v1285_v54 = vpop.f32.mrf.mxu3 }
 0x1b1   : > { %v1470_v40 = vpop.f32.mrf.mxu2  ;;  %v1344_v22 = vpop.f32.mrf.mxu0 }
 0x1b2   : > { %v4671_v14 = vadd.f32 %v1470_v40, %v1407_v36  ;;  %v1408_v48 = vpop.f32.mrf.mxu1  ;;  %v1345_v50 = vadd.f32 %v1344_v22, %v1280_v63  ;;  %v3468_v36 = vor.u32 %v3957_v18, %v3467_v49 }
 0x1b4   : > { %v1409_v56 = vadd.f32 %v1408_v48, %v1345_v50  ;;  %v3485_v48 = vld [vmem:[%s4175_s10 + $0x358] sm:$0xf0] }
 0x1b5   : > { %1837 = vmatmul.bf16.gmra.mxu3 %v3476_v20  ;;  %v3491_v20 = vld [vmem:[%s4175_s10 + $0x360] sm:$0xf] }
 0x1b8   : > { %v1288_v55 = vpop.f32.mrf.mxu3 }
 0x1b9   : > { %v1472_v26 = vpop.f32.mrf.mxu2  ;;  %v1347_v63 = vpop.f32.mrf.mxu0 }
 0x1ba   : > { %v4681_v40 = vadd.f32 %v1472_v26, %v1409_v56  ;;  %v1411_v27 = vpop.f32.mrf.mxu1  ;;  %v1348_v22 = vadd.f32 %v1347_v63, %v1283_v12  ;;  %v3964_v56 = vld [vmem:[%s4175_s10 + $0x36c] sm:$0xf0]  ;;  %v3477_v63 = vld [vmem:[%s4175_s10 + $0x350] sm:$0xf0] }
 0x1bb   : > { %v3492_v11 = vor.u32 %v3964_v56, %v3491_v20 }
 0x1bc   : > { %v1412_v50 = vadd.f32 %v1411_v27, %v1348_v22  ;;  %1896 = vmatmul.bf16.gmra.mxu0 %v3464_v6  ;;  %v3483_v27 = vld [vmem:[%s4175_s10 + $0x348] sm:$0xf]  ;;  %v3959_v22 = vld [vmem:[%s4175_s10 + $0x34c] sm:$0xf] }
 0x1bd   : > { %1960 = vmatmul.bf16.gmra.mxu1 %v3468_v36  ;;  %v3958_v36 = vld [vmem:[%s4175_s10 + $0x344] sm:$0xf]  ;;  %v3488_v56 = vor.u32 %v3959_v22, %v3485_v48 }
 0x1be   : > { %3588 = vmatmul.msk.bf16.gmra.mxu2 %vm667_vm0, %v3472_v0  ;;  %v3961_v0 = vld [vmem:[%s4175_s10 + $0x354] sm:$0xf0] }
 0x1bf   : > { %v3484_v30 = vor.u32 %v3961_v0, %v3483_v27 }
 0x1c0   : > { %v1290_v9 = vpop.f32.mrf.mxu3 }
 0x1c1   : > { %v1475_v21 = vpop.f32.mrf.mxu2  ;;  %v1349_v12 = vpop.f32.mrf.mxu0 }
 0x1c2   : > { %v4688_v60 = vadd.f32 %v1475_v21, %v1412_v50  ;;  %v1413_v49 = vpop.f32.mrf.mxu1  ;;  %v1350_v18 = vadd.f32 %v1349_v12, %v1285_v54  ;;  %v3480_v21 = vor.u32 %v3958_v36, %v3477_v63 }
 0x1c4   : > { %v1414_v6 = vadd.f32 %v1413_v49, %v1350_v18  ;;  %v3501_v49 = vld [vmem:[%s4175_s10 + $0x378] sm:$0xf0] }
 0x1c5   : > { %1842 = vmatmul.bf16.gmra.mxu3 %v3492_v11  ;;  %v3507_v11 = vld [vmem:[%s4175_s10 + $0x380] sm:$0xf] }
 0x1c8   : > { %v1293_v26 = vpop.f32.mrf.mxu3 }
 0x1c9   : > { %v1477_v50 = vpop.f32.mrf.mxu2  ;;  %v1352_v54 = vpop.f32.mrf.mxu0 }
 0x1ca   : > { %v4698_v3 = vadd.f32 %v1477_v50, %v1414_v6  ;;  %v1416_v20 = vpop.f32.mrf.mxu1  ;;  %v1353_v12 = vadd.f32 %v1352_v54, %v1288_v55  ;;  %v3968_v6 = vld [vmem:[%s4175_s10 + $0x38c] sm:$0xf0]  ;;  %v3493_v54 = vld [vmem:[%s4175_s10 + $0x370] sm:$0xf0] }
 0x1cb   : > { %v3508_v22 = vor.u32 %v3968_v6, %v3507_v11 }
 0x1cc   : > { %v1417_v18 = vadd.f32 %v1416_v20, %v1353_v12  ;;  %1901 = vmatmul.bf16.gmra.mxu0 %v3480_v21  ;;  %v3499_v20 = vld [vmem:[%s4175_s10 + $0x368] sm:$0xf]  ;;  %v3963_v12 = vld [vmem:[%s4175_s10 + $0x36c] sm:$0xf] }
 0x1cd   : > { %1965 = vmatmul.bf16.gmra.mxu1 %v3484_v30  ;;  %v3962_v30 = vld [vmem:[%s4175_s10 + $0x364] sm:$0xf]  ;;  %v3504_v6 = vor.u32 %v3963_v12, %v3501_v49 }
 0x1ce   : > { %3589 = vmatmul.msk.bf16.gmra.mxu2 %vm667_vm0, %v3488_v56  ;;  %v3965_v56 = vld [vmem:[%s4175_s10 + $0x374] sm:$0xf0] }
 0x1cf   : > { %v3500_v16 = vor.u32 %v3965_v56, %v3499_v20 }
 0x1d0   : > { %v1295_v0 = vpop.f32.mrf.mxu3 }
 0x1d1   : > { %v1480_v36 = vpop.f32.mrf.mxu2  ;;  %v1354_v55 = vpop.f32.mrf.mxu0 }
 0x1d2   : > { %v4705_v48 = vadd.f32 %v1480_v36, %v1417_v18  ;;  %v1418_v63 = vpop.f32.mrf.mxu1  ;;  %v1355_v27 = vadd.f32 %v1354_v55, %v1290_v9  ;;  %v3496_v36 = vor.u32 %v3962_v30, %v3493_v54 }
 0x1d4   : > { %v1419_v21 = vadd.f32 %v1418_v63, %v1355_v27  ;;  %v3517_v63 = vld [vmem:[%s4175_s10 + $0x398] sm:$0xf0] }
 0x1d5   : > { %1847 = vmatmul.bf16.gmra.mxu3 %v3508_v22  ;;  %v3523_v22 = vld [vmem:[%s4175_s10 + $0x3a0] sm:$0xf] }
 0x1d8   : > { %v1298_v50 = vpop.f32.mrf.mxu3 }
 0x1d9   : > { %v1482_v18 = vpop.f32.mrf.mxu2  ;;  %v1357_v9 = vpop.f32.mrf.mxu0 }
 0x1da   : > { %v4715_v15 = vadd.f32 %v1482_v18, %v1419_v21  ;;  %v1421_v11 = vpop.f32.mrf.mxu1  ;;  %v1358_v55 = vadd.f32 %v1357_v9, %v1293_v26  ;;  %v3972_v21 = vld [vmem:[%s4175_s10 + $0x3ac] sm:$0xf0]  ;;  %v3509_v9 = vld [vmem:[%s4175_s10 + $0x390] sm:$0xf0] }
 0x1db   : > { %v3524_v12 = vor.u32 %v3972_v21, %v3523_v22 }
 0x1dc   : > { %v1422_v27 = vadd.f32 %v1421_v11, %v1358_v55  ;;  %1906 = vmatmul.bf16.gmra.mxu0 %v3496_v36  ;;  %v3515_v11 = vld [vmem:[%s4175_s10 + $0x388] sm:$0xf]  ;;  %v3967_v55 = vld [vmem:[%s4175_s10 + $0x38c] sm:$0xf] }
 0x1dd   : > { %1970 = vmatmul.bf16.gmra.mxu1 %v3500_v16  ;;  %v3966_v16 = vld [vmem:[%s4175_s10 + $0x384] sm:$0xf]  ;;  %v3520_v21 = vor.u32 %v3967_v55, %v3517_v63 }
 0x1de   : > { %3590 = vmatmul.msk.bf16.gmra.mxu2 %vm667_vm0, %v3504_v6  ;;  %v3969_v6 = vld [vmem:[%s4175_s10 + $0x394] sm:$0xf0] }
 0x1df   : > { %v3516_v24 = vor.u32 %v3969_v6, %v3515_v11 }
 0x1e0   : > { %v1300_v56 = vpop.f32.mrf.mxu3 }
 0x1e1   : > { %v1485_v30 = vpop.f32.mrf.mxu2  ;;  %v1359_v26 = vpop.f32.mrf.mxu0 }
 0x1e2   : > { %v4722_v49 = vadd.f32 %v1485_v30, %v1422_v27  ;;  %v1423_v54 = vpop.f32.mrf.mxu1  ;;  %v1360_v20 = vadd.f32 %v1359_v26, %v1295_v0  ;;  %v3512_v30 = vor.u32 %v3966_v16, %v3509_v9 }
 0x1e4   : > { %v1424_v36 = vadd.f32 %v1423_v54, %v1360_v20  ;;  %v3533_v54 = vld [vmem:[%s4175_s10 + $0x3b8] sm:$0xf0] }
 0x1e5   : > { %1852 = vmatmul.bf16.gmra.mxu3 %v3524_v12  ;;  %v3539_v12 = vld [vmem:[%s4175_s10 + $0x3c0] sm:$0xf] }
 0x1e8   : > { %v1303_v18 = vpop.f32.mrf.mxu3 }
 0x1e9   : > { %v1487_v27 = vpop.f32.mrf.mxu2  ;;  %v1362_v0 = vpop.f32.mrf.mxu0 }
 0x1ea   : > { %v4732_v53 = vadd.f32 %v1487_v27, %v1424_v36  ;;  %v1426_v22 = vpop.f32.mrf.mxu1  ;;  %v1363_v26 = vadd.f32 %v1362_v0, %v1298_v50  ;;  %v3976_v36 = vld [vmem:[%s4175_s10 + $0x3cc] sm:$0xf0]  ;;  %v3525_v0 = vld [vmem:[%s4175_s10 + $0x3b0] sm:$0xf0] }
 0x1eb   : > { %v3540_v55 = vor.u32 %v3976_v36, %v3539_v12 }
 0x1ec   : > { %v1427_v20 = vadd.f32 %v1426_v22, %v1363_v26  ;;  %1911 = vmatmul.bf16.gmra.mxu0 %v3512_v30  ;;  %v3531_v22 = vld [vmem:[%s4175_s10 + $0x3a8] sm:$0xf]  ;;  %v3971_v26 = vld [vmem:[%s4175_s10 + $0x3ac] sm:$0xf] }
 0x1ed   : > { %1975 = vmatmul.bf16.gmra.mxu1 %v3516_v24  ;;  %v3970_v24 = vld [vmem:[%s4175_s10 + $0x3a4] sm:$0xf]  ;;  %v3536_v36 = vor.u32 %v3971_v26, %v3533_v54 }
 0x1ee   : > { %3591 = vmatmul.msk.bf16.gmra.mxu2 %vm667_vm0, %v3520_v21  ;;  %v3973_v21 = vld [vmem:[%s4175_s10 + $0x3b4] sm:$0xf0] }
 0x1ef   : > { %v3532_v28 = vor.u32 %v3973_v21, %v3531_v22 }
 0x1f0   : > { %v1305_v6 = vpop.f32.mrf.mxu3 }
 0x1f1   : > { %v1490_v16 = vpop.f32.mrf.mxu2  ;;  %v1364_v50 = vpop.f32.mrf.mxu0 }
 0x1f2   : > { %v4739_v63 = vadd.f32 %v1490_v16, %v1427_v20  ;;  %v1428_v9 = vpop.f32.mrf.mxu1  ;;  %v1365_v11 = vadd.f32 %v1364_v50, %v1300_v56  ;;  %v3528_v16 = vor.u32 %v3970_v24, %v3525_v0 }
 0x1f4   : > { %v1429_v30 = vadd.f32 %v1428_v9, %v1365_v11  ;;  %v3549_v9 = vld [vmem:[%s4175_s10 + $0x3d8] sm:$0xf0] }
 0x1f5   : > { %1857 = vmatmul.bf16.gmra.mxu3 %v3540_v55  ;;  %v3555_v55 = vld [vmem:[%s4175_s10 + $0x3e0] sm:$0xf] }
 0x1f8   : > { %v1818_v27 = vpop.f32.mrf.mxu3 }
 0x1f9   : > { %v1492_v20 = vpop.f32.mrf.mxu2  ;;  %v1367_v56 = vpop.f32.mrf.mxu0 }
 0x1fa   : > { %v4749_v29 = vadd.f32 %v1492_v20, %v1429_v30  ;;  %v1431_v12 = vpop.f32.mrf.mxu1  ;;  %v1368_v50 = vadd.f32 %v1367_v56, %v1303_v18  ;;  %v3980_v30 = vld [vmem:[%s4175_s10 + $0x3ec] sm:$0xf0]  ;;  %v3541_v56 = vld [vmem:[%s4175_s10 + $0x3d0] sm:$0xf0] }
 0x1fb   : > { %v3556_v26 = vor.u32 %v3980_v30, %v3555_v55 }
 0x1fc   : > { %v1432_v11 = vadd.f32 %v1431_v12, %v1368_v50  ;;  %1916 = vmatmul.bf16.gmra.mxu0 %v3528_v16  ;;  %v3547_v12 = vld [vmem:[%s4175_s10 + $0x3c8] sm:$0xf]  ;;  %v3975_v50 = vld [vmem:[%s4175_s10 + $0x3cc] sm:$0xf] }
 0x1fd   : > { %1980 = vmatmul.bf16.gmra.mxu1 %v3532_v28  ;;  %v3974_v28 = vld [vmem:[%s4175_s10 + $0x3c4] sm:$0xf]  ;;  %v3552_v30 = vor.u32 %v3975_v50, %v3549_v9 }
 0x1fe   : > { %3592 = vmatmul.msk.bf16.gmra.mxu2 %vm667_vm0, %v3536_v36  ;;  %v3977_v36 = vld [vmem:[%s4175_s10 + $0x3d4] sm:$0xf0] }
 0x1ff   : > { %v3548_v43 = vor.u32 %v3977_v36, %v3547_v12 }
 0x200   : > { %v1820_v21 = vpop.f32.mrf.mxu3 }
 0x201   : > { %v1495_v24 = vpop.f32.mrf.mxu2  ;;  %v1369_v18 = vpop.f32.mrf.mxu0 }
 0x202   : > { %v4756_v54 = vadd.f32 %v1495_v24, %v1432_v11  ;;  %v1433_v0 = vpop.f32.mrf.mxu1  ;;  %v1370_v22 = vadd.f32 %v1369_v18, %v1305_v6  ;;  %v3544_v24 = vor.u32 %v3974_v28, %v3541_v56 }
 0x204   : > { %v1434_v16 = vadd.f32 %v1433_v0, %v1370_v22  ;;  %v3979_v0 = vld [vmem:[%s4175_s10 + $0x3ec] sm:$0xf] }
 0x205   : > { %1862 = vmatmul.bf16.gmra.mxu3 %v3556_v26  ;;  %v3571_v26 = vld [vmem:[%s4175_s10 + $0x400] sm:$0xf] }
 0x208   : > { %v1823_v20 = vpop.f32.mrf.mxu3 }
 0x209   : > { %v1497_v11 = vpop.f32.mrf.mxu2  ;;  %v1882_v6 = vpop.f32.mrf.mxu0 }
 0x20a   : > { %v4766_v35 = vadd.f32 %v1497_v11, %v1434_v16  ;;  %v1946_v55 = vpop.f32.mrf.mxu1  ;;  %v1883_v18 = vadd.f32 %v1882_v6, %v1818_v27  ;;  %v3984_v16 = vld [vmem:[%s4175_s10 + $0x40c] sm:$0x10]  ;;  %v5112_v11 = vmax.f32 %v4413_v33, %v4586_v23  ;;  %v3978_v6 = vld [vmem:[%s4175_s10 + $0x3e4] sm:$0xf] }
 0x20b   : > { %v3572_v50 = vor.u32 %v3984_v16, %v3571_v26 }
 0x20c   : > { %5111 = vst [vmem:[#allocation3_spill] sm:$0xff] %v4766_v35  ;;  %v1947_v22 = vadd.f32 %v1946_v55, %v1883_v18  ;;  %1921 = vmatmul.bf16.gmra.mxu0 %v3544_v24  ;;  %v3557_v55 = vld [vmem:[%s4175_s10 + $0x3f0] sm:$0xf0]  ;;  %v3981_v18 = vld [vmem:[%s4175_s10 + $0x3f4] sm:$0xf0] }
 0x20d   : > { %1985 = vmatmul.bf16.gmra.mxu1 %v3548_v43  ;;  %v3565_v35 = vld [vmem:[%s4175_s10 + $0x3f8] sm:$0xf0] }
 0x20e   : > { %3593 = vmatmul.msk.bf16.gmra.mxu2 %vm667_vm0, %v3552_v30  ;;  %v3563_v30 = vld [vmem:[%s4175_s10 + $0x3e8] sm:$0xf]  ;;  %v3568_v57 = vor.u32 %v3979_v0, %v3565_v35  ;;  %v3988_v35 = vld [vmem:[%s4175_s10 + $0x42c] sm:$0xf0] }
 0x210   : > { %v1825_v36 = vpop.f32.mrf.mxu3 }
 0x211   : > { %v2010_v28 = vpop.f32.mrf.mxu2  ;;  %v1884_v27 = vpop.f32.mrf.mxu0 }
 0x212   : > { %v2011_v9 = vadd.f32 %v2010_v28, %v1947_v22  ;;  %v1948_v56 = vpop.f32.mrf.mxu1  ;;  %v1885_v12 = vadd.f32 %v1884_v27, %v1820_v21  ;;  %v3560_v28 = vor.u32 %v3978_v6, %v3557_v55  ;;  %v3564_v21 = vor.u32 %v3981_v18, %v3563_v30 }
 0x213   : > { %v5114_v55 = vmax.f32 %v4426_v61, %v4603_v7 }
 0x214   : > { %v4776_v24 = vmax.f32 %v5112_v11, %v2011_v9  ;;  %v1949_v43 = vadd.f32 %v1948_v56, %v1885_v12  ;;  %v5113_v9 = vmax.f32 %v4422_v51, %v4596_v44 }
 0x215   : > { %1867 = vmatmul.bf16.gmra.mxu3 %v3572_v50  ;;  %v3642_v50 = vld [vmem:[%s4175_s10 + $0x420] sm:$0xf] }
 0x216   : > { %v3643_v6 = vor.u32 %v3988_v35, %v3642_v50 }
 0x218   : > { %v1828_v23 = vpop.f32.mrf.mxu3 }
 0x219   : > { %v2012_v22 = vpop.f32.mrf.mxu2  ;;  %v1887_v26 = vpop.f32.mrf.mxu0 }
 0x21a   : > { %v2013_v27 = vadd.f32 %v2012_v22, %v1949_v43  ;;  %v1951_v16 = vpop.f32.mrf.mxu1  ;;  %v1888_v33 = vadd.f32 %v1887_v26, %v1823_v20  ;;  %v3982_v22 = vld [vmem:[%s4175_s10 + $0x404] sm:$0xf]  ;;  %v3581_v26 = vld [vmem:[%s4175_s10 + $0x418] sm:$0x10] }
 0x21c   : > { %v4787_v56 = vmax.f32 %v5113_v9, %v2013_v27  ;;  %v1952_v12 = vadd.f32 %v1951_v16, %v1888_v33  ;;  %1926 = vmatmul.bf16.gmra.mxu0 %v3560_v28  ;;  %v3573_v28 = vld [vmem:[%s4175_s10 + $0x410] sm:$0x10]  ;;  %v3983_v27 = vld [vmem:[%s4175_s10 + $0x40c] sm:$0xf] }
 0x21d   : > { %1990 = vmatmul.bf16.gmra.mxu1 %v3564_v21  ;;  %v3985_v21 = vld [vmem:[%s4175_s10 + $0x414] sm:$0x10]  ;;  %v3576_v33 = vor.u32 %v3982_v22, %v3573_v28  ;;  %v3584_v35 = vor.u32 %v3983_v27, %v3581_v26  ;;  %v5116_v28 = vmax.f32 %v4443_v47, %v4620_v42  ;;  %v3986_v27 = vld [vmem:[%s4175_s10 + $0x424] sm:$0xf]  ;;  %v3644_v26 = vld [vmem:[%s4175_s10 + $0x430] sm:$0xf0] }
 0x21e   : > { %3594 = vmatmul.msk.bf16.gmra.mxu2 %vm667_vm0, %v3568_v57  ;;  %v3579_v57 = vld [vmem:[%s4175_s10 + $0x408] sm:$0xf] }
 0x220   : > { %v1830_v44 = vpop.f32.mrf.mxu3 }
 0x221   : > { %v2015_v20 = vpop.f32.mrf.mxu2  ;;  %v1889_v11 = vpop.f32.mrf.mxu0 }
 0x222   : > { %v2016_v0 = vadd.f32 %v2015_v20, %v1952_v12  ;;  %v1953_v43 = vpop.f32.mrf.mxu1  ;;  %v1890_v51 = vadd.f32 %v1889_v11, %v1825_v36  ;;  %v3580_v36 = vor.u32 %v3985_v21, %v3579_v57  ;;  %v5115_v20 = vmax.f32 %v4435_v39, %v4613_v32 }
 0x224   : > { %v4795_v30 = vmax.f32 %v5114_v55, %v2016_v0  ;;  %v1954_v18 = vadd.f32 %v1953_v43, %v1890_v51  ;;  %v3658_v43 = vld [vmem:[%s4175_s10 + $0x440] sm:$0xf]  ;;  %v3992_v51 = vld [vmem:[%s4175_s10 + $0x44c] sm:$0xf0] }
 0x225   : > { %2382 = vmatmul.bf16.vlgmr.msrb.gmra.mxu3 %v3643_v6  ;;  %v3659_v22 = vor.u32 %v3992_v51, %v3658_v43  ;;  %v5117_v43 = vmax.f32 %v4453_v10, %v4630_v34 }
 0x228   : > { %v1833_v7 = vpop.f32.mrf.mxu3 }
 0x229   : > { %v2017_v16 = vpop.f32.mrf.mxu2  ;;  %v1892_v12 = vpop.f32.mrf.mxu0 }
 0x22a   : > { %v2018_v9 = vadd.f32 %v2017_v16, %v1954_v18  ;;  %v1956_v50 = vpop.f32.mrf.mxu1  ;;  %v1893_v61 = vadd.f32 %v1892_v12, %v1828_v23  ;;  %v3650_v16 = vld [vmem:[%s4175_s10 + $0x428] sm:$0xf] }
 0x22c   : > { %v4806_v0 = vmax.f32 %v5115_v20, %v2018_v9  ;;  %v1957_v11 = vadd.f32 %v1956_v50, %v1893_v61  ;;  %1931 = vmatmul.bf16.gmra.mxu0 %v3576_v33  ;;  %v3989_v33 = vld [vmem:[%s4175_s10 + $0x434] sm:$0xf0]  ;;  %v3652_v9 = vld [vmem:[%s4175_s10 + $0x438] sm:$0xf0]  ;;  %v3647_v50 = vor.u32 %v3986_v27, %v3644_v26 }
 0x22d   : > { %1995 = vmatmul.bf16.gmra.mxu1 %v3580_v36  ;;  %v3987_v36 = vld [vmem:[%s4175_s10 + $0x42c] sm:$0xf] }
 0x22e   : > { %3595 = vmatmul.msk.bf16.gmra.mxu2 %vm667_vm0, %v3584_v35 }
 0x230   : > { %v1835_v32 = vpop.f32.mrf.mxu3 }
 0x231   : > { %v2020_v23 = vpop.f32.mrf.mxu2  ;;  %v1894_v55 = vpop.f32.mrf.mxu0 }
 0x232   : > { %v2021_v6 = vadd.f32 %v2020_v23, %v1957_v11  ;;  %v1958_v18 = vpop.f32.mrf.mxu1  ;;  %v1895_v39 = vadd.f32 %v1894_v55, %v1830_v44  ;;  %v3651_v44 = vor.u32 %v3989_v33, %v3650_v16  ;;  %v3655_v11 = vor.u32 %v3987_v36, %v3652_v9  ;;  %v3996_v55 = vld [vmem:[%s4175_s10 + $0x46c] sm:$0xf0]  ;;  %v3990_v16 = vld [vmem:[%s4175_s10 + $0x444] sm:$0xf]  ;;  %v3660_v33 = vld [vmem:[%s4175_s10 + $0x450] sm:$0xf0] }
 0x233   : > { %v3666_v36 = vld [vmem:[%s4175_s10 + $0x448] sm:$0xf]  ;;  %v3993_v9 = vld [vmem:[%s4175_s10 + $0x454] sm:$0xf0] }
 0x234   : > { %v4814_v57 = vmax.f32 %v5116_v28, %v2021_v6  ;;  %v1959_v21 = vadd.f32 %v1958_v18, %v1895_v39  ;;  %v3674_v6 = vld [vmem:[%s4175_s10 + $0x460] sm:$0xf] }
 0x235   : > { %2387 = vmatmul.bf16.gmra.mxu3 %v3659_v22  ;;  %v3675_v28 = vor.u32 %v3996_v55, %v3674_v6  ;;  %v3690_v55 = vld [vmem:[%s4175_s10 + $0x480] sm:$0xf] }
 0x238   : > { %v1838_v42 = vpop.f32.mrf.mxu3 }
 0x239   : > { %v2022_v12 = vpop.f32.mrf.mxu2  ;;  %v1897_v61 = vpop.f32.mrf.mxu0 }
 0x23a   : > { %v2023_v35 = vadd.f32 %v2022_v12, %v1959_v21  ;;  %v1961_v20 = vpop.f32.mrf.mxu1  ;;  %v1898_v47 = vadd.f32 %v1897_v61, %v1833_v7  ;;  %v5118_v21 = vmax.f32 %v4467_v2, %v4637_v37  ;;  %v3991_v12 = vld [vmem:[%s4175_s10 + $0x44c] sm:$0xf] }
 0x23c   : > { %v4825_v51 = vmax.f32 %v5117_v43, %v2023_v35  ;;  %v1962_v23 = vadd.f32 %v1961_v20, %v1898_v47  ;;  %2446 = vmatmul.bf16.vlgmr.msrb.gmra.mxu0 %v3647_v50  ;;  %v3668_v50 = vld [vmem:[%s4175_s10 + $0x458] sm:$0xf0]  ;;  %v3663_v35 = vor.u32 %v3990_v16, %v3660_v33  ;;  %v5119_v43 = vmax.f32 %v4481_v8, %v4647_v62  ;;  %v3994_v16 = vld [vmem:[%s4175_s10 + $0x464] sm:$0xf]  ;;  %v3676_v33 = vld [vmem:[%s4175_s10 + $0x470] sm:$0xf0] }
 0x23d   : > { %2510 = vmatmul.bf16.vlgmr.msrb.gmra.mxu1 %v3651_v44  ;;  %v3671_v47 = vor.u32 %v3991_v12, %v3668_v50  ;;  %v3995_v12 = vld [vmem:[%s4175_s10 + $0x46c] sm:$0xf]  ;;  %v3684_v50 = vld [vmem:[%s4175_s10 + $0x478] sm:$0xf0] }
 0x23e   : > { %3816 = vmatmul.msk.bf16.vlgmr.msrb.gmra.mxu2 %vm667_vm0, %v3655_v11 }
 0x240   : > { %v1840_v34 = vpop.f32.mrf.mxu3 }
 0x241   : > { %v2025_v7 = vpop.f32.mrf.mxu2  ;;  %v1899_v39 = vpop.f32.mrf.mxu0 }
 0x242   : > { %v2026_v18 = vadd.f32 %v2025_v7, %v1962_v23  ;;  %v1963_v22 = vpop.f32.mrf.mxu1  ;;  %v1900_v10 = vadd.f32 %v1899_v39, %v1835_v32  ;;  %v3667_v32 = vor.u32 %v3993_v9, %v3666_v36  ;;  %v4000_v7 = vld [vmem:[%s4175_s10 + $0x48c] sm:$0xf0]  ;;  %v3682_v36 = vld [vmem:[%s4175_s10 + $0x468] sm:$0xf]  ;;  %v3997_v9 = vld [vmem:[%s4175_s10 + $0x474] sm:$0xf0] }
 0x244   : > { %v4833_v27 = vmax.f32 %v5118_v21, %v2026_v18  ;;  %v1964_v26 = vadd.f32 %v1963_v22, %v1900_v10  ;;  %v3691_v10 = vor.u32 %v4000_v7, %v3690_v55  ;;  %v4004_v55 = vld [vmem:[%s4175_s10 + $0x4ac] sm:$0xf0] }
 0x245   : > { %2392 = vmatmul.bf16.gmra.mxu3 %v3675_v28  ;;  %v5120_v28 = vmax.f32 %v4490_v17, %v4654_v4 }
 0x248   : > { %v1843_v37 = vpop.f32.mrf.mxu3 }
 0x249   : > { %v2027_v44 = vpop.f32.mrf.mxu2  ;;  %v1902_v20 = vpop.f32.mrf.mxu0 }
 0x24a   : > { %v2028_v61 = vadd.f32 %v2027_v44, %v1964_v26  ;;  %v1966_v11 = vpop.f32.mrf.mxu1  ;;  %v1903_v2 = vadd.f32 %v1902_v20, %v1838_v42 }
 0x24c   : > { %v4844_v23 = vmax.f32 %v5119_v43, %v2028_v61  ;;  %v1967_v6 = vadd.f32 %v1966_v11, %v1903_v2  ;;  %2451 = vmatmul.bf16.gmra.mxu0 %v3663_v35  ;;  %v3679_v35 = vor.u32 %v3994_v16, %v3676_v33  ;;  %v3687_v11 = vor.u32 %v3995_v12, %v3684_v50  ;;  %v3698_v16 = vld [vmem:[%s4175_s10 + $0x488] sm:$0xf]  ;;  %v4001_v33 = vld [vmem:[%s4175_s10 + $0x494] sm:$0xf0] }
 0x24d   : > { %2515 = vmatmul.bf16.gmra.mxu1 %v3667_v32 }
 0x24e   : > { %3817 = vmatmul.msk.bf16.gmra.mxu2 %vm667_vm0, %v3671_v47  ;;  %v5121_v47 = vmax.f32 %v4503_v25, %v4664_v13 }
 0x250   : > { %v1845_v62 = vpop.f32.mrf.mxu3 }
 0x251   : > { %v2030_v42 = vpop.f32.mrf.mxu2  ;;  %v1904_v39 = vpop.f32.mrf.mxu0 }
 0x252   : > { %v2031_v18 = vadd.f32 %v2030_v42, %v1967_v6  ;;  %v1968_v22 = vpop.f32.mrf.mxu1  ;;  %v1905_v8 = vadd.f32 %v1904_v39, %v1840_v34  ;;  %v3683_v34 = vor.u32 %v3997_v9, %v3682_v36  ;;  %v3706_v6 = vld [vmem:[%s4175_s10 + $0x4a0] sm:$0xf]  ;;  %v3999_v36 = vld [vmem:[%s4175_s10 + $0x48c] sm:$0xf]  ;;  %v3700_v9 = vld [vmem:[%s4175_s10 + $0x498] sm:$0xf0] }
 0x253   : > { %v3707_v39 = vor.u32 %v4004_v55, %v3706_v6 }
 0x254   : > { %v4852_v21 = vmax.f32 %v5120_v28, %v2031_v18  ;;  %v1969_v26 = vadd.f32 %v1968_v22, %v1905_v8  ;;  %v5122_v22 = vmax.f32 %v4508_v19, %v4671_v14  ;;  %v3998_v28 = vld [vmem:[%s4175_s10 + $0x484] sm:$0xf] }
 0x255   : > { %2397 = vmatmul.bf16.gmra.mxu3 %v3691_v10 }
 0x258   : > { %v1848_v4 = vpop.f32.mrf.mxu3 }
 0x259   : > { %v2032_v44 = vpop.f32.mrf.mxu2  ;;  %v1907_v61 = vpop.f32.mrf.mxu0 }
 0x25a   : > { %v2033_v32 = vadd.f32 %v2032_v44, %v1969_v26  ;;  %v1971_v20 = vpop.f32.mrf.mxu1  ;;  %v1908_v17 = vadd.f32 %v1907_v61, %v1843_v37  ;;  %v3692_v26 = vld [vmem:[%s4175_s10 + $0x490] sm:$0xf0]  ;;  %v5123_v61 = vmax.f32 %v4516_v38, %v4681_v40 }
 0x25b   : > { %v3695_v50 = vor.u32 %v3998_v28, %v3692_v26  ;;  %v4003_v28 = vld [vmem:[%s4175_s10 + $0x4ac] sm:$0xf]  ;;  %v3716_v26 = vld [vmem:[%s4175_s10 + $0x4b8] sm:$0xf0] }
 0x25c   : > { %v4863_v2 = vmax.f32 %v5121_v47, %v2033_v32  ;;  %v1972_v43 = vadd.f32 %v1971_v20, %v1908_v17  ;;  %2456 = vmatmul.bf16.gmra.mxu0 %v3679_v35  ;;  %v3703_v32 = vor.u32 %v3999_v36, %v3700_v9  ;;  %v3722_v17 = vld [vmem:[%s4175_s10 + $0x4c0] sm:$0xf]  ;;  %v4008_v47 = vld [vmem:[%s4175_s10 + $0x4cc] sm:$0xf0] }
 0x25d   : > { %2520 = vmatmul.bf16.gmra.mxu1 %v3683_v34 }
 0x25e   : > { %3818 = vmatmul.msk.bf16.gmra.mxu2 %vm667_vm0, %v3687_v11 }
 0x260   : > { %v1850_v13 = vpop.f32.mrf.mxu3 }
 0x261   : > { %v2035_v37 = vpop.f32.mrf.mxu2  ;;  %v1909_v42 = vpop.f32.mrf.mxu0 }
 0x262   : > { %v2036_v7 = vadd.f32 %v2035_v37, %v1972_v43  ;;  %v1973_v18 = vpop.f32.mrf.mxu1  ;;  %v1910_v25 = vadd.f32 %v1909_v42, %v1845_v62  ;;  %v3699_v62 = vor.u32 %v4001_v33, %v3698_v16  ;;  %v3723_v37 = vor.u32 %v4008_v47, %v3722_v17 }
 0x263   : > { %v5126_v47 = vmax.f32 %v4534_v59, %v4705_v48 }
 0x264   : > { %v4871_v8 = vmax.f32 %v5122_v22, %v2036_v7  ;;  %v1974_v10 = vadd.f32 %v1973_v18, %v1910_v25  ;;  %v5124_v7 = vmax.f32 %v4521_v31, %v4688_v60  ;;  %v4002_v25 = vld [vmem:[%s4175_s10 + $0x4a4] sm:$0xf]  ;;  %v3714_v22 = vld [vmem:[%s4175_s10 + $0x4a8] sm:$0xf] }
 0x265   : > { %2402 = vmatmul.bf16.gmra.mxu3 %v3707_v39  ;;  %v3708_v39 = vld [vmem:[%s4175_s10 + $0x4b0] sm:$0xf0] }
 0x266   : > { %v3711_v33 = vor.u32 %v4002_v25, %v3708_v39 }
 0x268   : > { %v1853_v14 = vpop.f32.mrf.mxu3 }
 0x269   : > { %v2037_v12 = vpop.f32.mrf.mxu2  ;;  %v1912_v35 = vpop.f32.mrf.mxu0 }
 0x26a   : > { %v2038_v44 = vadd.f32 %v2037_v12, %v1974_v10  ;;  %v1976_v34 = vpop.f32.mrf.mxu1  ;;  %v1913_v19 = vadd.f32 %v1912_v35, %v1848_v4  ;;  %v4005_v10 = vld [vmem:[%s4175_s10 + $0x4b4] sm:$0xf0] }
 0x26c   : > { %v4882_v20 = vmax.f32 %v5123_v61, %v2038_v44  ;;  %v1977_v11 = vadd.f32 %v1976_v34, %v1913_v19  ;;  %2461 = vmatmul.bf16.gmra.mxu0 %v3695_v50  ;;  %v3719_v50 = vor.u32 %v4003_v28, %v3716_v26  ;;  %v3738_v34 = vld [vmem:[%s4175_s10 + $0x4e0] sm:$0xf] }
 0x26d   : > { %2525 = vmatmul.bf16.gmra.mxu1 %v3699_v62  ;;  %v5125_v62 = vmax.f32 %v4529_v58, %v4698_v3 }
 0x26e   : > { %3819 = vmatmul.msk.bf16.gmra.mxu2 %vm667_vm0, %v3703_v32  ;;  %v4012_v32 = vld [vmem:[%s4175_s10 + $0x4ec] sm:$0xf0] }
 0x26f   : > { %v3739_v17 = vor.u32 %v4012_v32, %v3738_v34 }
 0x270   : > { %v1855_v40 = vpop.f32.mrf.mxu3 }
 0x271   : > { %v2040_v4 = vpop.f32.mrf.mxu2  ;;  %v1914_v6 = vpop.f32.mrf.mxu0 }
 0x272   : > { %v2041_v43 = vadd.f32 %v2040_v4, %v1977_v11  ;;  %v1978_v55 = vpop.f32.mrf.mxu1  ;;  %v1915_v38 = vadd.f32 %v1914_v6, %v1850_v13  ;;  %v3715_v13 = vor.u32 %v4005_v10, %v3714_v22  ;;  %v4006_v6 = vld [vmem:[%s4175_s10 + $0x4c4] sm:$0xf] }
 0x274   : > { %v4890_v42 = vmax.f32 %v5124_v7, %v2041_v43  ;;  %v1979_v18 = vadd.f32 %v1978_v55, %v1915_v38  ;;  %v3724_v55 = vld [vmem:[%s4175_s10 + $0x4d0] sm:$0xf0]  ;;  %v3730_v38 = vld [vmem:[%s4175_s10 + $0x4c8] sm:$0xf]  ;;  %v4007_v7 = vld [vmem:[%s4175_s10 + $0x4cc] sm:$0xf] }
 0x275   : > { %2407 = vmatmul.bf16.gmra.mxu3 %v3723_v37  ;;  %v4009_v37 = vld [vmem:[%s4175_s10 + $0x4d4] sm:$0xf0]  ;;  %v3727_v39 = vor.u32 %v4006_v6, %v3724_v55 }
 0x278   : > { %v1858_v60 = vpop.f32.mrf.mxu3 }
 0x279   : > { %v2042_v16 = vpop.f32.mrf.mxu2  ;;  %v1917_v9 = vpop.f32.mrf.mxu0 }
 0x27a   : > { %v2043_v36 = vadd.f32 %v2042_v16, %v1979_v18  ;;  %v1981_v12 = vpop.f32.mrf.mxu1  ;;  %v1918_v31 = vadd.f32 %v1917_v9, %v1853_v14  ;;  %v3732_v18 = vld [vmem:[%s4175_s10 + $0x4d8] sm:$0xf0]  ;;  %v5127_v16 = vmax.f32 %v4542_v5, %v4715_v15  ;;  %v4016_v9 = vld [vmem:[%s4175_s10 + $0x50c] sm:$0xf0] }
 0x27b   : > { %v3735_v26 = vor.u32 %v4007_v7, %v3732_v18  ;;  %v5129_v7 = vmax.f32 %v4555_v46, %v4732_v53 }
 0x27c   : > { %v4901_v44 = vmax.f32 %v5125_v62, %v2043_v36  ;;  %v1982_v35 = vadd.f32 %v1981_v12, %v1918_v31  ;;  %2466 = vmatmul.bf16.gmra.mxu0 %v3711_v33  ;;  %v3754_v36 = vld [vmem:[%s4175_s10 + $0x500] sm:$0xf] }
 0x27d   : > { %2530 = vmatmul.bf16.gmra.mxu1 %v3715_v13  ;;  %v3755_v62 = vor.u32 %v4016_v9, %v3754_v36  ;;  %v4014_v36 = vld [vmem:[%s4175_s10 + $0x504] sm:$0xf]  ;;  %v3756_v9 = vld [vmem:[%s4175_s10 + $0x510] sm:$0xf0] }
 0x27e   : > { %3820 = vmatmul.msk.bf16.gmra.mxu2 %vm667_vm0, %v3719_v50 }
 0x280   : > { %v1860_v3 = vpop.f32.mrf.mxu3 }
 0x281   : > { %v2045_v19 = vpop.f32.mrf.mxu2  ;;  %v1919_v61 = vpop.f32.mrf.mxu0 }
 0x282   : > { %v2046_v14 = vadd.f32 %v2045_v19, %v1982_v35  ;;  %v1983_v11 = vpop.f32.mrf.mxu1  ;;  %v1920_v58 = vadd.f32 %v1919_v61, %v1855_v40  ;;  %v3731_v40 = vor.u32 %v4009_v37, %v3730_v38  ;;  %v5128_v35 = vmax.f32 %v4547_v45, %v4722_v49  ;;  %v4010_v19 = vld [vmem:[%s4175_s10 + $0x4e4] sm:$0xf]  ;;  %v3746_v61 = vld [vmem:[%s4175_s10 + $0x4e8] sm:$0xf] }
 0x284   : > { %v4909_v4 = vmax.f32 %v5126_v47, %v2046_v14  ;;  %v1984_v43 = vadd.f32 %v1983_v11, %v1920_v58  ;;  %v3740_v14 = vld [vmem:[%s4175_s10 + $0x4f0] sm:$0xf0]  ;;  %v4013_v11 = vld [vmem:[%s4175_s10 + $0x4f4] sm:$0xf0]  ;;  %v4011_v58 = vld [vmem:[%s4175_s10 + $0x4ec] sm:$0xf] }
 0x285   : > { %2412 = vmatmul.bf16.gmra.mxu3 %v3739_v17  ;;  %v3748_v17 = vld [vmem:[%s4175_s10 + $0x4f8] sm:$0xf0] }
 0x286   : > { %v3751_v37 = vor.u32 %v4011_v58, %v3748_v17  ;;  %v3786_v17 = vld [vmem:[%s4175_s10 + $0x540] sm:$0xf] }
 0x288   : > { %v1863_v48 = vpop.f32.mrf.mxu3 }
 0x289   : > { %v2047_v25 = vpop.f32.mrf.mxu2  ;;  %v1922_v10 = vpop.f32.mrf.mxu0 }
 0x28a   : > { %v2048_v22 = vadd.f32 %v2047_v25, %v1984_v43  ;;  %v1986_v28 = vpop.f32.mrf.mxu1  ;;  %v1923_v59 = vadd.f32 %v1922_v10, %v1858_v60  ;;  %v3743_v43 = vor.u32 %v4010_v19, %v3740_v14 }
 0x28c   : > { %v4920_v33 = vmax.f32 %v5127_v16, %v2048_v22  ;;  %v1987_v13 = vadd.f32 %v1986_v28, %v1923_v59  ;;  %2471 = vmatmul.bf16.gmra.mxu0 %v3727_v39  ;;  %v3770_v39 = vld [vmem:[%s4175_s10 + $0x520] sm:$0xf] }
 0x28d   : > { %2535 = vmatmul.bf16.gmra.mxu1 %v3731_v40  ;;  %v4020_v40 = vld [vmem:[%s4175_s10 + $0x52c] sm:$0xf0] }
 0x28e   : > { %3821 = vmatmul.msk.bf16.gmra.mxu2 %vm667_vm0, %v3735_v26  ;;  %v3771_v59 = vor.u32 %v4020_v40, %v3770_v39  ;;  %v3778_v39 = vld [vmem:[%s4175_s10 + $0x528] sm:$0xf]  ;;  %v4021_v40 = vld [vmem:[%s4175_s10 + $0x534] sm:$0xf0] }
 0x290   : > { %v1865_v15 = vpop.f32.mrf.mxu3 }
 0x291   : > { %v2050_v12 = vpop.f32.mrf.mxu2  ;;  %v1924_v31 = vpop.f32.mrf.mxu0 }
 0x292   : > { %v2051_v50 = vadd.f32 %v2050_v12, %v1987_v13  ;;  %v1988_v60 = vpop.f32.mrf.mxu1  ;;  %v1925_v5 = vadd.f32 %v1924_v31, %v1860_v3  ;;  %v3747_v3 = vor.u32 %v4013_v11, %v3746_v61  ;;  %v3762_v12 = vld [vmem:[%s4175_s10 + $0x508] sm:$0xf]  ;;  %v4015_v31 = vld [vmem:[%s4175_s10 + $0x50c] sm:$0xf]  ;;  %v5131_v61 = vmax.f32 %v4568_v41, %v4749_v29 }
 0x294   : > { %v4928_v34 = vmax.f32 %v5128_v35, %v2051_v50  ;;  %v1989_v32 = vadd.f32 %v1988_v60, %v1925_v5  ;;  %v4017_v50 = vld [vmem:[%s4175_s10 + $0x514] sm:$0xf0]  ;;  %v3764_v60 = vld [vmem:[%s4175_s10 + $0x518] sm:$0xf0] }
 0x295   : > { %2417 = vmatmul.bf16.gmra.mxu3 %v3755_v62  ;;  %v3759_v62 = vor.u32 %v4014_v36, %v3756_v9  ;;  %v3767_v14 = vor.u32 %v4015_v31, %v3764_v60  ;;  %v5133_v36 = vld [vmem:[#allocation2_spill] sm:$0xff]  ;;  %v5134_v9 = vld [vmem:[#allocation3_spill] sm:$0xff] }
 0x296   : > { %v3802_v60 = vld [vmem:[%s4175_s10 + $0x560] sm:$0xf] }
 0x298   : > { %v1868_v49 = vpop.f32.mrf.mxu3 }
 0x299   : > { %v2052_v47 = vpop.f32.mrf.mxu2  ;;  %v1927_v55 = vpop.f32.mrf.mxu0 }
 0x29a   : > { %v2053_v6 = vadd.f32 %v2052_v47, %v1989_v32  ;;  %v1991_v38 = vpop.f32.mrf.mxu1  ;;  %v1928_v45 = vadd.f32 %v1927_v55, %v1863_v48  ;;  %v5130_v48 = vmax.f32 %v4560_v1, %v4739_v63  ;;  %v4024_v47 = vld [vmem:[%s4175_s10 + $0x54c] sm:$0xf0] }
 0x29c   : > { %v4939_v18 = vmax.f32 %v5129_v7, %v2053_v6  ;;  %v1992_v25 = vadd.f32 %v1991_v38, %v1928_v45  ;;  %2476 = vmatmul.bf16.gmra.mxu0 %v3743_v43  ;;  %v3787_v38 = vor.u32 %v4024_v47, %v3786_v17  ;;  %v4018_v7 = vld [vmem:[%s4175_s10 + $0x524] sm:$0xf]  ;;  %v3788_v47 = vld [vmem:[%s4175_s10 + $0x550] sm:$0xf0] }
 0x29d   : > { %2540 = vmatmul.bf16.gmra.mxu1 %v3747_v3 }
 0x29e   : > { %3822 = vmatmul.msk.bf16.gmra.mxu2 %vm667_vm0, %v3751_v37  ;;  %v5132_v37 = vmax.f32 %v4573_v52, %v4756_v54 }
 0x2a0   : > { %v1870_v53 = vpop.f32.mrf.mxu3 }
 0x2a1   : > { %v2055_v22 = vpop.f32.mrf.mxu2  ;;  %v1929_v28 = vpop.f32.mrf.mxu0 }
 0x2a2   : > { %v2056_v10 = vadd.f32 %v2055_v22, %v1992_v25  ;;  %v1993_v26 = vpop.f32.mrf.mxu1  ;;  %v1930_v46 = vadd.f32 %v1929_v28, %v1865_v15  ;;  %v3763_v15 = vor.u32 %v4017_v50, %v3762_v12  ;;  %v3772_v25 = vld [vmem:[%s4175_s10 + $0x530] sm:$0xf0]  ;;  %v4019_v22 = vld [vmem:[%s4175_s10 + $0x52c] sm:$0xf]  ;;  %v5135_v12 = vmax.f32 %v5133_v36, %v5134_v9 }
 0x2a4   : > { %v4947_v16 = vmax.f32 %v5130_v48, %v2056_v10  ;;  %v1994_v13 = vadd.f32 %v1993_v26, %v1930_v46  ;;  %v3780_v10 = vld [vmem:[%s4175_s10 + $0x538] sm:$0xf0]  ;;  %v3775_v26 = vor.u32 %v4018_v7, %v3772_v25  ;;  %v3779_v46 = vor.u32 %v4021_v40, %v3778_v39 }
 0x2a5   : > { %2422 = vmatmul.bf16.gmra.mxu3 %v3771_v59 }
 0x2a8   : > { %v2383_v63 = vpop.f32.mrf.mxu3 }
 0x2a9   : > { %v2057_v5 = vpop.f32.mrf.mxu2  ;;  %v1932_v32 = vpop.f32.mrf.mxu0 }
 0x2aa   : > { %v2058_v35 = vadd.f32 %v2057_v5, %v1994_v13  ;;  %v1996_v19 = vpop.f32.mrf.mxu1  ;;  %v1933_v1 = vadd.f32 %v1932_v32, %v1868_v49  ;;  %v3783_v13 = vor.u32 %v4019_v22, %v3780_v10  ;;  %v4028_v5 = vld [vmem:[%s4175_s10 + $0x56c] sm:$0x10] }
 0x2ac   : > { %v4958_v11 = vmax.f32 %v5131_v61, %v2058_v35  ;;  %v1997_v58 = vadd.f32 %v1996_v19, %v1933_v1  ;;  %2481 = vmatmul.bf16.gmra.mxu0 %v3759_v62  ;;  %v4985_v35 = vld [vmem:[%s5106_s2] ss:$0 sm:$0xff]  ;;  %v3803_v1 = vor.u32 %v4028_v5, %v3802_v60  ;;  %v3804_v60 = vld [vmem:[%s4175_s10 + $0x570] sm:$0x10]  ;;  %v3810_v5 = vld [vmem:[%s4175_s10 + $0x568] sm:$0xf] }
 0x2ad   : > { %2545 = vmatmul.bf16.gmra.mxu1 %v3763_v15 }
 0x2ae   : > { %3823 = vmatmul.msk.bf16.gmra.mxu2 %vm667_vm0, %v3767_v14 }
 0x2b0   : > { %v2385_v29 = vpop.f32.mrf.mxu3 }
 0x2b1   : > { %v2060_v43 = vpop.f32.mrf.mxu2  ;;  %v1934_v6 = vpop.f32.mrf.mxu0 }
 0x2b2   : > { %v2061_v3 = vadd.f32 %v2060_v43, %v1997_v58  ;;  %v1998_v55 = vpop.f32.mrf.mxu1  ;;  %v1935_v41 = vadd.f32 %v1934_v6, %v1870_v53  ;;  %v4022_v58 = vld [vmem:[%s4175_s10 + $0x544] sm:$0xf]  ;;  %v3794_v43 = vld [vmem:[%s4175_s10 + $0x548] sm:$0xf]  ;;  %v4023_v6 = vld [vmem:[%s4175_s10 + $0x54c] sm:$0xf] }
 0x2b4   : > { %v4966_v45 = vmax.f32 %v5132_v37, %v2061_v3  ;;  %v1999_v49 = vadd.f32 %v1998_v55, %v1935_v41  ;;  %v4025_v3 = vld [vmem:[%s4175_s10 + $0x554] sm:$0xf0]  ;;  %v3796_v55 = vld [vmem:[%s4175_s10 + $0x558] sm:$0xf0] }
 0x2b5   : > { %2427 = vmatmul.bf16.gmra.mxu3 %v3787_v38  ;;  %v3795_v37 = vor.u32 %v4025_v3, %v3794_v43  ;;  %v3799_v40 = vor.u32 %v4023_v6, %v3796_v55 }
 0x2b8   : > { %v2388_v54 = vpop.f32.mrf.mxu3 }
 0x2b9   : > { %v2062_v28 = vpop.f32.mrf.mxu2  ;;  %v2447_v59 = vpop.f32.mrf.mxu0 }
 0x2ba   : > { %v2063_v53 = vadd.f32 %v2062_v28, %v1999_v49  ;;  %v2511_v48 = vpop.f32.mrf.mxu1  ;;  %v2448_v52 = vadd.f32 %v2447_v59, %v2383_v63 }
 0x2bc   : > { %v4977_v50 = vmax.f32 %v5135_v12, %v2063_v53  ;;  %2486 = vmatmul.bf16.gmra.mxu0 %v3775_v26  ;;  %v2512_v31 = vadd.f32 %v2511_v48, %v2448_v52  ;;  %v4026_v12 = vld [vmem:[%s4175_s10 + $0x564] sm:$0xf] }
 0x2bd   : > { %2550 = vmatmul.bf16.gmra.mxu1 %v3779_v46 }
 0x2be   : > { %3824 = vmatmul.msk.bf16.gmra.mxu2 %vm667_vm0, %v3783_v13 }
 0x2c0   : > { %v2390_v14 = vpop.f32.mrf.mxu3 }
 0x2c1   : > { %v2575_v62 = vpop.f32.mrf.mxu2  ;;  %v2449_v32 = vpop.f32.mrf.mxu0 }
 0x2c2   : > { %v2576_v15 = vadd.f32 %v2575_v62, %v2512_v31  ;;  %v2513_v19 = vpop.f32.mrf.mxu1  ;;  %v2450_v61 = vadd.f32 %v2449_v32, %v2385_v29  ;;  %v3791_v29 = vor.u32 %v4022_v58, %v3788_v47  ;;  %v4029_v62 = vld [vmem:[%s4175_s10 + $0x574] sm:$0x10]  ;;  %v3812_v32 = vld [vmem:[%s4175_s10 + $0x578] sm:$0x10] }
 0x2c3   : > { %v3811_v58 = vor.u32 %v4029_v62, %v3810_v5 }
 0x2c4   : > { %v2630_v63 = vmax.f32 %v4776_v24, %v2576_v15  ;;  %v2514_v38 = vadd.f32 %v2513_v19, %v2450_v61  ;;  %v4027_v15 = vld [vmem:[%s4175_s10 + $0x56c] sm:$0xf]  ;;  %v3807_v61 = vor.u32 %v4026_v12, %v3804_v60 }
 0x2c5   : > { %2432 = vmatmul.bf16.gmra.mxu3 %v3803_v1 }
 0x2c6   : > { %v2656_v17 = vadd.f32 %v4985_v35, %v2630_v63 }
 0x2c8   : > { %v2678_v41 = vmax.f32 %v2656_v17, 0.0  ;;  %v2393_v10 = vpop.f32.mrf.mxu3 }
 0x2c9   : > { %v2577_v24 = vpop.f32.mrf.mxu2  ;;  %v2452_v25 = vpop.f32.mrf.mxu0 }
 0x2ca   : > { %v2700_v49 = vpack.c.bf16 %v2678_v41, %v2678_v41  ;;  %v2578_v7 = vadd.f32 %v2577_v24, %v2514_v38  ;;  %v2516_v39 = vpop.f32.mrf.mxu1  ;;  %v2453_v22 = vadd.f32 %v2452_v25, %v2388_v54 }
 0x2cc   : > { %2723 = vst.msk [vmem:[%s4999_s30] sm:$0xf] %vm2722_vm1, %v2700_v49  ;;  %v2631_v28 = vmax.f32 %v4787_v56, %v2578_v7  ;;  %2491 = vmatmul.bf16.gmra.mxu0 %v3791_v29  ;;  %v2517_v46 = vadd.f32 %v2516_v39, %v2453_v22 }
 0x2cd   : > { %2555 = vmatmul.bf16.gmra.mxu1 %v3795_v37 }
 0x2ce   : > { %v2657_v26 = vadd.f32 %v4985_v35, %v2631_v28  ;;  %3825 = vmatmul.msk.bf16.gmra.mxu2 %vm667_vm0, %v3799_v40 }
 0x2d0   : > { %v2679_v53 = vmax.f32 %v2657_v26, 0.0  ;;  %v2395_v56 = vpop.f32.mrf.mxu3 }
 0x2d1   : > { %v2580_v59 = vpop.f32.mrf.mxu2  ;;  %v2454_v52 = vpop.f32.mrf.mxu0 }
 0x2d2   : > { %v2701_v48 = vpack.c.bf16 %v2679_v53, %v2679_v53  ;;  %v2581_v13 = vadd.f32 %v2580_v59, %v2517_v46  ;;  %v2518_v54 = vpop.f32.mrf.mxu1  ;;  %v2455_v9 = vadd.f32 %v2454_v52, %v2390_v14 }
 0x2d4   : > { %2724 = vst.msk [vmem:[%s4999_s30 + $0x4] sm:$0xf] %vm2722_vm1, %v2701_v48  ;;  %v2632_v36 = vmax.f32 %v4795_v30, %v2581_v13  ;;  %v2519_v1 = vadd.f32 %v2518_v54, %v2455_v9  ;;  %v3815_v30 = vor.u32 %v4027_v15, %v3812_v32 }
 0x2d6   : > { %v2658_v31 = vadd.f32 %v4985_v35, %v2632_v36 }
 0x2d8   : > { %v2680_v19 = vmax.f32 %v2658_v31, 0.0  ;;  %v2398_v6 = vpop.f32.mrf.mxu3 }
 0x2d9   : > { %v2582_v63 = vpop.f32.mrf.mxu2  ;;  %v2457_v43 = vpop.f32.mrf.mxu0 }
 0x2da   : > { %v2702_v17 = vpack.c.bf16 %v2680_v19, %v2680_v19  ;;  %v2583_v47 = vadd.f32 %v2582_v63, %v2519_v1  ;;  %v2521_v3 = vpop.f32.mrf.mxu1  ;;  %v2458_v14 = vadd.f32 %v2457_v43, %v2393_v10 }
 0x2dc   : > { %2725 = vst.msk [vmem:[%s4999_s30 + $0x8] sm:$0xf] %vm2722_vm1, %v2702_v17  ;;  %v2633_v55 = vmax.f32 %v4806_v0, %v2583_v47  ;;  %2496 = vmatmul.bf16.gmra.mxu0 %v3807_v61  ;;  %v2522_v38 = vadd.f32 %v2521_v3, %v2458_v14 }
 0x2dd   : > { %2560 = vmatmul.bf16.gmra.mxu1 %v3811_v58 }
 0x2de   : > { %v2659_v41 = vadd.f32 %v4985_v35, %v2633_v55  ;;  %3826 = vmatmul.msk.bf16.gmra.mxu2 %vm667_vm0, %v3815_v30 }
 0x2e0   : > { %v2681_v24 = vmax.f32 %v2659_v41, 0.0  ;;  %v2400_v39 = vpop.f32.mrf.mxu3 }
 0x2e1   : > { %v2585_v29 = vpop.f32.mrf.mxu2  ;;  %v2459_v7 = vpop.f32.mrf.mxu0 }
 0x2e2   : > { %v2703_v37 = vpack.c.bf16 %v2681_v24, %v2681_v24  ;;  %v2586_v49 = vadd.f32 %v2585_v29, %v2522_v38  ;;  %v2523_v25 = vpop.f32.mrf.mxu1  ;;  %v2460_v0 = vadd.f32 %v2459_v7, %v2395_v56 }
 0x2e4   : > { %2726 = vst.msk [vmem:[%s4999_s30 + $0xc] sm:$0xf] %vm2722_vm1, %v2703_v37  ;;  %v2634_v40 = vmax.f32 %v4814_v57, %v2586_v49  ;;  %v2524_v28 = vadd.f32 %v2523_v25, %v2460_v0 }
 0x2e6   : > { %v2660_v22 = vadd.f32 %v4985_v35, %v2634_v40 }
 0x2e8   : > { %v2682_v10 = vmax.f32 %v2660_v22, 0.0  ;;  %v2403_v52 = vpop.f32.mrf.mxu3 }
 0x2e9   : > { %v2587_v26 = vpop.f32.mrf.mxu2  ;;  %v2462_v59 = vpop.f32.mrf.mxu0 }
 0x2ea   : > { %v2704_v46 = vpack.c.bf16 %v2682_v10, %v2682_v10  ;;  %v2588_v53 = vadd.f32 %v2587_v26, %v2524_v28  ;;  %v2526_v48 = vpop.f32.mrf.mxu1  ;;  %v2463_v13 = vadd.f32 %v2462_v59, %v2398_v6 }
 0x2ec   : > { %2727 = vst.msk [vmem:[%s4999_s30 + $0x10] sm:$0xf] %vm2722_vm1, %v2704_v46  ;;  %v2635_v54 = vmax.f32 %v4825_v51, %v2588_v53  ;;  %v2527_v57 = vadd.f32 %v2526_v48, %v2463_v13 }
 0x2ee   : > { %v2661_v36 = vadd.f32 %v4985_v35, %v2635_v54 }
 0x2f0   : > { %v2683_v56 = vmax.f32 %v2661_v36, 0.0  ;;  %v2405_v62 = vpop.f32.mrf.mxu3 }
 0x2f1   : > { %v2590_v9 = vpop.f32.mrf.mxu2  ;;  %v2464_v60 = vpop.f32.mrf.mxu0 }
 0x2f2   : > { %v2705_v12 = vpack.c.bf16 %v2683_v56, %v2683_v56  ;;  %v2591_v31 = vadd.f32 %v2590_v9, %v2527_v57  ;;  %v2528_v5 = vpop.f32.mrf.mxu1  ;;  %v2465_v32 = vadd.f32 %v2464_v60, %v2400_v39 }
 0x2f4   : > { %2728 = vst.msk [vmem:[%s4999_s30 + $0x14] sm:$0xf] %vm2722_vm1, %v2705_v12  ;;  %v2636_v15 = vmax.f32 %v4833_v27, %v2591_v31  ;;  %v2529_v51 = vadd.f32 %v2528_v5, %v2465_v32 }
 0x2f6   : > { %v2662_v19 = vadd.f32 %v4985_v35, %v2636_v15 }
 0x2f8   : > { %v2684_v1 = vmax.f32 %v2662_v19, 0.0  ;;  %v2408_v3 = vpop.f32.mrf.mxu3 }
 0x2f9   : > { %v2592_v63 = vpop.f32.mrf.mxu2  ;;  %v2467_v17 = vpop.f32.mrf.mxu0 }
 0x2fa   : > { %v2706_v61 = vpack.c.bf16 %v2684_v1, %v2684_v1  ;;  %v2593_v58 = vadd.f32 %v2592_v63, %v2529_v51  ;;  %v2531_v47 = vpop.f32.mrf.mxu1  ;;  %v2468_v43 = vadd.f32 %v2467_v17, %v2403_v52 }
 0x2fc   : > { %2729 = vst.msk [vmem:[%s4999_s30 + $0x18] sm:$0xf] %vm2722_vm1, %v2706_v61  ;;  %v2637_v30 = vmax.f32 %v4844_v23, %v2593_v58  ;;  %v2532_v27 = vadd.f32 %v2531_v47, %v2468_v43 }
 0x2fe   : > { %v2663_v14 = vadd.f32 %v4985_v35, %v2637_v30 }
 0x300   : > { %v2685_v6 = vmax.f32 %v2663_v14, 0.0  ;;  %v2410_v37 = vpop.f32.mrf.mxu3 }
 0x301   : > { %v2595_v55 = vpop.f32.mrf.mxu2  ;;  %v2469_v24 = vpop.f32.mrf.mxu0 }
 0x302   : > { %v2707_v41 = vpack.c.bf16 %v2685_v6, %v2685_v6  ;;  %v2596_v38 = vadd.f32 %v2595_v55, %v2532_v27  ;;  %v2533_v29 = vpop.f32.mrf.mxu1  ;;  %v2470_v7 = vadd.f32 %v2469_v24, %v2405_v62 }
 0x304   : > { %2730 = vst.msk [vmem:[%s4999_s30 + $0x1c] sm:$0xf] %vm2722_vm1, %v2707_v41  ;;  %v2638_v49 = vmax.f32 %v4852_v21, %v2596_v38  ;;  %v2534_v23 = vadd.f32 %v2533_v29, %v2470_v7 }
 0x306   : > { %v2664_v25 = vadd.f32 %v4985_v35, %v2638_v49 }
 0x308   : > { %v2686_v39 = vmax.f32 %v2664_v25, 0.0  ;;  %v2413_v46 = vpop.f32.mrf.mxu3 }
 0x309   : > { %v2597_v40 = vpop.f32.mrf.mxu2  ;;  %v2472_v10 = vpop.f32.mrf.mxu0 }
 0x30a   : > { %v2708_v0 = vpack.c.bf16 %v2686_v39, %v2686_v39  ;;  %v2598_v22 = vadd.f32 %v2597_v40, %v2534_v23  ;;  %v2536_v28 = vpop.f32.mrf.mxu1  ;;  %v2473_v26 = vadd.f32 %v2472_v10, %v2408_v3 }
 0x30c   : > { %2731 = vst.msk [vmem:[%s4999_s30 + $0x20] sm:$0xf] %vm2722_vm1, %v2708_v0  ;;  %v2639_v53 = vmax.f32 %v4863_v2, %v2598_v22  ;;  %v2537_v21 = vadd.f32 %v2536_v28, %v2473_v26 }
 0x30e   : > { %v2665_v59 = vadd.f32 %v4985_v35, %v2639_v53 }
 0x310   : > { %v2687_v48 = vmax.f32 %v2665_v59, 0.0  ;;  %v2415_v56 = vpop.f32.mrf.mxu3 }
 0x311   : > { %v2600_v13 = vpop.f32.mrf.mxu2  ;;  %v2474_v36 = vpop.f32.mrf.mxu0 }
 0x312   : > { %v2709_v52 = vpack.c.bf16 %v2687_v48, %v2687_v48  ;;  %v2601_v54 = vadd.f32 %v2600_v13, %v2537_v21  ;;  %v2538_v57 = vpop.f32.mrf.mxu1  ;;  %v2475_v12 = vadd.f32 %v2474_v36, %v2410_v37 }
 0x314   : > { %2732 = vst.msk [vmem:[%s4999_s30 + $0x24] sm:$0xf] %vm2722_vm1, %v2709_v52  ;;  %v2640_v9 = vmax.f32 %v4871_v8, %v2601_v54  ;;  %v2539_v2 = vadd.f32 %v2538_v57, %v2475_v12 }
 0x316   : > { %v2666_v31 = vadd.f32 %v4985_v35, %v2640_v9 }
 0x318   : > { %v2688_v60 = vmax.f32 %v2666_v31, 0.0  ;;  %v2418_v63 = vpop.f32.mrf.mxu3 }
 0x319   : > { %v2602_v5 = vpop.f32.mrf.mxu2  ;;  %v2477_v32 = vpop.f32.mrf.mxu0 }
 0x31a   : > { %v2710_v62 = vpack.c.bf16 %v2688_v60, %v2688_v60  ;;  %v2603_v15 = vadd.f32 %v2602_v5, %v2539_v2  ;;  %v2541_v19 = vpop.f32.mrf.mxu1  ;;  %v2478_v1 = vadd.f32 %v2477_v32, %v2413_v46 }
 0x31c   : > { %2733 = vst.msk [vmem:[%s4999_s30 + $0x28] sm:$0xf] %vm2722_vm1, %v2710_v62  ;;  %v2641_v51 = vmax.f32 %v4882_v20, %v2603_v15  ;;  %v2542_v8 = vadd.f32 %v2541_v19, %v2478_v1 }
 0x31e   : > { %v2667_v61 = vadd.f32 %v4985_v35, %v2641_v51 }
 0x320   : > { %v2689_v58 = vmax.f32 %v2667_v61, 0.0  ;;  %v2420_v55 = vpop.f32.mrf.mxu3 }
 0x321   : > { %v2605_v17 = vpop.f32.mrf.mxu2  ;;  %v2479_v3 = vpop.f32.mrf.mxu0 }
 0x322   : > { %v2711_v47 = vpack.c.bf16 %v2689_v58, %v2689_v58  ;;  %v2606_v43 = vadd.f32 %v2605_v17, %v2542_v8  ;;  %v2543_v30 = vpop.f32.mrf.mxu1  ;;  %v2480_v27 = vadd.f32 %v2479_v3, %v2415_v56 }
 0x324   : > { %2734 = vst.msk [vmem:[%s4999_s30 + $0x2c] sm:$0xf] %vm2722_vm1, %v2711_v47  ;;  %v2642_v14 = vmax.f32 %v4890_v42, %v2606_v43  ;;  %v2544_v41 = vadd.f32 %v2543_v30, %v2480_v27 }
 0x326   : > { %v2668_v6 = vadd.f32 %v4985_v35, %v2642_v14 }
 0x328   : > { %v2690_v20 = vmax.f32 %v2668_v6, 0.0  ;;  %v2423_v0 = vpop.f32.mrf.mxu3 }
 0x329   : > { %v2607_v38 = vpop.f32.mrf.mxu2  ;;  %v2482_v37 = vpop.f32.mrf.mxu0 }
 0x32a   : > { %v2712_v24 = vpack.c.bf16 %v2690_v20, %v2690_v20  ;;  %v2608_v29 = vadd.f32 %v2607_v38, %v2544_v41  ;;  %v2546_v49 = vpop.f32.mrf.mxu1  ;;  %v2483_v7 = vadd.f32 %v2482_v37, %v2418_v63 }
 0x32c   : > { %2735 = vst.msk [vmem:[%s4999_s30 + $0x30] sm:$0xf] %vm2722_vm1, %v2712_v24  ;;  %v2643_v25 = vmax.f32 %v4901_v44, %v2608_v29  ;;  %v2547_v42 = vadd.f32 %v2546_v49, %v2483_v7 }
 0x32e   : > { %v2669_v39 = vadd.f32 %v4985_v35, %v2643_v25 }
 0x330   : > { %v2691_v23 = vmax.f32 %v2669_v39, 0.0  ;;  %v2425_v56 = vpop.f32.mrf.mxu3 }
 0x331   : > { %v2610_v40 = vpop.f32.mrf.mxu2  ;;  %v2484_v28 = vpop.f32.mrf.mxu0 }
 0x332   : > { %v2713_v22 = vpack.c.bf16 %v2691_v23, %v2691_v23  ;;  %v2611_v10 = vadd.f32 %v2610_v40, %v2547_v42  ;;  %v2548_v26 = vpop.f32.mrf.mxu1  ;;  %v2485_v53 = vadd.f32 %v2484_v28, %v2420_v55 }
 0x334   : > { %2736 = vst.msk [vmem:[%s4999_s30 + $0x34] sm:$0xf] %vm2722_vm1, %v2713_v22  ;;  %v2644_v46 = vmax.f32 %v4909_v4, %v2611_v10  ;;  %v2549_v44 = vadd.f32 %v2548_v26, %v2485_v53 }
 0x336   : > { %v2670_v59 = vadd.f32 %v4985_v35, %v2644_v46 }
 0x338   : > { %v2692_v21 = vmax.f32 %v2670_v59, 0.0  ;;  %v2428_v1 = vpop.f32.mrf.mxu3 }
 0x339   : > { %v2612_v48 = vpop.f32.mrf.mxu2  ;;  %v2487_v54 = vpop.f32.mrf.mxu0 }
 0x33a   : > { %v2714_v13 = vpack.c.bf16 %v2692_v21, %v2692_v21  ;;  %v2613_v52 = vadd.f32 %v2612_v48, %v2549_v44  ;;  %v2551_v36 = vpop.f32.mrf.mxu1  ;;  %v2488_v57 = vadd.f32 %v2487_v54, %v2423_v0 }
 0x33c   : > { %2737 = vst.msk [vmem:[%s4999_s30 + $0x38] sm:$0xf] %vm2722_vm1, %v2714_v13  ;;  %v2645_v9 = vmax.f32 %v4920_v33, %v2613_v52  ;;  %v2552_v4 = vadd.f32 %v2551_v36, %v2488_v57 }
 0x33e   : > { %v2671_v12 = vadd.f32 %v4985_v35, %v2645_v9 }
 0x340   : > { %v2693_v31 = vmax.f32 %v2671_v12, 0.0  ;;  %v2430_v14 = vpop.f32.mrf.mxu3 }
 0x341   : > { %v2615_v60 = vpop.f32.mrf.mxu2  ;;  %v2489_v62 = vpop.f32.mrf.mxu0 }
 0x342   : > { %v2715_v2 = vpack.c.bf16 %v2693_v31, %v2693_v31  ;;  %v2616_v5 = vadd.f32 %v2615_v60, %v2552_v4  ;;  %v2553_v15 = vpop.f32.mrf.mxu1  ;;  %v2490_v19 = vadd.f32 %v2489_v62, %v2425_v56  ;;  %v2747_v4 = vld [vmem:[%s4999_s30 + $0x54] sm:$0x1] }
 0x344   : > { %2738 = vst.msk [vmem:[%s4999_s30 + $0x3c] sm:$0xf] %vm2722_vm1, %v2715_v2  ;;  %v2646_v32 = vmax.f32 %v4928_v34, %v2616_v5  ;;  %v2554_v33 = vadd.f32 %v2553_v15, %v2490_v19 }
 0x346   : > { %v2672_v51 = vadd.f32 %v4985_v35, %v2646_v32 }
 0x348   : > { %v2694_v63 = vmax.f32 %v2672_v51, 0.0  ;;  %v2433_v7 = vpop.f32.mrf.mxu3 }
 0x349   : > { %v2617_v61 = vpop.f32.mrf.mxu2  ;;  %v2492_v17 = vpop.f32.mrf.mxu0 }
 0x34a   : > { %v2716_v8 = vpack.c.bf16 %v2694_v63, %v2694_v63  ;;  %v2618_v58 = vadd.f32 %v2617_v61, %v2554_v33  ;;  %v2556_v47 = vpop.f32.mrf.mxu1  ;;  %v2493_v43 = vadd.f32 %v2492_v17, %v2428_v1 }
 0x34c   : > { %2739 = vst.msk [vmem:[%s4999_s30 + $0x40] sm:$0xf] %vm2722_vm1, %v2716_v8  ;;  %v2647_v3 = vmax.f32 %v4939_v18, %v2618_v58  ;;  %v2557_v34 = vadd.f32 %v2556_v47, %v2493_v43 }
 0x34e   : > { %v2673_v30 = vadd.f32 %v4985_v35, %v2647_v3 }
 0x350   : > { %v2695_v27 = vmax.f32 %v2673_v30, 0.0  ;;  %v2435_v21 = vpop.f32.mrf.mxu3 }
 0x351   : > { %v2620_v6 = vpop.f32.mrf.mxu2  ;;  %v2494_v41 = vpop.f32.mrf.mxu0 }
 0x352   : > { %v2717_v55 = vpack.c.bf16 %v2695_v27, %v2695_v27  ;;  %v2621_v20 = vadd.f32 %v2620_v6, %v2557_v34  ;;  %v2558_v38 = vpop.f32.mrf.mxu1  ;;  %v2495_v29 = vadd.f32 %v2494_v41, %v2430_v14 }
 0x354   : > { %2740 = vst.msk [vmem:[%s4999_s30 + $0x44] sm:$0xf] %vm2722_vm1, %v2717_v55  ;;  %v2648_v24 = vmax.f32 %v4947_v16, %v2621_v20  ;;  %v2559_v18 = vadd.f32 %v2558_v38, %v2495_v29 }
 0x356   : > { %v2674_v37 = vadd.f32 %v4985_v35, %v2648_v24 }
 0x358   : > { %v2696_v49 = vmax.f32 %v2674_v37, 0.0 }
 0x359   : > { %v2622_v25 = vpop.f32.mrf.mxu2  ;;  %v2497_v23 = vpop.f32.mrf.mxu0 }
 0x35a   : > { %v2718_v39 = vpack.c.bf16 %v2696_v49, %v2696_v49  ;;  %v2623_v42 = vadd.f32 %v2622_v25, %v2559_v18  ;;  %v2498_v40 = vadd.f32 %v2497_v23, %v2433_v7  ;;  %v2561_v22 = vpop.f32.mrf.mxu1 }
 0x35c   : > { %2741 = vst.msk [vmem:[%s4999_s30 + $0x48] sm:$0xf] %vm2722_vm1, %v2718_v39  ;;  %v2649_v0 = vmax.f32 %v4958_v11, %v2623_v42  ;;  %v2562_v16 = vadd.f32 %v2561_v22, %v2498_v40 }
 0x35e   : > { %v2675_v10 = vadd.f32 %v4985_v35, %v2649_v0 }
 0x360   : > { %v2697_v28 = vmax.f32 %v2675_v10, 0.0 }
 0x361   : > { %v2625_v26 = vpop.f32.mrf.mxu2  ;;  %v2499_v59 = vpop.f32.mrf.mxu0 }
 0x362   : > { %v2719_v46 = vpack.c.bf16 %v2697_v28, %v2697_v28  ;;  %v2626_v53 = vadd.f32 %v2625_v26, %v2562_v16  ;;  %v2500_v48 = vadd.f32 %v2499_v59, %v2435_v21  ;;  %v2563_v11 = vpop.f32.mrf.mxu1 }
 0x364   : > { %2742 = vst.msk [vmem:[%s4999_s30 + $0x4c] sm:$0xf] %vm2722_vm1, %v2719_v46  ;;  %v2650_v44 = vmax.f32 %v4966_v45, %v2626_v53  ;;  %v2564_v54 = vadd.f32 %v2563_v11, %v2500_v48 }
 0x366   : > { %v2676_v13 = vadd.f32 %v4985_v35, %v2650_v44 }
 0x368   : > { %v2698_v52 = vmax.f32 %v2676_v13, 0.0 }
 0x369   : > { %v2627_v36 = vpop.f32.mrf.mxu2 }
 0x36a   : > { %v2720_v57 = vpack.c.bf16 %v2698_v52, %v2698_v52  ;;  %v2628_v56 = vadd.f32 %v2627_v36, %v2564_v54 }
 0x36c   : > { %2743 = vst.msk [vmem:[%s4999_s30 + $0x50] sm:$0xf] %vm2722_vm1, %v2720_v57  ;;  %v2651_v9 = vmax.f32 %v4977_v50, %v2628_v56 }
 0x36e   : > { %v2677_v12 = vadd.f32 %v4985_v35, %v2651_v9 }
 0x370   : > { %v2699_v45 = vmax.f32 %v2677_v12, 0.0 }
 0x372   : > { %v2721_v31 = vpack.c.bf16 %v2699_v45, %v2699_v45 }
 0x374   : > { %v2748_v60 = vsel %vm2746_vm4, %v2721_v31, %v2747_v4 }
 0x375   : > { %2749 = vst [vmem:[%s4999_s30 + $0x54] sm:$0x1] %v2748_v60 }
 0x376 PF: > { %s13_s14 = sadd.s32 1, %s4079_s14   ;;  %s5136_s12 = smov %s4075_s13 }
 0x377   : > { %p10_p5 = scmp.ge.s32.totalorder %s13_s14, 4   ;;  %s5137_s13 = smov %s5139_s15 }
 0x379   :  { %12 = sbr.rel (!%p10_p5) target bundleno = 2 (0x2), region = 65 }

// kernel: cat_dog_convnet_forward.6
= control target key start
LH: loop header
LB: loop body
LE: loop exit
PB: predicated region body
PF: predicated region fallthrough
CT: control target
= control target key end

     0   :  { %s1339_s12 = smov 0   ;;  %s1341_s13 = smov 0   ;;  %s1654_s0 = inlined_call_operand.vmem [shape: bf16[2,4,36,288], index: 0, kind: input, shape index: {}]   ;;  %s1655_s1 = inlined_call_operand.vmem [shape: bf16[288,64], index: 1, kind: input, shape index: {}]   ;;  %s1656_s2 = inlined_call_operand.vmem [shape: f32[1,64], index: 2, kind: input, shape index: {}]   ;;  %s1657_s3 = inlined_call_operand.vmem [shape: bf16[2,36,64], index: 3, kind: output, shape index: {}]  }
   0x1   :  { %s1343_s14 = smov 0  }
   0x2 LB: > { %s25_s15 = sadd.s32 1, %s1313_s13  ;;  %p1009_p0 = scmp.ge.s32.totalorder %s1317_s14, 1  ;;  %s1317_s14 = sphi %s1343_s14, %s13_s14   ;;  %s1313_s13 = sphi %s1341_s13, %s1659_s13   ;;  %s1309_s12 = sphi %s1339_s12, %s1658_s12  }
   0x3   : > { %p27_p1 = scmp.ge.s32.totalorder %s25_s15, 2  ;;  %p159_p2 = scmp.lt.s32.totalorder %s1317_s14, 3 }
   0x5   : > { %s1661_s15 = smov (%p27_p1, %s25_s15), 0  ;;  %p160_p3 = pnand %p1009_p0, %p159_p2 }
   0x6   : > { %p193_p4 = scmp.lt.s32.totalorder (!%p160_p3), %s1309_s12, 1 }
   0x7   : > { %163 = sbr.rel (%p160_p3) target bundleno = 318 (0x13e), region = 32 }
   0xc   : > { %v1360_v0 = vld [vmem:[%s1655_s1 + $0x38] sm:$0xff]  ;;  %v1370_v2 = vld [vmem:[%s1655_s1 + $0x88] sm:$0xff]  ;;  %v1377_v3 = vld [vmem:[%s1655_s1 + $0x30] sm:$0xff]  ;;  %s1663_s12 = smov (!%p193_p4, %s1309_s12), 1  ;;  %vm408_vm0 = vcmask 261120   ;;  %vm908_vm1 = vcmask 519168  }
   0xd   : > { %v1365_v1 = vld [vmem:[%s1655_s1 + $0x78] sm:$0xff]  ;;  %418 = vmatpush.bf16.msra.mxu0 %v1360_v0  ;;  %v1382_v4 = vld [vmem:[%s1655_s1 + $0x70] sm:$0xff]  ;;  %470 = vmatpush.bf16.msra.mxu2 %v1370_v2  ;;  %v1391_v5 = vld [vmem:[%s1655_s1 + $0x80] sm:$0xff]  ;;  %s1268_s28 = smul.u32 240, %s1663_s12  ;;  %vm913_vm2 = vcmask 517120  }
   0xe   : > { %441 = vmatpush.bf16.msra.mxu1 %v1365_v1  ;;  %547 = vmatpush.bf16.msra.mxu3 %v1360_v0  ;;  %v1404_v6 = vld [vmem:[%s1655_s1 + $0x28] sm:$0xff]  ;;  %v1421_v11 = vld [vmem:[%s1655_s1 + $0x20] sm:$0xff]  ;;  %v1435_v13 = vld [vmem:[%s1655_s1 + $0x18] sm:$0xff]  ;;  %s1269_s8 = smul.u32 20, %s1663_s12 }
   0xf   : > { %s1399_s4 = scalar_lea.vmem %s1654_s0, %s1268_s28  ;;  %v1413_v9 = vld [vmem:[%s1655_s1 + $0x68] sm:$0xff]  ;;  %v1428_v12 = vld [vmem:[%s1655_s1 + $0x60] sm:$0xff]  ;;  %v1442_v14 = vld [vmem:[%s1655_s1 + $0x58] sm:$0xff] }
  0x10   : > { %v1022_v7 = vld [vmem:[%s1399_s4 + $0x8] sm:$0xf]  ;;  %v1244_v8 = vld [vmem:[%s1399_s4 + $0x10] sm:$0xf0]  ;;  %v1034_v17 = vld [vmem:[%s1399_s4 + $0x20] sm:$0xf]  ;;  %s1627_s11 = scalar_lea.vmem %s1657_s3, %s1269_s8 }
  0x11   : > { %419 = vmatpush.bf16.msra.mxu0 %v1377_v3  ;;  %471 = vmatpush.bf16.msra.mxu2 %v1391_v5  ;;  %v1023_v10 = vor.u32 %v1244_v8, %v1022_v7  ;;  %v1449_v15 = vld [vmem:[%s1655_s1 + $0x10] sm:$0xff]  ;;  %v1247_v18 = vld [vmem:[%s1399_s4 + $0x28] sm:$0xf0]  ;;  %v1478_v22 = vld [vmem:[%s1655_s1] sm:$0xff] }
  0x12   : > { %442 = vmatpush.bf16.msra.mxu1 %v1382_v4  ;;  %548 = vmatpush.bf16.msra.mxu3 %v1377_v3  ;;  %v1456_v16 = vld [vmem:[%s1655_s1 + $0x50] sm:$0xff]  ;;  %v1035_v19 = vor.u32 %v1247_v18, %v1034_v17  ;;  %v1465_v20 = vld [vmem:[%s1655_s1 + $0x8] sm:$0xff]  ;;  %v1483_v23 = vld [vmem:[%s1655_s1 + $0x40] sm:$0xff] }
  0x13   : > { %v1472_v21 = vld [vmem:[%s1655_s1 + $0x48] sm:$0xff]  ;;  %v1014_v24 = vld [vmem:[%s1399_s4] sm:$0xf]  ;;  %v1242_v26 = vld [vmem:[%s1399_s4 + $0x4] sm:$0xf] }
  0x14   : > { %1108 = vmatmul.msk.bf16.vlgmr.msra.gmra.mxu2 %vm408_vm0, %v1023_v10  ;;  %v1243_v25 = vld [vmem:[%s1399_s4 + $0x8] sm:$0xf0]  ;;  %v1016_v27 = vld [vmem:[%s1399_s4 + $0xc] sm:$0xf0]  ;;  %v1123_v28 = vld [vmem:[%s1399_s4 + $0x3c] sm:$0xf] }
  0x15   : > { %570 = vmatpush.bf16.msrb.mxu2 %v1365_v1  ;;  %420 = vmatpush.bf16.msra.mxu0 %v1404_v6  ;;  %v1249_v29 = vld [vmem:[%s1399_s4 + $0x44] sm:$0xf0]  ;;  %v1015_v30 = vor.u32 %v1243_v25, %v1014_v24  ;;  %v1019_v31 = vor.u32 %v1242_v26, %v1016_v27  ;;  %v259_v33 = vld [vmem:[%s1399_s4 + $0x38] sm:$0x3]  ;;  %v1246_v37 = vld [vmem:[%s1399_s4 + $0x20] sm:$0xf0] }
  0x16   : > { %443 = vmatpush.bf16.msra.mxu1 %v1413_v9  ;;  %549 = vmatpush.bf16.msra.mxu3 %v1404_v6  ;;  %v1124_v32 = vor.u32 %v1249_v29, %v1123_v28  ;;  %v284_v34 = vunpack.c.l.b16 %v259_v33  ;;  %v1026_v36 = vld [vmem:[%s1399_s4 + $0x18] sm:$0xf]  ;;  %v1245_v38 = vld [vmem:[%s1399_s4 + $0x1c] sm:$0xf]  ;;  %v1028_v39 = vld [vmem:[%s1399_s4 + $0x24] sm:$0xf0] }
  0x17   : > { %v1135_v40 = vld [vmem:[%s1399_s4 + $0x54] sm:$0xf]  ;;  %v1252_v41 = vld [vmem:[%s1399_s4 + $0x5c] sm:$0xf0]  ;;  %v1027_v42 = vor.u32 %v1246_v37, %v1026_v36  ;;  %v1031_v43 = vor.u32 %v1245_v38, %v1028_v39  ;;  %v1125_v46 = vld [vmem:[%s1399_s4 + $0x48] sm:$0xf0] }
  0x18   : > { %v293_v35 = vpack.c.b16 %v284_v34, %v284_v34  ;;  %v1136_v44 = vor.u32 %v1252_v41, %v1135_v40  ;;  %v1248_v45 = vld [vmem:[%s1399_s4 + $0x40] sm:$0xf]  ;;  %v258_v48 = vld [vmem:[%s1399_s4 + $0x30] sm:$0x33]  ;;  %v1251_v56 = vld [vmem:[%s1399_s4 + $0x58] sm:$0xf] }
  0x19   : > { %571 = vmatpush.bf16.msrb.mxu2 %v1382_v4  ;;  %421 = vmatpush.bf16.msra.mxu0 %v1421_v11  ;;  %v1128_v47 = vor.u32 %v1248_v45, %v1125_v46  ;;  %v1119_v49 = vld [vmem:[%s1399_s4 + $0x6c] sm:$0x33]  ;;  %v282_v50 = vunpack.c.l.b16 %v258_v48  ;;  %v283_v51 = vunpack.c.h.b16 %v258_v48  ;;  %v1137_v57 = vld [vmem:[%s1399_s4 + $0x60] sm:$0xf0]  ;;  %v1160_v61 = vld [vmem:[%s1399_s4 + $0x78] sm:$0xf] }
  0x1a   : > { %444 = vmatpush.bf16.msra.mxu1 %v1428_v12  ;;  %550 = vmatpush.bf16.msra.mxu3 %v1421_v11  ;;  %v520_v52 = vunpack.c.l.b16 %v1119_v49  ;;  %v1140_v58 = vor.u32 %v1251_v56, %v1137_v57  ;;  %v1131_v59 = vld [vmem:[%s1399_s4 + $0x44] sm:$0xf]  ;;  %v1250_v60 = vld [vmem:[%s1399_s4 + $0x4c] sm:$0xf0]  ;;  %v1254_v63 = vld [vmem:[%s1399_s4 + $0x7c] sm:$0xf] }
  0x1b   : > { %v291_v53 = vpack.c.b16 %v282_v50, %v282_v50  ;;  %v292_v54 = vpack.c.b16 %v283_v51, %v283_v51  ;;  %v1255_v62 = vld [vmem:[%s1399_s4 + $0x80] sm:$0xf0]  ;;  %v1253_v7 = vld [vmem:[%s1399_s4 + $0x64] sm:$0xf0]  ;;  %v1172_v8 = vld [vmem:[%s1399_s4 + $0x90] sm:$0xf] }
  0x1c   : > { %v529_v55 = vpack.c.b16 %v520_v52, %v520_v52  ;;  %v1257_v10 = vld [vmem:[%s1399_s4 + $0x94] sm:$0xf]  ;;  %v1156_v18 = vld [vmem:[%s1399_s4 + $0xa8] sm:$0x33]  ;;  %v1168_v26 = vld [vmem:[%s1399_s4 + $0x80] sm:$0xf] }
  0x1d   : > { %572 = vmatpush.bf16.msrb.mxu2 %v1413_v9  ;;  %422 = vmatpush.bf16.msra.mxu0 %v1435_v13  ;;  %v1256_v27 = vld [vmem:[%s1399_s4 + $0x88] sm:$0xf0]  ;;  %v1260_v29 = vld [vmem:[%s1399_s4 + $0xb8] sm:$0xf]  ;;  %v1205_v33 = vld [vmem:[%s1399_s4 + $0xbc] sm:$0xf] }
  0x1e   : > { %445 = vmatpush.bf16.msra.mxu1 %v1442_v14  ;;  %551 = vmatpush.bf16.msra.mxu3 %v1435_v13  ;;  %v1169_v28 = vor.u32 %v1256_v27, %v1168_v26  ;;  %v1262_v34 = vld [vmem:[%s1399_s4 + $0xc4] sm:$0xf0]  ;;  %v1180_v38 = vld [vmem:[%s1399_s4 + $0x98] sm:$0xf]  ;;  %v1259_v39 = vld [vmem:[%s1399_s4 + $0xa0] sm:$0xf0] }
  0x1f   : > { %v1206_v37 = vor.u32 %v1262_v34, %v1205_v33  ;;  %v1181_v40 = vor.u32 %v1259_v39, %v1180_v38  ;;  %v1193_v41 = vld [vmem:[%s1399_s4 + $0xe4] sm:$0x33]  ;;  %v1217_v45 = vld [vmem:[%s1399_s4 + $0xd4] sm:$0xf]  ;;  %v1265_v46 = vld [vmem:[%s1399_s4 + $0xdc] sm:$0xf0] }
  0x20   : > { %v1218_v50 = vor.u32 %v1265_v46, %v1217_v45  ;;  %v1157_v51 = vld [vmem:[%s1399_s4 + $0xb0] sm:$0x3]  ;;  %v789_v56 = vunpack.c.h.b16 %v1193_v41 }
  0x21   : > { %573 = vmatpush.bf16.msrb.mxu2 %v1428_v12  ;;  %423 = vmatpush.bf16.msra.mxu0 %v1449_v15  ;;  %v656_v52 = vunpack.c.l.b16 %v1157_v51 }
  0x22   : > { %446 = vmatpush.bf16.msra.mxu1 %v1456_v16  ;;  %552 = vmatpush.bf16.msra.mxu3 %v1449_v15 }
  0x24   : > { %1109 = vmatmul.msk.bf16.gmra.mxu2 %vm408_vm0, %v1035_v19  ;;  %v654_v19 = vunpack.c.l.b16 %v1156_v18 }
  0x25   : > { %574 = vmatpush.bf16.msrb.mxu2 %v1442_v14  ;;  %424 = vmatpush.bf16.msra.mxu0 %v1465_v20 }
  0x26   : > { %447 = vmatpush.bf16.msra.mxu1 %v1472_v21  ;;  %553 = vmatpush.bf16.msra.mxu3 %v1465_v20  ;;  %v663_v24 = vpack.c.b16 %v654_v19, %v654_v19 }
  0x29   : > { %575 = vmatpush.bf16.msrb.mxu2 %v1456_v16  ;;  %425 = vmatpush.bf16.msra.mxu0 %v1478_v22 }
  0x2a   : > { %448 = vmatpush.bf16.msra.mxu1 %v1483_v23  ;;  %554 = vmatpush.bf16.msra.mxu3 %v1478_v22 }
  0x2c   : > { %426 = vmatmul.bf16.vlgmr.msra.gmra.mxu0 %v1015_v30  ;;  %v1209_v30 = vld [vmem:[%s1399_s4 + $0xcc] sm:$0xf] }
  0x2d   : > { %576 = vmatpush.bf16.msrb.mxu2 %v1472_v21  ;;  %449 = vmatmul.bf16.vlgmr.msra.gmra.mxu1 %v1019_v31  ;;  %v1264_v31 = vld [vmem:[%s1399_s4 + $0xd4] sm:$0xf0] }
  0x2e   : > { %704 = vmatpush.bf16.msrb.mxu3 %v1365_v1  ;;  %681 = vmatpush.bf16.msrb.mxu1 %v1360_v0 }
  0x2f   : > { %555 = vmatmul.bf16.vlgmr.msra.gmra.mxu3 %v1124_v32  ;;  %599 = vmatpush.bf16.msrb.mxu0 %v1370_v2  ;;  %v1199_v32 = vld [vmem:[%s1399_s4 + $0xc0] sm:$0xf0] }
  0x30   : > { %v1202_v36 = vor.u32 %v1260_v29, %v1199_v32 }
  0x31   : > { %577 = vmatpush.bf16.msrb.mxu2 %v1483_v23 }
  0x32   : > { %705 = vmatpush.bf16.msrb.mxu3 %v1382_v4  ;;  %682 = vmatpush.bf16.msrb.mxu1 %v1377_v3 }
  0x33   : > { %600 = vmatpush.bf16.msrb.mxu0 %v1391_v5 }
  0x34   : > { %1110 = vmatmul.msk.bf16.gmra.mxu2 %vm408_vm0, %v293_v35  ;;  %v1210_v35 = vor.u32 %v1264_v31, %v1209_v30 }
  0x35   : > { %1266 = vmatpush.bf16.msra.mxu2 %v1370_v2 }
  0x36   : > { %706 = vmatpush.bf16.msrb.mxu3 %v1413_v9  ;;  %683 = vmatpush.bf16.msrb.mxu1 %v1404_v6 }
  0x37   : > { %815 = vmatpush.bf16.msra.mxu0 %v1360_v0  ;;  %v1162_v0 = vld [vmem:[%s1399_s4 + $0x84] sm:$0xf0] }
  0x39   : > { %1267 = vmatpush.bf16.msra.mxu2 %v1391_v5 }
  0x3a   : > { %707 = vmatpush.bf16.msrb.mxu3 %v1428_v12  ;;  %684 = vmatpush.bf16.msrb.mxu1 %v1421_v11 }
  0x3b   : > { %816 = vmatpush.bf16.msra.mxu0 %v1377_v3  ;;  %v1165_v3 = vor.u32 %v1254_v63, %v1162_v0 }
  0x3c   : > { %431 = vmatmul.bf16.gmra.mxu0 %v1027_v42  ;;  %v788_v42 = vunpack.c.l.b16 %v1193_v41 }
  0x3d   : > { %454 = vmatmul.bf16.gmra.mxu1 %v1031_v43  ;;  %v1263_v43 = vld [vmem:[%s1399_s4 + $0xd0] sm:$0xf] }
  0x3e   : > { %708 = vmatpush.bf16.msrb.mxu3 %v1442_v14  ;;  %685 = vmatpush.bf16.msrb.mxu1 %v1435_v13  ;;  %v797_v48 = vpack.c.b16 %v788_v42, %v788_v42 }
  0x3f   : > { %560 = vmatmul.bf16.gmra.mxu3 %v1136_v44  ;;  %817 = vmatpush.bf16.msra.mxu0 %v1404_v6  ;;  %v1143_v6 = vld [vmem:[%s1399_s4 + $0x5c] sm:$0xf] }
  0x40   : > { %v1211_v44 = vld [vmem:[%s1399_s4 + $0xd8] sm:$0xf0] }
  0x42   : > { %709 = vmatpush.bf16.msrb.mxu3 %v1456_v16  ;;  %686 = vmatpush.bf16.msrb.mxu1 %v1449_v15 }
  0x43   : > { %818 = vmatpush.bf16.msra.mxu0 %v1421_v11  ;;  %v1174_v11 = vld [vmem:[%s1399_s4 + $0x9c] sm:$0xf0] }
  0x44   : > { %578 = vmatmul.bf16.vlgmr.msrb.gmra.mxu2 %v1128_v47 }
  0x45   : > { %733 = vmatpush.bf16.msrb.mxu2 %v1370_v2 }
  0x46   : > { %710 = vmatpush.bf16.msrb.mxu3 %v1472_v21  ;;  %687 = vmatpush.bf16.msrb.mxu1 %v1465_v20 }
  0x47   : > { %819 = vmatpush.bf16.msra.mxu0 %v1435_v13 }
  0x49   : > { %734 = vmatpush.bf16.msrb.mxu2 %v1391_v5 }
  0x4a   : > { %711 = vmatpush.bf16.msrb.mxu3 %v1483_v23  ;;  %688 = vmatpush.bf16.msrb.mxu1 %v1478_v22 }
  0x4b   : > { %820 = vmatpush.bf16.msra.mxu0 %v1449_v15  ;;  %v1120_v15 = vld [vmem:[%s1399_s4 + $0x74] sm:$0x3] }
  0x4c   : > { %436 = vmatmul.bf16.gmra.mxu0 %v291_v53 }
  0x4d   : > { %459 = vmatmul.bf16.gmra.mxu1 %v292_v54  ;;  %v665_v54 = vpack.c.b16 %v656_v52, %v656_v52 }
  0x4e   : > { %867 = vmatpush.bf16.msra.mxu3 %v1370_v2  ;;  %838 = vmatpush.bf16.msra.mxu1 %v1365_v1  ;;  %v1132_v1 = vor.u32 %v1250_v60, %v1131_v59  ;;  %v1161_v2 = vor.u32 %v1255_v62, %v1160_v61  ;;  %v798_v60 = vpack.c.b16 %v789_v56, %v789_v56 }
  0x4f   : > { %565 = vmatmul.bf16.gmra.mxu3 %v529_v55  ;;  %821 = vmatpush.bf16.msra.mxu0 %v1465_v20  ;;  %v655_v20 = vunpack.c.h.b16 %v1156_v18  ;;  %v1194_v55 = vld [vmem:[%s1399_s4 + $0xec] sm:$0x3] }
  0x50   : > { %v790_v57 = vunpack.c.l.b16 %v1194_v55 }
  0x51   : > { %v664_v25 = vpack.c.b16 %v655_v20, %v655_v20 }
  0x52   : > { %839 = vmatpush.bf16.msra.mxu1 %v1382_v4  ;;  %868 = vmatpush.bf16.msra.mxu3 %v1391_v5  ;;  %v521_v4 = vunpack.c.h.b16 %v1119_v49  ;;  %v1214_v49 = vor.u32 %v1263_v43, %v1211_v44  ;;  %v799_v61 = vpack.c.b16 %v790_v57, %v790_v57 }
  0x53   : > { %822 = vmatpush.bf16.msra.mxu0 %v1478_v22  ;;  %v1261_v22 = vld [vmem:[%s1399_s4 + $0xbc] sm:$0xf0] }
  0x54   : > { %583 = vmatmul.bf16.gmra.mxu2 %v1140_v58  ;;  %v530_v5 = vpack.c.b16 %v521_v4, %v521_v4 }
  0x56   : > { %840 = vmatpush.bf16.msra.mxu1 %v1413_v9  ;;  %v1258_v9 = vld [vmem:[%s1399_s4 + $0x98] sm:$0xf0] }
  0x57   : > { %v1173_v13 = vor.u32 %v1258_v9, %v1172_v8 }
  0x5a   : > { %841 = vmatpush.bf16.msra.mxu1 %v1428_v12  ;;  %v1144_v12 = vor.u32 %v1253_v7, %v1143_v6 }
  0x5c   : > { %1145 = vmatmul.msk.bf16.vlgmr.msrb.gmra.mxu0 %vm408_vm0, %v1132_v1 }
  0x5d   : > { %689 = vmatmul.bf16.vlgmr.msrb.gmra.mxu1 %v1161_v2 }
  0x5e   : > { %842 = vmatpush.bf16.msra.mxu1 %v1442_v14  ;;  %v1177_v14 = vor.u32 %v1257_v10, %v1174_v11 }
  0x5f   : > { %712 = vmatmul.bf16.vlgmr.msrb.gmra.mxu3 %v1165_v3 }
  0x62   : > { %843 = vmatpush.bf16.msra.mxu1 %v1456_v16  ;;  %v522_v16 = vunpack.c.l.b16 %v1120_v15 }
  0x64   : > { %588 = vmatmul.bf16.gmra.mxu2 %v530_v5  ;;  %v531_v17 = vpack.c.b16 %v522_v16, %v522_v16 }
  0x66   : > { %844 = vmatpush.bf16.msra.mxu1 %v1472_v21  ;;  %v1197_v21 = vld [vmem:[%s1399_s4 + $0xb4] sm:$0xf] }
  0x6a   : > { %845 = vmatpush.bf16.msra.mxu1 %v1483_v23  ;;  %v1198_v23 = vor.u32 %v1261_v22, %v1197_v21 }
  0x6c   : > { %1146 = vmatmul.msk.bf16.gmra.mxu0 %vm408_vm0, %v1144_v12 }
  0x6d   : > { %694 = vmatmul.bf16.gmra.mxu1 %v1173_v13 }
  0x6f   : > { %717 = vmatmul.bf16.gmra.mxu3 %v1177_v14 }
  0x74   : > { %1147 = vmatmul.msk.bf16.vlgmr.msra.gmra.mxu2 %vm408_vm0, %v531_v17 }
  0x7c   : > { %823 = vmatmul.bf16.vlgmr.msra.gmra.mxu0 %v1198_v23 }
  0x7d   : > { %699 = vmatmul.bf16.gmra.mxu1 %v663_v24 }
  0x7f   : > { %722 = vmatmul.bf16.gmra.mxu3 %v664_v25 }
  0x84   : > { %1182 = vmatmul.msk.bf16.vlgmr.msrb.gmra.mxu2 %vm408_vm0, %v1169_v28 }
  0x8c   : > { %828 = vmatmul.bf16.gmra.mxu0 %v1210_v35 }
  0x8d   : > { %846 = vmatmul.bf16.vlgmr.msra.gmra.mxu1 %v1202_v36 }
  0x8f   : > { %1219 = vmatmul.msk.bf16.vlgmr.msra.gmra.mxu3 %vm408_vm0, %v1206_v37 }
  0x94   : > { %1183 = vmatmul.msk.bf16.gmra.mxu2 %vm408_vm0, %v1181_v40 }
  0x97   : > { %v473_v47 = vpop.f32.mrf.mxu2 }
  0x9c   : > { %833 = vmatmul.bf16.gmra.mxu0 %v797_v48 }
  0x9d   : > { %851 = vmatmul.bf16.gmra.mxu1 %v1214_v49 }
  0x9f   : > { %1220 = vmatmul.msk.bf16.gmra.mxu3 %vm408_vm0, %v1218_v50  ;;  %v475_v53 = vpop.f32.mrf.mxu2 }
  0xa4   : > { %1184 = vmatmul.msk.bf16.gmra.mxu2 %vm408_vm0, %v665_v54 }
  0xa7   : > { %v478_v58 = vpop.f32.mrf.mxu2 }
  0xa9   : > { %v427_v59 = vpop.f32.mrf.mxu0 }
  0xaa   : > { %v450_v62 = vpop.f32.mrf.mxu1 }
  0xab   : > { %v451_v63 = vadd.f32 %v450_v62, %v427_v59 }
  0xad   : > { %v1596_v0 = vadd.f32 %v473_v47, %v451_v63  ;;  %856 = vmatmul.bf16.gmra.mxu1 %v798_v60 }
  0xaf   : > { %1221 = vmatmul.msk.bf16.gmra.mxu3 %vm408_vm0, %v799_v61  ;;  %v480_v1 = vpop.f32.mrf.mxu2 }
  0xb1   : > { %v429_v3 = vpop.f32.mrf.mxu0 }
  0xb2   : > { %v556_v2 = vpop.f32.mrf.mxu3  ;;  %v452_v4 = vpop.f32.mrf.mxu1 }
  0xb3   : > { %v453_v5 = vadd.f32 %v452_v4, %v429_v3 }
  0xb5   : > { %v1599_v6 = vadd.f32 %v475_v53, %v453_v5 }
  0xb7   : > { %v483_v7 = vpop.f32.mrf.mxu2 }
  0xb9   : > { %v432_v9 = vpop.f32.mrf.mxu0 }
  0xba   : > { %v558_v8 = vpop.f32.mrf.mxu3  ;;  %v455_v10 = vpop.f32.mrf.mxu1 }
  0xbb   : > { %v456_v11 = vadd.f32 %v455_v10, %v432_v9 }
  0xbd   : > { %v1601_v12 = vadd.f32 %v478_v58, %v456_v11 }
  0xbf   : > { %v485_v13 = vpop.f32.mrf.mxu2 }
  0xc1   : > { %v434_v15 = vpop.f32.mrf.mxu0 }
  0xc2   : > { %v561_v14 = vpop.f32.mrf.mxu3  ;;  %v457_v16 = vpop.f32.mrf.mxu1 }
  0xc3   : > { %v458_v17 = vadd.f32 %v457_v16, %v434_v15  ;;  %v1294_v15 = vld [vmem:[%s1656_s2] ss:$0 sm:$0xff] }
  0xc5   : > { %v1603_v18 = vadd.f32 %v480_v1, %v458_v17 }
  0xc7   : > { %v579_v20 = vpop.f32.mrf.mxu2 }
  0xc8   : > { %v580_v21 = vadd.f32 %v579_v20, %v556_v2 }
  0xc9   : > { %v437_v22 = vpop.f32.mrf.mxu0 }
  0xca   : > { %v563_v19 = vpop.f32.mrf.mxu3  ;;  %v460_v23 = vpop.f32.mrf.mxu1 }
  0xcb   : > { %v461_v24 = vadd.f32 %v460_v23, %v437_v22 }
  0xcd   : > { %v1605_v25 = vadd.f32 %v483_v7, %v461_v24 }
  0xcf   : > { %v581_v27 = vpop.f32.mrf.mxu2 }
  0xd0   : > { %v582_v28 = vadd.f32 %v581_v27, %v558_v8 }
  0xd1   : > { %v439_v29 = vpop.f32.mrf.mxu0 }
  0xd2   : > { %v566_v26 = vpop.f32.mrf.mxu3  ;;  %v462_v30 = vpop.f32.mrf.mxu1 }
  0xd7   : > { %v584_v32 = vpop.f32.mrf.mxu2 }
  0xd8   : > { %v585_v33 = vadd.f32 %v584_v32, %v561_v14 }
  0xd9   : > { %v602_v34 = vpop.f32.mrf.mxu0 }
  0xda   : > { %v568_v31 = vpop.f32.mrf.mxu3  ;;  %v603_v35 = vadd.f32 %v602_v34, %v580_v21  ;;  %v690_v36 = vpop.f32.mrf.mxu1 }
  0xdc   : > { %v616_v37 = vmax.f32 %v1596_v0, %v603_v35 }
  0xdf   : > { %v586_v38 = vpop.f32.mrf.mxu2 }
  0xe0   : > { %v587_v40 = vadd.f32 %v586_v38, %v563_v19 }
  0xe1   : > { %v604_v41 = vpop.f32.mrf.mxu0 }
  0xe2   : > { %v713_v39 = vpop.f32.mrf.mxu3  ;;  %v605_v42 = vadd.f32 %v604_v41, %v582_v28  ;;  %v692_v43 = vpop.f32.mrf.mxu1 }
  0xe3   : > { %v714_v8 = vadd.f32 %v713_v39, %v690_v36 }
  0xe4   : > { %v617_v44 = vmax.f32 %v1599_v6, %v605_v42 }
  0xe7   : > { %v589_v45 = vpop.f32.mrf.mxu2 }
  0xe8   : > { %v590_v47 = vadd.f32 %v589_v45, %v566_v26 }
  0xe9   : > { %v607_v48 = vpop.f32.mrf.mxu0 }
  0xea   : > { %v715_v46 = vpop.f32.mrf.mxu3  ;;  %v608_v49 = vadd.f32 %v607_v48, %v585_v33  ;;  %v695_v50 = vpop.f32.mrf.mxu1 }
  0xeb   : > { %v716_v19 = vadd.f32 %v715_v46, %v692_v43 }
  0xec   : > { %v618_v51 = vmax.f32 %v1601_v12, %v608_v49 }
  0xef   : > { %v591_v52 = vpop.f32.mrf.mxu2 }
  0xf1   : > { %v609_v54 = vpop.f32.mrf.mxu0 }
  0xf2   : > { %v718_v53 = vpop.f32.mrf.mxu3  ;;  %v1610_v55 = vadd.f32 %v609_v54, %v587_v40  ;;  %v697_v56 = vpop.f32.mrf.mxu1 }
  0xf3   : > { %v719_v33 = vadd.f32 %v718_v53, %v695_v50 }
  0xf4   : > { %v619_v57 = vmax.f32 %v1603_v18, %v1610_v55 }
  0xf7   : > { %v612_v58 = vpop.f32.mrf.mxu2 }
  0xf8   : > { %v1614_v60 = vadd.f32 %v612_v58, %v590_v47 }
  0xf9   : > { %v824_v61 = vpop.f32.mrf.mxu0 }
  0xfa   : > { %v720_v59 = vpop.f32.mrf.mxu3  ;;  %v1616_v62 = vpop.f32.mrf.mxu1  ;;  %v620_v63 = vmax.f32 %v1605_v25, %v1614_v60 }
  0xfb   : > { %v721_v46 = vadd.f32 %v720_v59, %v697_v56 }
  0xff   : > { %v614_v0 = vpop.f32.mrf.mxu2 }
 0x101   : > { %v826_v2 = vpop.f32.mrf.mxu0 }
 0x102   : > { %v723_v1 = vpop.f32.mrf.mxu3  ;;  %v702_v3 = vpop.f32.mrf.mxu1 }
 0x107   : > { %v736_v5 = vpop.f32.mrf.mxu2 }
 0x108   : > { %v737_v9 = vadd.f32 %v736_v5, %v714_v8 }
 0x109   : > { %v829_v6 = vpop.f32.mrf.mxu0 }
 0x10a   : > { %v725_v4 = vpop.f32.mrf.mxu3  ;;  %v847_v7 = vpop.f32.mrf.mxu1  ;;  %v750_v13 = vmax.f32 %v616_v37, %v737_v9 }
 0x10b   : > { %v848_v10 = vadd.f32 %v847_v7, %v824_v61 }
 0x10f   : > { %v738_v11 = vpop.f32.mrf.mxu2 }
 0x110   : > { %v739_v21 = vadd.f32 %v738_v11, %v716_v19 }
 0x111   : > { %v831_v16 = vpop.f32.mrf.mxu0 }
 0x112   : > { %v870_v12 = vpop.f32.mrf.mxu3  ;;  %v849_v17 = vpop.f32.mrf.mxu1  ;;  %v751_v28 = vmax.f32 %v617_v44, %v739_v21 }
 0x113   : > { %v871_v14 = vadd.f32 %v870_v12, %v848_v10  ;;  %v850_v24 = vadd.f32 %v849_v17, %v826_v2  ;;  %v724_v2 = vadd.f32 %v723_v1, %v1616_v62 }
 0x115   : > { %v884_v20 = vmax.f32 %v750_v13, %v871_v14 }
 0x117   : > { %v893_v22 = vadd.f32 %v1294_v15, %v884_v20  ;;  %v741_v26 = vpop.f32.mrf.mxu2 }
 0x118   : > { %v742_v35 = vadd.f32 %v741_v26, %v719_v33 }
 0x119   : > { %v898_v23 = vmax.f32 %v893_v22, 0.0  ;;  %v834_v31 = vpop.f32.mrf.mxu0 }
 0x11a   : > { %v872_v27 = vpop.f32.mrf.mxu3  ;;  %v852_v32 = vpop.f32.mrf.mxu1  ;;  %v752_v41 = vmax.f32 %v618_v51, %v742_v35 }
 0x11b   : > { %v903_v29 = vpack.c.bf16 %v898_v23, %v898_v23  ;;  %v873_v30 = vadd.f32 %v872_v27, %v850_v24  ;;  %v853_v37 = vadd.f32 %v852_v32, %v829_v6 }
 0x11d   : > { %909 = vst.msk [vmem:[%s1627_s11] sm:$0xf] %vm908_vm1, %v903_v29  ;;  %v885_v34 = vmax.f32 %v751_v28, %v873_v30 }
 0x11f   : > { %v894_v36 = vadd.f32 %v1294_v15, %v885_v34  ;;  %v743_v39 = vpop.f32.mrf.mxu2 }
 0x120   : > { %v744_v48 = vadd.f32 %v743_v39, %v721_v46 }
 0x121   : > { %v899_v38 = vmax.f32 %v894_v36, 0.0  ;;  %v836_v45 = vpop.f32.mrf.mxu0 }
 0x122   : > { %v875_v40 = vpop.f32.mrf.mxu3  ;;  %v854_v44 = vpop.f32.mrf.mxu1  ;;  %v753_v58 = vmax.f32 %v619_v57, %v744_v48 }
 0x123   : > { %v904_v42 = vpack.c.bf16 %v899_v38, %v899_v38  ;;  %v876_v43 = vadd.f32 %v875_v40, %v853_v37  ;;  %v855_v52 = vadd.f32 %v854_v44, %v831_v16 }
 0x125   : > { %910 = vst.msk [vmem:[%s1627_s11 + $0x4] sm:$0xf] %vm908_vm1, %v904_v42  ;;  %v886_v47 = vmax.f32 %v752_v41, %v876_v43 }
 0x127   : > { %v895_v49 = vadd.f32 %v1294_v15, %v886_v47  ;;  %v746_v53 = vpop.f32.mrf.mxu2 }
 0x128   : > { %v747_v59 = vadd.f32 %v746_v53, %v724_v2 }
 0x129   : > { %v900_v50 = vmax.f32 %v895_v49, 0.0 }
 0x12a   : > { %v877_v54 = vpop.f32.mrf.mxu3  ;;  %v857_v0 = vpop.f32.mrf.mxu1  ;;  %v754_v18 = vmax.f32 %v620_v63, %v747_v59 }
 0x12b   : > { %v905_v51 = vpack.c.bf16 %v900_v50, %v900_v50  ;;  %v878_v61 = vadd.f32 %v877_v54, %v855_v52  ;;  %v858_v4 = vadd.f32 %v857_v0, %v834_v31 }
 0x12d   : > { %911 = vst.msk [vmem:[%s1627_s11 + $0x8] sm:$0xf] %vm908_vm1, %v905_v51  ;;  %v887_v56 = vmax.f32 %v753_v58, %v878_v61 }
 0x12f   : > { %v896_v3 = vadd.f32 %v1294_v15, %v887_v56  ;;  %v748_v6 = vpop.f32.mrf.mxu2 }
 0x131   : > { %v901_v5 = vmax.f32 %v896_v3, 0.0 }
 0x132   : > { %v880_v7 = vpop.f32.mrf.mxu3  ;;  %v859_v8 = vpop.f32.mrf.mxu1 }
 0x133   : > { %v906_v55 = vpack.c.bf16 %v901_v5, %v901_v5  ;;  %v881_v57 = vadd.f32 %v880_v7, %v858_v4 }
 0x135   : > { %912 = vst.msk [vmem:[%s1627_s11 + $0xc] sm:$0xf] %vm908_vm1, %v906_v55  ;;  %v888_v62 = vmax.f32 %v754_v18, %v881_v57 }
 0x137   : > { %v897_v1 = vadd.f32 %v1294_v15, %v888_v62 }
 0x139   : > { %v902_v9 = vmax.f32 %v897_v1, 0.0 }
 0x13a   : > { %v882_v10 = vpop.f32.mrf.mxu3 }
 0x13b   : > { %v907_v11 = vpack.c.bf16 %v902_v9, %v902_v9 }
 0x13d   : > { %914 = vst.msk [vmem:[%s1627_s11 + $0x10] sm:$0x3] %vm913_vm2, %v907_v11 }
 0x13e PF: > { %s13_s14 = sadd.s32 1, %s1317_s14   ;;  %s1658_s12 = smov %s1313_s13 }
 0x13f   : > { %p10_p5 = scmp.ge.s32.totalorder %s13_s14, 4   ;;  %s1659_s13 = smov %s1661_s15 }
 0x141   :  { %12 = sbr.rel (!%p10_p5) target bundleno = 2 (0x2), region = 65 }

// kernel: cat_dog_convnet_forward.7
= control target key start
LH: loop header
LB: loop body
LE: loop exit
PB: predicated region body
PF: predicated region fallthrough
CT: control target
= control target key end

     0   :  { %s11812_s0 = inlined_call_operand.vmem [shape: bf16[2,2304], index: 0, kind: input, shape index: {}]   ;;  %s11813_s1 = inlined_call_operand.vmem [shape: bf16[2304,512], index: 1, kind: input, shape index: {}]   ;;  %s11814_s2 = inlined_call_operand.vmem [shape: f32[1,512], index: 2, kind: input, shape index: {}]   ;;  %s11815_s3 = inlined_call_operand.vmem [shape: bf16[512,128], index: 3, kind: input, shape index: {}]   ;;  %s11816_s4 = inlined_call_operand.vmem [shape: f32[1,128], index: 4, kind: input, shape index: {}]   ;;  %s11817_s5 = inlined_call_operand.vmem [shape: bf16[128,128], index: 5, kind: input, shape index: {}]   ;;  %s11818_s6 = inlined_call_operand.vmem [shape: f32[1,128], index: 6, kind: input, shape index: {}]   ;;  %s11819_s7 = inlined_call_operand.hbm [shape: f32[2,128], index: 7, kind: output, shape index: {}]  }
   0x1   :  { %v5008_v0 = vld [vmem:[%s11813_s1 + $0xe0] sm:$0xf]  ;;  %v7388_v1 = vld [vmem:[%s11813_s1 + $0xec] sm:$0xf0] }
   0x2   :  { %v5136_v2 = vld [vmem:[%s11813_s1 + $0x1e0] sm:$0xf]  ;;  %v5009_v3 = vor.u32 %v7388_v1, %v5008_v0  ;;  %v7420_v4 = vld [vmem:[%s11813_s1 + $0x1ec] sm:$0xf0] }
   0x3   :  { %v5264_v5 = vld [vmem:[%s11813_s1 + $0x2e0] sm:$0xf]  ;;  %v7452_v6 = vld [vmem:[%s11813_s1 + $0x2ec] sm:$0xf0]  ;;  %v5137_v7 = vor.u32 %v7420_v4, %v5136_v2 }
   0x4   :  { %v5265_v8 = vor.u32 %v7452_v6, %v5264_v5  ;;  %v5392_v9 = vld [vmem:[%s11813_s1 + $0x3e0] sm:$0xf]  ;;  %v7484_v10 = vld [vmem:[%s11813_s1 + $0x3ec] sm:$0xf0]  ;;  %3538 = vmatpush.bf16.msra.mxu0 %v5009_v3 }
   0x5   :  { %v4992_v11 = vld [vmem:[%s11813_s1 + $0xc0] sm:$0xf]  ;;  %v5393_v12 = vor.u32 %v7484_v10, %v5392_v9  ;;  %v7384_v13 = vld [vmem:[%s11813_s1 + $0xcc] sm:$0xf0]  ;;  %3551 = vmatpush.bf16.msra.mxu1 %v5137_v7 }
   0x6   :  { %v5120_v14 = vld [vmem:[%s11813_s1 + $0x1c0] sm:$0xf]  ;;  %v7416_v15 = vld [vmem:[%s11813_s1 + $0x1cc] sm:$0xf0]  ;;  %3564 = vmatpush.bf16.msra.mxu2 %v5265_v8  ;;  %v4993_v16 = vor.u32 %v7384_v13, %v4992_v11 }
   0x7   :  { %v5121_v17 = vor.u32 %v7416_v15, %v5120_v14  ;;  %v5248_v18 = vld [vmem:[%s11813_s1 + $0x2c0] sm:$0xf]  ;;  %v7448_v19 = vld [vmem:[%s11813_s1 + $0x2cc] sm:$0xf0]  ;;  %3577 = vmatpush.bf16.msra.mxu3 %v5393_v12 }
   0x8   :  { %v5376_v20 = vld [vmem:[%s11813_s1 + $0x3c0] sm:$0xf]  ;;  %v5249_v21 = vor.u32 %v7448_v19, %v5248_v18  ;;  %v7480_v22 = vld [vmem:[%s11813_s1 + $0x3cc] sm:$0xf0]  ;;  %3539 = vmatpush.bf16.msra.mxu0 %v4993_v16 }
   0x9   :  { %v4976_v23 = vld [vmem:[%s11813_s1 + $0xa0] sm:$0xf]  ;;  %v7380_v24 = vld [vmem:[%s11813_s1 + $0xac] sm:$0xf0]  ;;  %v5377_v25 = vor.u32 %v7480_v22, %v5376_v20  ;;  %3552 = vmatpush.bf16.msra.mxu1 %v5121_v17 }
   0xa   :  { %v5104_v26 = vld [vmem:[%s11813_s1 + $0x1a0] sm:$0xf]  ;;  %v7412_v27 = vld [vmem:[%s11813_s1 + $0x1ac] sm:$0xf0]  ;;  %v4977_v29 = vor.u32 %v7380_v24, %v4976_v23  ;;  %3565 = vmatpush.bf16.msra.mxu2 %v5249_v21 }
   0xb   :  { %v5232_v28 = vld [vmem:[%s11813_s1 + $0x2a0] sm:$0xf]  ;;  %v7444_v30 = vld [vmem:[%s11813_s1 + $0x2ac] sm:$0xf0]  ;;  %v5105_v33 = vor.u32 %v7412_v27, %v5104_v26  ;;  %3578 = vmatpush.bf16.msra.mxu3 %v5377_v25 }
   0xc   :  { %v5360_v31 = vld [vmem:[%s11813_s1 + $0x3a0] sm:$0xf]  ;;  %v7476_v32 = vld [vmem:[%s11813_s1 + $0x3ac] sm:$0xf0]  ;;  %v5233_v34 = vor.u32 %v7444_v30, %v5232_v28  ;;  %3540 = vmatpush.bf16.msra.mxu0 %v4977_v29 }
   0xd   :  { %v4960_v35 = vld [vmem:[%s11813_s1 + $0x80] sm:$0xf]  ;;  %v7376_v36 = vld [vmem:[%s11813_s1 + $0x8c] sm:$0xf0]  ;;  %v5361_v38 = vor.u32 %v7476_v32, %v5360_v31  ;;  %3553 = vmatpush.bf16.msra.mxu1 %v5105_v33 }
   0xe   :  { %v5088_v37 = vld [vmem:[%s11813_s1 + $0x180] sm:$0xf]  ;;  %v7408_v39 = vld [vmem:[%s11813_s1 + $0x18c] sm:$0xf0]  ;;  %v4961_v44 = vor.u32 %v7376_v36, %v4960_v35  ;;  %3566 = vmatpush.bf16.msra.mxu2 %v5233_v34 }
   0xf   :  { %v5216_v40 = vld [vmem:[%s11813_s1 + $0x280] sm:$0xf]  ;;  %v7440_v41 = vld [vmem:[%s11813_s1 + $0x28c] sm:$0xf0]  ;;  %v5089_v45 = vor.u32 %v7408_v39, %v5088_v37  ;;  %3579 = vmatpush.bf16.msra.mxu3 %v5361_v38 }
  0x10   :  { %v5344_v42 = vld [vmem:[%s11813_s1 + $0x380] sm:$0xf]  ;;  %v7472_v43 = vld [vmem:[%s11813_s1 + $0x38c] sm:$0xf0]  ;;  %v5217_v46 = vor.u32 %v7440_v41, %v5216_v40  ;;  %3541 = vmatpush.bf16.msra.mxu0 %v4961_v44 }
  0x11   :  { %v4944_v47 = vld [vmem:[%s11813_s1 + $0x60] sm:$0xf]  ;;  %v7372_v48 = vld [vmem:[%s11813_s1 + $0x6c] sm:$0xf0]  ;;  %v5345_v50 = vor.u32 %v7472_v43, %v5344_v42  ;;  %3554 = vmatpush.bf16.msra.mxu1 %v5089_v45 }
  0x12   :  { %v5072_v49 = vld [vmem:[%s11813_s1 + $0x160] sm:$0xf]  ;;  %v7404_v51 = vld [vmem:[%s11813_s1 + $0x16c] sm:$0xf0]  ;;  %v4945_v56 = vor.u32 %v7372_v48, %v4944_v47  ;;  %3567 = vmatpush.bf16.msra.mxu2 %v5217_v46 }
  0x13   :  { %v5200_v52 = vld [vmem:[%s11813_s1 + $0x260] sm:$0xf]  ;;  %v7436_v53 = vld [vmem:[%s11813_s1 + $0x26c] sm:$0xf0]  ;;  %v5073_v57 = vor.u32 %v7404_v51, %v5072_v49  ;;  %3580 = vmatpush.bf16.msra.mxu3 %v5345_v50 }
  0x14   :  { %v5328_v54 = vld [vmem:[%s11813_s1 + $0x360] sm:$0xf]  ;;  %v7468_v55 = vld [vmem:[%s11813_s1 + $0x36c] sm:$0xf0]  ;;  %v5201_v58 = vor.u32 %v7436_v53, %v5200_v52  ;;  %3542 = vmatpush.bf16.msra.mxu0 %v4945_v56 }
  0x15   :  { %v4928_v59 = vld [vmem:[%s11813_s1 + $0x40] sm:$0xf]  ;;  %v7368_v60 = vld [vmem:[%s11813_s1 + $0x4c] sm:$0xf0]  ;;  %v5329_v62 = vor.u32 %v7468_v55, %v5328_v54  ;;  %3555 = vmatpush.bf16.msra.mxu1 %v5073_v57 }
  0x16   :  { %v5056_v61 = vld [vmem:[%s11813_s1 + $0x140] sm:$0xf]  ;;  %v7400_v63 = vld [vmem:[%s11813_s1 + $0x14c] sm:$0xf0]  ;;  %v4929_v4 = vor.u32 %v7368_v60, %v4928_v59  ;;  %3568 = vmatpush.bf16.msra.mxu2 %v5201_v58 }
  0x17   :  { %v5184_v0 = vld [vmem:[%s11813_s1 + $0x240] sm:$0xf]  ;;  %v7432_v1 = vld [vmem:[%s11813_s1 + $0x24c] sm:$0xf0]  ;;  %v5057_v5 = vor.u32 %v7400_v63, %v5056_v61  ;;  %3581 = vmatpush.bf16.msra.mxu3 %v5329_v62 }
  0x18   :  { %v5312_v2 = vld [vmem:[%s11813_s1 + $0x340] sm:$0xf]  ;;  %v7464_v3 = vld [vmem:[%s11813_s1 + $0x34c] sm:$0xf0]  ;;  %v5185_v6 = vor.u32 %v7432_v1, %v5184_v0  ;;  %3543 = vmatpush.bf16.msra.mxu0 %v4929_v4 }
  0x19   :  { %v4912_v7 = vld [vmem:[%s11813_s1 + $0x20] sm:$0xf]  ;;  %v7364_v8 = vld [vmem:[%s11813_s1 + $0x2c] sm:$0xf0]  ;;  %v5313_v10 = vor.u32 %v7464_v3, %v5312_v2  ;;  %3556 = vmatpush.bf16.msra.mxu1 %v5057_v5 }
  0x1a   :  { %v5040_v9 = vld [vmem:[%s11813_s1 + $0x120] sm:$0xf]  ;;  %v7396_v11 = vld [vmem:[%s11813_s1 + $0x12c] sm:$0xf0]  ;;  %v4913_v16 = vor.u32 %v7364_v8, %v4912_v7  ;;  %3569 = vmatpush.bf16.msra.mxu2 %v5185_v6 }
  0x1b   :  { %v5168_v12 = vld [vmem:[%s11813_s1 + $0x220] sm:$0xf]  ;;  %v7428_v13 = vld [vmem:[%s11813_s1 + $0x22c] sm:$0xf0]  ;;  %v5041_v19 = vor.u32 %v7396_v11, %v5040_v9  ;;  %3582 = vmatpush.bf16.msra.mxu3 %v5313_v10 }
  0x1c   :  { %v5296_v14 = vld [vmem:[%s11813_s1 + $0x320] sm:$0xf]  ;;  %v7460_v15 = vld [vmem:[%s11813_s1 + $0x32c] sm:$0xf0]  ;;  %v5169_v20 = vor.u32 %v7428_v13, %v5168_v12  ;;  %3544 = vmatpush.bf16.msra.mxu0 %v4913_v16 }
  0x1d   :  { %v4896_v17 = vld [vmem:[%s11813_s1] sm:$0xf]  ;;  %v7360_v18 = vld [vmem:[%s11813_s1 + $0xc] sm:$0xf0]  ;;  %v5297_v24 = vor.u32 %v7460_v15, %v5296_v14  ;;  %3557 = vmatpush.bf16.msra.mxu1 %v5041_v19 }
  0x1e   :  { %v5024_v21 = vld [vmem:[%s11813_s1 + $0x100] sm:$0xf]  ;;  %v7392_v22 = vld [vmem:[%s11813_s1 + $0x10c] sm:$0xf0]  ;;  %v4897_v31 = vor.u32 %v7360_v18, %v4896_v17  ;;  %3570 = vmatpush.bf16.msra.mxu2 %v5169_v20 }
  0x1f   :  { %v5152_v23 = vld [vmem:[%s11813_s1 + $0x200] sm:$0xf]  ;;  %v7424_v25 = vld [vmem:[%s11813_s1 + $0x20c] sm:$0xf0]  ;;  %v5025_v35 = vor.u32 %v7392_v22, %v5024_v21  ;;  %3583 = vmatpush.bf16.msra.mxu3 %v5297_v24 }
  0x20   :  { %v5280_v26 = vld [vmem:[%s11813_s1 + $0x300] sm:$0xf]  ;;  %v7456_v27 = vld [vmem:[%s11813_s1 + $0x30c] sm:$0xf0]  ;;  %v5153_v36 = vor.u32 %v7424_v25, %v5152_v23  ;;  %3545 = vmatpush.bf16.msra.mxu0 %v4897_v31 }
  0x21   :  { %v5520_v28 = vld [vmem:[%s11813_s1 + $0x4e0] sm:$0xf]  ;;  %v7516_v29 = vld [vmem:[%s11813_s1 + $0x4ec] sm:$0xf0]  ;;  %v5281_v39 = vor.u32 %v7456_v27, %v5280_v26  ;;  %3558 = vmatpush.bf16.msra.mxu1 %v5025_v35 }
  0x22   :  { %v5648_v30 = vld [vmem:[%s11813_s1 + $0x5e0] sm:$0xf]  ;;  %v7548_v32 = vld [vmem:[%s11813_s1 + $0x5ec] sm:$0xf0]  ;;  %v5521_v40 = vor.u32 %v7516_v29, %v5520_v28  ;;  %3571 = vmatpush.bf16.msra.mxu2 %v5153_v36 }
  0x23   :  { %v5776_v33 = vld [vmem:[%s11813_s1 + $0x6e0] sm:$0xf]  ;;  %v7580_v34 = vld [vmem:[%s11813_s1 + $0x6ec] sm:$0xf0]  ;;  %v5649_v41 = vor.u32 %v7548_v32, %v5648_v30  ;;  %3584 = vmatpush.bf16.msra.mxu3 %v5281_v39 }
  0x24   :  { %v5904_v37 = vld [vmem:[%s11813_s1 + $0x7e0] sm:$0xf]  ;;  %v7612_v38 = vld [vmem:[%s11813_s1 + $0x7ec] sm:$0xf0]  ;;  %v5777_v42 = vor.u32 %v7580_v34, %v5776_v33  ;;  %3590 = vmatpush.bf16.msrb.mxu0 %v5521_v40 }
  0x25   :  { %v5504_v43 = vld [vmem:[%s11813_s1 + $0x4c0] sm:$0xf]  ;;  %v7512_v44 = vld [vmem:[%s11813_s1 + $0x4cc] sm:$0xf0]  ;;  %v5905_v46 = vor.u32 %v7612_v38, %v5904_v37  ;;  %3603 = vmatpush.bf16.msrb.mxu1 %v5649_v41 }
  0x26   :  { %v5632_v45 = vld [vmem:[%s11813_s1 + $0x5c0] sm:$0xf]  ;;  %v7544_v47 = vld [vmem:[%s11813_s1 + $0x5cc] sm:$0xf0]  ;;  %v5505_v52 = vor.u32 %v7512_v44, %v5504_v43  ;;  %3616 = vmatpush.bf16.msrb.mxu2 %v5777_v42 }
  0x27   :  { %v5760_v48 = vld [vmem:[%s11813_s1 + $0x6c0] sm:$0xf]  ;;  %v7576_v49 = vld [vmem:[%s11813_s1 + $0x6cc] sm:$0xf0]  ;;  %v5633_v53 = vor.u32 %v7544_v47, %v5632_v45  ;;  %3629 = vmatpush.bf16.msrb.mxu3 %v5905_v46 }
  0x28   :  { %v5888_v50 = vld [vmem:[%s11813_s1 + $0x7c0] sm:$0xf]  ;;  %v7608_v51 = vld [vmem:[%s11813_s1 + $0x7cc] sm:$0xf0]  ;;  %v5761_v54 = vor.u32 %v7576_v49, %v5760_v48  ;;  %3591 = vmatpush.bf16.msrb.mxu0 %v5505_v52 }
  0x29   :  { %v5488_v55 = vld [vmem:[%s11813_s1 + $0x4a0] sm:$0xf]  ;;  %v7508_v56 = vld [vmem:[%s11813_s1 + $0x4ac] sm:$0xf0]  ;;  %v5889_v58 = vor.u32 %v7608_v51, %v5888_v50  ;;  %3604 = vmatpush.bf16.msrb.mxu1 %v5633_v53 }
  0x2a   :  { %v5616_v57 = vld [vmem:[%s11813_s1 + $0x5a0] sm:$0xf]  ;;  %v7540_v59 = vld [vmem:[%s11813_s1 + $0x5ac] sm:$0xf0]  ;;  %v5489_v0 = vor.u32 %v7508_v56, %v5488_v55  ;;  %3617 = vmatpush.bf16.msrb.mxu2 %v5761_v54 }
  0x2b   :  { %v5744_v60 = vld [vmem:[%s11813_s1 + $0x6a0] sm:$0xf]  ;;  %v7572_v61 = vld [vmem:[%s11813_s1 + $0x6ac] sm:$0xf0]  ;;  %v5617_v3 = vor.u32 %v7540_v59, %v5616_v57  ;;  %3630 = vmatpush.bf16.msrb.mxu3 %v5889_v58 }
  0x2c   :  { %v5872_v62 = vld [vmem:[%s11813_s1 + $0x7a0] sm:$0xf]  ;;  %v7604_v63 = vld [vmem:[%s11813_s1 + $0x7ac] sm:$0xf0]  ;;  %v5745_v4 = vor.u32 %v7572_v61, %v5744_v60  ;;  %3592 = vmatpush.bf16.msrb.mxu0 %v5489_v0  ;;  %v28_v61 = vld [vmem:[%s11812_s0 + $0x8] sm:$0xff] }
  0x2d   :  { %v5472_v1 = vld [vmem:[%s11813_s1 + $0x480] sm:$0xf]  ;;  %v7504_v5 = vld [vmem:[%s11813_s1 + $0x48c] sm:$0xf0]  ;;  %v5873_v7 = vor.u32 %v7604_v63, %v5872_v62  ;;  %3605 = vmatpush.bf16.msrb.mxu1 %v5617_v3 }
  0x2e   :  { %v27_v2 = vld [vmem:[%s11812_s0] sm:$0xff]  ;;  %v7536_v8 = vld [vmem:[%s11813_s1 + $0x58c] sm:$0xf0]  ;;  %v5473_v13 = vor.u32 %v7504_v5, %v5472_v1  ;;  %3618 = vmatpush.bf16.msrb.mxu2 %v5745_v4 }
  0x2f   :  { %v5600_v6 = vld [vmem:[%s11813_s1 + $0x580] sm:$0xf]  ;;  %617 = vst [vmem:[#allocation1] ss:$9 sm:$0xff] %v27_v2  ;;  %v7568_v10 = vld [vmem:[%s11813_s1 + $0x68c] sm:$0xf0]  ;;  %3631 = vmatpush.bf16.msrb.mxu3 %v5873_v7 }
  0x30   :  { %v5728_v9 = vld [vmem:[%s11813_s1 + $0x680] sm:$0xf]  ;;  %v7600_v12 = vld [vmem:[%s11813_s1 + $0x78c] sm:$0xf0]  ;;  %v5601_v14 = vor.u32 %v7536_v8, %v5600_v6  ;;  %3593 = vmatpush.bf16.msrb.mxu0 %v5473_v13 }
  0x31   :  { %v5856_v11 = vld [vmem:[%s11813_s1 + $0x780] sm:$0xf]  ;;  %v5729_v15 = vor.u32 %v7568_v10, %v5728_v9  ;;  %v7500_v17 = vld [vmem:[%s11813_s1 + $0x46c] sm:$0xf0] }
  0x32   :  { %v5456_v16 = vld [vmem:[%s11813_s1 + $0x460] sm:$0xf]  ;;  %v5857_v19 = vor.u32 %v7600_v12, %v5856_v11  ;;  %v7532_v20 = vld [vmem:[%s11813_s1 + $0x56c] sm:$0xf0]  ;;  %3606 = vmatpush.bf16.msrb.mxu1 %v5601_v14 }
  0x33   :  { %v5584_v18 = vld [vmem:[%s11813_s1 + $0x560] sm:$0xf]  ;;  %v7564_v22 = vld [vmem:[%s11813_s1 + $0x66c] sm:$0xf0]  ;;  %v5457_v26 = vor.u32 %v7500_v17, %v5456_v16  ;;  %3619 = vmatpush.bf16.msrb.mxu2 %v5729_v15 }
  0x34   :  { %v5712_v21 = vld [vmem:[%s11813_s1 + $0x660] sm:$0xf]  ;;  %v7596_v24 = vld [vmem:[%s11813_s1 + $0x76c] sm:$0xf0]  ;;  %v5585_v30 = vor.u32 %v7532_v20, %v5584_v18  ;;  %3632 = vmatpush.bf16.msrb.mxu3 %v5857_v19 }
  0x35   :  { %v5840_v23 = vld [vmem:[%s11813_s1 + $0x760] sm:$0xf]  ;;  %v5713_v31 = vor.u32 %v7564_v22, %v5712_v21  ;;  %v7496_v32 = vld [vmem:[%s11813_s1 + $0x44c] sm:$0xf0]  ;;  %3594 = vmatpush.bf16.msrb.mxu0 %v5457_v26 }
  0x36   :  { %v5440_v25 = vld [vmem:[%s11813_s1 + $0x440] sm:$0xf]  ;;  %v8371_v27 = vld [vmem:[#allocation1 + $0x12] sm:$0xff]  ;;  %v8383_v34 = vld [vmem:[#allocation1 + $0x9] sm:$0xff]  ;;  %v5841_v35 = vor.u32 %v7596_v24, %v5840_v23  ;;  %3607 = vmatpush.bf16.msrb.mxu1 %v5585_v30 }
  0x37   :  { %v8373_v28 = vld [vmem:[#allocation1] sm:$0xff]  ;;  %v7528_v36 = vld [vmem:[%s11813_s1 + $0x54c] sm:$0xf0]  ;;  %3572 = vmatmul.bf16.vlgmr.msra.gmra.mxu2 %v8371_v27  ;;  %v5441_v41 = vor.u32 %v7496_v32, %v5440_v25  ;;  %3559 = vmatmul.bf16.vlgmr.msra.gmra.mxu1 %v8383_v34  ;;  %v8446_v60 = vld [vmem:[#allocation1 + $0x36] sm:$0xff] }
  0x38   :  { %v8375_v29 = vld [vmem:[#allocation1 + $0x1b] sm:$0xff]  ;;  %v7560_v38 = vld [vmem:[%s11813_s1 + $0x64c] sm:$0xf0]  ;;  %3546 = vmatmul.bf16.vlgmr.msra.gmra.mxu0 %v8373_v28  ;;  %3620 = vmatpush.bf16.msrb.mxu2 %v5713_v31  ;;  %v8451_v0 = vld [vmem:[#allocation1 + $0x24] sm:$0xff] }
  0x39   :  { %v5568_v33 = vld [vmem:[%s11813_s1 + $0x540] sm:$0xf]  ;;  %v7592_v40 = vld [vmem:[%s11813_s1 + $0x74c] sm:$0xf0]  ;;  %3585 = vmatmul.bf16.vlgmr.msra.gmra.mxu3 %v8375_v29  ;;  %3595 = vmatpush.bf16.msrb.mxu0 %v5441_v41 }
  0x3a   :  { %v5696_v37 = vld [vmem:[%s11813_s1 + $0x640] sm:$0xf]  ;;  %v5569_v43 = vor.u32 %v7528_v36, %v5568_v33  ;;  %v7492_v45 = vld [vmem:[%s11813_s1 + $0x42c] sm:$0xf0]  ;;  %3633 = vmatpush.bf16.msrb.mxu3 %v5841_v35 }
  0x3b   :  { %v5824_v39 = vld [vmem:[%s11813_s1 + $0x740] sm:$0xf]  ;;  %v5697_v44 = vor.u32 %v7560_v38, %v5696_v37  ;;  %v7524_v47 = vld [vmem:[%s11813_s1 + $0x52c] sm:$0xf0] }
  0x3c   :  { %v5424_v42 = vld [vmem:[%s11813_s1 + $0x420] sm:$0xf]  ;;  %v5825_v48 = vor.u32 %v7592_v40, %v5824_v39  ;;  %v7556_v50 = vld [vmem:[%s11813_s1 + $0x62c] sm:$0xf0]  ;;  %3608 = vmatpush.bf16.msrb.mxu1 %v5569_v43 }
  0x3d   :  { %v5552_v46 = vld [vmem:[%s11813_s1 + $0x520] sm:$0xf]  ;;  %v7588_v52 = vld [vmem:[%s11813_s1 + $0x72c] sm:$0xf0]  ;;  %v5425_v55 = vor.u32 %v7492_v45, %v5424_v42  ;;  %3621 = vmatpush.bf16.msrb.mxu2 %v5697_v44 }
  0x3e   :  { %v5680_v49 = vld [vmem:[%s11813_s1 + $0x620] sm:$0xf]  ;;  %v7488_v54 = vld [vmem:[%s11813_s1 + $0x40c] sm:$0xf0]  ;;  %v5553_v62 = vor.u32 %v7524_v47, %v5552_v46  ;;  %3634 = vmatpush.bf16.msrb.mxu3 %v5825_v48 }
  0x3f   :  { %v5808_v51 = vld [vmem:[%s11813_s1 + $0x720] sm:$0xf]  ;;  %v7520_v57 = vld [vmem:[%s11813_s1 + $0x50c] sm:$0xf0]  ;;  %v5681_v63 = vor.u32 %v7556_v50, %v5680_v49  ;;  %3596 = vmatpush.bf16.msrb.mxu0 %v5425_v55 }
  0x40   :  { %v5408_v53 = vld [vmem:[%s11813_s1 + $0x400] sm:$0xf]  ;;  %v7552_v59 = vld [vmem:[%s11813_s1 + $0x60c] sm:$0xf0]  ;;  %v5809_v3 = vor.u32 %v7588_v52, %v5808_v51  ;;  %3609 = vmatpush.bf16.msrb.mxu1 %v5553_v62 }
  0x41   :  { %v5536_v56 = vld [vmem:[%s11813_s1 + $0x500] sm:$0xf]  ;;  %v8455_v2 = vld [vmem:[#allocation1 + $0x2d] sm:$0xff]  ;;  %v5409_v9 = vor.u32 %v7488_v54, %v5408_v53  ;;  %3622 = vmatpush.bf16.msrb.mxu2 %v5681_v63 }
  0x42   :  { %v5664_v58 = vld [vmem:[%s11813_s1 + $0x600] sm:$0xf]  ;;  %v7584_v5 = vld [vmem:[%s11813_s1 + $0x70c] sm:$0xf0]  ;;  %v5537_v13 = vor.u32 %v7520_v57, %v5536_v56  ;;  %3635 = vmatpush.bf16.msrb.mxu3 %v5809_v3 }
  0x43   :  { %v8453_v1 = vld [vmem:[#allocation1 + $0x3f] sm:$0xff]  ;;  %v7644_v7 = vld [vmem:[%s11813_s1 + $0x8ec] sm:$0xf0]  ;;  %v5665_v14 = vor.u32 %v7552_v59, %v5664_v58  ;;  %3597 = vmatpush.bf16.msrb.mxu0 %v5409_v9 }
  0x44   :  { %v5792_v4 = vld [vmem:[%s11813_s1 + $0x700] sm:$0xf]  ;;  %627 = vst [vmem:[#allocation1] ss:$9 sm:$0xff] %v28_v61  ;;  %v7676_v10 = vld [vmem:[%s11813_s1 + $0x9ec] sm:$0xf0]  ;;  %3610 = vmatpush.bf16.msrb.mxu1 %v5537_v13 }
  0x45   :  { %v6032_v6 = vld [vmem:[%s11813_s1 + $0x8e0] sm:$0xf]  ;;  %v7708_v12 = vld [vmem:[%s11813_s1 + $0xaec] sm:$0xf0]  ;;  %v5793_v17 = vor.u32 %v7584_v5, %v5792_v4  ;;  %3623 = vmatpush.bf16.msrb.mxu2 %v5665_v14 }
  0x46   :  { %v6160_v8 = vld [vmem:[%s11813_s1 + $0x9e0] sm:$0xf]  ;;  %v7740_v16 = vld [vmem:[%s11813_s1 + $0xbec] sm:$0xf0]  ;;  %v6033_v18 = vor.u32 %v7644_v7, %v6032_v6 }
  0x47   :  { %v6288_v11 = vld [vmem:[%s11813_s1 + $0xae0] sm:$0xf]  ;;  %v6161_v19 = vor.u32 %v7676_v10, %v6160_v8  ;;  %v7640_v22 = vld [vmem:[%s11813_s1 + $0x8cc] sm:$0xf0]  ;;  %3636 = vmatpush.bf16.msrb.mxu3 %v5793_v17  ;;  %3611 = vmatmul.bf16.vlgmr.msrb.gmra.mxu1 %v8455_v2 }
  0x48   :  { %v6416_v15 = vld [vmem:[%s11813_s1 + $0xbe0] sm:$0xf]  ;;  %v6289_v20 = vor.u32 %v7708_v12, %v6288_v11  ;;  %v7672_v25 = vld [vmem:[%s11813_s1 + $0x9cc] sm:$0xf0]  ;;  %3642 = vmatpush.bf16.msra.mxu0 %v6033_v18  ;;  %3624 = vmatmul.bf16.vlgmr.msrb.gmra.mxu2 %v8446_v60 }
  0x49   :  { %v6016_v21 = vld [vmem:[%s11813_s1 + $0x8c0] sm:$0xf]  ;;  %v6417_v24 = vor.u32 %v7740_v16, %v6416_v15  ;;  %v7704_v30 = vld [vmem:[%s11813_s1 + $0xacc] sm:$0xf0]  ;;  %3655 = vmatpush.bf16.msra.mxu1 %v6161_v19  ;;  %3598 = vmatmul.bf16.vlgmr.msrb.gmra.mxu0 %v8451_v0 }
  0x4a   :  { %v6144_v23 = vld [vmem:[%s11813_s1 + $0x9c0] sm:$0xf]  ;;  %v7736_v32 = vld [vmem:[%s11813_s1 + $0xbcc] sm:$0xf0]  ;;  %v6017_v33 = vor.u32 %v7640_v22, %v6016_v21  ;;  %3668 = vmatpush.bf16.msra.mxu2 %v6289_v20  ;;  %3637 = vmatmul.bf16.vlgmr.msrb.gmra.mxu3 %v8453_v1 }
  0x4b   :  { %v6272_v26 = vld [vmem:[%s11813_s1 + $0xac0] sm:$0xf]  ;;  %v6145_v35 = vor.u32 %v7672_v25, %v6144_v23  ;;  %v7636_v38 = vld [vmem:[%s11813_s1 + $0x8ac] sm:$0xf0]  ;;  %3681 = vmatpush.bf16.msra.mxu3 %v6417_v24 }
  0x4c   :  { %v6400_v31 = vld [vmem:[%s11813_s1 + $0xbc0] sm:$0xf]  ;;  %v6273_v36 = vor.u32 %v7704_v30, %v6272_v26  ;;  %v7668_v41 = vld [vmem:[%s11813_s1 + $0x9ac] sm:$0xf0]  ;;  %3643 = vmatpush.bf16.msra.mxu0 %v6017_v33 }
  0x4d   :  { %v6000_v37 = vld [vmem:[%s11813_s1 + $0x8a0] sm:$0xf]  ;;  %v6401_v40 = vor.u32 %v7736_v32, %v6400_v31  ;;  %v7700_v43 = vld [vmem:[%s11813_s1 + $0xaac] sm:$0xf0]  ;;  %3656 = vmatpush.bf16.msra.mxu1 %v6145_v35 }
  0x4e   :  { %v6128_v39 = vld [vmem:[%s11813_s1 + $0x9a0] sm:$0xf]  ;;  %v7732_v45 = vld [vmem:[%s11813_s1 + $0xbac] sm:$0xf0]  ;;  %v6001_v46 = vor.u32 %v7636_v38, %v6000_v37  ;;  %3669 = vmatpush.bf16.msra.mxu2 %v6273_v36 }
  0x4f   :  { %v6256_v42 = vld [vmem:[%s11813_s1 + $0xaa0] sm:$0xf]  ;;  %v6129_v47 = vor.u32 %v7668_v41, %v6128_v39  ;;  %v7632_v50 = vld [vmem:[%s11813_s1 + $0x88c] sm:$0xf0]  ;;  %3682 = vmatpush.bf16.msra.mxu3 %v6401_v40 }
  0x50   :  { %v6384_v44 = vld [vmem:[%s11813_s1 + $0xba0] sm:$0xf]  ;;  %v6257_v48 = vor.u32 %v7700_v43, %v6256_v42  ;;  %v7664_v53 = vld [vmem:[%s11813_s1 + $0x98c] sm:$0xf0]  ;;  %3644 = vmatpush.bf16.msra.mxu0 %v6001_v46 }
  0x51   :  { %v5984_v49 = vld [vmem:[%s11813_s1 + $0x880] sm:$0xf]  ;;  %v6385_v52 = vor.u32 %v7732_v45, %v6384_v44  ;;  %v7696_v55 = vld [vmem:[%s11813_s1 + $0xa8c] sm:$0xf0]  ;;  %3657 = vmatpush.bf16.msra.mxu1 %v6129_v47 }
  0x52   :  { %v6112_v51 = vld [vmem:[%s11813_s1 + $0x980] sm:$0xf]  ;;  %v7728_v57 = vld [vmem:[%s11813_s1 + $0xb8c] sm:$0xf0]  ;;  %v5985_v58 = vor.u32 %v7632_v50, %v5984_v49  ;;  %3670 = vmatpush.bf16.msra.mxu2 %v6257_v48 }
  0x53   :  { %v6240_v54 = vld [vmem:[%s11813_s1 + $0xa80] sm:$0xf]  ;;  %v6113_v59 = vor.u32 %v7664_v53, %v6112_v51  ;;  %v7628_v63 = vld [vmem:[%s11813_s1 + $0x86c] sm:$0xf0]  ;;  %3683 = vmatpush.bf16.msra.mxu3 %v6385_v52 }
  0x54   :  { %v6368_v56 = vld [vmem:[%s11813_s1 + $0xb80] sm:$0xf]  ;;  %v6241_v61 = vor.u32 %v7696_v55, %v6240_v54  ;;  %v7660_v5 = vld [vmem:[%s11813_s1 + $0x96c] sm:$0xf0]  ;;  %3645 = vmatpush.bf16.msra.mxu0 %v5985_v58 }
  0x55   :  { %v5968_v62 = vld [vmem:[%s11813_s1 + $0x860] sm:$0xf]  ;;  %v6369_v4 = vor.u32 %v7728_v57, %v6368_v56  ;;  %v7692_v7 = vld [vmem:[%s11813_s1 + $0xa6c] sm:$0xf0]  ;;  %3658 = vmatpush.bf16.msra.mxu1 %v6113_v59 }
  0x56   :  { %v6096_v3 = vld [vmem:[%s11813_s1 + $0x960] sm:$0xf]  ;;  %v7724_v9 = vld [vmem:[%s11813_s1 + $0xb6c] sm:$0xf0]  ;;  %v5969_v10 = vor.u32 %v7628_v63, %v5968_v62  ;;  %3671 = vmatpush.bf16.msra.mxu2 %v6241_v61 }
  0x57   :  { %v6224_v6 = vld [vmem:[%s11813_s1 + $0xa60] sm:$0xf]  ;;  %v6097_v11 = vor.u32 %v7660_v5, %v6096_v3  ;;  %v7624_v14 = vld [vmem:[%s11813_s1 + $0x84c] sm:$0xf0]  ;;  %3684 = vmatpush.bf16.msra.mxu3 %v6369_v4 }
  0x58   :  { %v6352_v8 = vld [vmem:[%s11813_s1 + $0xb60] sm:$0xf]  ;;  %v6225_v12 = vor.u32 %v7692_v7, %v6224_v6  ;;  %v7656_v17 = vld [vmem:[%s11813_s1 + $0x94c] sm:$0xf0]  ;;  %3646 = vmatpush.bf16.msra.mxu0 %v5969_v10 }
  0x59   :  { %v5952_v13 = vld [vmem:[%s11813_s1 + $0x840] sm:$0xf]  ;;  %v6353_v16 = vor.u32 %v7724_v9, %v6352_v8  ;;  %v7688_v19 = vld [vmem:[%s11813_s1 + $0xa4c] sm:$0xf0]  ;;  %3659 = vmatpush.bf16.msra.mxu1 %v6097_v11 }
  0x5a   :  { %v6080_v15 = vld [vmem:[%s11813_s1 + $0x940] sm:$0xf]  ;;  %v7720_v21 = vld [vmem:[%s11813_s1 + $0xb4c] sm:$0xf0]  ;;  %v5953_v22 = vor.u32 %v7624_v14, %v5952_v13  ;;  %3672 = vmatpush.bf16.msra.mxu2 %v6225_v12 }
  0x5b   :  { %v6208_v18 = vld [vmem:[%s11813_s1 + $0xa40] sm:$0xf]  ;;  %v6081_v23 = vor.u32 %v7656_v17, %v6080_v15  ;;  %v7620_v26 = vld [vmem:[%s11813_s1 + $0x82c] sm:$0xf0]  ;;  %3685 = vmatpush.bf16.msra.mxu3 %v6353_v16 }
  0x5c   :  { %v6336_v20 = vld [vmem:[%s11813_s1 + $0xb40] sm:$0xf]  ;;  %v6209_v24 = vor.u32 %v7688_v19, %v6208_v18  ;;  %v7652_v32 = vld [vmem:[%s11813_s1 + $0x92c] sm:$0xf0]  ;;  %3647 = vmatpush.bf16.msra.mxu0 %v5953_v22 }
  0x5d   :  { %v5936_v25 = vld [vmem:[%s11813_s1 + $0x820] sm:$0xf]  ;;  %v6337_v31 = vor.u32 %v7720_v21, %v6336_v20  ;;  %v7684_v35 = vld [vmem:[%s11813_s1 + $0xa2c] sm:$0xf0]  ;;  %3660 = vmatpush.bf16.msra.mxu1 %v6081_v23 }
  0x5e   :  { %v6064_v30 = vld [vmem:[%s11813_s1 + $0x920] sm:$0xf]  ;;  %v7716_v37 = vld [vmem:[%s11813_s1 + $0xb2c] sm:$0xf0]  ;;  %v5937_v38 = vor.u32 %v7620_v26, %v5936_v25  ;;  %3673 = vmatpush.bf16.msra.mxu2 %v6209_v24 }
  0x5f   :  { %v6192_v33 = vld [vmem:[%s11813_s1 + $0xa20] sm:$0xf]  ;;  %v7616_v40 = vld [vmem:[%s11813_s1 + $0x80c] sm:$0xf0]  ;;  %v6065_v41 = vor.u32 %v7652_v32, %v6064_v30  ;;  %3686 = vmatpush.bf16.msra.mxu3 %v6337_v31 }
  0x60   :  { %v6320_v36 = vld [vmem:[%s11813_s1 + $0xb20] sm:$0xf]  ;;  %v6193_v42 = vor.u32 %v7684_v35, %v6192_v33  ;;  %v7648_v44 = vld [vmem:[%s11813_s1 + $0x90c] sm:$0xf0]  ;;  %3648 = vmatpush.bf16.msra.mxu0 %v5937_v38 }
  0x61   :  { %v5920_v39 = vld [vmem:[%s11813_s1 + $0x800] sm:$0xf]  ;;  %v6321_v46 = vor.u32 %v7716_v37, %v6320_v36  ;;  %v7680_v47 = vld [vmem:[%s11813_s1 + $0xa0c] sm:$0xf0]  ;;  %3661 = vmatpush.bf16.msra.mxu1 %v6065_v41 }
  0x62   :  { %v6048_v43 = vld [vmem:[%s11813_s1 + $0x900] sm:$0xf]  ;;  %v7712_v49 = vld [vmem:[%s11813_s1 + $0xb0c] sm:$0xf0]  ;;  %v5921_v53 = vor.u32 %v7616_v40, %v5920_v39  ;;  %3674 = vmatpush.bf16.msra.mxu2 %v6193_v42 }
  0x63   :  { %v6176_v45 = vld [vmem:[%s11813_s1 + $0xa00] sm:$0xf]  ;;  %v7772_v51 = vld [vmem:[%s11813_s1 + $0xcec] sm:$0xf0]  ;;  %v6049_v57 = vor.u32 %v7648_v44, %v6048_v43  ;;  %3687 = vmatpush.bf16.msra.mxu3 %v6321_v46 }
  0x64   :  { %v6304_v48 = vld [vmem:[%s11813_s1 + $0xb00] sm:$0xf]  ;;  %v7804_v54 = vld [vmem:[%s11813_s1 + $0xdec] sm:$0xf0]  ;;  %v6177_v58 = vor.u32 %v7680_v47, %v6176_v45  ;;  %3649 = vmatpush.bf16.msra.mxu0 %v5921_v53 }
  0x65   :  { %v6544_v50 = vld [vmem:[%s11813_s1 + $0xce0] sm:$0xf]  ;;  %v7836_v56 = vld [vmem:[%s11813_s1 + $0xeec] sm:$0xf0]  ;;  %v6305_v62 = vor.u32 %v7712_v49, %v6304_v48  ;;  %3662 = vmatpush.bf16.msra.mxu1 %v6049_v57 }
  0x66   :  { %v6672_v52 = vld [vmem:[%s11813_s1 + $0xde0] sm:$0xf]  ;;  %v7868_v61 = vld [vmem:[%s11813_s1 + $0xfec] sm:$0xf0]  ;;  %v6545_v63 = vor.u32 %v7772_v51, %v6544_v50  ;;  %3675 = vmatpush.bf16.msra.mxu2 %v6177_v58 }
  0x67   :  { %v6800_v55 = vld [vmem:[%s11813_s1 + $0xee0] sm:$0xf]  ;;  %v6673_v3 = vor.u32 %v7804_v54, %v6672_v52  ;;  %v7768_v6 = vld [vmem:[%s11813_s1 + $0xccc] sm:$0xf0]  ;;  %3688 = vmatpush.bf16.msra.mxu3 %v6305_v62 }
  0x68   :  { %v6928_v59 = vld [vmem:[%s11813_s1 + $0xfe0] sm:$0xf]  ;;  %v6801_v4 = vor.u32 %v7836_v56, %v6800_v55  ;;  %v7800_v9 = vld [vmem:[%s11813_s1 + $0xdcc] sm:$0xf0]  ;;  %3694 = vmatpush.bf16.msrb.mxu0 %v6545_v63 }
  0x69   :  { %v6528_v5 = vld [vmem:[%s11813_s1 + $0xcc0] sm:$0xf]  ;;  %v6929_v8 = vor.u32 %v7868_v61, %v6928_v59  ;;  %v7832_v11 = vld [vmem:[%s11813_s1 + $0xecc] sm:$0xf0]  ;;  %3707 = vmatpush.bf16.msrb.mxu1 %v6673_v3 }
  0x6a   :  { %v6656_v7 = vld [vmem:[%s11813_s1 + $0xdc0] sm:$0xf]  ;;  %v7864_v14 = vld [vmem:[%s11813_s1 + $0xfcc] sm:$0xf0]  ;;  %v6529_v18 = vor.u32 %v7768_v6, %v6528_v5  ;;  %3720 = vmatpush.bf16.msrb.mxu2 %v6801_v4 }
  0x6b   :  { %v6784_v10 = vld [vmem:[%s11813_s1 + $0xec0] sm:$0xf]  ;;  %v8709_v15 = vld [vmem:[#allocation1 + $0x12] sm:$0xff]  ;;  %v8711_v16 = vld [vmem:[#allocation1 + $0x9] sm:$0xff]  ;;  %v6657_v19 = vor.u32 %v7800_v9, %v6656_v7  ;;  %3733 = vmatpush.bf16.msrb.mxu3 %v6929_v8 }
  0x6c   :  { %v8701_v12 = vld [vmem:[#allocation1] sm:$0xff]  ;;  %v6785_v20 = vor.u32 %v7832_v11, %v6784_v10  ;;  %v7764_v22 = vld [vmem:[%s11813_s1 + $0xcac] sm:$0xf0]  ;;  %3676 = vmatmul.bf16.vlgmr.msra.gmra.mxu2 %v8709_v15  ;;  %3663 = vmatmul.bf16.vlgmr.msra.gmra.mxu1 %v8711_v16 }
  0x6d   :  { %v6912_v13 = vld [vmem:[%s11813_s1 + $0xfc0] sm:$0xf]  ;;  %3650 = vmatmul.bf16.vlgmr.msra.gmra.mxu0 %v8701_v12  ;;  %v7796_v25 = vld [vmem:[%s11813_s1 + $0xdac] sm:$0xf0]  ;;  %3708 = vmatpush.bf16.msrb.mxu1 %v6657_v19 }
  0x6e   :  { %v8713_v17 = vld [vmem:[#allocation1 + $0x1b] sm:$0xff]  ;;  %v6913_v24 = vor.u32 %v7864_v14, %v6912_v13  ;;  %v7828_v30 = vld [vmem:[%s11813_s1 + $0xeac] sm:$0xf0]  ;;  %3695 = vmatpush.bf16.msrb.mxu0 %v6529_v18  ;;  %3721 = vmatpush.bf16.msrb.mxu2 %v6785_v20 }
  0x6f   :  { %v6512_v21 = vld [vmem:[%s11813_s1 + $0xca0] sm:$0xf]  ;;  %v7860_v32 = vld [vmem:[%s11813_s1 + $0xfac] sm:$0xf0]  ;;  %3689 = vmatmul.bf16.vlgmr.msra.gmra.mxu3 %v8713_v17 }
  0x70   :  { %v6640_v23 = vld [vmem:[%s11813_s1 + $0xda0] sm:$0xf]  ;;  %v6513_v33 = vor.u32 %v7764_v22, %v6512_v21  ;;  %v7760_v36 = vld [vmem:[%s11813_s1 + $0xc8c] sm:$0xf0]  ;;  %3734 = vmatpush.bf16.msrb.mxu3 %v6913_v24 }
  0x71   :  { %v6768_v26 = vld [vmem:[%s11813_s1 + $0xea0] sm:$0xf]  ;;  %v6641_v37 = vor.u32 %v7796_v25, %v6640_v23  ;;  %v7792_v40 = vld [vmem:[%s11813_s1 + $0xd8c] sm:$0xf0] }
  0x72   :  { %v6896_v31 = vld [vmem:[%s11813_s1 + $0xfa0] sm:$0xf]  ;;  %v6769_v38 = vor.u32 %v7828_v30, %v6768_v26  ;;  %v7824_v43 = vld [vmem:[%s11813_s1 + $0xe8c] sm:$0xf0] }
  0x73   :  { %v6496_v35 = vld [vmem:[%s11813_s1 + $0xc80] sm:$0xf]  ;;  %v6897_v42 = vor.u32 %v7860_v32, %v6896_v31  ;;  %v7856_v45 = vld [vmem:[%s11813_s1 + $0xf8c] sm:$0xf0] }
  0x74   :  { %v6624_v39 = vld [vmem:[%s11813_s1 + $0xd80] sm:$0xf] }
  0x75   :  { %v6752_v41 = vld [vmem:[%s11813_s1 + $0xe80] sm:$0xf] }
  0x76   :  { %v6880_v44 = vld [vmem:[%s11813_s1 + $0xf80] sm:$0xf] }
  0x77   :  { %12 = vsyncpa [#allocation3], 0  ;;  %3696 = vmatpush.bf16.msrb.mxu0 %v6513_v33  ;;  %v6497_v46 = vor.u32 %v7760_v36, %v6496_v35  ;;  %3709 = vmatpush.bf16.msrb.mxu1 %v6641_v37  ;;  %v6625_v47 = vor.u32 %v7792_v40, %v6624_v39  ;;  %v6753_v48 = vor.u32 %v7824_v43, %v6752_v41  ;;  %v6480_v49 = vld [vmem:[%s11813_s1 + $0xc60] sm:$0xf]  ;;  %v7756_v50 = vld [vmem:[%s11813_s1 + $0xc6c] sm:$0xf0] }
  0x78   :  { %3722 = vmatpush.bf16.msrb.mxu2 %v6769_v38  ;;  %v6608_v51 = vld [vmem:[%s11813_s1 + $0xd60] sm:$0xf]  ;;  %3735 = vmatpush.bf16.msrb.mxu3 %v6897_v42  ;;  %v6881_v52 = vor.u32 %v7856_v45, %v6880_v44  ;;  %v7788_v53 = vld [vmem:[%s11813_s1 + $0xd6c] sm:$0xf0]  ;;  %v6481_v58 = vor.u32 %v7756_v50, %v6480_v49  ;;  %s4885_s20 = sshll.u32 %s11819_s7, 4  ;;  %s4886_s20 = int_to_ptr.hbm [resolvable:$true] %s4885_s20 }
  0x79   :  { %v6736_v54 = vld [vmem:[%s11813_s1 + $0xe60] sm:$0xf]  ;;  %v7820_v55 = vld [vmem:[%s11813_s1 + $0xe6c] sm:$0xf0]  ;;  %v6609_v59 = vor.u32 %v7788_v53, %v6608_v51  ;;  %v5010_v53 = vld [vmem:[%s11813_s1 + $0xf0] sm:$0xf0] }
  0x7a   :  { %v6864_v56 = vld [vmem:[%s11813_s1 + $0xf60] sm:$0xf]  ;;  %v7852_v57 = vld [vmem:[%s11813_s1 + $0xf6c] sm:$0xf0]  ;;  %v6737_v61 = vor.u32 %v7820_v55, %v6736_v54 }
  0x7b   :  { %3697 = vmatpush.bf16.msrb.mxu0 %v6497_v46  ;;  %3710 = vmatpush.bf16.msrb.mxu1 %v6625_v47  ;;  %v6464_v62 = vld [vmem:[%s11813_s1 + $0xc40] sm:$0xf]  ;;  %v7752_v63 = vld [vmem:[%s11813_s1 + $0xc4c] sm:$0xf0]  ;;  %v6865_v4 = vor.u32 %v7852_v57, %v6864_v56  ;;  %v8875_v46 = vld [vmem:[#allocation1 + $0x24] sm:$0xff] }
  0x7c   :  { %3723 = vmatpush.bf16.msrb.mxu2 %v6753_v48  ;;  %v6592_v3 = vld [vmem:[%s11813_s1 + $0xd40] sm:$0xf]  ;;  %3736 = vmatpush.bf16.msrb.mxu3 %v6881_v52  ;;  %v7784_v5 = vld [vmem:[%s11813_s1 + $0xd4c] sm:$0xf0]  ;;  %v6465_v10 = vor.u32 %v7752_v63, %v6464_v62  ;;  %v8877_v47 = vld [vmem:[#allocation1 + $0x36] sm:$0xff] }
  0x7d   :  { %v6720_v6 = vld [vmem:[%s11813_s1 + $0xe40] sm:$0xf]  ;;  %v7816_v7 = vld [vmem:[%s11813_s1 + $0xe4c] sm:$0xf0]  ;;  %v6593_v13 = vor.u32 %v7784_v5, %v6592_v3  ;;  %v7386_v52 = vld [vmem:[%s11813_s1 + $0xe4] sm:$0xf] }
  0x7e   :  { %v6848_v8 = vld [vmem:[%s11813_s1 + $0xf40] sm:$0xf]  ;;  %v7848_v9 = vld [vmem:[%s11813_s1 + $0xf4c] sm:$0xf0]  ;;  %v6721_v14 = vor.u32 %v7816_v7, %v6720_v6  ;;  %v7418_v56 = vld [vmem:[%s11813_s1 + $0x1e4] sm:$0xf]  ;;  %v5013_v62 = vor.u32 %v7386_v52, %v5010_v53 }
  0x7f   :  { %3698 = vmatpush.bf16.msrb.mxu0 %v6481_v58  ;;  %v6448_v11 = vld [vmem:[%s11813_s1 + $0xc20] sm:$0xf]  ;;  %3711 = vmatpush.bf16.msrb.mxu1 %v6609_v59  ;;  %v7748_v18 = vld [vmem:[%s11813_s1 + $0xc2c] sm:$0xf0]  ;;  %v6849_v21 = vor.u32 %v7848_v9, %v6848_v8  ;;  %v5138_v57 = vld [vmem:[%s11813_s1 + $0x1f0] sm:$0xf0] }
  0x80   :  { %3724 = vmatpush.bf16.msrb.mxu2 %v6737_v61  ;;  %v6576_v19 = vld [vmem:[%s11813_s1 + $0xd20] sm:$0xf]  ;;  %v7780_v20 = vld [vmem:[%s11813_s1 + $0xd2c] sm:$0xf0]  ;;  %3737 = vmatpush.bf16.msrb.mxu3 %v6865_v4  ;;  %v6449_v31 = vor.u32 %v7748_v18, %v6448_v11  ;;  %v5141_v5 = vor.u32 %v7418_v56, %v5138_v57  ;;  %v7382_v7 = vld [vmem:[%s11813_s1 + $0xc4] sm:$0xf] }
  0x81   :  { %v6704_v22 = vld [vmem:[%s11813_s1 + $0xe20] sm:$0xf]  ;;  %v7812_v23 = vld [vmem:[%s11813_s1 + $0xe2c] sm:$0xf0]  ;;  %v6577_v37 = vor.u32 %v7780_v20, %v6576_v19  ;;  %v4994_v8 = vld [vmem:[%s11813_s1 + $0xd0] sm:$0xf0] }
  0x82   :  { %v6832_v24 = vld [vmem:[%s11813_s1 + $0xf20] sm:$0xf]  ;;  %v7844_v25 = vld [vmem:[%s11813_s1 + $0xf2c] sm:$0xf0]  ;;  %v6705_v38 = vor.u32 %v7812_v23, %v6704_v22  ;;  %v7414_v9 = vld [vmem:[%s11813_s1 + $0x1c4] sm:$0xf] }
  0x83   :  { %v6432_v26 = vld [vmem:[%s11813_s1 + $0xc00] sm:$0xf]  ;;  %v7744_v30 = vld [vmem:[%s11813_s1 + $0xc0c] sm:$0xf0]  ;;  %3699 = vmatpush.bf16.msrb.mxu0 %v6465_v10  ;;  %3712 = vmatpush.bf16.msrb.mxu1 %v6593_v13  ;;  %v6833_v43 = vor.u32 %v7844_v25, %v6832_v24  ;;  %v5122_v10 = vld [vmem:[%s11813_s1 + $0x1d0] sm:$0xf0] }
  0x84   :  { %v6560_v32 = vld [vmem:[%s11813_s1 + $0xd00] sm:$0xf]  ;;  %v7776_v33 = vld [vmem:[%s11813_s1 + $0xd0c] sm:$0xf0]  ;;  %3725 = vmatpush.bf16.msrb.mxu2 %v6721_v14  ;;  %3738 = vmatpush.bf16.msrb.mxu3 %v6849_v21  ;;  %v6433_v51 = vor.u32 %v7744_v30, %v6432_v26  ;;  %v4997_v14 = vor.u32 %v7382_v7, %v4994_v8  ;;  %v5125_v21 = vor.u32 %v7414_v9, %v5122_v10  ;;  %v7378_v23 = vld [vmem:[%s11813_s1 + $0xa4] sm:$0xf] }
  0x85   :  { %v6688_v35 = vld [vmem:[%s11813_s1 + $0xe00] sm:$0xf]  ;;  %v7808_v36 = vld [vmem:[%s11813_s1 + $0xe0c] sm:$0xf0]  ;;  %v6561_v54 = vor.u32 %v7776_v33, %v6560_v32  ;;  %v4978_v24 = vld [vmem:[%s11813_s1 + $0xb0] sm:$0xf0] }
  0x86   :  { %v6816_v39 = vld [vmem:[%s11813_s1 + $0xf00] sm:$0xf]  ;;  %v7840_v40 = vld [vmem:[%s11813_s1 + $0xf0c] sm:$0xf0]  ;;  %v6689_v55 = vor.u32 %v7808_v36, %v6688_v35  ;;  %v7410_v25 = vld [vmem:[%s11813_s1 + $0x1a4] sm:$0xf]  ;;  %v4981_v32 = vor.u32 %v7378_v23, %v4978_v24 }
  0x87   :  { %v7056_v41 = vld [vmem:[%s11813_s1 + $0x10e0] sm:$0xf]  ;;  %v7900_v42 = vld [vmem:[%s11813_s1 + $0x10ec] sm:$0xf0]  ;;  %3700 = vmatpush.bf16.msrb.mxu0 %v6449_v31  ;;  %3713 = vmatpush.bf16.msrb.mxu1 %v6577_v37  ;;  %v6817_v58 = vor.u32 %v7840_v40, %v6816_v39  ;;  %v5106_v26 = vld [vmem:[%s11813_s1 + $0x1b0] sm:$0xf0] }
  0x88   :  { %v7184_v44 = vld [vmem:[%s11813_s1 + $0x11e0] sm:$0xf]  ;;  %v7932_v45 = vld [vmem:[%s11813_s1 + $0x11ec] sm:$0xf0]  ;;  %3726 = vmatpush.bf16.msrb.mxu2 %v6705_v38  ;;  %3739 = vmatpush.bf16.msrb.mxu3 %v6833_v43  ;;  %v7057_v59 = vor.u32 %v7900_v42, %v7056_v41  ;;  %v5109_v37 = vor.u32 %v7410_v25, %v5106_v26  ;;  %v7374_v39 = vld [vmem:[%s11813_s1 + $0x84] sm:$0xf] }
  0x89   :  { %v8879_v48 = vld [vmem:[#allocation1 + $0x2d] sm:$0xff]  ;;  %v8881_v49 = vld [vmem:[#allocation1 + $0x3f] sm:$0xff]  ;;  %v7185_v61 = vor.u32 %v7932_v45, %v7184_v44 }
  0x8a   :  { %v29_v50 = vld [vmem:[%s11812_s0 + $0x10] sm:$0x3]  ;;  %v7040_v63 = vld [vmem:[%s11813_s1 + $0x10c0] sm:$0xf]  ;;  %v4962_v40 = vld [vmem:[%s11813_s1 + $0x90] sm:$0xf0] }
  0x8b   :  { %637 = vst [vmem:[#allocation1] ss:$9 sm:$0xff] %v29_v50  ;;  %v7896_v3 = vld [vmem:[%s11813_s1 + $0x10cc] sm:$0xf0]  ;;  %v7168_v4 = vld [vmem:[%s11813_s1 + $0x11c0] sm:$0xf]  ;;  %3701 = vmatpush.bf16.msrb.mxu0 %v6433_v51  ;;  %3714 = vmatpush.bf16.msrb.mxu1 %v6561_v54  ;;  %v4965_v45 = vor.u32 %v7374_v39, %v4962_v40 }
  0x8c   :  { %v7928_v6 = vld [vmem:[%s11813_s1 + $0x11cc] sm:$0xf0]  ;;  %3727 = vmatpush.bf16.msrb.mxu2 %v6689_v55  ;;  %3740 = vmatpush.bf16.msrb.mxu3 %v6817_v58  ;;  %v7041_v11 = vor.u32 %v7896_v3, %v7040_v63  ;;  %v7024_v18 = vld [vmem:[%s11813_s1 + $0x10a0] sm:$0xf]  ;;  %v7406_v41 = vld [vmem:[%s11813_s1 + $0x184] sm:$0xf] }
  0x8d   :  { %v7169_v13 = vor.u32 %v7928_v6, %v7168_v4  ;;  %v7892_v19 = vld [vmem:[%s11813_s1 + $0x10ac] sm:$0xf0]  ;;  %v7152_v20 = vld [vmem:[%s11813_s1 + $0x11a0] sm:$0xf]  ;;  %v5090_v42 = vld [vmem:[%s11813_s1 + $0x190] sm:$0xf0] }
  0x8e   :  { %3702 = vmatmul.bf16.vlgmr.msrb.gmra.mxu0 %v8875_v46  ;;  %v7924_v22 = vld [vmem:[%s11813_s1 + $0x11ac] sm:$0xf0]  ;;  %3715 = vmatmul.bf16.vlgmr.msrb.gmra.mxu1 %v8879_v48  ;;  %v7025_v30 = vor.u32 %v7892_v19, %v7024_v18  ;;  %v7008_v33 = vld [vmem:[%s11813_s1 + $0x1080] sm:$0xf]  ;;  %v5093_v53 = vor.u32 %v7406_v41, %v5090_v42  ;;  %v7370_v55 = vld [vmem:[%s11813_s1 + $0x64] sm:$0xf] }
  0x8f   :  { %3746 = vmatpush.bf16.msra.mxu0 %v7057_v59  ;;  %3759 = vmatpush.bf16.msra.mxu1 %v7185_v61  ;;  %v7153_v31 = vor.u32 %v7924_v22, %v7152_v20  ;;  %v7888_v35 = vld [vmem:[%s11813_s1 + $0x108c] sm:$0xf0]  ;;  %v7136_v36 = vld [vmem:[%s11813_s1 + $0x1180] sm:$0xf]  ;;  %v4946_v56 = vld [vmem:[%s11813_s1 + $0x70] sm:$0xf0] }
  0x90   :  { %3772 = vmatpush.bf16.msra.mxu2 %v5013_v62  ;;  %3785 = vmatpush.bf16.msra.mxu3 %v5141_v5  ;;  %v7920_v38 = vld [vmem:[%s11813_s1 + $0x118c] sm:$0xf0]  ;;  %v7009_v43 = vor.u32 %v7888_v35, %v7008_v33  ;;  %v6992_v50 = vld [vmem:[%s11813_s1 + $0x1060] sm:$0xf]  ;;  %v7402_v57 = vld [vmem:[%s11813_s1 + $0x164] sm:$0xf]  ;;  %v4949_v62 = vor.u32 %v7370_v55, %v4946_v56 }
  0x91   :  { %3728 = vmatmul.bf16.vlgmr.msrb.gmra.mxu2 %v8877_v47  ;;  %3741 = vmatmul.bf16.vlgmr.msrb.gmra.mxu3 %v8881_v49  ;;  %v7137_v44 = vor.u32 %v7920_v38, %v7136_v36  ;;  %v7884_v51 = vld [vmem:[%s11813_s1 + $0x106c] sm:$0xf0]  ;;  %v7120_v52 = vld [vmem:[%s11813_s1 + $0x1160] sm:$0xf]  ;;  %v5074_v58 = vld [vmem:[%s11813_s1 + $0x170] sm:$0xf0] }
  0x92   :  { %v7916_v54 = vld [vmem:[%s11813_s1 + $0x116c] sm:$0xf0]  ;;  %v6993_v59 = vor.u32 %v7884_v51, %v6992_v50  ;;  %v6976_v63 = vld [vmem:[%s11813_s1 + $0x1040] sm:$0xf]  ;;  %v5077_v5 = vor.u32 %v7402_v57, %v5074_v58  ;;  %v7366_v7 = vld [vmem:[%s11813_s1 + $0x44] sm:$0xf] }
  0x93   :  { %3747 = vmatpush.bf16.msra.mxu0 %v7041_v11  ;;  %3760 = vmatpush.bf16.msra.mxu1 %v7169_v13  ;;  %v7121_v61 = vor.u32 %v7916_v54, %v7120_v52  ;;  %v7880_v3 = vld [vmem:[%s11813_s1 + $0x104c] sm:$0xf0]  ;;  %v7104_v4 = vld [vmem:[%s11813_s1 + $0x1140] sm:$0xf]  ;;  %v4930_v8 = vld [vmem:[%s11813_s1 + $0x50] sm:$0xf0] }
  0x94   :  { %3773 = vmatpush.bf16.msra.mxu2 %v4997_v14  ;;  %3786 = vmatpush.bf16.msra.mxu3 %v5125_v21  ;;  %v7912_v6 = vld [vmem:[%s11813_s1 + $0x114c] sm:$0xf0]  ;;  %v7398_v9 = vld [vmem:[%s11813_s1 + $0x144] sm:$0xf]  ;;  %v5058_v10 = vld [vmem:[%s11813_s1 + $0x150] sm:$0xf0]  ;;  %v6977_v11 = vor.u32 %v7880_v3, %v6976_v63  ;;  %v4933_v14 = vor.u32 %v7366_v7, %v4930_v8 }
  0x95   :  { %v7105_v13 = vor.u32 %v7912_v6, %v7104_v4  ;;  %v6960_v18 = vld [vmem:[%s11813_s1 + $0x1020] sm:$0xf]  ;;  %v7876_v19 = vld [vmem:[%s11813_s1 + $0x102c] sm:$0xf0]  ;;  %v5061_v21 = vor.u32 %v7398_v9, %v5058_v10  ;;  %v7362_v23 = vld [vmem:[%s11813_s1 + $0x24] sm:$0xf] }
  0x96   :  { %v7088_v20 = vld [vmem:[%s11813_s1 + $0x1120] sm:$0xf]  ;;  %v7908_v22 = vld [vmem:[%s11813_s1 + $0x112c] sm:$0xf0]  ;;  %v4914_v24 = vld [vmem:[%s11813_s1 + $0x30] sm:$0xf0] }
  0x97   :  { %3748 = vmatpush.bf16.msra.mxu0 %v7025_v30  ;;  %3761 = vmatpush.bf16.msra.mxu1 %v7153_v31  ;;  %v7394_v25 = vld [vmem:[%s11813_s1 + $0x124] sm:$0xf]  ;;  %v5042_v26 = vld [vmem:[%s11813_s1 + $0x130] sm:$0xf0]  ;;  %v6961_v30 = vor.u32 %v7876_v19, %v6960_v18  ;;  %v6944_v31 = vld [vmem:[%s11813_s1 + $0x1000] sm:$0xf]  ;;  %v7089_v33 = vor.u32 %v7908_v22, %v7088_v20  ;;  %v4917_v35 = vor.u32 %v7362_v23, %v4914_v24 }
  0x98   :  { %3774 = vmatpush.bf16.msra.mxu2 %v4981_v32  ;;  %3787 = vmatpush.bf16.msra.mxu3 %v5109_v37  ;;  %v7872_v32 = vld [vmem:[%s11813_s1 + $0x100c] sm:$0xf0]  ;;  %v7072_v36 = vld [vmem:[%s11813_s1 + $0x1100] sm:$0xf]  ;;  %v7358_v38 = vld [vmem:[%s11813_s1 + $0x4] sm:$0xf]  ;;  %v5045_v39 = vor.u32 %v7394_v25, %v5042_v26 }
  0x99   :  { %v7904_v37 = vld [vmem:[%s11813_s1 + $0x110c] sm:$0xf0]  ;;  %v4898_v40 = vld [vmem:[%s11813_s1 + $0x10] sm:$0xf0]  ;;  %v7390_v41 = vld [vmem:[%s11813_s1 + $0x104] sm:$0xf]  ;;  %v6945_v50 = vor.u32 %v7872_v32, %v6944_v31 }
  0x9a   :  { %v5026_v42 = vld [vmem:[%s11813_s1 + $0x110] sm:$0xf0]  ;;  %v7514_v52 = vld [vmem:[%s11813_s1 + $0x4e4] sm:$0xf]  ;;  %v7073_v54 = vor.u32 %v7904_v37, %v7072_v36  ;;  %v4901_v55 = vor.u32 %v7358_v38, %v4898_v40 }
  0x9b   :  { %3749 = vmatpush.bf16.msra.mxu0 %v7009_v43  ;;  %3762 = vmatpush.bf16.msra.mxu1 %v7137_v44  ;;  %v7450_v43 = vld [vmem:[%s11813_s1 + $0x2e4] sm:$0xf]  ;;  %v5266_v44 = vld [vmem:[%s11813_s1 + $0x2f0] sm:$0xf0]  ;;  %v5029_v58 = vor.u32 %v7390_v41, %v5026_v42 }
  0x9c   :  { %3775 = vmatpush.bf16.msra.mxu2 %v4965_v45  ;;  %3788 = vmatpush.bf16.msra.mxu3 %v5093_v53  ;;  %v7482_v45 = vld [vmem:[%s11813_s1 + $0x3e4] sm:$0xf]  ;;  %v5394_v51 = vld [vmem:[%s11813_s1 + $0x3f0] sm:$0xf0] }
  0x9d   :  { %v5522_v53 = vld [vmem:[%s11813_s1 + $0x4f0] sm:$0xf0]  ;;  %v7546_v56 = vld [vmem:[%s11813_s1 + $0x5e4] sm:$0xf] }
  0x9e   :  { %v5650_v57 = vld [vmem:[%s11813_s1 + $0x5f0] sm:$0xf0]  ;;  %v7446_v63 = vld [vmem:[%s11813_s1 + $0x2c4] sm:$0xf] }
  0x9f   :  { %3750 = vmatpush.bf16.msra.mxu0 %v6993_v59  ;;  %3763 = vmatpush.bf16.msra.mxu1 %v7121_v61  ;;  %v5269_v59 = vor.u32 %v7450_v43, %v5266_v44  ;;  %v5397_v61 = vor.u32 %v7482_v45, %v5394_v51  ;;  %v5250_v3 = vld [vmem:[%s11813_s1 + $0x2d0] sm:$0xf0]  ;;  %v7478_v4 = vld [vmem:[%s11813_s1 + $0x3c4] sm:$0xf] }
  0xa0   :  { %3776 = vmatpush.bf16.msra.mxu2 %v4949_v62  ;;  %3789 = vmatpush.bf16.msra.mxu3 %v5077_v5  ;;  %v5525_v62 = vor.u32 %v7514_v52, %v5522_v53  ;;  %v5653_v5 = vor.u32 %v7546_v56, %v5650_v57  ;;  %v5378_v6 = vld [vmem:[%s11813_s1 + $0x3d0] sm:$0xf0]  ;;  %v7510_v7 = vld [vmem:[%s11813_s1 + $0x4c4] sm:$0xf] }
  0xa1   :  { %v5506_v8 = vld [vmem:[%s11813_s1 + $0x4d0] sm:$0xf0]  ;;  %v638_v9 = vld [vmem:[#allocation1] sm:$0xff]  ;;  %v5381_v18 = vor.u32 %v7478_v4, %v5378_v6 }
  0xa2   :  { %v7542_v10 = vld [vmem:[%s11813_s1 + $0x5c4] sm:$0xf]  ;;  %v5509_v19 = vor.u32 %v7510_v7, %v5506_v8  ;;  %v5362_v24 = vld [vmem:[%s11813_s1 + $0x3b0] sm:$0xf0] }
  0xa3   :  { %3751 = vmatpush.bf16.msra.mxu0 %v6977_v11  ;;  %3764 = vmatpush.bf16.msra.mxu1 %v7105_v13  ;;  %v5634_v11 = vld [vmem:[%s11813_s1 + $0x5d0] sm:$0xf0]  ;;  %v639_v13 = vld [vmem:[#allocation1 + $0x9] sm:$0xff]  ;;  %v7442_v20 = vld [vmem:[%s11813_s1 + $0x2a4] sm:$0xf] }
  0xa4   :  { %3777 = vmatpush.bf16.msra.mxu2 %v4933_v14  ;;  %3790 = vmatpush.bf16.msra.mxu3 %v5061_v21  ;;  %v5253_v14 = vor.u32 %v7446_v63, %v5250_v3  ;;  %v5234_v21 = vld [vmem:[%s11813_s1 + $0x2b0] sm:$0xf0]  ;;  %v7474_v22 = vld [vmem:[%s11813_s1 + $0x3a4] sm:$0xf]  ;;  %v5637_v23 = vor.u32 %v7542_v10, %v5634_v11  ;;  %v606_v11 = vld [vmem:[%s11814_s2] sm:$0xf] }
  0xa5   :  { %v7506_v25 = vld [vmem:[%s11813_s1 + $0x4a4] sm:$0xf]  ;;  %v5490_v26 = vld [vmem:[%s11813_s1 + $0x4b0] sm:$0xf0]  ;;  %v5237_v32 = vor.u32 %v7442_v20, %v5234_v21 }
  0xa6   :  { %v5618_v31 = vld [vmem:[%s11813_s1 + $0x5b0] sm:$0xf0]  ;;  %v7438_v36 = vld [vmem:[%s11813_s1 + $0x284] sm:$0xf] }
  0xa7   :  { %3752 = vmatpush.bf16.msra.mxu0 %v6961_v30  ;;  %3765 = vmatpush.bf16.msra.mxu1 %v7089_v33  ;;  %v7538_v30 = vld [vmem:[%s11813_s1 + $0x5a4] sm:$0xf]  ;;  %v5365_v33 = vor.u32 %v7474_v22, %v5362_v24  ;;  %v5218_v37 = vld [vmem:[%s11813_s1 + $0x290] sm:$0xf0]  ;;  %v608_v24 = vperm.slane %v606_v11, 0 }
  0xa8   :  { %3778 = vmatpush.bf16.msra.mxu2 %v4917_v35  ;;  %3791 = vmatpush.bf16.msra.mxu3 %v5045_v39  ;;  %v5493_v35 = vor.u32 %v7506_v25, %v5490_v26  ;;  %v7470_v38 = vld [vmem:[%s11813_s1 + $0x384] sm:$0xf]  ;;  %v5621_v39 = vor.u32 %v7538_v30, %v5618_v31  ;;  %v5346_v40 = vld [vmem:[%s11813_s1 + $0x390] sm:$0xf0]  ;;  %v5221_v45 = vor.u32 %v7438_v36, %v5218_v37 }
  0xa9   :  { %v7502_v41 = vld [vmem:[%s11813_s1 + $0x484] sm:$0xf]  ;;  %v5474_v42 = vld [vmem:[%s11813_s1 + $0x490] sm:$0xf0] }
  0xaa   :  { %v7534_v43 = vld [vmem:[%s11813_s1 + $0x584] sm:$0xf]  ;;  %v5602_v44 = vld [vmem:[%s11813_s1 + $0x590] sm:$0xf0]  ;;  %v5477_v51 = vor.u32 %v7502_v41, %v5474_v42 }
  0xab   :  { %3753 = vmatpush.bf16.msra.mxu0 %v6945_v50  ;;  %3766 = vmatpush.bf16.msra.mxu1 %v7073_v54  ;;  %v5349_v50 = vor.u32 %v7470_v38, %v5346_v40  ;;  %v7434_v52 = vld [vmem:[%s11813_s1 + $0x264] sm:$0xf]  ;;  %v5202_v53 = vld [vmem:[%s11813_s1 + $0x270] sm:$0xf0] }
  0xac   :  { %3779 = vmatpush.bf16.msra.mxu2 %v4901_v55  ;;  %3792 = vmatpush.bf16.msra.mxu3 %v5029_v58  ;;  %v7466_v54 = vld [vmem:[%s11813_s1 + $0x364] sm:$0xf]  ;;  %v5605_v55 = vor.u32 %v7534_v43, %v5602_v44  ;;  %v5330_v56 = vld [vmem:[%s11813_s1 + $0x370] sm:$0xf0] }
  0xad   :  { %v7498_v57 = vld [vmem:[%s11813_s1 + $0x464] sm:$0xf]  ;;  %v5458_v58 = vld [vmem:[%s11813_s1 + $0x470] sm:$0xf0]  ;;  %v5333_v3 = vor.u32 %v7466_v54, %v5330_v56 }
  0xae   :  { %3754 = vmatmul.bf16.vlgmr.msra.gmra.mxu0 %v638_v9  ;;  %3767 = vmatmul.bf16.vlgmr.msra.gmra.mxu1 %v639_v13  ;;  %v7430_v63 = vld [vmem:[%s11813_s1 + $0x244] sm:$0xf]  ;;  %v5461_v4 = vor.u32 %v7498_v57, %v5458_v58  ;;  %v5314_v7 = vld [vmem:[%s11813_s1 + $0x350] sm:$0xf0] }
  0xaf   :  { %3798 = vmatpush.bf16.msrb.mxu0 %v5269_v59  ;;  %3811 = vmatpush.bf16.msrb.mxu1 %v5397_v61  ;;  %v7530_v59 = vld [vmem:[%s11813_s1 + $0x564] sm:$0xf]  ;;  %v5586_v61 = vld [vmem:[%s11813_s1 + $0x570] sm:$0xf0] }
  0xb0   :  { %3824 = vmatpush.bf16.msrb.mxu2 %v5525_v62  ;;  %3837 = vmatpush.bf16.msrb.mxu3 %v5653_v5  ;;  %v5205_v62 = vor.u32 %v7434_v52, %v5202_v53  ;;  %v5186_v5 = vld [vmem:[%s11813_s1 + $0x250] sm:$0xf0]  ;;  %v7462_v6 = vld [vmem:[%s11813_s1 + $0x344] sm:$0xf]  ;;  %v5589_v8 = vor.u32 %v7530_v59, %v5586_v61 }
  0xb1   :  { %3780 = vmatmul.bf16.vlgmr.msra.gmra.mxu2 %v8373_v28  ;;  %3793 = vmatmul.bf16.vlgmr.msra.gmra.mxu3 %v8383_v34  ;;  %v7494_v9 = vld [vmem:[%s11813_s1 + $0x444] sm:$0xf]  ;;  %v5442_v10 = vld [vmem:[%s11813_s1 + $0x450] sm:$0xf0]  ;;  %v5317_v20 = vor.u32 %v7462_v6, %v5314_v7 }
  0xb2   :  { %v7526_v13 = vld [vmem:[%s11813_s1 + $0x544] sm:$0xf]  ;;  %v5445_v21 = vor.u32 %v7494_v9, %v5442_v10  ;;  %v5170_v22 = vld [vmem:[%s11813_s1 + $0x230] sm:$0xf0] }
  0xb3   :  { %3799 = vmatpush.bf16.msrb.mxu0 %v5253_v14  ;;  %3812 = vmatpush.bf16.msrb.mxu1 %v5381_v18  ;;  %v5570_v14 = vld [vmem:[%s11813_s1 + $0x550] sm:$0xf0]  ;;  %v5189_v18 = vor.u32 %v7430_v63, %v5186_v5  ;;  %v7490_v30 = vld [vmem:[%s11813_s1 + $0x424] sm:$0xf] }
  0xb4   :  { %3825 = vmatpush.bf16.msrb.mxu2 %v5509_v19  ;;  %3838 = vmatpush.bf16.msrb.mxu3 %v5637_v23  ;;  %v7426_v19 = vld [vmem:[%s11813_s1 + $0x224] sm:$0xf]  ;;  %v5573_v25 = vor.u32 %v7526_v13, %v5570_v14  ;;  %v5298_v26 = vld [vmem:[%s11813_s1 + $0x330] sm:$0xf0] }
  0xb5   :  { %v7458_v23 = vld [vmem:[%s11813_s1 + $0x324] sm:$0xf]  ;;  %v5426_v31 = vld [vmem:[%s11813_s1 + $0x430] sm:$0xf0]  ;;  %v3547_v38 = vpop.f32.mrf.mxu0 }
  0xb6   :  { %v7422_v36 = vld [vmem:[%s11813_s1 + $0x204] sm:$0xf]  ;;  %v5154_v37 = vld [vmem:[%s11813_s1 + $0x210] sm:$0xf0]  ;;  %v5429_v40 = vor.u32 %v7490_v30, %v5426_v31  ;;  %v3548_v44 = vadd.f32 %v3547_v38, %v608_v24 }
  0xb7   :  { %3800 = vmatpush.bf16.msrb.mxu0 %v5237_v32  ;;  %3813 = vmatpush.bf16.msrb.mxu1 %v5365_v33  ;;  %v7522_v32 = vld [vmem:[%s11813_s1 + $0x524] sm:$0xf]  ;;  %v5554_v33 = vld [vmem:[%s11813_s1 + $0x530] sm:$0xf0]  ;;  %v5157_v58 = vor.u32 %v7422_v36, %v5154_v37 }
  0xb8   :  { %3826 = vmatpush.bf16.msrb.mxu2 %v5493_v35  ;;  %3839 = vmatpush.bf16.msrb.mxu3 %v5621_v39  ;;  %v5173_v35 = vor.u32 %v7426_v19, %v5170_v22  ;;  %v5301_v39 = vor.u32 %v7458_v23, %v5298_v26  ;;  %v7454_v41 = vld [vmem:[%s11813_s1 + $0x304] sm:$0xf]  ;;  %v5282_v42 = vld [vmem:[%s11813_s1 + $0x310] sm:$0xf0] }
  0xb9   :  { %v7486_v43 = vld [vmem:[%s11813_s1 + $0x404] sm:$0xf]  ;;  %v5538_v53 = vld [vmem:[%s11813_s1 + $0x510] sm:$0xf0]  ;;  %v5285_v63 = vor.u32 %v7454_v41, %v5282_v42 }
  0xba   :  { %v7518_v52 = vld [vmem:[%s11813_s1 + $0x504] sm:$0xf]  ;;  %v5906_v59 = vld [vmem:[%s11813_s1 + $0x7f0] sm:$0xf0]  ;;  %v3573_v6 = vpop.f32.mrf.mxu2 }
  0xbb   :  { %3801 = vmatpush.bf16.msrb.mxu0 %v5221_v45  ;;  %3814 = vmatpush.bf16.msrb.mxu1 %v5349_v50  ;;  %v3560_v45 = vpop.f32.mrf.mxu1  ;;  %v5557_v50 = vor.u32 %v7522_v32, %v5554_v33  ;;  %v7578_v54 = vld [vmem:[%s11813_s1 + $0x6e4] sm:$0xf]  ;;  %v6162_v5 = vld [vmem:[%s11813_s1 + $0x9f0] sm:$0xf0]  ;;  %v5541_v7 = vor.u32 %v7518_v52, %v5538_v53 }
  0xbc   :  { %3827 = vmatpush.bf16.msrb.mxu2 %v5477_v51  ;;  %3840 = vmatpush.bf16.msrb.mxu3 %v5605_v55  ;;  %v5410_v51 = vld [vmem:[%s11813_s1 + $0x410] sm:$0xf0]  ;;  %v7610_v56 = vld [vmem:[%s11813_s1 + $0x7e4] sm:$0xf]  ;;  %v3561_v57 = vadd.f32 %v3560_v45, %v3548_v44  ;;  %v3586_v10 = vpop.f32.mrf.mxu3 }
  0xbd   :  { %v5778_v55 = vld [vmem:[%s11813_s1 + $0x6f0] sm:$0xf0]  ;;  %v7642_v61 = vld [vmem:[%s11813_s1 + $0x8e4] sm:$0xf]  ;;  %v5909_v11 = vor.u32 %v7610_v56, %v5906_v59 }
  0xbe   :  { %v3574_v9 = vadd.f32 %v3573_v6, %v3561_v57  ;;  %v7574_v14 = vld [vmem:[%s11813_s1 + $0x6c4] sm:$0xf]  ;;  %v6018_v23 = vld [vmem:[%s11813_s1 + $0x8d0] sm:$0xf0] }
  0xbf   :  { %3802 = vmatpush.bf16.msrb.mxu0 %v5205_v62  ;;  %3815 = vmatpush.bf16.msrb.mxu1 %v5333_v3  ;;  %v6034_v62 = vld [vmem:[%s11813_s1 + $0x8f0] sm:$0xf0]  ;;  %v5413_v3 = vor.u32 %v7486_v43, %v5410_v51  ;;  %v7606_v19 = vld [vmem:[%s11813_s1 + $0x7c4] sm:$0xf] }
  0xc0   :  { %3828 = vmatpush.bf16.msrb.mxu2 %v5461_v4  ;;  %3841 = vmatpush.bf16.msrb.mxu3 %v5589_v8  ;;  %v7674_v4 = vld [vmem:[%s11813_s1 + $0x9e4] sm:$0xf]  ;;  %v5781_v8 = vor.u32 %v7578_v54, %v5778_v55  ;;  %v6037_v13 = vor.u32 %v7642_v61, %v6034_v62  ;;  %v3587_v24 = vadd.f32 %v3586_v10, %v3574_v9  ;;  %v6146_v30 = vld [vmem:[%s11813_s1 + $0x9d0] sm:$0xf0] }
  0xc1   :  { %v7638_v22 = vld [vmem:[%s11813_s1 + $0x8c4] sm:$0xf]  ;;  %v5746_v37 = vld [vmem:[%s11813_s1 + $0x6b0] sm:$0xf0] }
  0xc2   :  { %v7670_v26 = vld [vmem:[%s11813_s1 + $0x9c4] sm:$0xf]  ;;  %v6002_v42 = vld [vmem:[%s11813_s1 + $0x8b0] sm:$0xf0]  ;;  %v3575_v45 = vpop.f32.mrf.mxu2 }
  0xc3   :  { %3803 = vmatpush.bf16.msrb.mxu0 %v5189_v18  ;;  %3816 = vmatpush.bf16.msrb.mxu1 %v5317_v20  ;;  %v5762_v18 = vld [vmem:[%s11813_s1 + $0x6d0] sm:$0xf0]  ;;  %v6165_v20 = vor.u32 %v7674_v4, %v6162_v5  ;;  %v3562_v31 = vpop.f32.mrf.mxu1  ;;  %v7570_v36 = vld [vmem:[%s11813_s1 + $0x6a4] sm:$0xf] }
  0xc4   :  { %3829 = vmatpush.bf16.msrb.mxu2 %v5445_v21  ;;  %3842 = vmatpush.bf16.msrb.mxu3 %v5573_v25  ;;  %v5890_v21 = vld [vmem:[%s11813_s1 + $0x7d0] sm:$0xf0]  ;;  %v3549_v25 = vpop.f32.mrf.mxu0  ;;  %v5765_v32 = vor.u32 %v7574_v14, %v5762_v18  ;;  %v7602_v38 = vld [vmem:[%s11813_s1 + $0x7a4] sm:$0xf]  ;;  %v3588_v51 = vpop.f32.mrf.mxu3 }
  0xc5   :  { %v5893_v33 = vor.u32 %v7606_v19, %v5890_v21  ;;  %v7634_v41 = vld [vmem:[%s11813_s1 + $0x8a4] sm:$0xf]  ;;  %v6130_v44 = vld [vmem:[%s11813_s1 + $0x9b0] sm:$0xf0] }
  0xc6   :  { %v7666_v43 = vld [vmem:[%s11813_s1 + $0x9a4] sm:$0xf]  ;;  %v6005_v53 = vor.u32 %v7634_v41, %v6002_v42  ;;  %v5730_v55 = vld [vmem:[%s11813_s1 + $0x690] sm:$0xf0] }
  0xc7   :  { %3804 = vmatpush.bf16.msrb.mxu0 %v5173_v35  ;;  %3817 = vmatpush.bf16.msrb.mxu1 %v5301_v39  ;;  %v6021_v35 = vor.u32 %v7638_v22, %v6018_v23  ;;  %v6149_v39 = vor.u32 %v7670_v26, %v6146_v30  ;;  %v7566_v54 = vld [vmem:[%s11813_s1 + $0x684] sm:$0xf]  ;;  %v6133_v57 = vor.u32 %v7666_v43, %v6130_v44  ;;  %v5986_v61 = vld [vmem:[%s11813_s1 + $0x890] sm:$0xf0] }
  0xc8   :  { %3830 = vmatpush.bf16.msrb.mxu2 %v5429_v40  ;;  %3843 = vmatpush.bf16.msrb.mxu3 %v5557_v50  ;;  %v5874_v40 = vld [vmem:[%s11813_s1 + $0x7b0] sm:$0xf0]  ;;  %v5749_v50 = vor.u32 %v7570_v36, %v5746_v37  ;;  %v7598_v56 = vld [vmem:[%s11813_s1 + $0x784] sm:$0xf] }
  0xc9   :  { %v5877_v52 = vor.u32 %v7602_v38, %v5874_v40  ;;  %v7630_v59 = vld [vmem:[%s11813_s1 + $0x884] sm:$0xf]  ;;  %v5842_v14 = vld [vmem:[%s11813_s1 + $0x770] sm:$0xf0] }
  0xca   :  { %v7662_v62 = vld [vmem:[%s11813_s1 + $0x984] sm:$0xf]  ;;  %v5989_v6 = vor.u32 %v7630_v59, %v5986_v61  ;;  %v5970_v19 = vld [vmem:[%s11813_s1 + $0x870] sm:$0xf0] }
  0xcb   :  { %3805 = vmatpush.bf16.msrb.mxu0 %v5157_v58  ;;  %3818 = vmatpush.bf16.msrb.mxu1 %v5285_v63  ;;  %v5858_v58 = vld [vmem:[%s11813_s1 + $0x790] sm:$0xf0]  ;;  %v7594_v9 = vld [vmem:[%s11813_s1 + $0x764] sm:$0xf] }
  0xcc   :  { %3831 = vmatpush.bf16.msrb.mxu2 %v5413_v3  ;;  %3844 = vmatpush.bf16.msrb.mxu3 %v5541_v7  ;;  %v6114_v63 = vld [vmem:[%s11813_s1 + $0x990] sm:$0xf0]  ;;  %v5733_v3 = vor.u32 %v7566_v54, %v5730_v55  ;;  %v3599_v4 = vpop.f32.mrf.mxu0  ;;  %v5861_v5 = vor.u32 %v7598_v56, %v5858_v58  ;;  %v7562_v7 = vld [vmem:[%s11813_s1 + $0x664] sm:$0xf] }
  0xcd   :  { %v3600_v10 = vadd.f32 %v3599_v4, %v3587_v24  ;;  %v7626_v18 = vld [vmem:[%s11813_s1 + $0x864] sm:$0xf]  ;;  %v6098_v21 = vld [vmem:[%s11813_s1 + $0x970] sm:$0xf0]  ;;  %v5845_v24 = vor.u32 %v7594_v9, %v5842_v14 }
  0xce   :  { %3806 = vmatmul.bf16.vlgmr.msrb.gmra.mxu0 %v8371_v27  ;;  %3819 = vmatmul.bf16.vlgmr.msrb.gmra.mxu1 %v8375_v29  ;;  %v5973_v25 = vor.u32 %v7626_v18, %v5970_v19  ;;  %v7558_v26 = vld [vmem:[%s11813_s1 + $0x644] sm:$0xf]  ;;  %v5698_v30 = vld [vmem:[%s11813_s1 + $0x650] sm:$0xf0] }
  0xcf   :  { %3850 = vmatpush.bf16.msra.mxu0 %v5781_v8  ;;  %3863 = vmatpush.bf16.msra.mxu1 %v5909_v11  ;;  %v5714_v8 = vld [vmem:[%s11813_s1 + $0x670] sm:$0xf0]  ;;  %v3612_v11 = vpop.f32.mrf.mxu1  ;;  %v7590_v31 = vld [vmem:[%s11813_s1 + $0x744] sm:$0xf]  ;;  %v5701_v42 = vor.u32 %v7558_v26, %v5698_v30 }
  0xd0   :  { %3876 = vmatpush.bf16.msra.mxu2 %v6037_v13  ;;  %3889 = vmatpush.bf16.msra.mxu3 %v6165_v20  ;;  %v6117_v13 = vor.u32 %v7662_v62, %v6114_v63  ;;  %v7658_v20 = vld [vmem:[%s11813_s1 + $0x964] sm:$0xf]  ;;  %v3613_v22 = vadd.f32 %v3612_v11, %v3600_v10  ;;  %v5717_v23 = vor.u32 %v7562_v7, %v5714_v8  ;;  %v5954_v37 = vld [vmem:[%s11813_s1 + $0x850] sm:$0xf0] }
  0xd1   :  { %3832 = vmatmul.bf16.vlgmr.msrb.gmra.mxu2 %v8451_v0  ;;  %3845 = vmatmul.bf16.vlgmr.msrb.gmra.mxu3 %v8455_v2  ;;  %v7622_v36 = vld [vmem:[%s11813_s1 + $0x844] sm:$0xf]  ;;  %v6082_v41 = vld [vmem:[%s11813_s1 + $0x950] sm:$0xf0] }
  0xd2   :  { %v7654_v40 = vld [vmem:[%s11813_s1 + $0x944] sm:$0xf]  ;;  %v5810_v56 = vld [vmem:[%s11813_s1 + $0x730] sm:$0xf0] }
  0xd3   :  { %3851 = vmatpush.bf16.msra.mxu0 %v5765_v32  ;;  %3864 = vmatpush.bf16.msra.mxu1 %v5893_v33  ;;  %v3625_v32 = vpop.f32.mrf.mxu2  ;;  %v6101_v33 = vor.u32 %v7658_v20, %v6098_v21  ;;  %v7554_v51 = vld [vmem:[%s11813_s1 + $0x624] sm:$0xf]  ;;  %v6085_v55 = vor.u32 %v7654_v40, %v6082_v41  ;;  %v5938_v58 = vld [vmem:[%s11813_s1 + $0x830] sm:$0xf0] }
  0xd4   :  { %3877 = vmatpush.bf16.msra.mxu2 %v6021_v35  ;;  %3890 = vmatpush.bf16.msra.mxu3 %v6149_v39  ;;  %v5826_v35 = vld [vmem:[%s11813_s1 + $0x750] sm:$0xf0]  ;;  %v3626_v38 = vadd.f32 %v3625_v32, %v3613_v22  ;;  %v3638_v39 = vpop.f32.mrf.mxu3  ;;  %v3601_v44 = vpop.f32.mrf.mxu0  ;;  %v7650_v59 = vld [vmem:[%s11813_s1 + $0x924] sm:$0xf] }
  0xd5   :  { %v5829_v45 = vor.u32 %v7590_v31, %v5826_v35  ;;  %v6066_v61 = vld [vmem:[%s11813_s1 + $0x930] sm:$0xf0]  ;;  %v7550_v63 = vld [vmem:[%s11813_s1 + $0x604] sm:$0xf] }
  0xd6   :  { %v9415_v43 = vadd.f32 %v3638_v39, %v3626_v38  ;;  %v5794_v7 = vld [vmem:[%s11813_s1 + $0x710] sm:$0xf0]  ;;  %v7614_v8 = vld [vmem:[%s11813_s1 + $0x804] sm:$0xf]  ;;  %v6069_v10 = vor.u32 %v7650_v59, %v6066_v61 }
  0xd7   :  { %3852 = vmatpush.bf16.msra.mxu0 %v5749_v50  ;;  %3865 = vmatpush.bf16.msra.mxu1 %v5877_v52  ;;  %v5957_v50 = vor.u32 %v7622_v36, %v5954_v37  ;;  %v5682_v52 = vld [vmem:[%s11813_s1 + $0x630] sm:$0xf0]  ;;  %v3614_v54 = vpop.f32.mrf.mxu1  ;;  %v7706_v19 = vld [vmem:[%s11813_s1 + $0xae4] sm:$0xf] }
  0xd8   :  { %3878 = vmatpush.bf16.msra.mxu2 %v6005_v53  ;;  %3891 = vmatpush.bf16.msra.mxu3 %v6133_v57  ;;  %v7586_v53 = vld [vmem:[%s11813_s1 + $0x724] sm:$0xf]  ;;  %v5685_v62 = vor.u32 %v7554_v51, %v5682_v52  ;;  %v5922_v11 = vld [vmem:[%s11813_s1 + $0x810] sm:$0xf0] }
  0xd9   :  { %v7618_v57 = vld [vmem:[%s11813_s1 + $0x824] sm:$0xf]  ;;  %v5813_v4 = vor.u32 %v7586_v53, %v5810_v56  ;;  %v6050_v14 = vld [vmem:[%s11813_s1 + $0x910] sm:$0xf0]  ;;  %v5925_v30 = vor.u32 %v7614_v8, %v5922_v11 }
  0xda   :  { %v6290_v20 = vld [vmem:[%s11813_s1 + $0xaf0] sm:$0xf0]  ;;  %v7738_v21 = vld [vmem:[%s11813_s1 + $0xbe4] sm:$0xf] }
  0xdb   :  { %3853 = vmatpush.bf16.msra.mxu0 %v5733_v3  ;;  %3866 = vmatpush.bf16.msra.mxu1 %v5861_v5  ;;  %v5666_v3 = vld [vmem:[%s11813_s1 + $0x610] sm:$0xf0]  ;;  %v5941_v5 = vor.u32 %v7618_v57, %v5938_v58  ;;  %v3627_v9 = vpop.f32.mrf.mxu2  ;;  %v7802_v31 = vld [vmem:[%s11813_s1 + $0xde4] sm:$0xf]  ;;  %v6293_v35 = vor.u32 %v7706_v19, %v6290_v20 }
  0xdc   :  { %3879 = vmatpush.bf16.msra.mxu2 %v5989_v6  ;;  %3892 = vmatpush.bf16.msra.mxu3 %v6117_v13  ;;  %v7582_v6 = vld [vmem:[%s11813_s1 + $0x704] sm:$0xf]  ;;  %v3640_v18 = vpop.f32.mrf.mxu3  ;;  %v5669_v22 = vor.u32 %v7550_v63, %v5666_v3  ;;  %v6674_v32 = vld [vmem:[%s11813_s1 + $0xdf0] sm:$0xf0] }
  0xdd   :  { %v7646_v13 = vld [vmem:[%s11813_s1 + $0x904] sm:$0xf]  ;;  %v5797_v26 = vor.u32 %v7582_v6, %v5794_v7  ;;  %v6274_v39 = vld [vmem:[%s11813_s1 + $0xad0] sm:$0xf0]  ;;  %v6677_v41 = vor.u32 %v7802_v31, %v6674_v32 }
  0xde   :  { %v7702_v38 = vld [vmem:[%s11813_s1 + $0xac4] sm:$0xf]  ;;  %v6658_v51 = vld [vmem:[%s11813_s1 + $0xdd0] sm:$0xf0] }
  0xdf   :  { %3854 = vmatpush.bf16.msra.mxu0 %v5717_v23  ;;  %3867 = vmatpush.bf16.msra.mxu1 %v5845_v24  ;;  %v6418_v23 = vld [vmem:[%s11813_s1 + $0xbf0] sm:$0xf0]  ;;  %v7770_v24 = vld [vmem:[%s11813_s1 + $0xce4] sm:$0xf]  ;;  %v6277_v52 = vor.u32 %v7702_v38, %v6274_v39 }
  0xe0   :  { %3880 = vmatpush.bf16.msra.mxu2 %v5973_v25  ;;  %3893 = vmatpush.bf16.msra.mxu3 %v6101_v33  ;;  %v6546_v25 = vld [vmem:[%s11813_s1 + $0xcf0] sm:$0xf0]  ;;  %v6053_v33 = vor.u32 %v7646_v13, %v6050_v14  ;;  %v6421_v36 = vor.u32 %v7738_v21, %v6418_v23  ;;  %v7734_v40 = vld [vmem:[%s11813_s1 + $0xbc4] sm:$0xf] }
  0xe1   :  { %v6549_v37 = vor.u32 %v7770_v24, %v6546_v25  ;;  %v7766_v44 = vld [vmem:[%s11813_s1 + $0xcc4] sm:$0xf]  ;;  %v6258_v56 = vld [vmem:[%s11813_s1 + $0xab0] sm:$0xf0] }
  0xe2   :  { %v7730_v57 = vld [vmem:[%s11813_s1 + $0xba4] sm:$0xf]  ;;  %v6386_v59 = vld [vmem:[%s11813_s1 + $0xbb0] sm:$0xf0] }
  0xe3   :  { %3855 = vmatpush.bf16.msra.mxu0 %v5701_v42  ;;  %3868 = vmatpush.bf16.msra.mxu1 %v5829_v45  ;;  %v6402_v42 = vld [vmem:[%s11813_s1 + $0xbd0] sm:$0xf0]  ;;  %v7762_v61 = vld [vmem:[%s11813_s1 + $0xca4] sm:$0xf] }
  0xe4   :  { %3881 = vmatpush.bf16.msra.mxu2 %v5957_v50  ;;  %3894 = vmatpush.bf16.msra.mxu3 %v6085_v55  ;;  %v6530_v45 = vld [vmem:[%s11813_s1 + $0xcd0] sm:$0xf0]  ;;  %v7798_v50 = vld [vmem:[%s11813_s1 + $0xdc4] sm:$0xf]  ;;  %v6405_v53 = vor.u32 %v7734_v40, %v6402_v42 }
  0xe5   :  { %v6533_v54 = vor.u32 %v7766_v44, %v6530_v45  ;;  %v7698_v55 = vld [vmem:[%s11813_s1 + $0xaa4] sm:$0xf]  ;;  %v6661_v58 = vor.u32 %v7798_v50, %v6658_v51  ;;  %v6642_v3 = vld [vmem:[%s11813_s1 + $0xdb0] sm:$0xf0] }
  0xe6   :  { %v7794_v63 = vld [vmem:[%s11813_s1 + $0xda4] sm:$0xf]  ;;  %v6242_v8 = vld [vmem:[%s11813_s1 + $0xa90] sm:$0xf0] }
  0xe7   :  { %3856 = vmatpush.bf16.msra.mxu0 %v5685_v62  ;;  %3869 = vmatpush.bf16.msra.mxu1 %v5813_v4  ;;  %v6514_v62 = vld [vmem:[%s11813_s1 + $0xcb0] sm:$0xf0]  ;;  %v6261_v4 = vor.u32 %v7698_v55, %v6258_v56  ;;  %v7694_v7 = vld [vmem:[%s11813_s1 + $0xa84] sm:$0xf] }
  0xe8   :  { %3882 = vmatpush.bf16.msra.mxu2 %v5941_v5  ;;  %3895 = vmatpush.bf16.msra.mxu3 %v6069_v10  ;;  %v6389_v5 = vor.u32 %v7730_v57, %v6386_v59  ;;  %v6517_v6 = vor.u32 %v7762_v61, %v6514_v62  ;;  %v7726_v9 = vld [vmem:[%s11813_s1 + $0xb84] sm:$0xf]  ;;  %v6645_v10 = vor.u32 %v7794_v63, %v6642_v3  ;;  %v6370_v11 = vld [vmem:[%s11813_s1 + $0xb90] sm:$0xf0] }
  0xe9   :  { %v7758_v13 = vld [vmem:[%s11813_s1 + $0xc84] sm:$0xf]  ;;  %v6498_v14 = vld [vmem:[%s11813_s1 + $0xc90] sm:$0xf0]  ;;  %v3664_v23 = vpop.f32.mrf.mxu1  ;;  %v6373_v24 = vor.u32 %v7726_v9, %v6370_v11 }
  0xea   :  { %v3651_v18 = vpop.f32.mrf.mxu0  ;;  %v7790_v19 = vld [vmem:[%s11813_s1 + $0xd84] sm:$0xf]  ;;  %v6626_v20 = vld [vmem:[%s11813_s1 + $0xd90] sm:$0xf0]  ;;  %v6501_v25 = vor.u32 %v7758_v13, %v6498_v14 }
  0xeb   :  { %3857 = vmatpush.bf16.msra.mxu0 %v5669_v22  ;;  %3870 = vmatpush.bf16.msra.mxu1 %v5797_v26  ;;  %v3652_v21 = vadd.f32 %v3651_v18, %v9415_v43  ;;  %v6245_v22 = vor.u32 %v7694_v7, %v6242_v8  ;;  %v7690_v26 = vld [vmem:[%s11813_s1 + $0xa64] sm:$0xf]  ;;  %v6629_v43 = vor.u32 %v7790_v19, %v6626_v20  ;;  %v6610_v38 = vld [vmem:[%s11813_s1 + $0xd70] sm:$0xf0] }
  0xec   :  { %3883 = vmatpush.bf16.msra.mxu2 %v5925_v30  ;;  %3896 = vmatpush.bf16.msra.mxu3 %v6053_v33  ;;  %v6226_v30 = vld [vmem:[%s11813_s1 + $0xa70] sm:$0xf0]  ;;  %v7722_v31 = vld [vmem:[%s11813_s1 + $0xb64] sm:$0xf] }
  0xed   :  { %v3665_v32 = vadd.f32 %v3664_v23, %v3652_v21  ;;  %v6354_v33 = vld [vmem:[%s11813_s1 + $0xb70] sm:$0xf0]  ;;  %v6229_v39 = vor.u32 %v7690_v26, %v6226_v30  ;;  %v7686_v42 = vld [vmem:[%s11813_s1 + $0xa44] sm:$0xf] }
  0xee   :  { %3858 = vmatmul.bf16.vlgmr.msra.gmra.mxu0 %v8446_v60  ;;  %3871 = vmatmul.bf16.vlgmr.msra.gmra.mxu1 %v8453_v1  ;;  %v6357_v40 = vor.u32 %v7722_v31, %v6354_v33  ;;  %v6210_v44 = vld [vmem:[%s11813_s1 + $0xa50] sm:$0xf0]  ;;  %v7718_v45 = vld [vmem:[%s11813_s1 + $0xb44] sm:$0xf] }
  0xef   :  { %3902 = vmatpush.bf16.msrb.mxu0 %v6293_v35  ;;  %3915 = vmatpush.bf16.msrb.mxu1 %v6421_v36  ;;  %v7754_v35 = vld [vmem:[%s11813_s1 + $0xc64] sm:$0xf]  ;;  %v6482_v36 = vld [vmem:[%s11813_s1 + $0xc70] sm:$0xf0]  ;;  %v3677_v51 = vpop.f32.mrf.mxu2  ;;  %v6213_v61 = vor.u32 %v7686_v42, %v6210_v44 }
  0xf0   :  { %3928 = vmatpush.bf16.msrb.mxu2 %v6549_v37  ;;  %3941 = vmatpush.bf16.msrb.mxu3 %v6677_v41  ;;  %v7786_v37 = vld [vmem:[%s11813_s1 + $0xd64] sm:$0xf]  ;;  %v6485_v41 = vor.u32 %v7754_v35, %v6482_v36  ;;  %v3678_v55 = vadd.f32 %v3677_v51, %v3665_v32  ;;  %v6322_v9 = vld [vmem:[%s11813_s1 + $0xb30] sm:$0xf0] }
  0xf1   :  { %3884 = vmatmul.bf16.vlgmr.msra.gmra.mxu2 %v8701_v12  ;;  %3897 = vmatmul.bf16.vlgmr.msra.gmra.mxu3 %v8711_v16  ;;  %v6613_v50 = vor.u32 %v7786_v37, %v6610_v38  ;;  %v7782_v57 = vld [vmem:[%s11813_s1 + $0xd44] sm:$0xf]  ;;  %v3666_v62 = vpop.f32.mrf.mxu1  ;;  %v6450_v11 = vld [vmem:[%s11813_s1 + $0xc30] sm:$0xf0] }
  0xf2   :  { %v3690_v56 = vpop.f32.mrf.mxu3  ;;  %v3653_v59 = vpop.f32.mrf.mxu0  ;;  %v7714_v7 = vld [vmem:[%s11813_s1 + $0xb24] sm:$0xf]  ;;  %v6578_v14 = vld [vmem:[%s11813_s1 + $0xd30] sm:$0xf0] }
  0xf3   :  { %3903 = vmatpush.bf16.msrb.mxu0 %v6277_v52  ;;  %3916 = vmatpush.bf16.msrb.mxu1 %v6405_v53  ;;  %v6338_v52 = vld [vmem:[%s11813_s1 + $0xb50] sm:$0xf0]  ;;  %v7750_v53 = vld [vmem:[%s11813_s1 + $0xc44] sm:$0xf]  ;;  %v9614_v63 = vadd.f32 %v3690_v56, %v3678_v55  ;;  %v6325_v21 = vor.u32 %v7714_v7, %v6322_v9 }
  0xf4   :  { %3929 = vmatpush.bf16.msrb.mxu2 %v6533_v54  ;;  %3942 = vmatpush.bf16.msrb.mxu3 %v6661_v58  ;;  %v6466_v54 = vld [vmem:[%s11813_s1 + $0xc50] sm:$0xf0]  ;;  %v6341_v3 = vor.u32 %v7718_v45, %v6338_v52  ;;  %v7778_v13 = vld [vmem:[%s11813_s1 + $0xd24] sm:$0xf] }
  0xf5   :  { %v6594_v58 = vld [vmem:[%s11813_s1 + $0xd50] sm:$0xf0]  ;;  %v7678_v19 = vld [vmem:[%s11813_s1 + $0xa04] sm:$0xf]  ;;  %v6581_v26 = vor.u32 %v7778_v13, %v6578_v14 }
  0xf6   :  { %v6597_v8 = vor.u32 %v7782_v57, %v6594_v58  ;;  %v6178_v20 = vld [vmem:[%s11813_s1 + $0xa10] sm:$0xf0]  ;;  %v7710_v23 = vld [vmem:[%s11813_s1 + $0xb04] sm:$0xf] }
  0xf7   :  { %3904 = vmatpush.bf16.msrb.mxu0 %v6261_v4  ;;  %3917 = vmatpush.bf16.msrb.mxu1 %v6389_v5  ;;  %v6469_v4 = vor.u32 %v7750_v53, %v6466_v54  ;;  %v7682_v5 = vld [vmem:[%s11813_s1 + $0xa24] sm:$0xf]  ;;  %v6434_v30 = vld [vmem:[%s11813_s1 + $0xc10] sm:$0xf0]  ;;  %v3679_v32 = vpop.f32.mrf.mxu2  ;;  %v6181_v38 = vor.u32 %v7678_v19, %v6178_v20 }
  0xf8   :  { %3930 = vmatpush.bf16.msrb.mxu2 %v6517_v6  ;;  %3943 = vmatpush.bf16.msrb.mxu3 %v6645_v10  ;;  %v6194_v6 = vld [vmem:[%s11813_s1 + $0xa30] sm:$0xf0]  ;;  %v7746_v10 = vld [vmem:[%s11813_s1 + $0xc24] sm:$0xf] }
  0xf9   :  { %v6197_v18 = vor.u32 %v7682_v5, %v6194_v6  ;;  %v7774_v31 = vld [vmem:[%s11813_s1 + $0xd04] sm:$0xf]  ;;  %v6802_v35 = vld [vmem:[%s11813_s1 + $0xef0] sm:$0xf0] }
  0xfa   :  { %v7834_v33 = vld [vmem:[%s11813_s1 + $0xee4] sm:$0xf]  ;;  %v3692_v37 = vpop.f32.mrf.mxu3  ;;  %v6786_v56 = vld [vmem:[%s11813_s1 + $0xed0] sm:$0xf0] }
  0xfb   :  { %3905 = vmatpush.bf16.msrb.mxu0 %v6245_v22  ;;  %3918 = vmatpush.bf16.msrb.mxu1 %v6373_v24  ;;  %v6453_v22 = vor.u32 %v7746_v10, %v6450_v11  ;;  %v6306_v24 = vld [vmem:[%s11813_s1 + $0xb10] sm:$0xf0]  ;;  %v7866_v36 = vld [vmem:[%s11813_s1 + $0xfe4] sm:$0xf]  ;;  %v6805_v52 = vor.u32 %v7834_v33, %v6802_v35 }
  0xfc   :  { %3931 = vmatpush.bf16.msrb.mxu2 %v6501_v25  ;;  %3944 = vmatpush.bf16.msrb.mxu3 %v6629_v43  ;;  %v7742_v25 = vld [vmem:[%s11813_s1 + $0xc04] sm:$0xf]  ;;  %v6562_v43 = vld [vmem:[%s11813_s1 + $0xd10] sm:$0xf0]  ;;  %v6309_v42 = vor.u32 %v7710_v23, %v6306_v24 }
  0xfd   :  { %v6437_v44 = vor.u32 %v7742_v25, %v6434_v30  ;;  %v7930_v45 = vld [vmem:[%s11813_s1 + $0x11e4] sm:$0xf]  ;;  %v6565_v51 = vor.u32 %v7774_v31, %v6562_v43  ;;  %v6914_v59 = vld [vmem:[%s11813_s1 + $0xfd0] sm:$0xf0] }
  0xfe   :  { %v7830_v55 = vld [vmem:[%s11813_s1 + $0xec4] sm:$0xf]  ;;  %v7042_v62 = vld [vmem:[%s11813_s1 + $0x10d0] sm:$0xf0] }
  0xff   :  { %3906 = vmatpush.bf16.msrb.mxu0 %v6229_v39  ;;  %3919 = vmatpush.bf16.msrb.mxu1 %v6357_v40  ;;  %v6930_v39 = vld [vmem:[%s11813_s1 + $0xff0] sm:$0xf0]  ;;  %v7898_v40 = vld [vmem:[%s11813_s1 + $0x10e4] sm:$0xf]  ;;  %v6789_v5 = vor.u32 %v7830_v55, %v6786_v56 }
 0x100   :  { %3932 = vmatpush.bf16.msrb.mxu2 %v6485_v41  ;;  %3945 = vmatpush.bf16.msrb.mxu3 %v6613_v50  ;;  %v7058_v41 = vld [vmem:[%s11813_s1 + $0x10f0] sm:$0xf0]  ;;  %v6933_v53 = vor.u32 %v7866_v36, %v6930_v39  ;;  %v7862_v57 = vld [vmem:[%s11813_s1 + $0xfc4] sm:$0xf] }
 0x101   :  { %v7186_v50 = vld [vmem:[%s11813_s1 + $0x11f0] sm:$0xf0]  ;;  %v7061_v54 = vor.u32 %v7898_v40, %v7058_v41  ;;  %v6917_v6 = vor.u32 %v7862_v57, %v6914_v59  ;;  %v7858_v10 = vld [vmem:[%s11813_s1 + $0xfa4] sm:$0xf] }
 0x102   :  { %v7189_v58 = vor.u32 %v7930_v45, %v7186_v50  ;;  %v6770_v9 = vld [vmem:[%s11813_s1 + $0xeb0] sm:$0xf0]  ;;  %v7890_v14 = vld [vmem:[%s11813_s1 + $0x10a4] sm:$0xf] }
 0x103   :  { %3907 = vmatpush.bf16.msrb.mxu0 %v6213_v61  ;;  %3920 = vmatpush.bf16.msrb.mxu1 %v6341_v3  ;;  %v7894_v61 = vld [vmem:[%s11813_s1 + $0x10c4] sm:$0xf]  ;;  %v6898_v13 = vld [vmem:[%s11813_s1 + $0xfb0] sm:$0xf0] }
 0x104   :  { %3933 = vmatpush.bf16.msrb.mxu2 %v6469_v4  ;;  %3946 = vmatpush.bf16.msrb.mxu3 %v6597_v8  ;;  %v7926_v3 = vld [vmem:[%s11813_s1 + $0x11c4] sm:$0xf]  ;;  %v7170_v4 = vld [vmem:[%s11813_s1 + $0x11d0] sm:$0xf0]  ;;  %v7045_v7 = vor.u32 %v7894_v61, %v7042_v62 }
 0x105   :  { %v7826_v8 = vld [vmem:[%s11813_s1 + $0xea4] sm:$0xf]  ;;  %v7173_v11 = vor.u32 %v7926_v3, %v7170_v4  ;;  %v7154_v20 = vld [vmem:[%s11813_s1 + $0x11b0] sm:$0xf0] }
 0x106   :  { %v7922_v19 = vld [vmem:[%s11813_s1 + $0x11a4] sm:$0xf]  ;;  %v6754_v25 = vld [vmem:[%s11813_s1 + $0xe90] sm:$0xf0] }
 0x107   :  { %3908 = vmatpush.bf16.msrb.mxu0 %v6197_v18  ;;  %3921 = vmatpush.bf16.msrb.mxu1 %v6325_v21  ;;  %v7026_v18 = vld [vmem:[%s11813_s1 + $0x10b0] sm:$0xf0]  ;;  %v6773_v21 = vor.u32 %v7826_v8, %v6770_v9  ;;  %v7822_v24 = vld [vmem:[%s11813_s1 + $0xe84] sm:$0xf]  ;;  %v7157_v30 = vor.u32 %v7922_v19, %v7154_v20 }
 0x108   :  { %3934 = vmatpush.bf16.msrb.mxu2 %v6453_v22  ;;  %3947 = vmatpush.bf16.msrb.mxu3 %v6581_v26  ;;  %v6901_v22 = vor.u32 %v7858_v10, %v6898_v13  ;;  %v7029_v23 = vor.u32 %v7890_v14, %v7026_v18  ;;  %v7854_v26 = vld [vmem:[%s11813_s1 + $0xf84] sm:$0xf]  ;;  %v6882_v31 = vld [vmem:[%s11813_s1 + $0xf90] sm:$0xf0] }
 0x109   :  { %v7886_v43 = vld [vmem:[%s11813_s1 + $0x1084] sm:$0xf]  ;;  %v7010_v32 = vld [vmem:[%s11813_s1 + $0x1090] sm:$0xf0]  ;;  %v6885_v40 = vor.u32 %v7854_v26, %v6882_v31 }
 0x10a   :  { %v7918_v35 = vld [vmem:[%s11813_s1 + $0x1184] sm:$0xf]  ;;  %v7138_v36 = vld [vmem:[%s11813_s1 + $0x1190] sm:$0xf0]  ;;  %v7013_v41 = vor.u32 %v7886_v43, %v7010_v32 }
 0x10b   :  { %3909 = vmatpush.bf16.msrb.mxu0 %v6181_v38  ;;  %3922 = vmatpush.bf16.msrb.mxu1 %v6309_v42  ;;  %v3703_v33 = vpop.f32.mrf.mxu0  ;;  %v6757_v38 = vor.u32 %v7822_v24, %v6754_v25  ;;  %v3716_v39 = vpop.f32.mrf.mxu1  ;;  %v7818_v42 = vld [vmem:[%s11813_s1 + $0xe64] sm:$0xf]  ;;  %v7122_v55 = vld [vmem:[%s11813_s1 + $0x1170] sm:$0xf0] }
 0x10c   :  { %3935 = vmatpush.bf16.msrb.mxu2 %v6437_v44  ;;  %3948 = vmatpush.bf16.msrb.mxu3 %v6565_v51  ;;  %v3704_v37 = vadd.f32 %v3703_v33, %v9614_v63  ;;  %v6738_v44 = vld [vmem:[%s11813_s1 + $0xe70] sm:$0xf0]  ;;  %v7850_v45 = vld [vmem:[%s11813_s1 + $0xf64] sm:$0xf]  ;;  %v7141_v63 = vor.u32 %v7918_v35, %v7138_v36 }
 0x10d   :  { %v6866_v51 = vld [vmem:[%s11813_s1 + $0xf70] sm:$0xf0]  ;;  %v6741_v56 = vor.u32 %v7818_v42, %v6738_v44  ;;  %v7814_v59 = vld [vmem:[%s11813_s1 + $0xe44] sm:$0xf] }
 0x10e   :  { %3910 = vmatmul.bf16.vlgmr.msrb.gmra.mxu0 %v8709_v15  ;;  %3923 = vmatmul.bf16.vlgmr.msrb.gmra.mxu1 %v8713_v17  ;;  %v3717_v50 = vadd.f32 %v3716_v39, %v3704_v37  ;;  %v6869_v57 = vor.u32 %v7850_v45, %v6866_v51  ;;  %v6722_v61 = vld [vmem:[%s11813_s1 + $0xe50] sm:$0xf0]  ;;  %v7846_v62 = vld [vmem:[%s11813_s1 + $0xf44] sm:$0xf]  ;;  %v5016_v51 = vld [vmem:[%s11813_s1 + $0xe8] sm:$0xf] }
 0x10f   :  { %3954 = vmatpush.bf16.msra.mxu0 %v6805_v52  ;;  %3967 = vmatpush.bf16.msra.mxu1 %v6933_v53  ;;  %v7882_v52 = vld [vmem:[%s11813_s1 + $0x1064] sm:$0xf]  ;;  %v6994_v53 = vld [vmem:[%s11813_s1 + $0x1070] sm:$0xf0]  ;;  %v6725_v14 = vor.u32 %v7814_v59, %v6722_v61 }
 0x110   :  { %3980 = vmatpush.bf16.msra.mxu2 %v7061_v54  ;;  %3993 = vmatpush.bf16.msra.mxu3 %v7189_v58  ;;  %v7914_v54 = vld [vmem:[%s11813_s1 + $0x1164] sm:$0xf]  ;;  %v6997_v58 = vor.u32 %v7882_v52, %v6994_v53  ;;  %v6834_v26 = vld [vmem:[%s11813_s1 + $0xf30] sm:$0xf0]  ;;  %v7389_v52 = vld [vmem:[%s11813_s1 + $0xf4] sm:$0xf0] }
 0x111   :  { %3936 = vmatmul.bf16.vlgmr.msrb.gmra.mxu2 %v8875_v46  ;;  %3949 = vmatmul.bf16.vlgmr.msrb.gmra.mxu3 %v8879_v48  ;;  %v7125_v3 = vor.u32 %v7914_v54, %v7122_v55  ;;  %v7910_v10 = vld [vmem:[%s11813_s1 + $0x1144] sm:$0xf]  ;;  %v6962_v31 = vld [vmem:[%s11813_s1 + $0x1030] sm:$0xf0]  ;;  %v5144_v53 = vld [vmem:[%s11813_s1 + $0x1e8] sm:$0xf] }
 0x112   :  { %v7842_v24 = vld [vmem:[%s11813_s1 + $0xf24] sm:$0xf]  ;;  %v7090_v32 = vld [vmem:[%s11813_s1 + $0x1130] sm:$0xf0] }
 0x113   :  { %3955 = vmatpush.bf16.msra.mxu0 %v6789_v5  ;;  %3968 = vmatpush.bf16.msra.mxu1 %v6917_v6  ;;  %v6850_v5 = vld [vmem:[%s11813_s1 + $0xf50] sm:$0xf0]  ;;  %v7878_v6 = vld [vmem:[%s11813_s1 + $0x1044] sm:$0xf]  ;;  %v3705_v13 = vpop.f32.mrf.mxu0  ;;  %v3718_v18 = vpop.f32.mrf.mxu1  ;;  %v6837_v37 = vor.u32 %v7842_v24, %v6834_v26  ;;  %v7381_v26 = vld [vmem:[%s11813_s1 + $0xb4] sm:$0xf0] }
 0x114   :  { %3981 = vmatpush.bf16.msra.mxu2 %v7045_v7  ;;  %3994 = vmatpush.bf16.msra.mxu3 %v7173_v11  ;;  %v3729_v4 = vpop.f32.mrf.mxu2  ;;  %v6978_v7 = vld [vmem:[%s11813_s1 + $0x1050] sm:$0xf0]  ;;  %v3742_v9 = vpop.f32.mrf.mxu3  ;;  %v6853_v20 = vor.u32 %v7846_v62, %v6850_v5  ;;  %v7906_v43 = vld [vmem:[%s11813_s1 + $0x1124] sm:$0xf]  ;;  %v5400_v62 = vld [vmem:[%s11813_s1 + $0x3e8] sm:$0xf]  ;;  %v5017_v5 = vor.u32 %v7389_v52, %v5016_v51 }
 0x115   :  { %v3730_v8 = vadd.f32 %v3729_v4, %v3717_v50  ;;  %v7106_v11 = vld [vmem:[%s11813_s1 + $0x1150] sm:$0xf0]  ;;  %v7806_v35 = vld [vmem:[%s11813_s1 + $0xe04] sm:$0xf]  ;;  %v7093_v42 = vor.u32 %v7906_v43, %v7090_v32  ;;  %v7417_v13 = vld [vmem:[%s11813_s1 + $0x1d4] sm:$0xf0] }
 0x116   :  { %v7109_v25 = vor.u32 %v7910_v10, %v7106_v11  ;;  %v6690_v36 = vld [vmem:[%s11813_s1 + $0xe10] sm:$0xf0]  ;;  %v7838_v39 = vld [vmem:[%s11813_s1 + $0xf04] sm:$0xf]  ;;  %v5128_v10 = vld [vmem:[%s11813_s1 + $0x1c8] sm:$0xf] }
 0x117   :  { %3956 = vmatpush.bf16.msra.mxu0 %v6773_v21  ;;  %3969 = vmatpush.bf16.msra.mxu1 %v6901_v22  ;;  %v9813_v19 = vadd.f32 %v3742_v9, %v3730_v8  ;;  %v6981_v21 = vor.u32 %v7878_v6, %v6978_v7  ;;  %v7810_v22 = vld [vmem:[%s11813_s1 + $0xe24] sm:$0xf]  ;;  %v6946_v44 = vld [vmem:[%s11813_s1 + $0x1010] sm:$0xf0]  ;;  %v6693_v55 = vor.u32 %v7806_v35, %v6690_v36  ;;  %v5000_v8 = vld [vmem:[%s11813_s1 + $0xc8] sm:$0xf] }
 0x118   :  { %3982 = vmatpush.bf16.msra.mxu2 %v7029_v23  ;;  %3995 = vmatpush.bf16.msra.mxu3 %v7157_v30  ;;  %v6706_v23 = vld [vmem:[%s11813_s1 + $0xe30] sm:$0xf0]  ;;  %v7874_v30 = vld [vmem:[%s11813_s1 + $0x1024] sm:$0xf]  ;;  %v7385_v9 = vld [vmem:[%s11813_s1 + $0xd4] sm:$0xf0] }
 0x119   :  { %v6709_v33 = vor.u32 %v7810_v22, %v6706_v23  ;;  %v7902_v45 = vld [vmem:[%s11813_s1 + $0x1104] sm:$0xf]  ;;  %v7449_v18 = vld [vmem:[%s11813_s1 + $0x2d4] sm:$0xf0]  ;;  %v5001_v22 = vor.u32 %v7385_v9, %v5000_v8  ;;  %v5129_v23 = vor.u32 %v7417_v13, %v5128_v10  ;;  %v5240_v32 = vld [vmem:[%s11813_s1 + $0x2a8] sm:$0xf] }
 0x11a   :  { %v7413_v43 = vld [vmem:[%s11813_s1 + $0x1b4] sm:$0xf0]  ;;  %v7977_v35 = vld [vmem:[#allocation1] sm:$0xff]  ;;  %v5368_v36 = vld [vmem:[%s11813_s1 + $0x3a8] sm:$0xf] }
 0x11b   :  { %3957 = vmatpush.bf16.msra.mxu0 %v6757_v38  ;;  %3970 = vmatpush.bf16.msra.mxu1 %v6885_v40  ;;  %v6965_v38 = vor.u32 %v7874_v30, %v6962_v31  ;;  %v6818_v40 = vld [vmem:[%s11813_s1 + $0xf10] sm:$0xf0]  ;;  %v5112_v30 = vld [vmem:[%s11813_s1 + $0x1a8] sm:$0xf]  ;;  %v7441_v52 = vld [vmem:[%s11813_s1 + $0x294] sm:$0xf0] }
 0x11c   :  { %3983 = vmatpush.bf16.msra.mxu2 %v7013_v41  ;;  %3996 = vmatpush.bf16.msra.mxu3 %v7141_v63  ;;  %v7870_v41 = vld [vmem:[%s11813_s1 + $0x1004] sm:$0xf]  ;;  %v7074_v63 = vld [vmem:[%s11813_s1 + $0x1110] sm:$0xf0]  ;;  %v3731_v50 = vpop.f32.mrf.mxu2  ;;  %v3744_v54 = vpop.f32.mrf.mxu3  ;;  %v6821_v59 = vor.u32 %v7838_v39, %v6818_v40  ;;  %v5113_v40 = vor.u32 %v7413_v43, %v5112_v30  ;;  %v5224_v51 = vld [vmem:[%s11813_s1 + $0x288] sm:$0xf] }
 0x11d   :  { %v6949_v61 = vor.u32 %v7870_v41, %v6946_v44  ;;  %v7077_v4 = vor.u32 %v7902_v45, %v7074_v63  ;;  %v7377_v44 = vld [vmem:[%s11813_s1 + $0x94] sm:$0xf0]  ;;  %v5096_v45 = vld [vmem:[%s11813_s1 + $0x188] sm:$0xf] }
 0x11e   :  { %v7409_v50 = vld [vmem:[%s11813_s1 + $0x194] sm:$0xf0]  ;;  %v5352_v54 = vld [vmem:[%s11813_s1 + $0x388] sm:$0xf] }
 0x11f   :  { %3958 = vmatpush.bf16.msra.mxu0 %v6741_v56  ;;  %3971 = vmatpush.bf16.msra.mxu1 %v6869_v57  ;;  %v7421_v56 = vld [vmem:[%s11813_s1 + $0x1f4] sm:$0xf0]  ;;  %v5272_v57 = vld [vmem:[%s11813_s1 + $0x2e8] sm:$0xf] }
 0x120   :  { %3984 = vmatpush.bf16.msra.mxu2 %v6997_v58  ;;  %3997 = vmatpush.bf16.msra.mxu3 %v7125_v3  ;;  %v7453_v58 = vld [vmem:[%s11813_s1 + $0x2f4] sm:$0xf0]  ;;  %v5145_v6 = vor.u32 %v7421_v56, %v5144_v53  ;;  %v5336_v9 = vld [vmem:[%s11813_s1 + $0x368] sm:$0xf] }
 0x121   :  { %v7485_v3 = vld [vmem:[%s11813_s1 + $0x3f4] sm:$0xf0]  ;;  %v5273_v7 = vor.u32 %v7453_v58, %v5272_v57  ;;  %v5320_v43 = vld [vmem:[%s11813_s1 + $0x348] sm:$0xf] }
 0x122   :  { %v5401_v11 = vor.u32 %v7485_v3, %v5400_v62  ;;  %v4952_v62 = vld [vmem:[%s11813_s1 + $0x68] sm:$0xf]  ;;  %v7373_v3 = vld [vmem:[%s11813_s1 + $0x74] sm:$0xf0] }
 0x123   :  { %3959 = vmatpush.bf16.msra.mxu0 %v6725_v14  ;;  %3972 = vmatpush.bf16.msra.mxu1 %v6853_v20  ;;  %v5256_v14 = vld [vmem:[%s11813_s1 + $0x2c8] sm:$0xf]  ;;  %v7437_v8 = vld [vmem:[%s11813_s1 + $0x274] sm:$0xf0] }
 0x124   :  { %3985 = vmatpush.bf16.msra.mxu2 %v6981_v21  ;;  %3998 = vmatpush.bf16.msra.mxu3 %v7109_v25  ;;  %v5384_v20 = vld [vmem:[%s11813_s1 + $0x3c8] sm:$0xf]  ;;  %v7481_v21 = vld [vmem:[%s11813_s1 + $0x3d4] sm:$0xf0]  ;;  %v5257_v24 = vor.u32 %v7449_v18, %v5256_v14  ;;  %v4953_v14 = vor.u32 %v7373_v3, %v4952_v62 }
 0x125   :  { %v4984_v25 = vld [vmem:[%s11813_s1 + $0xa8] sm:$0xf]  ;;  %v5385_v31 = vor.u32 %v7481_v21, %v5384_v20  ;;  %v7469_v10 = vld [vmem:[%s11813_s1 + $0x374] sm:$0xf0] }
 0x126   :  { %v4985_v39 = vor.u32 %v7381_v26, %v4984_v25  ;;  %v4936_v21 = vld [vmem:[%s11813_s1 + $0x48] sm:$0xf]  ;;  %v7401_v25 = vld [vmem:[%s11813_s1 + $0x154] sm:$0xf0] }
 0x127   :  { %3960 = vmatpush.bf16.msra.mxu0 %v6709_v33  ;;  %3973 = vmatpush.bf16.msra.mxu1 %v6837_v37  ;;  %v7445_v33 = vld [vmem:[%s11813_s1 + $0x2b4] sm:$0xf0]  ;;  %v5192_v26 = vld [vmem:[%s11813_s1 + $0x248] sm:$0xf] }
 0x128   :  { %3986 = vmatpush.bf16.msra.mxu2 %v6965_v38  ;;  %3999 = vmatpush.bf16.msra.mxu3 %v7093_v42  ;;  %v7477_v37 = vld [vmem:[%s11813_s1 + $0x3b4] sm:$0xf0]  ;;  %v7978_v38 = vld [vmem:[#allocation1 + $0x9] sm:$0xff]  ;;  %v5241_v41 = vor.u32 %v7445_v33, %v5240_v32 }
 0x129   :  { %v4968_v42 = vld [vmem:[%s11813_s1 + $0x88] sm:$0xf]  ;;  %v5369_v63 = vor.u32 %v7477_v37, %v5368_v36  ;;  %v7433_v30 = vld [vmem:[%s11813_s1 + $0x254] sm:$0xf0] }
 0x12a   :  { %v4969_v57 = vor.u32 %v7377_v44, %v4968_v42  ;;  %v7465_v32 = vld [vmem:[%s11813_s1 + $0x354] sm:$0xf0]  ;;  %v5048_v44 = vld [vmem:[%s11813_s1 + $0x128] sm:$0xf] }
 0x12b   :  { %3961 = vmatpush.bf16.msra.mxu0 %v6693_v55  ;;  %3974 = vmatpush.bf16.msra.mxu1 %v6821_v59  ;;  %v3755_v53 = vpop.f32.mrf.mxu0  ;;  %v7473_v55 = vld [vmem:[%s11813_s1 + $0x394] sm:$0xf0]  ;;  %v3768_v58 = vpop.f32.mrf.mxu1  ;;  %v5097_v59 = vor.u32 %v7409_v50, %v5096_v45  ;;  %v5160_v3 = vld [vmem:[%s11813_s1 + $0x208] sm:$0xf] }
 0x12c   :  { %3987 = vmatpush.bf16.msra.mxu2 %v6949_v61  ;;  %4000 = vmatpush.bf16.msra.mxu3 %v7077_v4  ;;  %v3756_v56 = vadd.f32 %v3755_v53, %v9813_v19  ;;  %v5225_v61 = vor.u32 %v7441_v52, %v5224_v51  ;;  %v5080_v4 = vld [vmem:[%s11813_s1 + $0x168] sm:$0xf]  ;;  %v5353_v19 = vor.u32 %v7473_v55, %v5352_v54  ;;  %v7365_v42 = vld [vmem:[%s11813_s1 + $0x34] sm:$0xf0] }
 0x12d   :  { %v7397_v50 = vld [vmem:[%s11813_s1 + $0x134] sm:$0xf0]  ;;  %v5176_v51 = vld [vmem:[%s11813_s1 + $0x228] sm:$0xf] }
 0x12e   :  { %3962 = vmatmul.bf16.vlgmr.msra.gmra.mxu0 %v8877_v47  ;;  %3975 = vmatmul.bf16.vlgmr.msra.gmra.mxu1 %v8881_v49  ;;  %v7429_v52 = vld [vmem:[%s11813_s1 + $0x234] sm:$0xf0]  ;;  %v5304_v53 = vld [vmem:[%s11813_s1 + $0x328] sm:$0xf] }
 0x12f   :  { %4006 = vmatpush.bf16.msrb.mxu0 %v5017_v5  ;;  %4019 = vmatpush.bf16.msrb.mxu1 %v5145_v6  ;;  %v9971_v5 = vadd.f32 %v3768_v58, %v3756_v56  ;;  %v7405_v6 = vld [vmem:[%s11813_s1 + $0x174] sm:$0xf0]  ;;  %v4904_v56 = vld [vmem:[%s11813_s1 + $0x8] sm:$0xf]  ;;  %v5049_v58 = vor.u32 %v7397_v50, %v5048_v44 }
 0x130   :  { %4032 = vmatpush.bf16.msrb.mxu2 %v5273_v7  ;;  %4045 = vmatpush.bf16.msrb.mxu3 %v5401_v11  ;;  %v5208_v7 = vld [vmem:[%s11813_s1 + $0x268] sm:$0xf]  ;;  %v7979_v11 = vld [vmem:[%s11814_s2] sm:$0xf]  ;;  %v5081_v18 = vor.u32 %v7405_v6, %v5080_v4  ;;  %v7461_v54 = vld [vmem:[%s11813_s1 + $0x334] sm:$0xf0] }
 0x131   :  { %3988 = vmatmul.bf16.vlgmr.msra.gmra.mxu2 %v7977_v35  ;;  %4001 = vmatmul.bf16.vlgmr.msra.gmra.mxu3 %v7978_v38  ;;  %v609_v13 = vperm.slane %v7979_v11, 1  ;;  %v5209_v20 = vor.u32 %v7437_v8, %v5208_v7  ;;  %v7393_v62 = vld [vmem:[%s11813_s1 + $0x114] sm:$0xf0]  ;;  %v5305_v4 = vor.u32 %v7461_v54, %v5304_v53  ;;  %v5288_v6 = vld [vmem:[%s11813_s1 + $0x308] sm:$0xf] }
 0x132   :  { %v7457_v7 = vld [vmem:[%s11813_s1 + $0x314] sm:$0xf0]  ;;  %v5656_v11 = vld [vmem:[%s11813_s1 + $0x5e8] sm:$0xf] }
 0x133   :  { %4007 = vmatpush.bf16.msrb.mxu0 %v5001_v22  ;;  %4020 = vmatpush.bf16.msrb.mxu1 %v5129_v23  ;;  %v7369_v22 = vld [vmem:[%s11813_s1 + $0x54] sm:$0xf0]  ;;  %v5064_v23 = vld [vmem:[%s11813_s1 + $0x148] sm:$0xf]  ;;  %v3757_v36 = vpop.f32.mrf.mxu0  ;;  %v3770_v38 = vpop.f32.mrf.mxu1 }
 0x134   :  { %4033 = vmatpush.bf16.msrb.mxu2 %v5257_v24  ;;  %4046 = vmatpush.bf16.msrb.mxu3 %v5385_v31  ;;  %v5337_v24 = vor.u32 %v7469_v10, %v5336_v9  ;;  %v3781_v31 = vpop.f32.mrf.mxu2  ;;  %v3794_v35 = vpop.f32.mrf.mxu3  ;;  %v4937_v37 = vor.u32 %v7369_v22, %v4936_v21  ;;  %v5528_v9 = vld [vmem:[%s11813_s1 + $0x4e8] sm:$0xf]  ;;  %v7517_v10 = vld [vmem:[%s11813_s1 + $0x4f4] sm:$0xf0] }
 0x135   :  { %v3782_v33 = vadd.f32 %v3781_v31, %v609_v13  ;;  %v7581_v21 = vld [vmem:[%s11813_s1 + $0x6f4] sm:$0xf0]  ;;  %v5768_v38 = vld [vmem:[%s11813_s1 + $0x6c8] sm:$0xf] }
 0x136   :  { %v5496_v50 = vld [vmem:[%s11813_s1 + $0x4a8] sm:$0xf]  ;;  %v7541_v54 = vld [vmem:[%s11813_s1 + $0x5b4] sm:$0xf0] }
 0x137   :  { %4008 = vmatpush.bf16.msrb.mxu0 %v4985_v39  ;;  %4021 = vmatpush.bf16.msrb.mxu1 %v5113_v40  ;;  %v5065_v39 = vor.u32 %v7401_v25, %v5064_v23  ;;  %v5193_v40 = vor.u32 %v7433_v30, %v5192_v26  ;;  %v10024_v45 = vadd.f32 %v3794_v35, %v3782_v33  ;;  %v7613_v25 = vld [vmem:[%s11813_s1 + $0x7f4] sm:$0xf0]  ;;  %v5640_v35 = vld [vmem:[%s11813_s1 + $0x5c8] sm:$0xf] }
 0x138   :  { %4034 = vmatpush.bf16.msrb.mxu2 %v5241_v41  ;;  %4047 = vmatpush.bf16.msrb.mxu3 %v5369_v63  ;;  %v4920_v41 = vld [vmem:[%s11813_s1 + $0x28] sm:$0xf]  ;;  %v5321_v63 = vor.u32 %v7465_v32, %v5320_v43  ;;  %v5289_v26 = vor.u32 %v7457_v7, %v5288_v6  ;;  %v5529_v30 = vor.u32 %v7517_v10, %v5528_v9  ;;  %v7513_v33 = vld [vmem:[%s11813_s1 + $0x4d4] sm:$0xf0] }
 0x139   :  { %v4921_v55 = vor.u32 %v7365_v42, %v4920_v41  ;;  %v5512_v32 = vld [vmem:[%s11813_s1 + $0x4c8] sm:$0xf]  ;;  %v7609_v41 = vld [vmem:[%s11813_s1 + $0x7d4] sm:$0xf0] }
 0x13a   :  { %v5513_v42 = vor.u32 %v7513_v33, %v5512_v32  ;;  %v7537_v7 = vld [vmem:[%s11813_s1 + $0x594] sm:$0xf0]  ;;  %v5864_v10 = vld [vmem:[%s11813_s1 + $0x788] sm:$0xf] }
 0x13b   :  { %4009 = vmatpush.bf16.msrb.mxu0 %v4969_v57  ;;  %4022 = vmatpush.bf16.msrb.mxu1 %v5097_v59  ;;  %v7361_v57 = vld [vmem:[%s11813_s1 + $0x14] sm:$0xf0]  ;;  %v5177_v59 = vor.u32 %v7429_v52, %v5176_v51  ;;  %v5624_v52 = vld [vmem:[%s11813_s1 + $0x5a8] sm:$0xf] }
 0x13c   :  { %4035 = vmatpush.bf16.msrb.mxu2 %v5225_v61  ;;  %4048 = vmatpush.bf16.msrb.mxu3 %v5353_v19  ;;  %v5032_v61 = vld [vmem:[%s11813_s1 + $0x108] sm:$0xf]  ;;  %v7425_v19 = vld [vmem:[%s11813_s1 + $0x214] sm:$0xf0]  ;;  %v3783_v8 = vpop.f32.mrf.mxu2  ;;  %v3796_v13 = vpop.f32.mrf.mxu3 }
 0x13d   :  { %v5033_v22 = vor.u32 %v7393_v62, %v5032_v61  ;;  %v5161_v23 = vor.u32 %v7425_v19, %v5160_v3  ;;  %v7509_v51 = vld [vmem:[%s11813_s1 + $0x4b4] sm:$0xf0]  ;;  %v5625_v61 = vor.u32 %v7541_v54, %v5624_v52  ;;  %v5480_v3 = vld [vmem:[%s11813_s1 + $0x488] sm:$0xf] }
 0x13e   :  { %v5608_v19 = vld [vmem:[%s11813_s1 + $0x588] sm:$0xf]  ;;  %v7569_v9 = vld [vmem:[%s11813_s1 + $0x694] sm:$0xf0] }
 0x13f   :  { %4010 = vmatpush.bf16.msrb.mxu0 %v4953_v14  ;;  %4023 = vmatpush.bf16.msrb.mxu1 %v5081_v18  ;;  %v4905_v14 = vor.u32 %v7361_v57, %v4904_v56  ;;  %v7549_v18 = vld [vmem:[%s11813_s1 + $0x5f4] sm:$0xf0]  ;;  %v5880_v57 = vld [vmem:[%s11813_s1 + $0x7a8] sm:$0xf] }
 0x140   :  { %4036 = vmatpush.bf16.msrb.mxu2 %v5209_v20  ;;  %4049 = vmatpush.bf16.msrb.mxu3 %v5337_v24  ;;  %v5784_v20 = vld [vmem:[%s11813_s1 + $0x6e8] sm:$0xf]  ;;  %v5657_v31 = vor.u32 %v7549_v18, %v5656_v11  ;;  %v7573_v56 = vld [vmem:[%s11813_s1 + $0x6b4] sm:$0xf0]  ;;  %v5609_v18 = vor.u32 %v7537_v7, %v5608_v19 }
 0x141   :  { %v5912_v24 = vld [vmem:[%s11813_s1 + $0x7e8] sm:$0xf]  ;;  %v5785_v43 = vor.u32 %v7581_v21, %v5784_v20  ;;  %v7601_v11 = vld [vmem:[%s11813_s1 + $0x794] sm:$0xf0] }
 0x142   :  { %v5913_v36 = vor.u32 %v7613_v25, %v5912_v24  ;;  %v5736_v8 = vld [vmem:[%s11813_s1 + $0x688] sm:$0xf]  ;;  %v7593_v54 = vld [vmem:[%s11813_s1 + $0x754] sm:$0xf0] }
 0x143   :  { %4011 = vmatpush.bf16.msrb.mxu0 %v4937_v37  ;;  %4024 = vmatpush.bf16.msrb.mxu1 %v5065_v39  ;;  %v7545_v37 = vld [vmem:[%s11813_s1 + $0x5d4] sm:$0xf0]  ;;  %v5737_v20 = vor.u32 %v7569_v9, %v5736_v8  ;;  %v5464_v21 = vld [vmem:[%s11813_s1 + $0x468] sm:$0xf] }
 0x144   :  { %4037 = vmatpush.bf16.msrb.mxu2 %v5193_v40  ;;  %4050 = vmatpush.bf16.msrb.mxu3 %v5321_v63  ;;  %v7577_v39 = vld [vmem:[%s11813_s1 + $0x6d4] sm:$0xf0]  ;;  %v5896_v40 = vld [vmem:[%s11813_s1 + $0x7c8] sm:$0xf]  ;;  %v5641_v44 = vor.u32 %v7545_v37, %v5640_v35 }
 0x145   :  { %v5769_v63 = vor.u32 %v7577_v39, %v5768_v38  ;;  %v5897_v53 = vor.u32 %v7609_v41, %v5896_v40  ;;  %v5848_v32 = vld [vmem:[%s11813_s1 + $0x768] sm:$0xf]  ;;  %v7497_v39 = vld [vmem:[%s11813_s1 + $0x454] sm:$0xf0] }
 0x146   :  { %v5448_v38 = vld [vmem:[%s11813_s1 + $0x448] sm:$0xf]  ;;  %v7557_v8 = vld [vmem:[%s11813_s1 + $0x634] sm:$0xf0] }
 0x147   :  { %4012 = vmatpush.bf16.msrb.mxu0 %v4921_v55  ;;  %4025 = vmatpush.bf16.msrb.mxu1 %v5049_v58  ;;  %v5752_v55 = vld [vmem:[%s11813_s1 + $0x6a8] sm:$0xf]  ;;  %v7605_v58 = vld [vmem:[%s11813_s1 + $0x7b4] sm:$0xf0] }
 0x148   :  { %4038 = vmatpush.bf16.msrb.mxu2 %v5177_v59  ;;  %4051 = vmatpush.bf16.msrb.mxu3 %v5305_v4  ;;  %v5497_v59 = vor.u32 %v7509_v51, %v5496_v50  ;;  %v5753_v62 = vor.u32 %v7573_v56, %v5752_v55  ;;  %v7505_v4 = vld [vmem:[%s11813_s1 + $0x494] sm:$0xf0]  ;;  %v5881_v6 = vor.u32 %v7605_v58, %v5880_v57  ;;  %v5576_v40 = vld [vmem:[%s11813_s1 + $0x548] sm:$0xf] }
 0x149   :  { %v5481_v13 = vor.u32 %v7505_v4, %v5480_v3  ;;  %v7561_v50 = vld [vmem:[%s11813_s1 + $0x654] sm:$0xf0]  ;;  %v5449_v55 = vor.u32 %v7497_v39, %v5448_v38  ;;  %v5560_v3 = vld [vmem:[%s11813_s1 + $0x528] sm:$0xf] }
 0x14a   :  { %v5688_v7 = vld [vmem:[%s11813_s1 + $0x628] sm:$0xf]  ;;  %v7709_v38 = vld [vmem:[%s11813_s1 + $0xaf4] sm:$0xf0] }
 0x14b   :  { %4013 = vmatpush.bf16.msrb.mxu0 %v4905_v14  ;;  %4026 = vmatpush.bf16.msrb.mxu1 %v5033_v22  ;;  %v3807_v14 = vpop.f32.mrf.mxu0  ;;  %v7501_v22 = vld [vmem:[%s11813_s1 + $0x474] sm:$0xf0]  ;;  %v3820_v25 = vpop.f32.mrf.mxu1  ;;  %v5816_v9 = vld [vmem:[%s11813_s1 + $0x728] sm:$0xf] }
 0x14c   :  { %4039 = vmatpush.bf16.msrb.mxu2 %v5161_v23  ;;  %4052 = vmatpush.bf16.msrb.mxu3 %v5289_v26  ;;  %v5592_v23 = vld [vmem:[%s11813_s1 + $0x568] sm:$0xf]  ;;  %v3808_v24 = vadd.f32 %v3807_v14, %v10024_v45  ;;  %v5865_v26 = vor.u32 %v7601_v11, %v5864_v10  ;;  %v7597_v45 = vld [vmem:[%s11813_s1 + $0x774] sm:$0xf0]  ;;  %v5465_v35 = vor.u32 %v7501_v22, %v5464_v21 }
 0x14d   :  { %v7589_v10 = vld [vmem:[%s11813_s1 + $0x734] sm:$0xf0]  ;;  %v5544_v21 = vld [vmem:[%s11813_s1 + $0x508] sm:$0xf] }
 0x14e   :  { %4014 = vmatmul.bf16.vlgmr.msrb.gmra.mxu0 %v8373_v28  ;;  %4027 = vmatmul.bf16.vlgmr.msrb.gmra.mxu1 %v8383_v34  ;;  %v3821_v33 = vadd.f32 %v3820_v25, %v3808_v24  ;;  %v7489_v14 = vld [vmem:[%s11813_s1 + $0x414] sm:$0xf0]  ;;  %v5817_v25 = vor.u32 %v7589_v10, %v5816_v9 }
 0x14f   :  { %4058 = vmatpush.bf16.msra.mxu0 %v5529_v30  ;;  %4071 = vmatpush.bf16.msra.mxu1 %v5657_v31  ;;  %v7533_v30 = vld [vmem:[%s11813_s1 + $0x574] sm:$0xf0]  ;;  %v5720_v31 = vld [vmem:[%s11813_s1 + $0x668] sm:$0xf] }
 0x150   :  { %4084 = vmatpush.bf16.msra.mxu2 %v5785_v43  ;;  %4097 = vmatpush.bf16.msra.mxu3 %v5913_v36  ;;  %v7565_v43 = vld [vmem:[%s11813_s1 + $0x674] sm:$0xf0]  ;;  %v5593_v36 = vor.u32 %v7533_v30, %v5592_v23  ;;  %v5672_v23 = vld [vmem:[%s11813_s1 + $0x608] sm:$0xf] }
 0x151   :  { %4040 = vmatmul.bf16.vlgmr.msrb.gmra.mxu2 %v8371_v27  ;;  %4053 = vmatmul.bf16.vlgmr.msrb.gmra.mxu3 %v8375_v29  ;;  %v5721_v37 = vor.u32 %v7565_v43, %v5720_v31  ;;  %v7521_v22 = vld [vmem:[%s11813_s1 + $0x514] sm:$0xf0]  ;;  %v5800_v30 = vld [vmem:[%s11813_s1 + $0x708] sm:$0xf] }
 0x152   :  { %v7585_v31 = vld [vmem:[%s11813_s1 + $0x714] sm:$0xf0]  ;;  %v5545_v39 = vor.u32 %v7521_v22, %v5544_v21 }
 0x153   :  { %4059 = vmatpush.bf16.msra.mxu0 %v5513_v42  ;;  %4072 = vmatpush.bf16.msra.mxu1 %v5641_v44  ;;  %v5849_v42 = vor.u32 %v7597_v45, %v5848_v32  ;;  %v7529_v44 = vld [vmem:[%s11813_s1 + $0x554] sm:$0xf0]  ;;  %v3809_v57 = vpop.f32.mrf.mxu0  ;;  %v3822_v4 = vpop.f32.mrf.mxu1  ;;  %v6040_v32 = vld [vmem:[%s11813_s1 + $0x8e8] sm:$0xf] }
 0x154   :  { %4085 = vmatpush.bf16.msra.mxu2 %v5769_v63  ;;  %4098 = vmatpush.bf16.msra.mxu3 %v5897_v53  ;;  %v3833_v41 = vpop.f32.mrf.mxu2  ;;  %v5704_v63 = vld [vmem:[%s11813_s1 + $0x648] sm:$0xf]  ;;  %v3846_v52 = vpop.f32.mrf.mxu3  ;;  %v5577_v58 = vor.u32 %v7529_v44, %v5576_v40  ;;  %v7645_v45 = vld [vmem:[%s11813_s1 + $0x8f4] sm:$0xf0]  ;;  %v5801_v44 = vor.u32 %v7585_v31, %v5800_v30 }
 0x155   :  { %v3834_v51 = vadd.f32 %v3833_v41, %v3821_v33  ;;  %v5832_v53 = vld [vmem:[%s11813_s1 + $0x748] sm:$0xf]  ;;  %v7673_v57 = vld [vmem:[%s11813_s1 + $0x9d4] sm:$0xf0] }
 0x156   :  { %v5833_v19 = vor.u32 %v7593_v54, %v5832_v53  ;;  %v6168_v33 = vld [vmem:[%s11813_s1 + $0x9e8] sm:$0xf]  ;;  %v7641_v53 = vld [vmem:[%s11813_s1 + $0x8d4] sm:$0xf0] }
 0x157   :  { %4060 = vmatpush.bf16.msra.mxu0 %v5497_v59  ;;  %4073 = vmatpush.bf16.msra.mxu1 %v5625_v61  ;;  %v10214_v56 = vadd.f32 %v3846_v52, %v3834_v51  ;;  %v5705_v59 = vor.u32 %v7561_v50, %v5704_v63  ;;  %v5432_v61 = vld [vmem:[%s11813_s1 + $0x428] sm:$0xf]  ;;  %v6041_v63 = vor.u32 %v7645_v45, %v6040_v32  ;;  %v7669_v10 = vld [vmem:[%s11813_s1 + $0x9b4] sm:$0xf0] }
 0x158   :  { %4086 = vmatpush.bf16.msra.mxu2 %v5753_v62  ;;  %4099 = vmatpush.bf16.msra.mxu3 %v5881_v6  ;;  %v7493_v62 = vld [vmem:[%s11813_s1 + $0x434] sm:$0xf0]  ;;  %v6424_v41 = vld [vmem:[%s11813_s1 + $0xbe8] sm:$0xf] }
 0x159   :  { %v7525_v6 = vld [vmem:[%s11813_s1 + $0x534] sm:$0xf0]  ;;  %v5433_v11 = vor.u32 %v7493_v62, %v5432_v61  ;;  %v6024_v52 = vld [vmem:[%s11813_s1 + $0x8c8] sm:$0xf] }
 0x15a   :  { %v6152_v54 = vld [vmem:[%s11813_s1 + $0x9c8] sm:$0xf]  ;;  %v7737_v62 = vld [vmem:[%s11813_s1 + $0xbd4] sm:$0xf0] }
 0x15b   :  { %4061 = vmatpush.bf16.msra.mxu0 %v5481_v13  ;;  %4074 = vmatpush.bf16.msra.mxu1 %v5609_v18  ;;  %v5416_v13 = vld [vmem:[%s11813_s1 + $0x408] sm:$0xf]  ;;  %v5561_v18 = vor.u32 %v7525_v6, %v5560_v3  ;;  %v6025_v3 = vor.u32 %v7641_v53, %v6024_v52  ;;  %v6153_v4 = vor.u32 %v7673_v57, %v6152_v54  ;;  %v7665_v30 = vld [vmem:[%s11813_s1 + $0x994] sm:$0xf0] }
 0x15c   :  { %4087 = vmatpush.bf16.msra.mxu2 %v5737_v20  ;;  %4100 = vmatpush.bf16.msra.mxu3 %v5865_v26  ;;  %v5689_v20 = vor.u32 %v7557_v8, %v5688_v7  ;;  %v3835_v24 = vpop.f32.mrf.mxu2  ;;  %v7553_v26 = vld [vmem:[%s11813_s1 + $0x614] sm:$0xf0]  ;;  %v3848_v43 = vpop.f32.mrf.mxu3  ;;  %v6408_v61 = vld [vmem:[%s11813_s1 + $0xbc8] sm:$0xf] }
 0x15d   :  { %v5673_v40 = vor.u32 %v7553_v26, %v5672_v23  ;;  %v6008_v6 = vld [vmem:[%s11813_s1 + $0x8a8] sm:$0xf]  ;;  %v7637_v7 = vld [vmem:[%s11813_s1 + $0x8b4] sm:$0xf0]  ;;  %v6409_v9 = vor.u32 %v7737_v62, %v6408_v61 }
 0x15e   :  { %v6136_v8 = vld [vmem:[%s11813_s1 + $0x9a8] sm:$0xf]  ;;  %v7633_v24 = vld [vmem:[%s11813_s1 + $0x894] sm:$0xf0] }
 0x15f   :  { %4062 = vmatpush.bf16.msra.mxu0 %v5465_v35  ;;  %4075 = vmatpush.bf16.msra.mxu1 %v5593_v36  ;;  %v5417_v35 = vor.u32 %v7489_v14, %v5416_v13  ;;  %v7677_v36 = vld [vmem:[%s11813_s1 + $0x9f4] sm:$0xf0]  ;;  %v6392_v14 = vld [vmem:[%s11813_s1 + $0xba8] sm:$0xf]  ;;  %v6137_v21 = vor.u32 %v7669_v10, %v6136_v8 }
 0x160   :  { %4088 = vmatpush.bf16.msra.mxu2 %v5721_v37  ;;  %4101 = vmatpush.bf16.msra.mxu3 %v5849_v42  ;;  %v6296_v37 = vld [vmem:[%s11813_s1 + $0xae8] sm:$0xf]  ;;  %v7741_v42 = vld [vmem:[%s11813_s1 + $0xbf4] sm:$0xf0]  ;;  %v6169_v50 = vor.u32 %v7677_v36, %v6168_v33 }
 0x161   :  { %v6297_v51 = vor.u32 %v7709_v38, %v6296_v37  ;;  %v7701_v13 = vld [vmem:[%s11813_s1 + $0xab4] sm:$0xf0]  ;;  %v5992_v23 = vld [vmem:[%s11813_s1 + $0x888] sm:$0xf] }
 0x162   :  { %v6248_v31 = vld [vmem:[%s11813_s1 + $0xa88] sm:$0xf]  ;;  %v7697_v43 = vld [vmem:[%s11813_s1 + $0xa94] sm:$0xf0]  ;;  %v5993_v36 = vor.u32 %v7633_v24, %v5992_v23 }
 0x163   :  { %4063 = vmatpush.bf16.msra.mxu0 %v5449_v55  ;;  %4076 = vmatpush.bf16.msra.mxu1 %v5577_v58  ;;  %v6425_v55 = vor.u32 %v7741_v42, %v6424_v41  ;;  %v6280_v58 = vld [vmem:[%s11813_s1 + $0xac8] sm:$0xf]  ;;  %v7729_v33 = vld [vmem:[%s11813_s1 + $0xb94] sm:$0xf0] }
 0x164   :  { %4089 = vmatpush.bf16.msra.mxu2 %v5705_v59  ;;  %4102 = vmatpush.bf16.msra.mxu3 %v5833_v19  ;;  %v7705_v59 = vld [vmem:[%s11813_s1 + $0xad4] sm:$0xf0]  ;;  %v6376_v45 = vld [vmem:[%s11813_s1 + $0xb88] sm:$0xf] }
 0x165   :  { %v6281_v19 = vor.u32 %v7705_v59, %v6280_v58  ;;  %v7629_v41 = vld [vmem:[%s11813_s1 + $0x874] sm:$0xf0]  ;;  %v6104_v42 = vld [vmem:[%s11813_s1 + $0x968] sm:$0xf] }
 0x166   :  { %v6360_v52 = vld [vmem:[%s11813_s1 + $0xb68] sm:$0xf]  ;;  %v7725_v53 = vld [vmem:[%s11813_s1 + $0xb74] sm:$0xf0] }
 0x167   :  { %4064 = vmatpush.bf16.msra.mxu0 %v5433_v11  ;;  %4077 = vmatpush.bf16.msra.mxu1 %v5561_v18  ;;  %v6264_v11 = vld [vmem:[%s11813_s1 + $0xaa8] sm:$0xf]  ;;  %v7733_v18 = vld [vmem:[%s11813_s1 + $0xbb4] sm:$0xf0]  ;;  %v6361_v62 = vor.u32 %v7725_v53, %v6360_v52 }
 0x168   :  { %4090 = vmatpush.bf16.msra.mxu2 %v5689_v20  ;;  %4103 = vmatpush.bf16.msra.mxu3 %v5817_v25  ;;  %v6009_v20 = vor.u32 %v7637_v7, %v6008_v6  ;;  %v6265_v22 = vor.u32 %v7701_v13, %v6264_v11  ;;  %v6120_v25 = vld [vmem:[%s11813_s1 + $0x988] sm:$0xf]  ;;  %v6393_v26 = vor.u32 %v7733_v18, %v6392_v14  ;;  %v7625_v59 = vld [vmem:[%s11813_s1 + $0x854] sm:$0xf0] }
 0x169   :  { %v6121_v38 = vor.u32 %v7665_v30, %v6120_v25  ;;  %v5960_v58 = vld [vmem:[%s11813_s1 + $0x848] sm:$0xf]  ;;  %v7689_v6 = vld [vmem:[%s11813_s1 + $0xa54] sm:$0xf0] }
 0x16a   :  { %v6088_v61 = vld [vmem:[%s11813_s1 + $0x948] sm:$0xf]  ;;  %v7721_v10 = vld [vmem:[%s11813_s1 + $0xb54] sm:$0xf0]  ;;  %v5961_v13 = vor.u32 %v7625_v59, %v5960_v58 }
 0x16b   :  { %4065 = vmatpush.bf16.msra.mxu0 %v5417_v35  ;;  %4078 = vmatpush.bf16.msra.mxu1 %v5545_v39  ;;  %v3859_v32 = vpop.f32.mrf.mxu0  ;;  %v3872_v37 = vpop.f32.mrf.mxu1  ;;  %v6249_v39 = vor.u32 %v7697_v43, %v6248_v31  ;;  %v7621_v23 = vld [vmem:[%s11813_s1 + $0x834] sm:$0xf0]  ;;  %v6072_v24 = vld [vmem:[%s11813_s1 + $0x928] sm:$0xf] }
 0x16c   :  { %4091 = vmatpush.bf16.msra.mxu2 %v5673_v40  ;;  %4104 = vmatpush.bf16.msra.mxu3 %v5801_v44  ;;  %v3860_v35 = vadd.f32 %v3859_v32, %v10214_v56  ;;  %v5976_v40 = vld [vmem:[%s11813_s1 + $0x868] sm:$0xf]  ;;  %v6377_v56 = vor.u32 %v7729_v33, %v6376_v45  ;;  %v7685_v31 = vld [vmem:[%s11813_s1 + $0xa34] sm:$0xf0] }
 0x16d   :  { %v5977_v54 = vor.u32 %v7629_v41, %v5976_v40  ;;  %v6200_v30 = vld [vmem:[%s11813_s1 + $0xa28] sm:$0xf]  ;;  %v7717_v32 = vld [vmem:[%s11813_s1 + $0xb34] sm:$0xf0] }
 0x16e   :  { %4066 = vmatmul.bf16.vlgmr.msra.gmra.mxu0 %v8451_v0  ;;  %4079 = vmatmul.bf16.vlgmr.msra.gmra.mxu1 %v8455_v2  ;;  %v3873_v44 = vadd.f32 %v3872_v37, %v3860_v35  ;;  %v6328_v43 = vld [vmem:[%s11813_s1 + $0xb28] sm:$0xf]  ;;  %v7617_v35 = vld [vmem:[%s11813_s1 + $0x814] sm:$0xf0]  ;;  %v6201_v37 = vor.u32 %v7685_v31, %v6200_v30 }
 0x16f   :  { %4110 = vmatpush.bf16.msrb.mxu0 %v6041_v63  ;;  %4123 = vmatpush.bf16.msrb.mxu1 %v6169_v50  ;;  %v7661_v63 = vld [vmem:[%s11813_s1 + $0x974] sm:$0xf0]  ;;  %v6232_v50 = vld [vmem:[%s11813_s1 + $0xa68] sm:$0xf]  ;;  %v6329_v41 = vor.u32 %v7717_v32, %v6328_v43 }
 0x170   :  { %4136 = vmatpush.bf16.msrb.mxu2 %v6297_v51  ;;  %4149 = vmatpush.bf16.msrb.mxu3 %v6425_v55  ;;  %v7693_v51 = vld [vmem:[%s11813_s1 + $0xa74] sm:$0xf0]  ;;  %v6105_v55 = vor.u32 %v7661_v63, %v6104_v42  ;;  %v5928_v33 = vld [vmem:[%s11813_s1 + $0x808] sm:$0xf] }
 0x171   :  { %4092 = vmatmul.bf16.vlgmr.msra.gmra.mxu2 %v8446_v60  ;;  %4105 = vmatmul.bf16.vlgmr.msra.gmra.mxu3 %v8453_v1  ;;  %v6233_v57 = vor.u32 %v7693_v51, %v6232_v50  ;;  %v6184_v40 = vld [vmem:[%s11813_s1 + $0xa08] sm:$0xf]  ;;  %v7681_v42 = vld [vmem:[%s11813_s1 + $0xa14] sm:$0xf0] }
 0x172   :  { %v6552_v50 = vld [vmem:[%s11813_s1 + $0xce8] sm:$0xf]  ;;  %v7773_v51 = vld [vmem:[%s11813_s1 + $0xcf4] sm:$0xf0] }
 0x173   :  { %4111 = vmatpush.bf16.msrb.mxu0 %v6025_v3  ;;  %4124 = vmatpush.bf16.msrb.mxu1 %v6153_v4  ;;  %v7657_v4 = vld [vmem:[%s11813_s1 + $0x954] sm:$0xf0]  ;;  %v3861_v11 = vpop.f32.mrf.mxu0  ;;  %v3874_v14 = vpop.f32.mrf.mxu1  ;;  %v6680_v52 = vld [vmem:[%s11813_s1 + $0xde8] sm:$0xf] }
 0x174   :  { %4137 = vmatpush.bf16.msrb.mxu2 %v6281_v19  ;;  %4150 = vmatpush.bf16.msrb.mxu3 %v6409_v9  ;;  %v3885_v3 = vpop.f32.mrf.mxu2  ;;  %v6216_v19 = vld [vmem:[%s11813_s1 + $0xa48] sm:$0xf]  ;;  %v3898_v8 = vpop.f32.mrf.mxu3  ;;  %v7837_v58 = vld [vmem:[%s11813_s1 + $0xef4] sm:$0xf0] }
 0x175   :  { %v3886_v7 = vadd.f32 %v3885_v3, %v3873_v44  ;;  %v6344_v9 = vld [vmem:[%s11813_s1 + $0xb48] sm:$0xf]  ;;  %v7713_v44 = vld [vmem:[%s11813_s1 + $0xb14] sm:$0xf0] }
 0x176   :  { %v6345_v25 = vor.u32 %v7721_v10, %v6344_v9  ;;  %v7869_v3 = vld [vmem:[%s11813_s1 + $0xff4] sm:$0xf0]  ;;  %v6664_v10 = vld [vmem:[%s11813_s1 + $0xdc8] sm:$0xf] }
 0x177   :  { %4112 = vmatpush.bf16.msrb.mxu0 %v6009_v20  ;;  %4125 = vmatpush.bf16.msrb.mxu1 %v6137_v21  ;;  %v10413_v18 = vadd.f32 %v3898_v8, %v3886_v7  ;;  %v6089_v20 = vor.u32 %v7657_v4, %v6088_v61  ;;  %v6217_v21 = vor.u32 %v7689_v6, %v6216_v19  ;;  %v6536_v8 = vld [vmem:[%s11813_s1 + $0xcc8] sm:$0xf]  ;;  %v7769_v9 = vld [vmem:[%s11813_s1 + $0xcd4] sm:$0xf0] }
 0x178   :  { %4138 = vmatpush.bf16.msrb.mxu2 %v6265_v22  ;;  %4151 = vmatpush.bf16.msrb.mxu3 %v6393_v26  ;;  %v5944_v22 = vld [vmem:[%s11813_s1 + $0x828] sm:$0xf]  ;;  %v7653_v26 = vld [vmem:[%s11813_s1 + $0x934] sm:$0xf0]  ;;  %v6185_v61 = vor.u32 %v7681_v42, %v6184_v40  ;;  %v6553_v19 = vor.u32 %v7773_v51, %v6552_v50 }
 0x179   :  { %v5945_v45 = vor.u32 %v7621_v23, %v5944_v22  ;;  %v6792_v14 = vld [vmem:[%s11813_s1 + $0xec8] sm:$0xf]  ;;  %v7865_v22 = vld [vmem:[%s11813_s1 + $0xfd4] sm:$0xf0]  ;;  %v6537_v23 = vor.u32 %v7769_v9, %v6536_v8 }
 0x17a   :  { %v7765_v30 = vld [vmem:[%s11813_s1 + $0xcb4] sm:$0xf0]  ;;  %v6648_v31 = vld [vmem:[%s11813_s1 + $0xda8] sm:$0xf] }
 0x17b   :  { %4113 = vmatpush.bf16.msrb.mxu0 %v5993_v36  ;;  %4126 = vmatpush.bf16.msrb.mxu1 %v6121_v38  ;;  %v6073_v36 = vor.u32 %v7653_v26, %v6072_v24  ;;  %v6056_v38 = vld [vmem:[%s11813_s1 + $0x908] sm:$0xf]  ;;  %v7797_v32 = vld [vmem:[%s11813_s1 + $0xdb4] sm:$0xf0] }
 0x17c   :  { %4139 = vmatpush.bf16.msrb.mxu2 %v6249_v39  ;;  %4152 = vmatpush.bf16.msrb.mxu3 %v6377_v56  ;;  %v7649_v39 = vld [vmem:[%s11813_s1 + $0x914] sm:$0xf0]  ;;  %v6312_v56 = vld [vmem:[%s11813_s1 + $0xb08] sm:$0xf]  ;;  %v3887_v63 = vpop.f32.mrf.mxu2  ;;  %v3900_v53 = vpop.f32.mrf.mxu3 }
 0x17d   :  { %v6057_v59 = vor.u32 %v7649_v39, %v6056_v38  ;;  %v6313_v4 = vor.u32 %v7713_v44, %v6312_v56  ;;  %v6520_v26 = vld [vmem:[%s11813_s1 + $0xca8] sm:$0xf]  ;;  %v6649_v38 = vor.u32 %v7797_v32, %v6648_v31  ;;  %v7793_v44 = vld [vmem:[%s11813_s1 + $0xd94] sm:$0xf0] }
 0x17e   :  { %v6504_v40 = vld [vmem:[%s11813_s1 + $0xc88] sm:$0xf]  ;;  %v7825_v50 = vld [vmem:[%s11813_s1 + $0xe94] sm:$0xf0] }
 0x17f   :  { %4114 = vmatpush.bf16.msrb.mxu0 %v5977_v54  ;;  %4127 = vmatpush.bf16.msrb.mxu1 %v6105_v55  ;;  %v5929_v54 = vor.u32 %v7617_v35, %v5928_v33  ;;  %v7805_v55 = vld [vmem:[%s11813_s1 + $0xdf4] sm:$0xf0]  ;;  %v6904_v35 = vld [vmem:[%s11813_s1 + $0xfa8] sm:$0xf] }
 0x180   :  { %4140 = vmatpush.bf16.msrb.mxu2 %v6233_v57  ;;  %4153 = vmatpush.bf16.msrb.mxu3 %v6361_v62  ;;  %v6808_v57 = vld [vmem:[%s11813_s1 + $0xee8] sm:$0xf]  ;;  %v6681_v6 = vor.u32 %v7805_v55, %v6680_v52  ;;  %v7829_v33 = vld [vmem:[%s11813_s1 + $0xeb4] sm:$0xf0] }
 0x181   :  { %v6936_v62 = vld [vmem:[%s11813_s1 + $0xfe8] sm:$0xf]  ;;  %v6809_v7 = vor.u32 %v7837_v58, %v6808_v57  ;;  %v7857_v53 = vld [vmem:[%s11813_s1 + $0xf94] sm:$0xf0] }
 0x182   :  { %v6937_v11 = vor.u32 %v7869_v3, %v6936_v62  ;;  %v6632_v42 = vld [vmem:[%s11813_s1 + $0xd88] sm:$0xf]  ;;  %v7757_v62 = vld [vmem:[%s11813_s1 + $0xc74] sm:$0xf0] }
 0x183   :  { %4115 = vmatpush.bf16.msrb.mxu0 %v5961_v13  ;;  %4128 = vmatpush.bf16.msrb.mxu1 %v6089_v20  ;;  %v7801_v13 = vld [vmem:[%s11813_s1 + $0xdd4] sm:$0xf0]  ;;  %v6760_v63 = vld [vmem:[%s11813_s1 + $0xe88] sm:$0xf]  ;;  %v6633_v58 = vor.u32 %v7793_v44, %v6632_v42 }
 0x184   :  { %4141 = vmatpush.bf16.msrb.mxu2 %v6217_v21  ;;  %4154 = vmatpush.bf16.msrb.mxu3 %v6345_v25  ;;  %v7833_v20 = vld [vmem:[%s11813_s1 + $0xed4] sm:$0xf0]  ;;  %v6920_v21 = vld [vmem:[%s11813_s1 + $0xfc8] sm:$0xf]  ;;  %v6665_v24 = vor.u32 %v7801_v13, %v6664_v10 }
 0x185   :  { %v6793_v25 = vor.u32 %v7833_v20, %v6792_v14  ;;  %v6921_v43 = vor.u32 %v7865_v22, %v6920_v21  ;;  %v6888_v52 = vld [vmem:[%s11813_s1 + $0xf88] sm:$0xf]  ;;  %v7853_v9 = vld [vmem:[%s11813_s1 + $0xf74] sm:$0xf0] }
 0x186   :  { %v6616_v3 = vld [vmem:[%s11813_s1 + $0xd68] sm:$0xf]  ;;  %v7753_v20 = vld [vmem:[%s11813_s1 + $0xc54] sm:$0xf0] }
 0x187   :  { %4116 = vmatpush.bf16.msrb.mxu0 %v5945_v45  ;;  %4129 = vmatpush.bf16.msrb.mxu1 %v6073_v36  ;;  %v6776_v45 = vld [vmem:[%s11813_s1 + $0xea8] sm:$0xf]  ;;  %v7861_v36 = vld [vmem:[%s11813_s1 + $0xfb4] sm:$0xf0] }
 0x188   :  { %4142 = vmatpush.bf16.msrb.mxu2 %v6201_v37  ;;  %4155 = vmatpush.bf16.msrb.mxu3 %v6329_v41  ;;  %v6521_v37 = vor.u32 %v7765_v30, %v6520_v26  ;;  %v6777_v39 = vor.u32 %v7829_v33, %v6776_v45  ;;  %v7761_v41 = vld [vmem:[%s11813_s1 + $0xc94] sm:$0xf0]  ;;  %v6905_v56 = vor.u32 %v7861_v36, %v6904_v35  ;;  %v6872_v8 = vld [vmem:[%s11813_s1 + $0xf68] sm:$0xf] }
 0x189   :  { %v6505_v55 = vor.u32 %v7761_v41, %v6504_v40  ;;  %v6472_v14 = vld [vmem:[%s11813_s1 + $0xc48] sm:$0xf]  ;;  %v6873_v22 = vor.u32 %v7853_v9, %v6872_v8  ;;  %v7817_v26 = vld [vmem:[%s11813_s1 + $0xe54] sm:$0xf0] }
 0x18a   :  { %v6600_v21 = vld [vmem:[%s11813_s1 + $0xd48] sm:$0xf]  ;;  %v7849_v32 = vld [vmem:[%s11813_s1 + $0xf54] sm:$0xf0]  ;;  %v6473_v33 = vor.u32 %v7753_v20, %v6472_v14  ;;  %v5018_v14 = vld [vmem:[%s11813_s1 + $0xf8] sm:$0xf0] }
 0x18b   :  { %4117 = vmatpush.bf16.msrb.mxu0 %v5929_v54  ;;  %4130 = vmatpush.bf16.msrb.mxu1 %v6057_v59  ;;  %v3911_v51 = vpop.f32.mrf.mxu0  ;;  %v3924_v57 = vpop.f32.mrf.mxu1  ;;  %v6761_v59 = vor.u32 %v7825_v50, %v6760_v63  ;;  %v7749_v40 = vld [vmem:[%s11813_s1 + $0xc34] sm:$0xf0]  ;;  %v6584_v41 = vld [vmem:[%s11813_s1 + $0xd28] sm:$0xf] }
 0x18c   :  { %4143 = vmatpush.bf16.msrb.mxu2 %v6185_v61  ;;  %4156 = vmatpush.bf16.msrb.mxu3 %v6313_v4  ;;  %v3912_v54 = vadd.f32 %v3911_v51, %v10413_v18  ;;  %v6488_v61 = vld [vmem:[%s11813_s1 + $0xc68] sm:$0xf]  ;;  %v6889_v18 = vor.u32 %v7857_v53, %v6888_v52  ;;  %v7813_v63 = vld [vmem:[%s11813_s1 + $0xe34] sm:$0xf0] }
 0x18d   :  { %v6489_v10 = vor.u32 %v7757_v62, %v6488_v61  ;;  %v6712_v44 = vld [vmem:[%s11813_s1 + $0xe28] sm:$0xf]  ;;  %v7845_v51 = vld [vmem:[%s11813_s1 + $0xf34] sm:$0xf0] }
 0x18e   :  { %4118 = vmatmul.bf16.vlgmr.msrb.gmra.mxu0 %v8701_v12  ;;  %4131 = vmatmul.bf16.vlgmr.msrb.gmra.mxu1 %v8711_v16  ;;  %v3925_v4 = vadd.f32 %v3924_v57, %v3912_v54  ;;  %v6840_v50 = vld [vmem:[%s11813_s1 + $0xf28] sm:$0xf]  ;;  %v7745_v54 = vld [vmem:[%s11813_s1 + $0xc14] sm:$0xf0]  ;;  %v6713_v57 = vor.u32 %v7813_v63, %v6712_v44 }
 0x18f   :  { %4162 = vmatpush.bf16.msra.mxu0 %v6553_v19  ;;  %4175 = vmatpush.bf16.msra.mxu1 %v6681_v6  ;;  %v7789_v19 = vld [vmem:[%s11813_s1 + $0xd74] sm:$0xf0]  ;;  %v6744_v6 = vld [vmem:[%s11813_s1 + $0xe68] sm:$0xf]  ;;  %v6841_v62 = vor.u32 %v7845_v51, %v6840_v50 }
 0x190   :  { %4188 = vmatpush.bf16.msra.mxu2 %v6809_v7  ;;  %4201 = vmatpush.bf16.msra.mxu3 %v6937_v11  ;;  %v7821_v7 = vld [vmem:[%s11813_s1 + $0xe74] sm:$0xf0]  ;;  %v6617_v11 = vor.u32 %v7789_v19, %v6616_v3  ;;  %v6440_v53 = vld [vmem:[%s11813_s1 + $0xc08] sm:$0xf] }
 0x191   :  { %4144 = vmatmul.bf16.vlgmr.msrb.gmra.mxu2 %v8709_v15  ;;  %4157 = vmatmul.bf16.vlgmr.msrb.gmra.mxu3 %v8713_v17  ;;  %v6745_v13 = vor.u32 %v7821_v7, %v6744_v6  ;;  %v6696_v61 = vld [vmem:[%s11813_s1 + $0xe08] sm:$0xf]  ;;  %v7809_v3 = vld [vmem:[%s11813_s1 + $0xe14] sm:$0xf0] }
 0x192   :  { %v7064_v6 = vld [vmem:[%s11813_s1 + $0x10e8] sm:$0xf]  ;;  %v7901_v7 = vld [vmem:[%s11813_s1 + $0x10f4] sm:$0xf0] }
 0x193   :  { %4163 = vmatpush.bf16.msra.mxu0 %v6537_v23  ;;  %4176 = vmatpush.bf16.msra.mxu1 %v6665_v24  ;;  %v7785_v24 = vld [vmem:[%s11813_s1 + $0xd54] sm:$0xf0]  ;;  %v3913_v45 = vpop.f32.mrf.mxu0  ;;  %v3926_v35 = vpop.f32.mrf.mxu1  ;;  %v7192_v8 = vld [vmem:[%s11813_s1 + $0x11e8] sm:$0xf] }
 0x194   :  { %4189 = vmatpush.bf16.msra.mxu2 %v6793_v25  ;;  %4202 = vmatpush.bf16.msra.mxu3 %v6921_v43  ;;  %v3937_v23 = vpop.f32.mrf.mxu2  ;;  %v6728_v25 = vld [vmem:[%s11813_s1 + $0xe48] sm:$0xf]  ;;  %v3950_v31 = vpop.f32.mrf.mxu3  ;;  %v7383_v35 = vld [vmem:[%s11813_s1 + $0xcc] sm:$0xf]  ;;  %v7893_v44 = vld [vmem:[%s11813_s1 + $0x10b4] sm:$0xf0] }
 0x195   :  { %v3938_v30 = vadd.f32 %v3937_v23, %v3925_v4  ;;  %v6856_v43 = vld [vmem:[%s11813_s1 + $0xf48] sm:$0xf]  ;;  %v7841_v4 = vld [vmem:[%s11813_s1 + $0xf14] sm:$0xf0]  ;;  %v5146_v23 = vld [vmem:[%s11813_s1 + $0x1f8] sm:$0xf0] }
 0x196   :  { %v6857_v42 = vor.u32 %v7849_v32, %v6856_v43  ;;  %v7897_v43 = vld [vmem:[%s11813_s1 + $0x10d4] sm:$0xf0]  ;;  %v7176_v32 = vld [vmem:[%s11813_s1 + $0x11c8] sm:$0xf] }
 0x197   :  { %4164 = vmatpush.bf16.msra.mxu0 %v6521_v37  ;;  %4177 = vmatpush.bf16.msra.mxu1 %v6649_v38  ;;  %v10612_v36 = vadd.f32 %v3950_v31, %v3938_v30  ;;  %v6601_v37 = vor.u32 %v7785_v24, %v6600_v21  ;;  %v6729_v38 = vor.u32 %v7817_v26, %v6728_v25  ;;  %v7048_v31 = vld [vmem:[%s11813_s1 + $0x10c8] sm:$0xf]  ;;  %v7925_v51 = vld [vmem:[%s11813_s1 + $0x11b4] sm:$0xf0] }
 0x198   :  { %4190 = vmatpush.bf16.msra.mxu2 %v6777_v39  ;;  %4203 = vmatpush.bf16.msra.mxu3 %v6905_v56  ;;  %v6456_v39 = vld [vmem:[%s11813_s1 + $0xc28] sm:$0xf]  ;;  %v7781_v56 = vld [vmem:[%s11813_s1 + $0xd34] sm:$0xf0]  ;;  %v6697_v21 = vor.u32 %v7809_v3, %v6696_v61  ;;  %v7065_v25 = vor.u32 %v7901_v7, %v7064_v6  ;;  %v4970_v6 = vld [vmem:[%s11813_s1 + $0x98] sm:$0xf0] }
 0x199   :  { %v6457_v52 = vor.u32 %v7749_v40, %v6456_v39  ;;  %v5130_v39 = vld [vmem:[%s11813_s1 + $0x1d8] sm:$0xf0]  ;;  %v7049_v40 = vor.u32 %v7897_v43, %v7048_v31  ;;  %v7160_v63 = vld [vmem:[%s11813_s1 + $0x11a8] sm:$0xf]  ;;  %v7403_v31 = vld [vmem:[%s11813_s1 + $0x16c] sm:$0xf] }
 0x19a   :  { %v7016_v61 = vld [vmem:[%s11813_s1 + $0x1088] sm:$0xf]  ;;  %v5082_v43 = vld [vmem:[%s11813_s1 + $0x178] sm:$0xf0] }
 0x19b   :  { %4165 = vmatpush.bf16.msra.mxu0 %v6505_v55  ;;  %4178 = vmatpush.bf16.msra.mxu1 %v6633_v58  ;;  %v6585_v55 = vor.u32 %v7781_v56, %v6584_v41  ;;  %v6568_v58 = vld [vmem:[%s11813_s1 + $0xd08] sm:$0xf] }
 0x19c   :  { %4191 = vmatpush.bf16.msra.mxu2 %v6761_v59  ;;  %4204 = vmatpush.bf16.msra.mxu3 %v6889_v18  ;;  %v7777_v59 = vld [vmem:[%s11813_s1 + $0xd14] sm:$0xf0]  ;;  %v6824_v18 = vld [vmem:[%s11813_s1 + $0xf08] sm:$0xf]  ;;  %v3939_v19 = vpop.f32.mrf.mxu2  ;;  %v3952_v9 = vpop.f32.mrf.mxu3 }
 0x19d   :  { %v6569_v20 = vor.u32 %v7777_v59, %v6568_v58  ;;  %v6825_v24 = vor.u32 %v7841_v4, %v6824_v18  ;;  %v7032_v56 = vld [vmem:[%s11813_s1 + $0x10a8] sm:$0xf]  ;;  %v7161_v58 = vor.u32 %v7925_v51, %v7160_v63  ;;  %v7921_v4 = vld [vmem:[%s11813_s1 + $0x1194] sm:$0xf0]  ;;  %v7375_v19 = vld [vmem:[%s11813_s1 + $0x8c] sm:$0xf] }
 0x19e   :  { %v7144_v3 = vld [vmem:[%s11813_s1 + $0x1188] sm:$0xf]  ;;  %v5098_v9 = vld [vmem:[%s11813_s1 + $0x198] sm:$0xf0] }
 0x19f   :  { %4166 = vmatpush.bf16.msra.mxu0 %v6489_v10  ;;  %4179 = vmatpush.bf16.msra.mxu1 %v6617_v11  ;;  %v6441_v10 = vor.u32 %v7745_v54, %v6440_v53  ;;  %v7933_v11 = vld [vmem:[%s11813_s1 + $0x11f4] sm:$0xf0]  ;;  %v4986_v53 = vld [vmem:[%s11813_s1 + $0xb8] sm:$0xf0]  ;;  %v7411_v54 = vld [vmem:[%s11813_s1 + $0x1ac] sm:$0xf] }
 0x1a0   :  { %4192 = vmatpush.bf16.msra.mxu2 %v6745_v13  ;;  %4205 = vmatpush.bf16.msra.mxu3 %v6873_v22  ;;  %v7387_v13 = vld [vmem:[%s11813_s1 + $0xec] sm:$0xf]  ;;  %v7193_v26 = vor.u32 %v7933_v11, %v7192_v8  ;;  %v5066_v51 = vld [vmem:[%s11813_s1 + $0x158] sm:$0xf0] }
 0x1a1   :  { %v7419_v22 = vld [vmem:[%s11813_s1 + $0x1ec] sm:$0xf]  ;;  %v5021_v30 = vor.u32 %v7387_v13, %v5018_v14  ;;  %v7145_v14 = vor.u32 %v7921_v4, %v7144_v3 }
 0x1a2   :  { %v5149_v45 = vor.u32 %v7419_v22, %v5146_v23  ;;  %v7407_v8 = vld [vmem:[%s11813_s1 + $0x18c] sm:$0xf]  ;;  %v7885_v22 = vld [vmem:[%s11813_s1 + $0x1074] sm:$0xf0]  ;;  %v7128_v23 = vld [vmem:[%s11813_s1 + $0x1168] sm:$0xf] }
 0x1a3   :  { %4167 = vmatpush.bf16.msra.mxu0 %v6473_v33  ;;  %4180 = vmatpush.bf16.msra.mxu1 %v6601_v37  ;;  %v7929_v33 = vld [vmem:[%s11813_s1 + $0x11d4] sm:$0xf0]  ;;  %v5002_v37 = vld [vmem:[%s11813_s1 + $0xd8] sm:$0xf0]  ;;  %v7363_v4 = vld [vmem:[%s11813_s1 + $0x2c] sm:$0xf] }
 0x1a4   :  { %4193 = vmatpush.bf16.msra.mxu2 %v6729_v38  ;;  %4206 = vmatpush.bf16.msra.mxu3 %v6857_v42  ;;  %v7415_v38 = vld [vmem:[%s11813_s1 + $0x1cc] sm:$0xf]  ;;  %v7177_v41 = vor.u32 %v7929_v33, %v7176_v32  ;;  %v5005_v42 = vor.u32 %v7383_v35, %v5002_v37  ;;  %v6984_v35 = vld [vmem:[%s11813_s1 + $0x1048] sm:$0xf]  ;;  %v7881_v37 = vld [vmem:[%s11813_s1 + $0x1054] sm:$0xf0] }
 0x1a5   :  { %v5133_v50 = vor.u32 %v7415_v38, %v5130_v39  ;;  %v7112_v38 = vld [vmem:[%s11813_s1 + $0x1148] sm:$0xf]  ;;  %v5085_v39 = vor.u32 %v7403_v31, %v5082_v43  ;;  %v7483_v31 = vld [vmem:[%s11813_s1 + $0x3ec] sm:$0xf] }
 0x1a7   :  { %4168 = vmatpush.bf16.msra.mxu0 %v6457_v52  ;;  %4181 = vmatpush.bf16.msra.mxu1 %v6585_v55  ;;  %v7379_v52 = vld [vmem:[%s11813_s1 + $0xac] sm:$0xf]  ;;  %v5114_v55 = vld [vmem:[%s11813_s1 + $0x1b8] sm:$0xf0] }
 0x1a8   :  { %4194 = vmatpush.bf16.msra.mxu2 %v6713_v57  ;;  %4207 = vmatpush.bf16.msra.mxu3 %v6841_v62  ;;  %v7033_v57 = vor.u32 %v7893_v44, %v7032_v56  ;;  %v4989_v59 = vor.u32 %v7379_v52, %v4986_v53  ;;  %v7889_v62 = vld [vmem:[%s11813_s1 + $0x1094] sm:$0xf0]  ;;  %v5117_v18 = vor.u32 %v7411_v54, %v5114_v55  ;;  %v4938_v56 = vld [vmem:[%s11813_s1 + $0x58] sm:$0xf0] }
 0x1a9   :  { %v7017_v11 = vor.u32 %v7889_v62, %v7016_v61  ;;  %v6985_v53 = vor.u32 %v7881_v37, %v6984_v35  ;;  %v7877_v61 = vld [vmem:[%s11813_s1 + $0x1034] sm:$0xf0]  ;;  %v7096_v62 = vld [vmem:[%s11813_s1 + $0x1128] sm:$0xf]  ;;  %v5530_v35 = vld [vmem:[%s11813_s1 + $0x4f8] sm:$0xf0] }
 0x1ab   :  { %4169 = vmatpush.bf16.msra.mxu0 %v6441_v10  ;;  %4182 = vmatpush.bf16.msra.mxu1 %v6569_v20  ;;  %v3963_v7 = vpop.f32.mrf.mxu0  ;;  %v3976_v13 = vpop.f32.mrf.mxu1  ;;  %v4973_v20 = vor.u32 %v7375_v19, %v4970_v6  ;;  %v4922_v19 = vld [vmem:[%s11813_s1 + $0x38] sm:$0xf0]  ;;  %v7395_v6 = vld [vmem:[%s11813_s1 + $0x12c] sm:$0xf] }
 0x1ac   :  { %4195 = vmatpush.bf16.msra.mxu2 %v6697_v21  ;;  %4208 = vmatpush.bf16.msra.mxu3 %v6825_v24  ;;  %v3964_v10 = vadd.f32 %v3963_v7, %v10612_v36  ;;  %v7000_v21 = vld [vmem:[%s11813_s1 + $0x1068] sm:$0xf]  ;;  %v5101_v36 = vor.u32 %v7407_v8, %v5098_v9  ;;  %v5050_v7 = vld [vmem:[%s11813_s1 + $0x138] sm:$0xf0] }
 0x1ad   :  { %v7001_v32 = vor.u32 %v7885_v22, %v7000_v21  ;;  %v6952_v9 = vld [vmem:[%s11813_s1 + $0x1008] sm:$0xf]  ;;  %v7359_v21 = vld [vmem:[%s11813_s1 + $0xc] sm:$0xf]  ;;  %v5053_v22 = vor.u32 %v7395_v6, %v5050_v7  ;;  %v7980_v6 = vld [vmem:[#allocation1] sm:$0xff] }
 0x1ae   :  { %4170 = vmatmul.bf16.vlgmr.msra.gmra.mxu0 %v8875_v46  ;;  %4183 = vmatmul.bf16.vlgmr.msra.gmra.mxu1 %v8879_v48  ;;  %v3977_v24 = vadd.f32 %v3976_v13, %v3964_v10  ;;  %v7873_v10 = vld [vmem:[%s11813_s1 + $0x1014] sm:$0xf0]  ;;  %v4925_v13 = vor.u32 %v7363_v4, %v4922_v19  ;;  %v5242_v4 = vld [vmem:[%s11813_s1 + $0x2b8] sm:$0xf0]  ;;  %v7475_v19 = vld [vmem:[%s11813_s1 + $0x3ac] sm:$0xf] }
 0x1af   :  { %4214 = vmatpush.bf16.msrb.mxu0 %v7065_v25  ;;  %4227 = vmatpush.bf16.msrb.mxu1 %v7193_v26  ;;  %v7917_v25 = vld [vmem:[%s11813_s1 + $0x1174] sm:$0xf0]  ;;  %v7371_v26 = vld [vmem:[%s11813_s1 + $0x6c] sm:$0xf] }
 0x1b0   :  { %4240 = vmatpush.bf16.msrb.mxu2 %v5021_v30  ;;  %4253 = vmatpush.bf16.msrb.mxu3 %v5149_v45  ;;  %v4954_v30 = vld [vmem:[%s11813_s1 + $0x78] sm:$0xf0]  ;;  %v7129_v45 = vor.u32 %v7917_v25, %v7128_v23 }
 0x1b1   :  { %4196 = vmatmul.bf16.vlgmr.msra.gmra.mxu2 %v8877_v47  ;;  %4209 = vmatmul.bf16.vlgmr.msra.gmra.mxu3 %v8881_v49  ;;  %v4957_v33 = vor.u32 %v7371_v26, %v4954_v30  ;;  %v4906_v23 = vld [vmem:[%s11813_s1 + $0x18] sm:$0xf0]  ;;  %v7451_v26 = vld [vmem:[%s11813_s1 + $0x2ec] sm:$0xf] }
 0x1b2   :  { %v5274_v30 = vld [vmem:[%s11813_s1 + $0x2f8] sm:$0xf0] }
 0x1b3   :  { %4215 = vmatpush.bf16.msrb.mxu0 %v7049_v40  ;;  %4228 = vmatpush.bf16.msrb.mxu1 %v7177_v41  ;;  %v7913_v41 = vld [vmem:[%s11813_s1 + $0x1154] sm:$0xf0]  ;;  %v3965_v52 = vpop.f32.mrf.mxu0  ;;  %v3978_v54 = vpop.f32.mrf.mxu1 }
 0x1b4   :  { %4241 = vmatpush.bf16.msrb.mxu2 %v5005_v42  ;;  %4254 = vmatpush.bf16.msrb.mxu3 %v5133_v50  ;;  %v3989_v40 = vpop.f32.mrf.mxu2  ;;  %v7367_v42 = vld [vmem:[%s11813_s1 + $0x4c] sm:$0xf]  ;;  %v4002_v63 = vpop.f32.mrf.mxu3 }
 0x1b5   :  { %v3990_v44 = vadd.f32 %v3989_v40, %v3977_v24  ;;  %v7399_v50 = vld [vmem:[%s11813_s1 + $0x14c] sm:$0xf]  ;;  %v5034_v24 = vld [vmem:[%s11813_s1 + $0x118] sm:$0xf0] }
 0x1b6   :  { %v5069_v3 = vor.u32 %v7399_v50, %v5066_v51  ;;  %v5658_v40 = vld [vmem:[%s11813_s1 + $0x5f8] sm:$0xf0]  ;;  %v7479_v51 = vld [vmem:[%s11813_s1 + $0x3cc] sm:$0xf] }
 0x1b7   :  { %4216 = vmatpush.bf16.msrb.mxu0 %v7033_v57  ;;  %4229 = vmatpush.bf16.msrb.mxu1 %v7161_v58  ;;  %v10811_v55 = vadd.f32 %v4002_v63, %v3990_v44  ;;  %v7113_v57 = vor.u32 %v7913_v41, %v7112_v38  ;;  %v4941_v58 = vor.u32 %v7367_v42, %v4938_v56  ;;  %v7447_v63 = vld [vmem:[%s11813_s1 + $0x2cc] sm:$0xf]  ;;  %v5258_v50 = vld [vmem:[%s11813_s1 + $0x2d8] sm:$0xf0] }
 0x1b8   :  { %4242 = vmatpush.bf16.msrb.mxu2 %v4989_v59  ;;  %4255 = vmatpush.bf16.msrb.mxu3 %v5117_v18  ;;  %v6968_v59 = vld [vmem:[%s11813_s1 + $0x1028] sm:$0xf]  ;;  %v7909_v18 = vld [vmem:[%s11813_s1 + $0x1134] sm:$0xf0]  ;;  %v4909_v38 = vor.u32 %v7359_v21, %v4906_v23  ;;  %v5277_v42 = vor.u32 %v7451_v26, %v5274_v30  ;;  %v7511_v54 = vld [vmem:[%s11813_s1 + $0x4cc] sm:$0xf] }
 0x1b9   :  { %v6969_v8 = vor.u32 %v7877_v61, %v6968_v59  ;;  %v5642_v59 = vld [vmem:[%s11813_s1 + $0x5d8] sm:$0xf0]  ;;  %v5261_v61 = vor.u32 %v7447_v63, %v5258_v50  ;;  %v7439_v21 = vld [vmem:[%s11813_s1 + $0x28c] sm:$0xf] }
 0x1ba   :  { %v7503_v30 = vld [vmem:[%s11813_s1 + $0x48c] sm:$0xf]  ;;  %v5466_v50 = vld [vmem:[%s11813_s1 + $0x478] sm:$0xf0] }
 0x1bb   :  { %4217 = vmatpush.bf16.msrb.mxu0 %v7017_v11  ;;  %4230 = vmatpush.bf16.msrb.mxu1 %v7145_v14  ;;  %v7097_v11 = vor.u32 %v7909_v18, %v7096_v62  ;;  %v7080_v14 = vld [vmem:[%s11813_s1 + $0x1108] sm:$0xf]  ;;  %v7443_v18 = vld [vmem:[%s11813_s1 + $0x2ac] sm:$0xf] }
 0x1bc   :  { %4243 = vmatpush.bf16.msrb.mxu2 %v4973_v20  ;;  %4256 = vmatpush.bf16.msrb.mxu3 %v5101_v36  ;;  %v7905_v20 = vld [vmem:[%s11813_s1 + $0x1114] sm:$0xf0]  ;;  %v7391_v36 = vld [vmem:[%s11813_s1 + $0x10c] sm:$0xf]  ;;  %v3991_v25 = vpop.f32.mrf.mxu2  ;;  %v4004_v43 = vpop.f32.mrf.mxu3 }
 0x1bd   :  { %v7081_v37 = vor.u32 %v7905_v20, %v7080_v14  ;;  %v5037_v41 = vor.u32 %v7391_v36, %v5034_v24  ;;  %v5626_v14 = vld [vmem:[%s11813_s1 + $0x5b8] sm:$0xf0]  ;;  %v5245_v20 = vor.u32 %v7443_v18, %v5242_v4  ;;  %v7982_v24 = vld [vmem:[%s11814_s2] sm:$0xf]  ;;  %v7535_v43 = vld [vmem:[%s11813_s1 + $0x58c] sm:$0xf] }
 0x1be   :  { %v5226_v36 = vld [vmem:[%s11813_s1 + $0x298] sm:$0xf0]  ;;  %v610_v25 = vperm.slane %v7982_v24, 2  ;;  %v7499_v63 = vld [vmem:[%s11813_s1 + $0x46c] sm:$0xf] }
 0x1bf   :  { %4218 = vmatpush.bf16.msrb.mxu0 %v7001_v32  ;;  %4231 = vmatpush.bf16.msrb.mxu1 %v7129_v45  ;;  %v6953_v32 = vor.u32 %v7873_v10, %v6952_v9  ;;  %v5402_v45 = vld [vmem:[%s11813_s1 + $0x3f8] sm:$0xf0]  ;;  %v7507_v9 = vld [vmem:[%s11813_s1 + $0x4ac] sm:$0xf] }
 0x1c0   :  { %4244 = vmatpush.bf16.msrb.mxu2 %v4957_v33  ;;  %4257 = vmatpush.bf16.msrb.mxu3 %v5085_v39  ;;  %v7515_v33 = vld [vmem:[%s11813_s1 + $0x4ec] sm:$0xf]  ;;  %v5405_v56 = vor.u32 %v7483_v31, %v5402_v45  ;;  %v5498_v10 = vld [vmem:[%s11813_s1 + $0x4b8] sm:$0xf0]  ;;  %v5229_v45 = vor.u32 %v7439_v21, %v5226_v36 }
 0x1c1   :  { %v7547_v39 = vld [vmem:[%s11813_s1 + $0x5ec] sm:$0xf]  ;;  %v5533_v44 = vor.u32 %v7515_v33, %v5530_v35  ;;  %v5501_v23 = vor.u32 %v7507_v9, %v5498_v10  ;;  %v5482_v31 = vld [vmem:[%s11813_s1 + $0x498] sm:$0xf0] }
 0x1c2   :  { %v5661_v52 = vor.u32 %v7547_v39, %v5658_v40  ;;  %v5210_v39 = vld [vmem:[%s11813_s1 + $0x278] sm:$0xf0]  ;;  %v7467_v40 = vld [vmem:[%s11813_s1 + $0x36c] sm:$0xf] }
 0x1c3   :  { %4219 = vmatpush.bf16.msrb.mxu0 %v6985_v53  ;;  %4232 = vmatpush.bf16.msrb.mxu1 %v7113_v57  ;;  %v5386_v53 = vld [vmem:[%s11813_s1 + $0x3d8] sm:$0xf0]  ;;  %v7527_v9 = vld [vmem:[%s11813_s1 + $0x54c] sm:$0xf] }
 0x1c4   :  { %4245 = vmatpush.bf16.msrb.mxu2 %v4941_v58  ;;  %4258 = vmatpush.bf16.msrb.mxu3 %v5069_v3  ;;  %v5514_v57 = vld [vmem:[%s11813_s1 + $0x4d8] sm:$0xf0]  ;;  %v7543_v58 = vld [vmem:[%s11813_s1 + $0x5cc] sm:$0xf]  ;;  %v5389_v62 = vor.u32 %v7479_v51, %v5386_v53 }
 0x1c5   :  { %v5517_v3 = vor.u32 %v7511_v54, %v5514_v57  ;;  %v5645_v7 = vor.u32 %v7543_v58, %v5642_v59  ;;  %v7531_v51 = vld [vmem:[%s11813_s1 + $0x56c] sm:$0xf]  ;;  %v5469_v58 = vor.u32 %v7499_v63, %v5466_v50  ;;  %v5322_v4 = vld [vmem:[%s11813_s1 + $0x358] sm:$0xf0] }
 0x1c6   :  { %v7431_v59 = vld [vmem:[%s11813_s1 + $0x24c] sm:$0xf]  ;;  %v5578_v10 = vld [vmem:[%s11813_s1 + $0x558] sm:$0xf0] }
 0x1c7   :  { %4220 = vmatpush.bf16.msrb.mxu0 %v6969_v8  ;;  %4233 = vmatpush.bf16.msrb.mxu1 %v7097_v11  ;;  %v5370_v8 = vld [vmem:[%s11813_s1 + $0x3b8] sm:$0xf0]  ;;  %v7981_v11 = vld [vmem:[#allocation1 + $0x9] sm:$0xff]  ;;  %v5581_v24 = vor.u32 %v7527_v9, %v5578_v10 }
 0x1c8   :  { %4246 = vmatpush.bf16.msrb.mxu2 %v4925_v13  ;;  %4259 = vmatpush.bf16.msrb.mxu3 %v5053_v22  ;;  %v7539_v13 = vld [vmem:[%s11813_s1 + $0x5ac] sm:$0xf]  ;;  %v5373_v22 = vor.u32 %v7475_v19, %v5370_v8 }
 0x1c9   :  { %v5629_v26 = vor.u32 %v7539_v13, %v5626_v14  ;;  %v7495_v19 = vld [vmem:[%s11813_s1 + $0x44c] sm:$0xf] }
 0x1ca   :  { %v7459_v36 = vld [vmem:[%s11813_s1 + $0x32c] sm:$0xf] }
 0x1cb   :  { %4221 = vmatpush.bf16.msrb.mxu0 %v6953_v32  ;;  %4234 = vmatpush.bf16.msrb.mxu1 %v7081_v37  ;;  %v5610_v32 = vld [vmem:[%s11813_s1 + $0x598] sm:$0xf0]  ;;  %v4015_v33 = vpop.f32.mrf.mxu0  ;;  %v5485_v37 = vor.u32 %v7503_v30, %v5482_v31  ;;  %v7523_v30 = vld [vmem:[%s11813_s1 + $0x52c] sm:$0xf] }
 0x1cc   :  { %4247 = vmatpush.bf16.msrb.mxu2 %v4909_v38  ;;  %4260 = vmatpush.bf16.msrb.mxu3 %v5037_v41  ;;  %v7435_v38 = vld [vmem:[%s11813_s1 + $0x26c] sm:$0xf]  ;;  %v4016_v41 = vadd.f32 %v4015_v33, %v610_v25  ;;  %v5306_v25 = vld [vmem:[%s11813_s1 + $0x338] sm:$0xf0] }
 0x1cd   :  { %v5213_v54 = vor.u32 %v7435_v38, %v5210_v39  ;;  %v5562_v31 = vld [vmem:[%s11813_s1 + $0x538] sm:$0xf0]  ;;  %v5309_v33 = vor.u32 %v7459_v36, %v5306_v25  ;;  %v7487_v39 = vld [vmem:[%s11813_s1 + $0x40c] sm:$0xf] }
 0x1ce   :  { %4222 = vmatmul.bf16.vlgmr.msrb.gmra.mxu0 %v7980_v6  ;;  %4235 = vmatmul.bf16.vlgmr.msrb.gmra.mxu1 %v7981_v11  ;;  %v5450_v6 = vld [vmem:[%s11813_s1 + $0x458] sm:$0xf0]  ;;  %v7579_v50 = vld [vmem:[%s11813_s1 + $0x6ec] sm:$0xf] }
 0x1cf   :  { %4266 = vmatpush.bf16.msra.mxu0 %v5277_v42  ;;  %4279 = vmatpush.bf16.msra.mxu1 %v5405_v56  ;;  %v4028_v42 = vpop.f32.mrf.mxu1  ;;  %v5613_v56 = vor.u32 %v7535_v43, %v5610_v32  ;;  %v5453_v21 = vor.u32 %v7495_v19, %v5450_v6  ;;  %v7423_v32 = vld [vmem:[%s11813_s1 + $0x20c] sm:$0xf]  ;;  %v5290_v38 = vld [vmem:[%s11813_s1 + $0x318] sm:$0xf0] }
 0x1d0   :  { %4292 = vmatpush.bf16.msra.mxu2 %v5533_v44  ;;  %4305 = vmatpush.bf16.msra.mxu3 %v5661_v52  ;;  %v5338_v44 = vld [vmem:[%s11813_s1 + $0x378] sm:$0xf0]  ;;  %v4029_v53 = vadd.f32 %v4028_v42, %v4016_v41  ;;  %v5565_v41 = vor.u32 %v7523_v30, %v5562_v31  ;;  %v7607_v9 = vld [vmem:[%s11813_s1 + $0x7cc] sm:$0xf] }
 0x1d1   :  { %4248 = vmatmul.bf16.vlgmr.msrb.gmra.mxu2 %v8373_v28  ;;  %4261 = vmatmul.bf16.vlgmr.msrb.gmra.mxu3 %v8383_v34  ;;  %v7471_v28 = vld [vmem:[%s11813_s1 + $0x38c] sm:$0xf]  ;;  %v5354_v34 = vld [vmem:[%s11813_s1 + $0x398] sm:$0xf0]  ;;  %v5341_v57 = vor.u32 %v7467_v40, %v5338_v44 }
 0x1d2   :  { %v5357_v35 = vor.u32 %v7471_v28, %v5354_v34  ;;  %v5594_v52 = vld [vmem:[%s11813_s1 + $0x578] sm:$0xf0]  ;;  %v7635_v31 = vld [vmem:[%s11813_s1 + $0x8ac] sm:$0xf] }
 0x1d3   :  { %4267 = vmatpush.bf16.msra.mxu0 %v5261_v61  ;;  %4280 = vmatpush.bf16.msra.mxu1 %v5389_v62  ;;  %v5194_v61 = vld [vmem:[%s11813_s1 + $0x258] sm:$0xf0]  ;;  %v7463_v62 = vld [vmem:[%s11813_s1 + $0x34c] sm:$0xf]  ;;  %v5597_v18 = vor.u32 %v7531_v51, %v5594_v52  ;;  %v4017_v14 = vpop.f32.mrf.mxu0 }
 0x1d4   :  { %4293 = vmatpush.bf16.msra.mxu2 %v5517_v3  ;;  %4306 = vmatpush.bf16.msra.mxu3 %v5645_v7  ;;  %v4041_v3 = vpop.f32.mrf.mxu2  ;;  %v4054_v8 = vpop.f32.mrf.mxu3  ;;  %v5197_v11 = vor.u32 %v7431_v59, %v5194_v61  ;;  %v5434_v34 = vld [vmem:[%s11813_s1 + $0x438] sm:$0xf0]  ;;  %v7611_v52 = vld [vmem:[%s11813_s1 + $0x7ec] sm:$0xf] }
 0x1d5   :  { %v4042_v7 = vadd.f32 %v4041_v3, %v4029_v53  ;;  %v5418_v42 = vld [vmem:[%s11813_s1 + $0x418] sm:$0xf0]  ;;  %v7639_v14 = vld [vmem:[%s11813_s1 + $0x8cc] sm:$0xf] }
 0x1d6   :  { %v5546_v44 = vld [vmem:[%s11813_s1 + $0x518] sm:$0xf0]  ;;  %v5421_v61 = vor.u32 %v7487_v39, %v5418_v42  ;;  %v7631_v39 = vld [vmem:[%s11813_s1 + $0x88c] sm:$0xf] }
 0x1d7   :  { %4268 = vmatpush.bf16.msra.mxu0 %v5245_v20  ;;  %4281 = vmatpush.bf16.msra.mxu1 %v5373_v22  ;;  %v11010_v13 = vadd.f32 %v4054_v8, %v4042_v7  ;;  %v5325_v20 = vor.u32 %v7463_v62, %v5322_v4  ;;  %v7427_v22 = vld [vmem:[%s11813_s1 + $0x22c] sm:$0xf]  ;;  %v4030_v28 = vpop.f32.mrf.mxu1  ;;  %v5786_v51 = vld [vmem:[%s11813_s1 + $0x6f8] sm:$0xf0] }
 0x1d8   :  { %4294 = vmatpush.bf16.msra.mxu2 %v5501_v23  ;;  %4307 = vmatpush.bf16.msra.mxu3 %v5629_v26  ;;  %v5178_v23 = vld [vmem:[%s11813_s1 + $0x238] sm:$0xf0]  ;;  %v7491_v26 = vld [vmem:[%s11813_s1 + $0x42c] sm:$0xf]  ;;  %v5789_v4 = vor.u32 %v7579_v50, %v5786_v51 }
 0x1d9   :  { %v5181_v43 = vor.u32 %v7427_v22, %v5178_v23  ;;  %v7675_v62 = vld [vmem:[%s11813_s1 + $0x9ec] sm:$0xf]  ;;  %v6170_v3 = vld [vmem:[%s11813_s1 + $0x9f8] sm:$0xf0] }
 0x1da   :  { %v7575_v7 = vld [vmem:[%s11813_s1 + $0x6cc] sm:$0xf]  ;;  %v5770_v8 = vld [vmem:[%s11813_s1 + $0x6d8] sm:$0xf0]  ;;  %v6173_v10 = vor.u32 %v7675_v62, %v6170_v3 }
 0x1db   :  { %4269 = vmatpush.bf16.msra.mxu0 %v5229_v45  ;;  %4282 = vmatpush.bf16.msra.mxu1 %v5357_v35  ;;  %v5162_v45 = vld [vmem:[%s11813_s1 + $0x218] sm:$0xf0]  ;;  %v5437_v35 = vor.u32 %v7491_v26, %v5434_v34  ;;  %v5773_v23 = vor.u32 %v7575_v7, %v5770_v8  ;;  %v7603_v26 = vld [vmem:[%s11813_s1 + $0x7ac] sm:$0xf] }
 0x1dc   :  { %4295 = vmatpush.bf16.msra.mxu2 %v5485_v37  ;;  %4308 = vmatpush.bf16.msra.mxu3 %v5613_v56  ;;  %v7455_v37 = vld [vmem:[%s11813_s1 + $0x30c] sm:$0xf]  ;;  %v4043_v40 = vpop.f32.mrf.mxu2  ;;  %v4056_v63 = vpop.f32.mrf.mxu3  ;;  %v5165_v53 = vor.u32 %v7423_v32, %v5162_v45  ;;  %v6154_v22 = vld [vmem:[%s11813_s1 + $0x9d8] sm:$0xf0] }
 0x1dd   :  { %v7519_v56 = vld [vmem:[%s11813_s1 + $0x50c] sm:$0xf]  ;;  %v5293_v59 = vor.u32 %v7455_v37, %v5290_v38  ;;  %v5754_v25 = vld [vmem:[%s11813_s1 + $0x6b8] sm:$0xf0] }
 0x1de   :  { %v5882_v30 = vld [vmem:[%s11813_s1 + $0x7b8] sm:$0xf0]  ;;  %v7667_v32 = vld [vmem:[%s11813_s1 + $0x9ac] sm:$0xf] }
 0x1df   :  { %4270 = vmatpush.bf16.msra.mxu0 %v5213_v54  ;;  %4283 = vmatpush.bf16.msra.mxu1 %v5341_v57  ;;  %v5914_v54 = vld [vmem:[%s11813_s1 + $0x7f8] sm:$0xf0]  ;;  %v7643_v57 = vld [vmem:[%s11813_s1 + $0x8ec] sm:$0xf] }
 0x1e0   :  { %4296 = vmatpush.bf16.msra.mxu2 %v5469_v58  ;;  %4309 = vmatpush.bf16.msra.mxu3 %v5597_v18  ;;  %v6042_v58 = vld [vmem:[%s11813_s1 + $0x8f8] sm:$0xf0]  ;;  %v5549_v18 = vor.u32 %v7519_v56, %v5546_v44  ;;  %v5917_v19 = vor.u32 %v7611_v52, %v5914_v54  ;;  %v7567_v37 = vld [vmem:[%s11813_s1 + $0x68c] sm:$0xf] }
 0x1e1   :  { %v6045_v6 = vor.u32 %v7643_v57, %v6042_v58  ;;  %v5738_v38 = vld [vmem:[%s11813_s1 + $0x698] sm:$0xf0]  ;;  %v7563_v51 = vld [vmem:[%s11813_s1 + $0x66c] sm:$0xf] }
 0x1e2   :  { %v5994_v40 = vld [vmem:[%s11813_s1 + $0x898] sm:$0xf0]  ;;  %v5741_v56 = vor.u32 %v7567_v37, %v5738_v38  ;;  %v7659_v3 = vld [vmem:[%s11813_s1 + $0x96c] sm:$0xf] }
 0x1e3   :  { %4271 = vmatpush.bf16.msra.mxu0 %v5197_v11  ;;  %4284 = vmatpush.bf16.msra.mxu1 %v5325_v20  ;;  %v5898_v11 = vld [vmem:[%s11813_s1 + $0x7d8] sm:$0xf0]  ;;  %v5997_v50 = vor.u32 %v7631_v39, %v5994_v40  ;;  %v7559_v7 = vld [vmem:[%s11813_s1 + $0x64c] sm:$0xf] }
 0x1e4   :  { %4297 = vmatpush.bf16.msra.mxu2 %v5453_v21  ;;  %4310 = vmatpush.bf16.msra.mxu3 %v5581_v24  ;;  %v6026_v20 = vld [vmem:[%s11813_s1 + $0x8d8] sm:$0xf0]  ;;  %v7671_v21 = vld [vmem:[%s11813_s1 + $0x9cc] sm:$0xf]  ;;  %v5901_v36 = vor.u32 %v7607_v9, %v5898_v11 }
 0x1e5   :  { %v6029_v28 = vor.u32 %v7639_v14, %v6026_v20  ;;  %v7571_v24 = vld [vmem:[%s11813_s1 + $0x6ac] sm:$0xf]  ;;  %v6157_v34 = vor.u32 %v7671_v21, %v6154_v22  ;;  %v6122_v42 = vld [vmem:[%s11813_s1 + $0x998] sm:$0xf0] }
 0x1e6   :  { %v5757_v45 = vor.u32 %v7571_v24, %v5754_v25  ;;  %v5722_v52 = vld [vmem:[%s11813_s1 + $0x678] sm:$0xf0]  ;;  %v7591_v9 = vld [vmem:[%s11813_s1 + $0x74c] sm:$0xf] }
 0x1e7   :  { %4272 = vmatpush.bf16.msra.mxu0 %v5181_v43  ;;  %4285 = vmatpush.bf16.msra.mxu1 %v5309_v33  ;;  %v6010_v43 = vld [vmem:[%s11813_s1 + $0x8b8] sm:$0xf0]  ;;  %v5885_v33 = vor.u32 %v7603_v26, %v5882_v30  ;;  %v7623_v20 = vld [vmem:[%s11813_s1 + $0x84c] sm:$0xf] }
 0x1e8   :  { %4298 = vmatpush.bf16.msra.mxu2 %v5437_v35  ;;  %4311 = vmatpush.bf16.msra.mxu3 %v5565_v41  ;;  %v6013_v35 = vor.u32 %v7635_v31, %v6010_v43  ;;  %v7663_v41 = vld [vmem:[%s11813_s1 + $0x98c] sm:$0xf]  ;;  %v5978_v62 = vld [vmem:[%s11813_s1 + $0x878] sm:$0xf0] }
 0x1e9   :  { %v6125_v58 = vor.u32 %v7663_v41, %v6122_v42  ;;  %v5706_v8 = vld [vmem:[%s11813_s1 + $0x658] sm:$0xf0]  ;;  %v7555_v31 = vld [vmem:[%s11813_s1 + $0x62c] sm:$0xf] }
 0x1ea   :  { %v5834_v14 = vld [vmem:[%s11813_s1 + $0x758] sm:$0xf0]  ;;  %v5709_v24 = vor.u32 %v7559_v7, %v5706_v8  ;;  %v7651_v38 = vld [vmem:[%s11813_s1 + $0x92c] sm:$0xf] }
 0x1eb   :  { %4273 = vmatpush.bf16.msra.mxu0 %v5165_v53  ;;  %4286 = vmatpush.bf16.msra.mxu1 %v5293_v59  ;;  %v4067_v44 = vpop.f32.mrf.mxu0  ;;  %v7595_v53 = vld [vmem:[%s11813_s1 + $0x76c] sm:$0xf]  ;;  %v4080_v57 = vpop.f32.mrf.mxu1  ;;  %v5850_v59 = vld [vmem:[%s11813_s1 + $0x778] sm:$0xf0] }
 0x1ec   :  { %4299 = vmatpush.bf16.msra.mxu2 %v5421_v61  ;;  %4312 = vmatpush.bf16.msra.mxu3 %v5549_v18  ;;  %v4068_v54 = vadd.f32 %v4067_v44, %v11010_v13  ;;  %v7627_v61 = vld [vmem:[%s11813_s1 + $0x86c] sm:$0xf]  ;;  %v6106_v13 = vld [vmem:[%s11813_s1 + $0x978] sm:$0xf0] }
 0x1ed   :  { %v6109_v11 = vor.u32 %v7659_v3, %v6106_v13  ;;  %v5962_v21 = vld [vmem:[%s11813_s1 + $0x858] sm:$0xf0]  ;;  %v7583_v42 = vld [vmem:[%s11813_s1 + $0x70c] sm:$0xf] }
 0x1ee   :  { %4274 = vmatmul.bf16.vlgmr.msra.gmra.mxu0 %v8371_v27  ;;  %4287 = vmatmul.bf16.vlgmr.msra.gmra.mxu1 %v8375_v29  ;;  %v7599_v27 = vld [vmem:[%s11813_s1 + $0x78c] sm:$0xf]  ;;  %v5866_v29 = vld [vmem:[%s11813_s1 + $0x798] sm:$0xf0]  ;;  %v4081_v18 = vadd.f32 %v4080_v57, %v4068_v54  ;;  %v5965_v30 = vor.u32 %v7623_v20, %v5962_v21 }
 0x1ef   :  { %4318 = vmatpush.bf16.msrb.mxu0 %v5789_v4  ;;  %4331 = vmatpush.bf16.msrb.mxu1 %v5917_v19  ;;  %v5869_v63 = vor.u32 %v7599_v27, %v5866_v29  ;;  %v5725_v4 = vor.u32 %v7563_v51, %v5722_v52  ;;  %v5853_v19 = vor.u32 %v7595_v53, %v5850_v59  ;;  %v5690_v43 = vld [vmem:[%s11813_s1 + $0x638] sm:$0xf0]  ;;  %v7551_v29 = vld [vmem:[%s11813_s1 + $0x60c] sm:$0xf] }
 0x1f0   :  { %4344 = vmatpush.bf16.msrb.mxu2 %v6045_v6  ;;  %4357 = vmatpush.bf16.msrb.mxu3 %v6173_v10  ;;  %v5981_v6 = vor.u32 %v7627_v61, %v5978_v62  ;;  %v5946_v37 = vld [vmem:[%s11813_s1 + $0x838] sm:$0xf0]  ;;  %v7615_v44 = vld [vmem:[%s11813_s1 + $0x80c] sm:$0xf] }
 0x1f1   :  { %4300 = vmatmul.bf16.vlgmr.msra.gmra.mxu2 %v8451_v0  ;;  %v6138_v0 = vld [vmem:[%s11813_s1 + $0x9b8] sm:$0xf0]  ;;  %4313 = vmatmul.bf16.vlgmr.msra.gmra.mxu3 %v8455_v2  ;;  %v7647_v52 = vld [vmem:[%s11813_s1 + $0x90c] sm:$0xf] }
 0x1f2   :  { %v6141_v2 = vor.u32 %v7667_v32, %v6138_v0  ;;  %v7587_v32 = vld [vmem:[%s11813_s1 + $0x72c] sm:$0xf]  ;;  %v6074_v27 = vld [vmem:[%s11813_s1 + $0x938] sm:$0xf0] }
 0x1f3   :  { %4319 = vmatpush.bf16.msrb.mxu0 %v5773_v23  ;;  %4332 = vmatpush.bf16.msrb.mxu1 %v5901_v36  ;;  %v7655_v36 = vld [vmem:[%s11813_s1 + $0x94c] sm:$0xf]  ;;  %v4069_v26 = vpop.f32.mrf.mxu0  ;;  %v4082_v0 = vpop.f32.mrf.mxu1  ;;  %v5674_v39 = vld [vmem:[%s11813_s1 + $0x618] sm:$0xf0] }
 0x1f4   :  { %4345 = vmatpush.bf16.msrb.mxu2 %v6029_v28  ;;  %4358 = vmatpush.bf16.msrb.mxu3 %v6157_v34  ;;  %v4093_v10 = vpop.f32.mrf.mxu2  ;;  %v4106_v23 = vpop.f32.mrf.mxu3  ;;  %v6090_v28 = vld [vmem:[%s11813_s1 + $0x958] sm:$0xf0]  ;;  %v5837_v34 = vor.u32 %v7591_v9, %v5834_v14  ;;  %v7707_v57 = vld [vmem:[%s11813_s1 + $0xaec] sm:$0xf]  ;;  %v5677_v61 = vor.u32 %v7551_v29, %v5674_v39 }
 0x1f5   :  { %v4094_v22 = vadd.f32 %v4093_v10, %v4081_v18  ;;  %v5930_v51 = vld [vmem:[%s11813_s1 + $0x818] sm:$0xf0]  ;;  %v7739_v59 = vld [vmem:[%s11813_s1 + $0xbec] sm:$0xf] }
 0x1f6   :  { %v6058_v53 = vld [vmem:[%s11813_s1 + $0x918] sm:$0xf0]  ;;  %v7771_v3 = vld [vmem:[%s11813_s1 + $0xcec] sm:$0xf] }
 0x1f7   :  { %4320 = vmatpush.bf16.msrb.mxu0 %v5757_v45  ;;  %4333 = vmatpush.bf16.msrb.mxu1 %v5885_v33  ;;  %v11209_v25 = vadd.f32 %v4106_v23, %v4094_v22  ;;  %v6093_v45 = vor.u32 %v7655_v36, %v6090_v28  ;;  %v5818_v33 = vld [vmem:[%s11813_s1 + $0x738] sm:$0xf0]  ;;  %v6061_v7 = vor.u32 %v7647_v52, %v6058_v53  ;;  %v7735_v20 = vld [vmem:[%s11813_s1 + $0xbcc] sm:$0xf] }
 0x1f8   :  { %4346 = vmatpush.bf16.msrb.mxu2 %v6013_v35  ;;  %4359 = vmatpush.bf16.msrb.mxu3 %v6141_v2  ;;  %v7619_v35 = vld [vmem:[%s11813_s1 + $0x82c] sm:$0xf]  ;;  %v5693_v2 = vor.u32 %v7555_v31, %v5690_v43  ;;  %v5821_v40 = vor.u32 %v7587_v32, %v5818_v33  ;;  %v6426_v62 = vld [vmem:[%s11813_s1 + $0xbf8] sm:$0xf0] }
 0x1f9   :  { %v5949_v41 = vor.u32 %v7619_v35, %v5946_v37  ;;  %v6554_v13 = vld [vmem:[%s11813_s1 + $0xcf8] sm:$0xf0]  ;;  %v6429_v9 = vor.u32 %v7739_v59, %v6426_v62  ;;  %v7767_v23 = vld [vmem:[%s11813_s1 + $0xccc] sm:$0xf] }
 0x1fa   :  { %v6557_v10 = vor.u32 %v7771_v3, %v6554_v13  ;;  %v6282_v14 = vld [vmem:[%s11813_s1 + $0xad8] sm:$0xf0]  ;;  %v7799_v28 = vld [vmem:[%s11813_s1 + $0xdcc] sm:$0xf] }
 0x1fb   :  { %4321 = vmatpush.bf16.msrb.mxu0 %v5741_v56  ;;  %4334 = vmatpush.bf16.msrb.mxu1 %v5869_v63  ;;  %v5802_v56 = vld [vmem:[%s11813_s1 + $0x718] sm:$0xf0]  ;;  %v7699_v31 = vld [vmem:[%s11813_s1 + $0xaac] sm:$0xf] }
 0x1fc   :  { %4347 = vmatpush.bf16.msrb.mxu2 %v5997_v50  ;;  %4360 = vmatpush.bf16.msrb.mxu3 %v6125_v58  ;;  %v4095_v63 = vpop.f32.mrf.mxu2  ;;  %v6077_v50 = vor.u32 %v7651_v38, %v6074_v27  ;;  %v4108_v54 = vpop.f32.mrf.mxu3  ;;  %v6298_v58 = vld [vmem:[%s11813_s1 + $0xaf8] sm:$0xf0]  ;;  %v5805_v18 = vor.u32 %v7583_v42, %v5802_v56  ;;  %v7731_v32 = vld [vmem:[%s11813_s1 + $0xbac] sm:$0xf] }
 0x1fd   :  { %v6301_v8 = vor.u32 %v7707_v57, %v6298_v58  ;;  %v6410_v22 = vld [vmem:[%s11813_s1 + $0xbd8] sm:$0xf0]  ;;  %v7763_v33 = vld [vmem:[%s11813_s1 + $0xcac] sm:$0xf] }
 0x1fe   :  { %v6538_v36 = vld [vmem:[%s11813_s1 + $0xcd8] sm:$0xf0]  ;;  %v7727_v29 = vld [vmem:[%s11813_s1 + $0xb8c] sm:$0xf] }
 0x1ff   :  { %4322 = vmatpush.bf16.msrb.mxu0 %v5725_v4  ;;  %4335 = vmatpush.bf16.msrb.mxu1 %v5853_v19  ;;  %v5933_v4 = vor.u32 %v7615_v44, %v5930_v51  ;;  %v7803_v19 = vld [vmem:[%s11813_s1 + $0xdec] sm:$0xf]  ;;  %v6266_v43 = vld [vmem:[%s11813_s1 + $0xab8] sm:$0xf0] }
 0x200   :  { %4348 = vmatpush.bf16.msrb.mxu2 %v5981_v6  ;;  %4361 = vmatpush.bf16.msrb.mxu3 %v6109_v11  ;;  %v6682_v6 = vld [vmem:[%s11813_s1 + $0xdf8] sm:$0xf0]  ;;  %v7703_v11 = vld [vmem:[%s11813_s1 + $0xacc] sm:$0xf]  ;;  %v6269_v38 = vor.u32 %v7699_v31, %v6266_v43 }
 0x201   :  { %v6685_v21 = vor.u32 %v7803_v19, %v6682_v6  ;;  %v6285_v26 = vor.u32 %v7703_v11, %v6282_v14  ;;  %v6522_v35 = vld [vmem:[%s11813_s1 + $0xcb8] sm:$0xf0]  ;;  %v7791_v56 = vld [vmem:[%s11813_s1 + $0xd8c] sm:$0xf] }
 0x202   :  { %v6650_v37 = vld [vmem:[%s11813_s1 + $0xdb8] sm:$0xf0]  ;;  %v7691_v53 = vld [vmem:[%s11813_s1 + $0xa6c] sm:$0xf] }
 0x203   :  { %4323 = vmatpush.bf16.msrb.mxu0 %v5709_v24  ;;  %4336 = vmatpush.bf16.msrb.mxu1 %v5837_v34  ;;  %v6666_v24 = vld [vmem:[%s11813_s1 + $0xdd8] sm:$0xf0]  ;;  %v6413_v34 = vor.u32 %v7735_v20, %v6410_v22  ;;  %v7723_v57 = vld [vmem:[%s11813_s1 + $0xb6c] sm:$0xf] }
 0x204   :  { %4349 = vmatpush.bf16.msrb.mxu2 %v5965_v30  ;;  %4362 = vmatpush.bf16.msrb.mxu3 %v6093_v45  ;;  %v6541_v30 = vor.u32 %v7767_v23, %v6538_v36  ;;  %v6669_v0 = vor.u32 %v7799_v28, %v6666_v24  ;;  %v6394_v45 = vld [vmem:[%s11813_s1 + $0xbb8] sm:$0xf0]  ;;  %v7787_v3 = vld [vmem:[%s11813_s1 + $0xd6c] sm:$0xf] }
 0x205   :  { %v6397_v27 = vor.u32 %v7731_v32, %v6394_v45  ;;  %v6378_v39 = vld [vmem:[%s11813_s1 + $0xb98] sm:$0xf0]  ;;  %v7687_v6 = vld [vmem:[%s11813_s1 + $0xa4c] sm:$0xf] }
 0x206   :  { %v6634_v44 = vld [vmem:[%s11813_s1 + $0xd98] sm:$0xf0]  ;;  %v6381_v51 = vor.u32 %v7727_v29, %v6378_v39  ;;  %v7751_v14 = vld [vmem:[%s11813_s1 + $0xc4c] sm:$0xf] }
 0x207   :  { %4324 = vmatpush.bf16.msrb.mxu0 %v5693_v2  ;;  %4337 = vmatpush.bf16.msrb.mxu1 %v5821_v40  ;;  %v6525_v2 = vor.u32 %v7763_v33, %v6522_v35  ;;  %v7759_v40 = vld [vmem:[%s11813_s1 + $0xc8c] sm:$0xf]  ;;  %v6234_v54 = vld [vmem:[%s11813_s1 + $0xa78] sm:$0xf0]  ;;  %v6637_v58 = vor.u32 %v7791_v56, %v6634_v44 }
 0x208   :  { %4350 = vmatpush.bf16.msrb.mxu2 %v5949_v41  ;;  %4363 = vmatpush.bf16.msrb.mxu3 %v6077_v50  ;;  %v6506_v41 = vld [vmem:[%s11813_s1 + $0xc98] sm:$0xf0]  ;;  %v7783_v22 = vld [vmem:[%s11813_s1 + $0xd4c] sm:$0xf] }
 0x209   :  { %v6509_v52 = vor.u32 %v7759_v40, %v6506_v41  ;;  %v6362_v59 = vld [vmem:[%s11813_s1 + $0xb78] sm:$0xf0]  ;;  %v7715_v43 = vld [vmem:[%s11813_s1 + $0xb2c] sm:$0xf] }
 0x20a   :  { %v6490_v62 = vld [vmem:[%s11813_s1 + $0xc78] sm:$0xf0]  ;;  %v7747_v45 = vld [vmem:[%s11813_s1 + $0xc2c] sm:$0xf] }
 0x20b   :  { %4325 = vmatpush.bf16.msrb.mxu0 %v5677_v61  ;;  %4338 = vmatpush.bf16.msrb.mxu1 %v5805_v18  ;;  %v11353_v42 = vpop.f32.mrf.mxu0  ;;  %v11361_v50 = vpop.f32.mrf.mxu1  ;;  %v7755_v61 = vld [vmem:[%s11813_s1 + $0xc6c] sm:$0xf]  ;;  %v6618_v13 = vld [vmem:[%s11813_s1 + $0xd78] sm:$0xf0]  ;;  %v6237_v18 = vor.u32 %v7691_v53, %v6234_v54 }
 0x20c   :  { %4351 = vmatpush.bf16.msrb.mxu2 %v5933_v4  ;;  %4364 = vmatpush.bf16.msrb.mxu3 %v6061_v7  ;;  %v6365_v4 = vor.u32 %v7723_v57, %v6362_v59  ;;  %v6493_v19 = vor.u32 %v7755_v61, %v6490_v62  ;;  %v6218_v7 = vld [vmem:[%s11813_s1 + $0xa58] sm:$0xf0]  ;;  %v7779_v35 = vld [vmem:[%s11813_s1 + $0xd2c] sm:$0xf] }
 0x20d   :  { %v6346_v11 = vld [vmem:[%s11813_s1 + $0xb58] sm:$0xf0]  ;;  %v6221_v28 = vor.u32 %v7687_v6, %v6218_v7  ;;  %v7775_v41 = vld [vmem:[%s11813_s1 + $0xd0c] sm:$0xf] }
 0x20e   :  { %4326 = vmatmul.bf16.vlgmr.msrb.gmra.mxu0 %v8446_v60  ;;  %4339 = vmatmul.bf16.vlgmr.msrb.gmra.mxu1 %v8453_v1  ;;  %v7795_v60 = vld [vmem:[%s11813_s1 + $0xdac] sm:$0xf]  ;;  %v6474_v20 = vld [vmem:[%s11813_s1 + $0xc58] sm:$0xf0] }
 0x20f   :  { %4370 = vmatpush.bf16.msra.mxu0 %v6301_v8  ;;  %4383 = vmatpush.bf16.msra.mxu1 %v6429_v9  ;;  %v7695_v1 = vld [vmem:[%s11813_s1 + $0xa8c] sm:$0xf]  ;;  %v6621_v9 = vor.u32 %v7787_v3, %v6618_v13  ;;  %v6602_v23 = vld [vmem:[%s11813_s1 + $0xd58] sm:$0xf0] }
 0x210   :  { %4396 = vmatpush.bf16.msra.mxu2 %v6557_v10  ;;  %4409 = vmatpush.bf16.msra.mxu3 %v6685_v21  ;;  %v7719_v8 = vld [vmem:[%s11813_s1 + $0xb4c] sm:$0xf]  ;;  %v6202_v31 = vld [vmem:[%s11813_s1 + $0xa38] sm:$0xf0]  ;;  %v6605_v32 = vor.u32 %v7783_v22, %v6602_v23 }
 0x211   :  { %4352 = vmatmul.bf16.vlgmr.msrb.gmra.mxu2 %v8701_v12  ;;  %4365 = vmatmul.bf16.vlgmr.msrb.gmra.mxu3 %v8711_v16  ;;  %v6250_v12 = vld [vmem:[%s11813_s1 + $0xa98] sm:$0xf0]  ;;  %v6653_v16 = vor.u32 %v7795_v60, %v6650_v37  ;;  %v7931_v3 = vld [vmem:[%s11813_s1 + $0x11ec] sm:$0xf] }
 0x212   :  { %v6253_v63 = vor.u32 %v7695_v1, %v6250_v12  ;;  %v6458_v33 = vld [vmem:[%s11813_s1 + $0xc38] sm:$0xf0]  ;;  %v7711_v12 = vld [vmem:[%s11813_s1 + $0xb0c] sm:$0xf] }
 0x213   :  { %4371 = vmatpush.bf16.msra.mxu0 %v6285_v26  ;;  %4384 = vmatpush.bf16.msra.mxu1 %v6413_v34  ;;  %v4121_v36 = vpop.f32.mrf.mxu0  ;;  %v4134_v24 = vpop.f32.mrf.mxu1  ;;  %v6349_v26 = vor.u32 %v7719_v8, %v6346_v11  ;;  %v6477_v34 = vor.u32 %v7751_v14, %v6474_v20  ;;  %v6586_v60 = vld [vmem:[%s11813_s1 + $0xd38] sm:$0xf0]  ;;  %v6461_v1 = vor.u32 %v7747_v45, %v6458_v33  ;;  %v7831_v7 = vld [vmem:[%s11813_s1 + $0xecc] sm:$0xf] }
 0x214   :  { %4397 = vmatpush.bf16.msra.mxu2 %v6541_v30  ;;  %4410 = vmatpush.bf16.msra.mxu3 %v6669_v0  ;;  %v11396_v10 = vpop.f32.mrf.mxu2  ;;  %v11407_v21 = vpop.f32.mrf.mxu3  ;;  %v7683_v30 = vld [vmem:[%s11813_s1 + $0xa2c] sm:$0xf]  ;;  %v6330_v0 = vld [vmem:[%s11813_s1 + $0xb38] sm:$0xf0]  ;;  %v6589_v39 = vor.u32 %v7779_v35, %v6586_v60 }
 0x215   :  { %v6205_v37 = vor.u32 %v7683_v30, %v6202_v31  ;;  %v6314_v29 = vld [vmem:[%s11813_s1 + $0xb18] sm:$0xf0]  ;;  %v7895_v20 = vld [vmem:[%s11813_s1 + $0x10cc] sm:$0xf] }
 0x216   :  { %v6442_v40 = vld [vmem:[%s11813_s1 + $0xc18] sm:$0xf0]  ;;  %v6317_v61 = vor.u32 %v7711_v12, %v6314_v29  ;;  %v7927_v23 = vld [vmem:[%s11813_s1 + $0x11cc] sm:$0xf] }
 0x217   :  { %4372 = vmatpush.bf16.msra.mxu0 %v6269_v38  ;;  %4385 = vmatpush.bf16.msra.mxu1 %v6397_v27  ;;  %v7679_v38 = vld [vmem:[%s11813_s1 + $0xa0c] sm:$0xf]  ;;  %v6186_v27 = vld [vmem:[%s11813_s1 + $0xa18] sm:$0xf0] }
 0x218   :  { %4398 = vmatpush.bf16.msra.mxu2 %v6525_v2  ;;  %4411 = vmatpush.bf16.msra.mxu3 %v6653_v16  ;;  %v6333_v2 = vor.u32 %v7715_v43, %v6330_v0  ;;  %v7743_v16 = vld [vmem:[%s11813_s1 + $0xc0c] sm:$0xf]  ;;  %v6570_v56 = vld [vmem:[%s11813_s1 + $0xd18] sm:$0xf0]  ;;  %v6189_v54 = vor.u32 %v7679_v38, %v6186_v27 }
 0x219   :  { %v6938_v57 = vld [vmem:[%s11813_s1 + $0xff8] sm:$0xf0]  ;;  %v6445_v62 = vor.u32 %v7743_v16, %v6442_v40  ;;  %v7859_v31 = vld [vmem:[%s11813_s1 + $0xfac] sm:$0xf] }
 0x21a   :  { %v7066_v59 = vld [vmem:[%s11813_s1 + $0x10f8] sm:$0xf0]  ;;  %v7891_v0 = vld [vmem:[%s11813_s1 + $0x10ac] sm:$0xf] }
 0x21b   :  { %4373 = vmatpush.bf16.msra.mxu0 %v6253_v63  ;;  %4386 = vmatpush.bf16.msra.mxu1 %v6381_v51  ;;  %v7835_v63 = vld [vmem:[%s11813_s1 + $0xeec] sm:$0xf]  ;;  %v6810_v51 = vld [vmem:[%s11813_s1 + $0xef8] sm:$0xf0] }
 0x21c   :  { %4399 = vmatpush.bf16.msra.mxu2 %v6509_v52  ;;  %4412 = vmatpush.bf16.msra.mxu3 %v6637_v58  ;;  %v4147_v44 = vpop.f32.mrf.mxu2  ;;  %v7867_v52 = vld [vmem:[%s11813_s1 + $0xfec] sm:$0xf]  ;;  %v4160_v53 = vpop.f32.mrf.mxu3  ;;  %v7194_v13 = vld [vmem:[%s11813_s1 + $0x11f8] sm:$0xf0] }
 0x21d   :  { %v7899_v58 = vld [vmem:[%s11813_s1 + $0x10ec] sm:$0xf]  ;;  %v6794_v8 = vld [vmem:[%s11813_s1 + $0xed8] sm:$0xf0]  ;;  %v7197_v11 = vor.u32 %v7931_v3, %v7194_v13 }
 0x21e   :  { %v7069_v6 = vor.u32 %v7899_v58, %v7066_v59  ;;  %v6922_v14 = vld [vmem:[%s11813_s1 + $0xfd8] sm:$0xf0]  ;;  %v7855_v38 = vld [vmem:[%s11813_s1 + $0xf8c] sm:$0xf] }
 0x21f   :  { %4374 = vmatpush.bf16.msra.mxu0 %v6237_v18  ;;  %4387 = vmatpush.bf16.msra.mxu1 %v6365_v4  ;;  %v6573_v18 = vor.u32 %v7775_v41, %v6570_v56  ;;  %v6813_v4 = vor.u32 %v7835_v63, %v6810_v51  ;;  %v7050_v22 = vld [vmem:[%s11813_s1 + $0x10d8] sm:$0xf0]  ;;  %v7919_v29 = vld [vmem:[%s11813_s1 + $0x118c] sm:$0xf] }
 0x220   :  { %4400 = vmatpush.bf16.msra.mxu2 %v6493_v19  ;;  %4413 = vmatpush.bf16.msra.mxu3 %v6621_v9  ;;  %v6941_v19 = vor.u32 %v7867_v52, %v6938_v57  ;;  %v7863_v9 = vld [vmem:[%s11813_s1 + $0xfcc] sm:$0xf]  ;;  %v7178_v36 = vld [vmem:[%s11813_s1 + $0x11d8] sm:$0xf0] }
 0x221   :  { %v6925_v24 = vor.u32 %v7863_v9, %v6922_v14  ;;  %v6778_v30 = vld [vmem:[%s11813_s1 + $0xeb8] sm:$0xf0]  ;;  %v7181_v43 = vor.u32 %v7927_v23, %v7178_v36  ;;  %v7819_v44 = vld [vmem:[%s11813_s1 + $0xe6c] sm:$0xf] }
 0x222   :  { %v7034_v45 = vld [vmem:[%s11813_s1 + $0x10b8] sm:$0xf0]  ;;  %v7851_v51 = vld [vmem:[%s11813_s1 + $0xf6c] sm:$0xf] }
 0x223   :  { %4375 = vmatpush.bf16.msra.mxu0 %v6221_v28  ;;  %4388 = vmatpush.bf16.msra.mxu1 %v6349_v26  ;;  %v6797_v28 = vor.u32 %v7831_v7, %v6794_v8  ;;  %v7053_v26 = vor.u32 %v7895_v20, %v7050_v22  ;;  %v7162_v33 = vld [vmem:[%s11813_s1 + $0x11b8] sm:$0xf0]  ;;  %v7915_v58 = vld [vmem:[%s11813_s1 + $0x116c] sm:$0xf] }
 0x224   :  { %4401 = vmatpush.bf16.msra.mxu2 %v6477_v34  ;;  %4414 = vmatpush.bf16.msra.mxu3 %v6605_v32  ;;  %v7827_v34 = vld [vmem:[%s11813_s1 + $0xeac] sm:$0xf]  ;;  %v6906_v32 = vld [vmem:[%s11813_s1 + $0xfb8] sm:$0xf0] }
 0x225   :  { %v6781_v35 = vor.u32 %v7827_v34, %v6778_v30  ;;  %v6909_v60 = vor.u32 %v7859_v31, %v6906_v32  ;;  %v6890_v27 = vld [vmem:[%s11813_s1 + $0xf98] sm:$0xf0]  ;;  %v7815_v13 = vld [vmem:[%s11813_s1 + $0xe4c] sm:$0xf] }
 0x226   :  { %v7146_v16 = vld [vmem:[%s11813_s1 + $0x1198] sm:$0xf0]  ;;  %v6893_v41 = vor.u32 %v7855_v38, %v6890_v27  ;;  %v7879_v8 = vld [vmem:[%s11813_s1 + $0x104c] sm:$0xf] }
 0x227   :  { %4376 = vmatpush.bf16.msra.mxu0 %v6205_v37  ;;  %4389 = vmatpush.bf16.msra.mxu1 %v6333_v2  ;;  %v7037_v37 = vor.u32 %v7891_v0, %v7034_v45  ;;  %v7887_v2 = vld [vmem:[%s11813_s1 + $0x108c] sm:$0xf]  ;;  %v6746_v63 = vld [vmem:[%s11813_s1 + $0xe78] sm:$0xf0]  ;;  %v7149_v52 = vor.u32 %v7919_v29, %v7146_v16 }
 0x228   :  { %4402 = vmatpush.bf16.msra.mxu2 %v6461_v1  ;;  %4415 = vmatpush.bf16.msra.mxu3 %v6589_v39  ;;  %v7018_v1 = vld [vmem:[%s11813_s1 + $0x1098] sm:$0xf0]  ;;  %v7911_v14 = vld [vmem:[%s11813_s1 + $0x114c] sm:$0xf] }
 0x229   :  { %v7021_v56 = vor.u32 %v7887_v2, %v7018_v1  ;;  %v6874_v53 = vld [vmem:[%s11813_s1 + $0xf78] sm:$0xf0]  ;;  %v7843_v30 = vld [vmem:[%s11813_s1 + $0xf2c] sm:$0xf] }
 0x22a   :  { %v7002_v57 = vld [vmem:[%s11813_s1 + $0x1078] sm:$0xf0]  ;;  %v7875_v32 = vld [vmem:[%s11813_s1 + $0x102c] sm:$0xf] }
 0x22b   :  { %4377 = vmatpush.bf16.msra.mxu0 %v6189_v54  ;;  %4390 = vmatpush.bf16.msra.mxu1 %v6317_v61  ;;  %v11557_v12 = vpop.f32.mrf.mxu0  ;;  %v11565_v40 = vpop.f32.mrf.mxu1  ;;  %v7883_v54 = vld [vmem:[%s11813_s1 + $0x106c] sm:$0xf]  ;;  %v7130_v59 = vld [vmem:[%s11813_s1 + $0x1178] sm:$0xf0]  ;;  %v6749_v61 = vor.u32 %v7819_v44, %v6746_v63 }
 0x22c   :  { %4403 = vmatpush.bf16.msra.mxu2 %v6445_v62  ;;  %4416 = vmatpush.bf16.msra.mxu3 %v6573_v18  ;;  %v6877_v62 = vor.u32 %v7851_v51, %v6874_v53  ;;  %v7005_v3 = vor.u32 %v7883_v54, %v7002_v57  ;;  %v6730_v18 = vld [vmem:[%s11813_s1 + $0xe58] sm:$0xf0]  ;;  %v7907_v45 = vld [vmem:[%s11813_s1 + $0x112c] sm:$0xf]  ;;  %v7940_v57 = vld [vmem:[%s11815_s3 + $0x30] sm:$0xff] }
 0x22d   :  { %v6858_v7 = vld [vmem:[%s11813_s1 + $0xf58] sm:$0xf0]  ;;  %v6733_v23 = vor.u32 %v7815_v13, %v6730_v18  ;;  %v7871_v27 = vld [vmem:[%s11813_s1 + $0x100c] sm:$0xf] }
 0x22e   :  { %4378 = vmatmul.bf16.vlgmr.msra.gmra.mxu0 %v8709_v15  ;;  %4391 = vmatmul.bf16.vlgmr.msra.gmra.mxu1 %v8713_v17  ;;  %v7923_v15 = vld [vmem:[%s11813_s1 + $0x11ac] sm:$0xf]  ;;  %v6986_v9 = vld [vmem:[%s11813_s1 + $0x1058] sm:$0xf0] }
 0x22f   :  { %4422 = vmatpush.bf16.msrb.mxu0 %v6813_v4  ;;  %4435 = vmatpush.bf16.msrb.mxu1 %v6941_v19  ;;  %v7823_v17 = vld [vmem:[%s11813_s1 + $0xe8c] sm:$0xf]  ;;  %v7133_v19 = vor.u32 %v7915_v58, %v7130_v59  ;;  %v7114_v20 = vld [vmem:[%s11813_s1 + $0x1158] sm:$0xf0]  ;;  %v7948_v58 = vld [vmem:[%s11815_s3 + $0x70] sm:$0xff] }
 0x230   :  { %4448 = vmatpush.bf16.msrb.mxu2 %v7069_v6  ;;  %4461 = vmatpush.bf16.msrb.mxu3 %v7197_v11  ;;  %v7847_v4 = vld [vmem:[%s11813_s1 + $0xf4c] sm:$0xf]  ;;  %v6714_v34 = vld [vmem:[%s11813_s1 + $0xe38] sm:$0xf0]  ;;  %v7117_v31 = vor.u32 %v7911_v14, %v7114_v20 }
 0x231   :  { %4404 = vmatmul.bf16.vlgmr.msra.gmra.mxu2 %v8875_v46  ;;  %4417 = vmatmul.bf16.vlgmr.msra.gmra.mxu3 %v8879_v48  ;;  %v6762_v46 = vld [vmem:[%s11813_s1 + $0xe98] sm:$0xf0]  ;;  %v7165_v48 = vor.u32 %v7923_v15, %v7162_v33  ;;  %v7903_v29 = vld [vmem:[%s11813_s1 + $0x110c] sm:$0xf] }
 0x232   :  { %v6765_v39 = vor.u32 %v7823_v17, %v6762_v46  ;;  %v6970_v0 = vld [vmem:[%s11813_s1 + $0x1038] sm:$0xf0]  ;;  %v7839_v46 = vld [vmem:[%s11813_s1 + $0xf0c] sm:$0xf] }
 0x233   :  { %4423 = vmatpush.bf16.msrb.mxu0 %v6797_v28  ;;  %4436 = vmatpush.bf16.msrb.mxu1 %v6925_v24  ;;  %v4173_v22 = vpop.f32.mrf.mxu0  ;;  %v4186_v36 = vpop.f32.mrf.mxu1  ;;  %v6861_v28 = vor.u32 %v7847_v4, %v6858_v7  ;;  %v6989_v24 = vor.u32 %v7879_v8, %v6986_v9  ;;  %v7098_v15 = vld [vmem:[%s11813_s1 + $0x1138] sm:$0xf0]  ;;  %v7984_v59 = vld [vmem:[#allocation1 + $0x9] sm:$0xff]  ;;  %v7946_v4 = vld [vmem:[%s11815_s3 + $0x60] sm:$0xff] }
 0x234   :  { %4449 = vmatpush.bf16.msrb.mxu2 %v7053_v26  ;;  %4462 = vmatpush.bf16.msrb.mxu3 %v7181_v43  ;;  %v11600_v6 = vpop.f32.mrf.mxu2  ;;  %v11611_v11 = vpop.f32.mrf.mxu3  ;;  %v7811_v26 = vld [vmem:[%s11813_s1 + $0xe2c] sm:$0xf]  ;;  %v6842_v43 = vld [vmem:[%s11813_s1 + $0xf38] sm:$0xf0]  ;;  %v7101_v38 = vor.u32 %v7907_v45, %v7098_v15 }
 0x235   :  { %v6717_v33 = vor.u32 %v7811_v26, %v6714_v34  ;;  %v6698_v17 = vld [vmem:[%s11813_s1 + $0xe18] sm:$0xf0]  ;;  %v7944_v34 = vld [vmem:[%s11815_s3 + $0x50] sm:$0xff] }
 0x236   :  { %v6954_v2 = vld [vmem:[%s11813_s1 + $0x1018] sm:$0xf0] }
 0x237   :  { %4424 = vmatpush.bf16.msrb.mxu0 %v6781_v35  ;;  %4437 = vmatpush.bf16.msrb.mxu1 %v6909_v60  ;;  %v6845_v35 = vor.u32 %v7843_v30, %v6842_v43  ;;  %v6973_v60 = vor.u32 %v7875_v32, %v6970_v0  ;;  %v7082_v16 = vld [vmem:[%s11813_s1 + $0x1118] sm:$0xf0]  ;;  %v6957_v63 = vor.u32 %v7871_v27, %v6954_v2  ;;  %v7952_v30 = vld [vmem:[%s11815_s3 + $0x90] sm:$0xff]  ;;  %v7943_v32 = vld [vmem:[%s11815_s3 + $0x48] sm:$0xff] }
 0x238   :  { %4450 = vmatpush.bf16.msrb.mxu2 %v7037_v37  ;;  %4463 = vmatpush.bf16.msrb.mxu3 %v7165_v48  ;;  %v7807_v37 = vld [vmem:[%s11813_s1 + $0xe0c] sm:$0xf]  ;;  %v6826_v48 = vld [vmem:[%s11813_s1 + $0xf18] sm:$0xf0]  ;;  %v7085_v51 = vor.u32 %v7903_v29, %v7082_v16 }
 0x239   :  { %v6829_v44 = vor.u32 %v7839_v46, %v6826_v48  ;;  %v7949_v53 = vld [vmem:[%s11815_s3 + $0x78] sm:$0xff]  ;;  %v7951_v0 = vld [vmem:[%s11815_s3 + $0x88] sm:$0xff]  ;;  %v4475_v46 = vmax.f32 %v10811_v55, 0.0 }
 0x23a   :  { %v7937_v14 = vld [vmem:[%s11815_s3 + $0x18] sm:$0xff] }
 0x23b   :  { %4425 = vmatpush.bf16.msrb.mxu0 %v6765_v39  ;;  %4438 = vmatpush.bf16.msrb.mxu1 %v6893_v41  ;;  %v4120_v41 = vadd.f32 %v11353_v42, %v11209_v25  ;;  %v7957_v25 = vld [vmem:[%s11815_s3 + $0xb8] sm:$0xff]  ;;  %v4479_v27 = vpack.c.bf16 %v4475_v46, %v4475_v46 }
 0x23c   :  { %4451 = vmatpush.bf16.msrb.mxu2 %v7021_v56  ;;  %4464 = vmatpush.bf16.msrb.mxu3 %v7149_v52  ;;  %v4199_v1 = vpop.f32.mrf.mxu2  ;;  %v4212_v39 = vpop.f32.mrf.mxu3  ;;  %v6701_v56 = vor.u32 %v7807_v37, %v6698_v17  ;;  %v7941_v52 = vld [vmem:[%s11815_s3 + $0x38] sm:$0xff]  ;;  %v7942_v37 = vld [vmem:[%s11815_s3 + $0x40] sm:$0xff] }
 0x23d   :  { %v4133_v42 = vadd.f32 %v11361_v50, %v4120_v41  ;;  %v7956_v50 = vld [vmem:[%s11815_s3 + $0xb0] sm:$0xff]  ;;  %v7945_v20 = vld [vmem:[%s11815_s3 + $0x58] sm:$0xff]  ;;  %v7950_v17 = vld [vmem:[%s11815_s3 + $0x80] sm:$0xff] }
 0x23f   :  { %4426 = vmatpush.bf16.msrb.mxu0 %v6749_v61  ;;  %4439 = vmatpush.bf16.msrb.mxu1 %v6877_v62  ;;  %v4146_v54 = vadd.f32 %v11396_v10, %v4133_v42  ;;  %v7983_v10 = vld [vmem:[#allocation1] sm:$0xff]  ;;  %v7939_v62 = vld [vmem:[%s11815_s3 + $0x28] sm:$0xff] }
 0x240   :  { %4452 = vmatpush.bf16.msrb.mxu2 %v7005_v3  ;;  %4465 = vmatpush.bf16.msrb.mxu3 %v7133_v19  ;;  %v7947_v3 = vld [vmem:[%s11815_s3 + $0x68] sm:$0xff]  ;;  %v7954_v19 = vld [vmem:[%s11815_s3 + $0xa0] sm:$0xff] }
 0x241   :  { %v4159_v61 = vadd.f32 %v11407_v21, %v4146_v54  ;;  %v7938_v21 = vld [vmem:[%s11815_s3 + $0x20] sm:$0xff] }
 0x243   :  { %4427 = vmatpush.bf16.msrb.mxu0 %v6733_v23  ;;  %4440 = vmatpush.bf16.msrb.mxu1 %v6861_v28 }
 0x244   :  { %4453 = vmatpush.bf16.msrb.mxu2 %v6989_v24  ;;  %4466 = vmatpush.bf16.msrb.mxu3 %v7117_v31  ;;  %v7936_v24 = vld [vmem:[%s11815_s3 + $0x10] sm:$0xff] }
 0x247   :  { %4428 = vmatpush.bf16.msrb.mxu0 %v6717_v33  ;;  %4441 = vmatpush.bf16.msrb.mxu1 %v6845_v35  ;;  %v7934_v35 = vld [vmem:[%s11815_s3] sm:$0xff] }
 0x248   :  { %4454 = vmatpush.bf16.msrb.mxu2 %v6973_v60  ;;  %4467 = vmatpush.bf16.msrb.mxu3 %v7101_v38  ;;  %v4474_v60 = vmax.f32 %v9971_v5, 0.0 }
 0x24a   :  { %v4478_v48 = vpack.c.bf16 %v4474_v60, %v4474_v60 }
 0x24b   :  { %4429 = vmatpush.bf16.msrb.mxu0 %v6701_v56  ;;  %4442 = vmatpush.bf16.msrb.mxu1 %v6829_v44  ;;  %v4223_v13 = vpop.f32.mrf.mxu0  ;;  %v4236_v18 = vpop.f32.mrf.mxu1 }
 0x24c   :  { %4455 = vmatpush.bf16.msrb.mxu2 %v6957_v63  ;;  %4468 = vmatpush.bf16.msrb.mxu3 %v7085_v51 }
 0x24e   :  { %4430 = vmatmul.bf16.vlgmr.msrb.gmra.mxu0 %v8877_v47  ;;  %4443 = vmatmul.bf16.vlgmr.msrb.gmra.mxu1 %v8881_v49  ;;  %v7955_v47 = vld [vmem:[%s11815_s3 + $0xa8] sm:$0xff]  ;;  %v4172_v49 = vadd.f32 %v11557_v12, %v4159_v61  ;;  %v7985_v12 = vld [vmem:[%s11814_s2] sm:$0xf]  ;;  %s8012_s2 = smov [#allocation2]  }
 0x24f   :  { %4742 = vmatpush.bf16.msra.mxu0 %v7941_v52  ;;  %4755 = vmatpush.bf16.msra.mxu1 %v7949_v53  ;;  %v611_v8 = vperm.slane %v7985_v12, 3  ;;  %s4883_s17 = sshll.u32 %s8012_s2, 4  ;;  %s4884_s17 = int_to_ptr.vmem [resolvable:$true] %s4883_s17 }
 0x250   :  { %4768 = vmatpush.bf16.msra.mxu2 %v7957_v25  ;;  %4469 = vmatmul.bf16.vlgmr.msrb.gmra.mxu3 %v7984_v59  ;;  %v4185_v7 = vadd.f32 %v11565_v40, %v4172_v49  ;;  %v7953_v40 = vld [vmem:[%s11815_s3 + $0x98] sm:$0xff]  ;;  %v7963_v59 = vld [vmem:[%s11815_s3 + $0xe8] sm:$0xff] }
 0x251   :  { %4456 = vmatmul.bf16.vlgmr.msrb.gmra.mxu2 %v7983_v10  ;;  %v7964_v10 = vld [vmem:[%s11815_s3 + $0xf0] sm:$0xff] }
 0x252   :  { %v4198_v9 = vadd.f32 %v11600_v6, %v4185_v7 }
 0x253   :  { %4743 = vmatpush.bf16.msra.mxu0 %v7940_v57  ;;  %4756 = vmatpush.bf16.msra.mxu1 %v7948_v58  ;;  %v4225_v28 = vpop.f32.mrf.mxu0  ;;  %v4238_v26 = vpop.f32.mrf.mxu1  ;;  %v7965_v58 = vld [vmem:[%s11815_s3 + $0xf8] sm:$0xff] }
 0x254   :  { %4769 = vmatpush.bf16.msra.mxu2 %v7956_v50  ;;  %v4249_v22 = vpop.f32.mrf.mxu2  ;;  %v4262_v36 = vpop.f32.mrf.mxu3  ;;  %v4211_v6 = vadd.f32 %v11611_v11, %v4198_v9  ;;  %v7935_v11 = vld [vmem:[%s11815_s3 + $0x8] sm:$0xff]  ;;  %4781 = vmatpush.bf16.msra.mxu3 %v7965_v58  ;;  %v7958_v9 = vld [vmem:[%s11815_s3 + $0xc0] sm:$0xff] }
 0x255   :  { %v4250_v23 = vadd.f32 %v4249_v22, %v611_v8  ;;  %v7976_v58 = vld [vmem:[%s11818_s6] ss:$0 sm:$0xff] }
 0x256   :  { %v4224_v43 = vadd.f32 %v4223_v13, %v4211_v6 }
 0x257   :  { %4744 = vmatpush.bf16.msra.mxu0 %v7939_v62  ;;  %4757 = vmatpush.bf16.msra.mxu1 %v7947_v3  ;;  %v4263_v31 = vadd.f32 %v4262_v36, %v4250_v23  ;;  %v7962_v3 = vld [vmem:[%s11815_s3 + $0xe0] sm:$0xff] }
 0x258   :  { %4770 = vmatpush.bf16.msra.mxu2 %v7955_v47  ;;  %v4237_v45 = vadd.f32 %v4236_v18, %v4224_v43  ;;  %4782 = vmatpush.bf16.msra.mxu3 %v7964_v10  ;;  %v7961_v47 = vld [vmem:[%s11815_s3 + $0xd8] sm:$0xff]  ;;  %v7959_v18 = vld [vmem:[%s11815_s3 + $0xc8] sm:$0xff] }
 0x25a   :  { %v4476_v38 = vmax.f32 %v4237_v45, 0.0 }
 0x25b   :  { %4745 = vmatpush.bf16.msra.mxu0 %v7938_v21  ;;  %4758 = vmatpush.bf16.msra.mxu1 %v7946_v4  ;;  %v7960_v21 = vld [vmem:[%s11815_s3 + $0xd0] sm:$0xff] }
 0x25c   :  { %4771 = vmatpush.bf16.msra.mxu2 %v7954_v19  ;;  %v4251_v15 = vpop.f32.mrf.mxu2  ;;  %v4264_v33 = vpop.f32.mrf.mxu3  ;;  %v4480_v2 = vpack.c.bf16 %v4476_v38, %v4476_v38  ;;  %4783 = vmatpush.bf16.msra.mxu3 %v7963_v59  ;;  %v7971_v38 = vld [vmem:[%s11817_s5 + $0x28] sm:$0xff] }
 0x25f   :  { %4746 = vmatpush.bf16.msra.mxu0 %v7937_v14  ;;  %4759 = vmatpush.bf16.msra.mxu1 %v7945_v20 }
 0x260   :  { %4772 = vmatpush.bf16.msra.mxu2 %v7953_v40  ;;  %4784 = vmatpush.bf16.msra.mxu3 %v7962_v3 }
 0x263   :  { %4747 = vmatpush.bf16.msra.mxu0 %v7936_v24  ;;  %4760 = vmatpush.bf16.msra.mxu1 %v7944_v34 }
 0x264   :  { %4773 = vmatpush.bf16.msra.mxu2 %v7952_v30  ;;  %4785 = vmatpush.bf16.msra.mxu3 %v7961_v47 }
 0x267   :  { %4748 = vmatpush.bf16.msra.mxu0 %v7935_v11  ;;  %4761 = vmatpush.bf16.msra.mxu1 %v7943_v32 }
 0x268   :  { %4774 = vmatpush.bf16.msra.mxu2 %v7951_v0  ;;  %4786 = vmatpush.bf16.msra.mxu3 %v7960_v21 }
 0x26b   :  { %4749 = vmatpush.bf16.msra.mxu0 %v7934_v35  ;;  %4762 = vmatpush.bf16.msra.mxu1 %v7942_v37  ;;  %v4275_v5 = vpop.f32.mrf.mxu0  ;;  %v4288_v29 = vpop.f32.mrf.mxu1  ;;  %v7973_v35 = vld [vmem:[%s11817_s5 + $0x38] sm:$0xff]  ;;  %v7972_v37 = vld [vmem:[%s11817_s5 + $0x30] sm:$0xff] }
 0x26c   :  { %4775 = vmatpush.bf16.msra.mxu2 %v7950_v17  ;;  %v4276_v1 = vadd.f32 %v4275_v5, %v4263_v31  ;;  %4787 = vmatpush.bf16.msra.mxu3 %v7959_v18 }
 0x26e   :  { %4750 = vmatmul.bf16.vlgmr.msra.gmra.mxu0 %v4478_v48  ;;  %4763 = vmatmul.bf16.vlgmr.msra.gmra.mxu1 %v4479_v27  ;;  %v4289_v16 = vadd.f32 %v4288_v29, %v4276_v1  ;;  %v7970_v48 = vld [vmem:[%s11817_s5 + $0x20] sm:$0xff] }
 0x26f   :  { %4776 = vmatmul.bf16.vlgmr.msra.gmra.mxu2 %v4480_v2  ;;  %4864 = vmatpush.bf16.msrb.mxu0 %v7973_v35  ;;  %v7975_v27 = vld [vmem:[%s11816_s4] ss:$0 sm:$0xff]  ;;  %v7969_v2 = vld [vmem:[%s11817_s5 + $0x18] sm:$0xff] }
 0x270   :  { %4788 = vmatpush.bf16.msra.mxu3 %v7958_v9 }
 0x273   :  { %v4277_v63 = vpop.f32.mrf.mxu0  ;;  %v4290_v55 = vpop.f32.mrf.mxu1  ;;  %4865 = vmatpush.bf16.msrb.mxu0 %v7972_v37 }
 0x274   :  { %v4301_v39 = vpop.f32.mrf.mxu2  ;;  %v4314_v56 = vpop.f32.mrf.mxu3 }
 0x275   :  { %v4302_v41 = vadd.f32 %v4301_v39, %v4289_v16  ;;  %v7968_v16 = vld [vmem:[%s11817_s5 + $0x10] sm:$0xff] }
 0x277   :  { %v4315_v44 = vadd.f32 %v4314_v56, %v4302_v41  ;;  %4866 = vmatpush.bf16.msrb.mxu0 %v7971_v38 }
 0x27b   :  { %4867 = vmatpush.bf16.msrb.mxu0 %v7970_v48 }
 0x27c   :  { %v4303_v51 = vpop.f32.mrf.mxu2  ;;  %v4316_v52 = vpop.f32.mrf.mxu3 }
 0x27d   :  { %v7967_v51 = vld [vmem:[%s11817_s5 + $0x8] sm:$0xff]  ;;  %v7966_v52 = vld [vmem:[%s11817_s5] sm:$0xff] }
 0x27f   :  { %4868 = vmatpush.bf16.msrb.mxu0 %v7969_v2 }
 0x283   :  { %4869 = vmatpush.bf16.msrb.mxu0 %v7968_v16 }
 0x287   :  { %4870 = vmatpush.bf16.msrb.mxu0 %v7967_v51 }
 0x28b   :  { %v4327_v53 = vpop.f32.mrf.mxu0  ;;  %v4340_v25 = vpop.f32.mrf.mxu1  ;;  %4871 = vmatpush.bf16.msrb.mxu0 %v7966_v52 }
 0x28c   :  { %v4328_v19 = vadd.f32 %v4327_v53, %v4315_v44 }
 0x28e   :  { %v4341_v14 = vadd.f32 %v4340_v25, %v4328_v19 }
 0x293   :  { %v4329_v57 = vpop.f32.mrf.mxu0  ;;  %v4342_v50 = vpop.f32.mrf.mxu1 }
 0x294   :  { %v4353_v42 = vpop.f32.mrf.mxu2  ;;  %v4366_v54 = vpop.f32.mrf.mxu3 }
 0x295   :  { %v4354_v20 = vadd.f32 %v4353_v42, %v4341_v14 }
 0x297   :  { %v4367_v23 = vadd.f32 %v4366_v54, %v4354_v20 }
 0x29c   :  { %v4355_v61 = vpop.f32.mrf.mxu2  ;;  %v4368_v62 = vpop.f32.mrf.mxu3 }
 0x2ab   :  { %v4379_v49 = vpop.f32.mrf.mxu0  ;;  %v4392_v13 = vpop.f32.mrf.mxu1 }
 0x2ac   :  { %v4380_v36 = vadd.f32 %v4379_v49, %v4367_v23 }
 0x2ae   :  { %v4393_v28 = vadd.f32 %v4392_v13, %v4380_v36 }
 0x2b3   :  { %v4381_v12 = vpop.f32.mrf.mxu0  ;;  %v4394_v8 = vpop.f32.mrf.mxu1 }
 0x2b4   :  { %v4405_v4 = vpop.f32.mrf.mxu2  ;;  %v4418_v7 = vpop.f32.mrf.mxu3 }
 0x2b5   :  { %v4406_v6 = vadd.f32 %v4405_v4, %v4393_v28 }
 0x2b7   :  { %v4419_v24 = vadd.f32 %v4418_v7, %v4406_v6 }
 0x2bc   :  { %v4407_v40 = vpop.f32.mrf.mxu2  ;;  %v4420_v22 = vpop.f32.mrf.mxu3 }
 0x2cb   :  { %v4431_v26 = vpop.f32.mrf.mxu0  ;;  %v4444_v34 = vpop.f32.mrf.mxu1 }
 0x2cc   :  { %v4432_v30 = vadd.f32 %v4431_v26, %v4419_v24 }
 0x2ce   :  { %v4445_v31 = vadd.f32 %v4444_v34, %v4432_v30 }
 0x2d3   :  { %v4470_v11 = vpop.f32.mrf.mxu3  ;;  %v4433_v0 = vpop.f32.mrf.mxu0 }
 0x2d4   :  { %v4457_v43 = vpop.f32.mrf.mxu2  ;;  %v4446_v45 = vpop.f32.mrf.mxu1 }
 0x2d5   :  { %v4458_v32 = vadd.f32 %v4457_v43, %v4445_v31 }
 0x2d7   :  { %v4471_v15 = vadd.f32 %v4470_v11, %v4458_v32 }
 0x2d9   :  { %v4477_v33 = vmax.f32 %v4471_v15, 0.0 }
 0x2db   :  { %v4481_v60 = vpack.c.bf16 %v4477_v33, %v4477_v33  ;;  %v4472_v46 = vpop.f32.mrf.mxu3 }
 0x2dc   :  { %v4459_v17 = vpop.f32.mrf.mxu2 }
 0x2dd   :  { %4789 = vmatmul.bf16.vlgmr.msra.gmra.mxu3 %v4481_v60 }
 0x2eb   :  { %v4751_v5 = vpop.f32.mrf.mxu0  ;;  %v4764_v29 = vpop.f32.mrf.mxu1 }
 0x2ec   :  { %v4752_v1 = vadd.f32 %v7975_v27, %v4751_v5 }
 0x2ee   :  { %v4765_v39 = vadd.f32 %v4764_v29, %v4752_v1 }
 0x2f2   :  { %v4777_v41 = vpop.f32.mrf.mxu2 }
 0x2f3   :  { %v4778_v56 = vadd.f32 %v4777_v41, %v4765_v39  ;;  %v4753_v44 = vpop.f32.mrf.mxu0  ;;  %v4766_v63 = vpop.f32.mrf.mxu1 }
 0x2fa   :  { %v4779_v55 = vpop.f32.mrf.mxu2 }
 0x360   :  { %v4790_v53 = vpop.f32.mrf.mxu3 }
 0x361   :  { %v4791_v25 = vadd.f32 %v4790_v53, %v4778_v56 }
 0x363   :  { %v4794_v42 = vmax.f32 %v4791_v25, 0.0 }
 0x365   :  { %v4795_v54 = vpack.c.bf16 %v4794_v42, %v4794_v42 }
 0x367   :  { %4872 = vmatmul.bf16.vlgmr.msrb.gmra.mxu0 %v4795_v54 }
 0x368   :  { %v4792_v57 = vpop.f32.mrf.mxu3 }
 0x3e4   :  { %v4873_v50 = vpop.f32.mrf.mxu0 }
 0x3e5   :  { %v4874_v10 = vadd.f32 %v7976_v58, %v4873_v50 }
 0x3e7   :  { %4877 = vst [vmem:[#allocation2] sm:$0x3] %v4874_v10 }
 0x3e8   :  { %4888 = dma.vmem_to_hbm [thread:$0]  %s4884_s17, 32, %s4886_s20, [#allocation3]  }
 0x3ec   :  { %v4875_v59 = vpop.f32.mrf.mxu0 }
 0x3ed   :  { %8010 = dma.done.wait [#allocation3], 32  }
 0x3ee   :  { %8011 = vsyncadd [#allocation3], 4294967264 }
 0x3ef   :  { %4893 = vsyncpa [#allocation3], 1 }

</bundles_post_ra>
